<compile_context>
chip_gen: v7x
topology: tpu7x:2x2x1
jax: 0.10.0
libtpu: 0.0.40
codegen_flags: <defaults>
</compile_context>

<pallas_src>
import functools

import jax
import jax.numpy as jnp
from jax.experimental import pallas as pl
from jax.experimental.pallas import tpu as pltpu


_LANE = 128        # channel padding target (lane-dense stores / MXU width)
_BN_EPS = 1e-5     # torch BatchNorm2d default


def _largest_divisor_at_most(n, cap):
    cap = max(1, min(n, cap))
    for d in range(cap, 0, -1):
        if n % d == 0:
            return d
    return 1


def _cparams(*sem):
    return pltpu.CompilerParams(dimension_semantics=sem,
                                vmem_limit_bytes=28 * 1024 * 1024)


# --------------------------------------------------------------------------- #
# 3x3 stride-1 convolution + fused BN partial statistics                      #
# --------------------------------------------------------------------------- #
def _conv3x3_kernel(x_ref, w_ref, b_ref, o_ref, st_ref, *, hb, wo, channels_last):
    # x_ref: whole padded image of one batch item:
    #          channels_last:  (Hp, Wp, Cin)   (layers 2-4, Cin = 128)
    #          else:           (Hp, Cin, Wp)   (layer 1, tiny Cin kept off lanes)
    # w_ref: (3, 3*Cin, Cout)  (dy major, K index = dx*Cin + ci)
    # b_ref: (1, Cout)
    # o_ref: (hb, Wo, Cout)    output rows [g*hb, (g+1)*hb)
    # st_ref: (2, Cout)        [sum, sum of squares] of this row block (for BN)
    cout = o_ref.shape[-1]
    h0 = pl.program_id(1) * hb

    def body(hloc, carry):
        s_sum, s_sq = carry
        acc = jnp.zeros((wo, cout), jnp.float32)
        for dy in range(3):
            row = x_ref[h0 + hloc + dy]
            if channels_last:
                # row: (Wp, Cin) -> fold the 3 dx taps into K: patch (Wo, 3*Cin)
                patch = jnp.concatenate(
                    [row[dx:dx + wo, :] for dx in range(3)], axis=1)
                acc = acc + jnp.dot(patch, w_ref[dy],
                                    preferred_element_type=jnp.float32)
            else:
                # row: (Cin, Wp) -> patch (3*Cin, Wo); contract dim 0 of both.
                patch = jnp.concatenate(
                    [row[:, dx:dx + wo] for dx in range(3)], axis=0)
                acc = acc + jax.lax.dot_general(
                    patch, w_ref[dy],
                    dimension_numbers=(((0,), (0,)), ((), ())),
                    preferred_element_type=jnp.float32)
        acc = acc + b_ref[0]
        o_ref[hloc] = acc
        return (s_sum + jnp.sum(acc, axis=0, keepdims=True),
                s_sq + jnp.sum(acc * acc, axis=0, keepdims=True))

    zero = jnp.zeros((1, cout), jnp.float32)
    s_sum, s_sq = jax.lax.fori_loop(0, hb, body, (zero, zero))
    st_ref[...] = jnp.concatenate([s_sum, s_sq], axis=0)


def conv3x3_bn_stats(x, w, b, *, padding, channels_last):
    """3x3 / stride-1 conv (NHWC f32 output) + per-(image, row-block) BN sums.

    x: (N,H,W,Cin) if channels_last else (N,H,Cin,W); w: (3, 3*Cin, Cout); b: (Cout,)
    Returns y: (N,Ho,Wo,Cout) and stats: (N,G,2,Cout) with channel sum / sum-of-sq.
    """
    if padding:
        if channels_last:
            x = jnp.pad(x, ((0, 0), (padding, padding), (padding, padding), (0, 0)))
        else:
            x = jnp.pad(x, ((0, 0), (padding, padding), (0, 0), (padding, padding)))
    if channels_last:
        N, Hp, Wp, _ = x.shape
        x_spec = pl.BlockSpec((None, Hp, x.shape[2], x.shape[3]),
                              lambda n, g: (n, 0, 0, 0))
    else:
        N, Hp, _, Wp = x.shape
        x_spec = pl.BlockSpec((None, Hp, x.shape[2], x.shape[3]),
                              lambda n, g: (n, 0, 0, 0))
    Cout = w.shape[-1]
    Ho, Wo = Hp - 2, Wp - 2

    # Row block: largest divisor of Ho whose output block is ~<= 2.5 MiB.
    hb = _largest_divisor_at_most(Ho, (5 * 2**19) // (Wo * Cout * 4))
    G = Ho // hb

    y, stats = pl.pallas_call(
        functools.partial(_conv3x3_kernel, hb=hb, wo=Wo,
                          channels_last=channels_last),
        out_shape=(jax.ShapeDtypeStruct((N, Ho, Wo, Cout), jnp.float32),
                   jax.ShapeDtypeStruct((N, G, 2, Cout), jnp.float32)),
        grid=(N, G),
        in_specs=[x_spec,
                  pl.BlockSpec((3, w.shape[1], Cout), lambda n, g: (0, 0, 0)),
                  pl.BlockSpec((1, Cout), lambda n, g: (0, 0))],
        out_specs=(pl.BlockSpec((None, hb, Wo, Cout), lambda n, g: (n, g, 0, 0)),
                   pl.BlockSpec((None, None, 2, Cout), lambda n, g: (n, g, 0, 0))),
        compiler_params=_cparams("parallel", "parallel"),
    )(x, w, b.reshape(1, Cout))
    return y, stats


def bn_scale_shift(stats, count, gamma, beta, eps=_BN_EPS):
    """Finish the BN batch statistics (train mode, biased variance)."""
    tot = jnp.sum(stats, axis=(0, 1))                      # (2, C)
    mean = tot[0] / count
    var = jnp.maximum(tot[1] / count - mean * mean, 0.0)
    scale = gamma * jax.lax.rsqrt(var + eps)
    shift = beta - mean * scale
    return scale.reshape(1, -1), shift.reshape(1, -1)


# --------------------------------------------------------------------------- #
# Fused BatchNorm-apply + 3x3/s3 max-pool + ReLU                              #
# --------------------------------------------------------------------------- #
def _bn_relu_pool_kernel(x_ref, s_ref, t_ref, o_ref, *, hbp, wpool):
    # x_ref: (3*hbp, W, C) conv output rows;  o_ref: (hbp, wpool, C) pooled rows.
    s = s_ref[0]
    t = t_ref[0]
    # One-hot (wpool, 3*wpool) selector picking every 3rd column (stride-3 pool),
    # applied with a small MXU matmul (avoids sublane-splitting reshapes).
    rows = jax.lax.broadcasted_iota(jnp.int32, (wpool, 3 * wpool), 0)
    cols = jax.lax.broadcasted_iota(jnp.int32, (wpool, 3 * wpool), 1)
    sel = (cols == 3 * rows).astype(jnp.float32)

    def body(ho, carry):
        z = x_ref[pl.ds(3 * ho, 3)] * s + t          # BatchNorm affine, (3, W, C)
        zr = jnp.max(z, axis=0)                      # max over the 3 pooled rows
        a = zr[0:3 * wpool, :]
        b = zr[1:3 * wpool + 1, :]
        c = zr[2:3 * wpool + 2, :]
        win = jnp.maximum(jnp.maximum(a, b), c)      # win[w] = max over cols w..w+2
        pooled = jnp.dot(sel, win, preferred_element_type=jnp.float32)
        o_ref[ho] = jnp.maximum(pooled, 0.0)         # ReLU (after pool, as in torch)
        return carry

    jax.lax.fori_loop(0, hbp, body, 0)


def bn_relu_maxpool3(y, scale, shift):
    N, H, W, C = y.shape
    Hp, Wp = H // 3, W // 3
    hbp = _largest_divisor_at_most(Hp, (5 * 2**20) // (3 * W * C * 4))
    return pl.pallas_call(
        functools.partial(_bn_relu_pool_kernel, hbp=hbp, wpool=Wp),
        out_shape=jax.ShapeDtypeStruct((N, Hp, Wp, C), jnp.float32),
        grid=(N, Hp // hbp),
        in_specs=[pl.BlockSpec((None, 3 * hbp, W, C), lambda n, g: (n, g, 0, 0)),
                  pl.BlockSpec((1, C), lambda n, g: (0, 0)),
                  pl.BlockSpec((1, C), lambda n, g: (0, 0))],
        out_specs=pl.BlockSpec((None, hbp, Wp, C), lambda n, g: (n, g, 0, 0)),
        compiler_params=_cparams("parallel", "parallel"),
    )(y, scale, shift)


# --------------------------------------------------------------------------- #
# BatchNorm-apply + ReLU (no pooling, layers 3/4)                             #
# --------------------------------------------------------------------------- #
def _bn_relu_kernel(x_ref, s_ref, t_ref, o_ref):
    o_ref[...] = jnp.maximum(x_ref[...] * s_ref[0] + t_ref[0], 0.0)


def bn_relu(y, scale, shift):
    N, H, W, C = y.shape
    M = N * H * W
    out = pl.pallas_call(
        _bn_relu_kernel,
        out_shape=jax.ShapeDtypeStruct((M, C), jnp.float32),
        grid=(1,),
        in_specs=[pl.BlockSpec((M, C), lambda i: (0, 0)),
                  pl.BlockSpec((1, C), lambda i: (0, 0)),
                  pl.BlockSpec((1, C), lambda i: (0, 0))],
        out_specs=pl.BlockSpec((M, C), lambda i: (0, 0)),
        compiler_params=_cparams("arbitrary"),
    )(y.reshape(M, C), scale, shift)
    return out.reshape(N, H, W, C)


# --------------------------------------------------------------------------- #
# Final Linear + softmax (single grid step; whole problem fits VMEM)          #
# --------------------------------------------------------------------------- #
def _fc_softmax_kernel(x_ref, w_ref, b_ref, o_ref, *, out_dim):
    x = x_ref[...]                                          # (N, K)
    cols = []
    for d in range(out_dim):                                # out_dim is tiny (2)
        wd = w_ref[pl.ds(d, 1), :]                          # (1, K)
        cols.append(jnp.sum(x * wd, axis=1, keepdims=True))  # (N, 1)
    z = jnp.concatenate(cols, axis=1) + b_ref[0]            # (N, D)
    z = z - jnp.max(z, axis=-1, keepdims=True)
    e = jnp.exp(z)
    o_ref[...] = e / jnp.sum(e, axis=-1, keepdims=True)


def fc_softmax(x, w, b):
    """softmax(x @ w.T + b, axis=-1); w in torch Linear layout (D, K)."""
    N, K = x.shape
    D = w.shape[0]
    return pl.pallas_call(
        functools.partial(_fc_softmax_kernel, out_dim=D),
        out_shape=jax.ShapeDtypeStruct((N, D), jnp.float32),
        grid=(1,),
        in_specs=[pl.BlockSpec((N, K), lambda i: (0, 0)),
                  pl.BlockSpec((D, K), lambda i: (0, 0)),
                  pl.BlockSpec((1, D), lambda i: (0, 0))],
        out_specs=pl.BlockSpec((N, D), lambda i: (0, 0)),
        compiler_params=_cparams("arbitrary"),
    )(x, w, b.reshape(1, D))


# --------------------------------------------------------------------------- #
# DiscriminatorCNN parameters + forward                                       #
# --------------------------------------------------------------------------- #
def init_params(key, in_channel=230, output_dim=2):
    """Random params in kernel-friendly layouts (conv channels zero-padded to 128)."""
    ks = jax.random.split(key, 8)

    def conv_w(k, cin, cout):       # torch Conv2d layout (Cout, Cin, 3, 3)
        return 0.05 * jax.random.normal(k, (cout, cin, 3, 3), jnp.float32)

    def prep(w_oihw, bias, cin_pad, cout_pad):
        cout, cin = w_oihw.shape[:2]
        wp = jnp.zeros((cout_pad, cin_pad, 3, 3), jnp.float32)
        wp = wp.at[:cout, :cin].set(w_oihw)
        # (Cout,Cin,3,3) -> (dy, dx, Cin, Cout) -> (3, 3*Cin, Cout)  (dx-major K)
        w_k = jnp.transpose(wp, (2, 3, 1, 0)).reshape(3, 3 * cin_pad, cout_pad)
        b_p = jnp.zeros((cout_pad,), jnp.float32).at[:cout].set(bias)
        return w_k, b_p

    conv1_w, conv1_b = prep(conv_w(ks[0], in_channel, 100),
                            0.05 * jax.random.normal(ks[1], (100,), jnp.float32),
                            in_channel, _LANE)
    conv2_w, conv2_b = prep(conv_w(ks[2], 100, 100),
                            0.05 * jax.random.normal(ks[3], (100,), jnp.float32),
                            _LANE, _LANE)
    conv34_w, conv34_b = prep(conv_w(ks[4], 100, 100),
                              0.05 * jax.random.normal(ks[5], (100,), jnp.float32),
                              _LANE, _LANE)

    # torch BatchNorm2d defaults (gamma=1, beta=0); zero padding keeps the padded
    # channels identically zero through BN / ReLU / pooling.
    gamma = jnp.zeros((_LANE,), jnp.float32).at[:100].set(1.0)
    beta = jnp.zeros((_LANE,), jnp.float32)

    fc_w = 0.05 * jax.random.normal(ks[6], (output_dim, 100 * 14 * 14), jnp.float32)
    fc_b = 0.05 * jax.random.normal(ks[7], (output_dim,), jnp.float32)

    return dict(conv1_w=conv1_w, conv1_b=conv1_b,
                conv2_w=conv2_w, conv2_b=conv2_b,
                conv34_w=conv34_w, conv34_b=conv34_b,
                bn_gamma=gamma, bn_beta=beta, fc_w=fc_w, fc_b=fc_b)


def discriminator_cnn_forward(params, x_nchw):
    x = x_nchw.astype(jnp.float32)
    n = x.shape[0]
    gamma, beta = params["bn_gamma"], params["bn_beta"]

    # y = relu(maxpool(bn(conv_d_1(x))))
    # Layer-1 input kept as (N, H, Cin, W): tiny Cin stays off the 128-lane axis.
    x1 = jnp.transpose(x, (0, 2, 1, 3))
    y, st = conv3x3_bn_stats(x1, params["conv1_w"], params["conv1_b"],
                             padding=1, channels_last=False)
    s, t = bn_scale_shift(st, n * y.shape[1] * y.shape[2], gamma, beta)
    y = bn_relu_maxpool3(y, s, t)

    # y = relu(maxpool(bn(conv_d_2(y))))
    y, st = conv3x3_bn_stats(y, params["conv2_w"], params["conv2_b"],
                             padding=0, channels_last=True)
    s, t = bn_scale_shift(st, n * y.shape[1] * y.shape[2], gamma, beta)
    y = bn_relu_maxpool3(y, s, t)

    # y = relu(bn(conv_d_34(y))) twice (same conv/bn weights, fresh batch stats)
    for _ in range(2):
        y, st = conv3x3_bn_stats(y, params["conv34_w"], params["conv34_b"],
                                 padding=1, channels_last=True)
        s, t = bn_scale_shift(st, n * y.shape[1] * y.shape[2], gamma, beta)
        y = bn_relu(y, s, t)

    # y.view(-1, 100*14*14): drop channel padding, flatten in PyTorch NCHW order.
    y_flat = jnp.transpose(y[..., :100], (0, 3, 1, 2)).reshape(n, -1)

    # out = F.softmax(self.fully(y))   (implicit dim -> dim=1 for 2-D input)
    return fc_softmax(y_flat, params["fc_w"], params["fc_b"])


if __name__ == "__main__":
    key = jax.random.PRNGKey(0)
    kp, kx = jax.random.split(key)

    # Small in_channel via the constructor argument; spatial 140 is what the
    # forward implies: 140 -conv1(p=1)-> 140 -pool/3-> 46 -conv2(p=0)-> 44
    # -pool/3-> 14 -conv34(p=1)x2-> 14, and fully expects 100*14*14 features.
    in_channel, output_dim = 8, 2
    x = jax.random.normal(kx, (2, in_channel, 140, 140), jnp.float32)
    params = init_params(kp, in_channel=in_channel, output_dim=output_dim)

    fwd = jax.jit(discriminator_cnn_forward)
    out = jax.block_until_ready(fwd(params, x))

    assert out.shape == (2, output_dim), out.shape
    assert bool(jnp.all(jnp.isfinite(out)))
    assert bool(jnp.allclose(jnp.sum(out, axis=-1), 1.0, atol=1e-3))
    print("KERNEL_OK")
</pallas_src>

<mosaic_0001>
module attributes {stable_mosaic.version = 11 : i64} {
  func.func @_conv3x3_kernel(%arg0: i32, %arg1: i32, %arg2: memref<1x142x8x142xf32, #tpu.memory_space<vmem>>, %arg3: memref<3x24x128xf32, #tpu.memory_space<vmem>>, %arg4: memref<1x128xf32, #tpu.memory_space<vmem>>, %arg5: memref<1x35x140x128xf32, #tpu.memory_space<vmem>>, %arg6: memref<1x1x2x128xf32, #tpu.memory_space<vmem>>) attributes {dimension_semantics = [#tpu.dimension_semantics<parallel>, #tpu.dimension_semantics<parallel>], iteration_bounds = array<i64: 2, 4>, scalar_prefetch = 0 : i64, scratch_operands = 0 : i64, tpu.core_type = #tpu.core_type<tc>, window_params = [{transform_indices = @transform_0, window_bounds = array<i64: 1, 142, 8, 142>}, {pipeline_mode = #tpu.pipeline_mode<synchronous>, transform_indices = @transform_1, window_bounds = array<i64: 3, 24, 128>}, {pipeline_mode = #tpu.pipeline_mode<synchronous>, transform_indices = @transform_2, window_bounds = array<i64: 1, 128>}, {transform_indices = @transform_3, window_bounds = array<i64: 1, 35, 140, 128>}, {transform_indices = @transform_4, window_bounds = array<i64: 1, 1, 2, 128>}]} {
    %c35_i32 = arith.constant 35 : i32
    %0 = arith.muli %arg1, %c35_i32 : i32
    %cst = arith.constant 0.000000e+00 : f32
    %1 = vector.broadcast %cst : f32 to vector<1x128xf32>
    %c0_i32 = arith.constant 0 : i32
    %c35_i32_0 = arith.constant 35 : i32
    %2 = arith.addi %c0_i32, %c35_i32_0 : i32
    %c1_i32 = arith.constant 1 : i32
    %3:2 = scf.for %arg7 = %c0_i32 to %2 step %c1_i32 iter_args(%arg8 = %1, %arg9 = %1) -> (vector<1x128xf32>, vector<1x128xf32>)  : i32 {
      %cst_5 = arith.constant 0.000000e+00 : f32
      %8 = vector.broadcast %cst_5 : f32 to vector<140x128xf32>
      %9 = arith.addi %0, %arg7 : i32
      %c0_i32_6 = arith.constant 0 : i32
      %10 = arith.addi %9, %c0_i32_6 : i32
      %c0_7 = arith.constant 0 : index
      %11 = arith.index_cast %10 : i32 to index
      %c0_8 = arith.constant 0 : index
      %c0_9 = arith.constant 0 : index
      %12 = vector.load %arg2[%c0_7, %11, %c0_8, %c0_9] : memref<1x142x8x142xf32, #tpu.memory_space<vmem>>, vector<1x1x8x142xf32>
      %13 = vector.shape_cast %12 : vector<1x1x8x142xf32> to vector<8x142xf32>
      %14 = vector.extract_strided_slice %13 {offsets = [0, 0], sizes = [8, 140], strides = [1, 1]} : vector<8x142xf32> to vector<8x140xf32>
      %15 = vector.extract_strided_slice %13 {offsets = [0, 1], sizes = [8, 140], strides = [1, 1]} : vector<8x142xf32> to vector<8x140xf32>
      %16 = vector.extract_strided_slice %13 {offsets = [0, 2], sizes = [8, 140], strides = [1, 1]} : vector<8x142xf32> to vector<8x140xf32>
      %17 = tpu.concatenate %14, %15, %16 in 0 : vector<8x140xf32>, vector<8x140xf32>, vector<8x140xf32> -> vector<24x140xf32>
      %c0_10 = arith.constant 0 : index
      %c0_11 = arith.constant 0 : index
      %c0_12 = arith.constant 0 : index
      %18 = vector.load %arg3[%c0_10, %c0_11, %c0_12] : memref<3x24x128xf32, #tpu.memory_space<vmem>>, vector<1x24x128xf32>
      %19 = vector.shape_cast %18 : vector<1x24x128xf32> to vector<24x128xf32>
      %cst_13 = arith.constant dense<0.000000e+00> : vector<140x128xf32>
      %20 = tpu.matmul %17, %19, %cst_13 {dimension_numbers = #tpu.dot_dimension_numbers<[0], [0], [1], [1], [0, 1, 1, 1], [], []>} : vector<24x140xf32>, vector<24x128xf32>, vector<140x128xf32> -> vector<140x128xf32>
      %21 = arith.addf %8, %20 : vector<140x128xf32>
      %22 = arith.addi %0, %arg7 : i32
      %c1_i32_14 = arith.constant 1 : i32
      %23 = arith.addi %22, %c1_i32_14 : i32
      %c0_15 = arith.constant 0 : index
      %24 = arith.index_cast %23 : i32 to index
      %c0_16 = arith.constant 0 : index
      %c0_17 = arith.constant 0 : index
      %25 = vector.load %arg2[%c0_15, %24, %c0_16, %c0_17] : memref<1x142x8x142xf32, #tpu.memory_space<vmem>>, vector<1x1x8x142xf32>
      %26 = vector.shape_cast %25 : vector<1x1x8x142xf32> to vector<8x142xf32>
      %27 = vector.extract_strided_slice %26 {offsets = [0, 0], sizes = [8, 140], strides = [1, 1]} : vector<8x142xf32> to vector<8x140xf32>
      %28 = vector.extract_strided_slice %26 {offsets = [0, 1], sizes = [8, 140], strides = [1, 1]} : vector<8x142xf32> to vector<8x140xf32>
      %29 = vector.extract_strided_slice %26 {offsets = [0, 2], sizes = [8, 140], strides = [1, 1]} : vector<8x142xf32> to vector<8x140xf32>
      %30 = tpu.concatenate %27, %28, %29 in 0 : vector<8x140xf32>, vector<8x140xf32>, vector<8x140xf32> -> vector<24x140xf32>
      %c1 = arith.constant 1 : index
      %c0_18 = arith.constant 0 : index
      %c0_19 = arith.constant 0 : index
      %31 = vector.load %arg3[%c1, %c0_18, %c0_19] : memref<3x24x128xf32, #tpu.memory_space<vmem>>, vector<1x24x128xf32>
      %32 = vector.shape_cast %31 : vector<1x24x128xf32> to vector<24x128xf32>
      %cst_20 = arith.constant dense<0.000000e+00> : vector<140x128xf32>
      %33 = tpu.matmul %30, %32, %cst_20 {dimension_numbers = #tpu.dot_dimension_numbers<[0], [0], [1], [1], [0, 1, 1, 1], [], []>} : vector<24x140xf32>, vector<24x128xf32>, vector<140x128xf32> -> vector<140x128xf32>
      %34 = arith.addf %21, %33 : vector<140x128xf32>
      %35 = arith.addi %0, %arg7 : i32
      %c2_i32 = arith.constant 2 : i32
      %36 = arith.addi %35, %c2_i32 : i32
      %c0_21 = arith.constant 0 : index
      %37 = arith.index_cast %36 : i32 to index
      %c0_22 = arith.constant 0 : index
      %c0_23 = arith.constant 0 : index
      %38 = vector.load %arg2[%c0_21, %37, %c0_22, %c0_23] : memref<1x142x8x142xf32, #tpu.memory_space<vmem>>, vector<1x1x8x142xf32>
      %39 = vector.shape_cast %38 : vector<1x1x8x142xf32> to vector<8x142xf32>
      %40 = vector.extract_strided_slice %39 {offsets = [0, 0], sizes = [8, 140], strides = [1, 1]} : vector<8x142xf32> to vector<8x140xf32>
      %41 = vector.extract_strided_slice %39 {offsets = [0, 1], sizes = [8, 140], strides = [1, 1]} : vector<8x142xf32> to vector<8x140xf32>
      %42 = vector.extract_strided_slice %39 {offsets = [0, 2], sizes = [8, 140], strides = [1, 1]} : vector<8x142xf32> to vector<8x140xf32>
      %43 = tpu.concatenate %40, %41, %42 in 0 : vector<8x140xf32>, vector<8x140xf32>, vector<8x140xf32> -> vector<24x140xf32>
      %c2 = arith.constant 2 : index
      %c0_24 = arith.constant 0 : index
      %c0_25 = arith.constant 0 : index
      %44 = vector.load %arg3[%c2, %c0_24, %c0_25] : memref<3x24x128xf32, #tpu.memory_space<vmem>>, vector<1x24x128xf32>
      %45 = vector.shape_cast %44 : vector<1x24x128xf32> to vector<24x128xf32>
      %cst_26 = arith.constant dense<0.000000e+00> : vector<140x128xf32>
      %46 = tpu.matmul %43, %45, %cst_26 {dimension_numbers = #tpu.dot_dimension_numbers<[0], [0], [1], [1], [0, 1, 1, 1], [], []>} : vector<24x140xf32>, vector<24x128xf32>, vector<140x128xf32> -> vector<140x128xf32>
      %47 = arith.addf %34, %46 : vector<140x128xf32>
      %c0_27 = arith.constant 0 : index
      %c0_28 = arith.constant 0 : index
      %48 = vector.load %arg4[%c0_27, %c0_28] : memref<1x128xf32, #tpu.memory_space<vmem>>, vector<1x128xf32>
      %49 = vector.shape_cast %48 : vector<1x128xf32> to vector<128xf32>
      %50 = vector.shape_cast %49 : vector<128xf32> to vector<1x128xf32>
      %51 = vector.broadcast %50 : vector<1x128xf32> to vector<140x128xf32>
      %52 = arith.addf %47, %51 : vector<140x128xf32>
      %c0_29 = arith.constant 0 : index
      %53 = arith.index_cast %arg7 : i32 to index
      %c0_30 = arith.constant 0 : index
      %c0_31 = arith.constant 0 : index
      %54 = vector.load %arg5[%c0_29, %53, %c0_30, %c0_31] : memref<1x35x140x128xf32, #tpu.memory_space<vmem>>, vector<1x1x140x128xf32>
      %55 = vector.shape_cast %54 : vector<1x1x140x128xf32> to vector<140x128xf32>
      %56 = vector.shape_cast %52 : vector<140x128xf32> to vector<1x1x140x128xf32>
      tpu.vector_store %arg5[%c0_29, %53, %c0_30, %c0_31], %56 {strides = array<i32>} : memref<1x35x140x128xf32, #tpu.memory_space<vmem>>, vector<1x1x140x128xf32>,
      %cst_32 = arith.constant dense<0.000000e+00> : vector<128xf32>
      %57 = vector.multi_reduction <add>, %52, %cst_32 [0] : vector<140x128xf32> to vector<128xf32>
      %58 = vector.shape_cast %57 : vector<128xf32> to vector<1x128xf32>
      %59 = arith.addf %arg8, %58 : vector<1x128xf32>
      %60 = arith.mulf %52, %52 : vector<140x128xf32>
      %cst_33 = arith.constant dense<0.000000e+00> : vector<128xf32>
      %61 = vector.multi_reduction <add>, %60, %cst_33 [0] : vector<140x128xf32> to vector<128xf32>
      %62 = vector.shape_cast %61 : vector<128xf32> to vector<1x128xf32>
      %63 = arith.addf %arg9, %62 : vector<1x128xf32>
      scf.yield %59, %63 : vector<1x128xf32>, vector<1x128xf32>
    }
    %c35_i32_1 = arith.constant 35 : i32
    %4 = tpu.concatenate %3#0, %3#1 in 0 : vector<1x128xf32>, vector<1x128xf32> -> vector<2x128xf32>
    %c0 = arith.constant 0 : index
    %c0_2 = arith.constant 0 : index
    %c0_3 = arith.constant 0 : index
    %c0_4 = arith.constant 0 : index
    %5 = vector.load %arg6[%c0, %c0_2, %c0_3, %c0_4] : memref<1x1x2x128xf32, #tpu.memory_space<vmem>>, vector<1x1x2x128xf32>
    %6 = vector.shape_cast %5 : vector<1x1x2x128xf32> to vector<2x128xf32>
    %7 = vector.shape_cast %4 : vector<2x128xf32> to vector<1x1x2x128xf32>
    tpu.vector_store %arg6[%c0, %c0_2, %c0_3, %c0_4], %7 {strides = array<i32>} : memref<1x1x2x128xf32, #tpu.memory_space<vmem>>, vector<1x1x2x128xf32>,
    return
  }
  func.func @transform_0(%arg0: i32, %arg1: i32) -> (i32, i32, i32, i32) {
    %c0_i32 = arith.constant 0 : i32
    %c0_i32_0 = arith.constant 0 : i32
    %c0_i32_1 = arith.constant 0 : i32
    %c0_i32_2 = arith.constant 0 : i32
    return %arg0, %c0_i32, %c0_i32_0, %c0_i32_1 : i32, i32, i32, i32
  }
  func.func @transform_1(%arg0: i32, %arg1: i32) -> (i32, i32, i32) {
    %c0_i32 = arith.constant 0 : i32
    %c0_i32_0 = arith.constant 0 : i32
    %c0_i32_1 = arith.constant 0 : i32
    %c0_i32_2 = arith.constant 0 : i32
    return %c0_i32, %c0_i32_0, %c0_i32_1 : i32, i32, i32
  }
  func.func @transform_2(%arg0: i32, %arg1: i32) -> (i32, i32) {
    %c0_i32 = arith.constant 0 : i32
    %c0_i32_0 = arith.constant 0 : i32
    %c0_i32_1 = arith.constant 0 : i32
    return %c0_i32, %c0_i32_0 : i32, i32
  }
  func.func @transform_3(%arg0: i32, %arg1: i32) -> (i32, i32, i32, i32) {
    %c0_i32 = arith.constant 0 : i32
    %c0_i32_0 = arith.constant 0 : i32
    %c0_i32_1 = arith.constant 0 : i32
    return %arg0, %arg1, %c0_i32, %c0_i32_0 : i32, i32, i32, i32
  }
  func.func @transform_4(%arg0: i32, %arg1: i32) -> (i32, i32, i32, i32) {
    %c0_i32 = arith.constant 0 : i32
    %c0_i32_0 = arith.constant 0 : i32
    %c0_i32_1 = arith.constant 0 : i32
    return %arg0, %arg1, %c0_i32, %c0_i32_0 : i32, i32, i32, i32
  }
}

module attributes {stable_mosaic.version = 11 : i64} {
  func.func @_conv3x3_kernel(%arg0: i32, %arg1: i32, %arg2: memref<1x46x46x128xf32, #tpu.memory_space<vmem>>, %arg3: memref<3x384x128xf32, #tpu.memory_space<vmem>>, %arg4: memref<1x128xf32, #tpu.memory_space<vmem>>, %arg5: memref<1x44x44x128xf32, #tpu.memory_space<vmem>>, %arg6: memref<1x1x2x128xf32, #tpu.memory_space<vmem>>) attributes {dimension_semantics = [#tpu.dimension_semantics<parallel>, #tpu.dimension_semantics<parallel>], iteration_bounds = array<i64: 2, 1>, scalar_prefetch = 0 : i64, scratch_operands = 0 : i64, tpu.core_type = #tpu.core_type<tc>, window_params = [{transform_indices = @transform_0, window_bounds = array<i64: 1, 46, 46, 128>}, {pipeline_mode = #tpu.pipeline_mode<synchronous>, transform_indices = @transform_1, window_bounds = array<i64: 3, 384, 128>}, {pipeline_mode = #tpu.pipeline_mode<synchronous>, transform_indices = @transform_2, window_bounds = array<i64: 1, 128>}, {transform_indices = @transform_3, window_bounds = array<i64: 1, 44, 44, 128>}, {transform_indices = @transform_4, window_bounds = array<i64: 1, 1, 2, 128>}]} {
    %c44_i32 = arith.constant 44 : i32
    %0 = arith.muli %arg1, %c44_i32 : i32
    %cst = arith.constant 0.000000e+00 : f32
    %1 = vector.broadcast %cst : f32 to vector<1x128xf32>
    %c0_i32 = arith.constant 0 : i32
    %c44_i32_0 = arith.constant 44 : i32
    %2 = arith.addi %c0_i32, %c44_i32_0 : i32
    %c1_i32 = arith.constant 1 : i32
    %3:2 = scf.for %arg7 = %c0_i32 to %2 step %c1_i32 iter_args(%arg8 = %1, %arg9 = %1) -> (vector<1x128xf32>, vector<1x128xf32>)  : i32 {
      %cst_5 = arith.constant 0.000000e+00 : f32
      %8 = vector.broadcast %cst_5 : f32 to vector<44x128xf32>
      %9 = arith.addi %0, %arg7 : i32
      %c0_i32_6 = arith.constant 0 : i32
      %10 = arith.addi %9, %c0_i32_6 : i32
      %c0_7 = arith.constant 0 : index
      %11 = arith.index_cast %10 : i32 to index
      %c0_8 = arith.constant 0 : index
      %c0_9 = arith.constant 0 : index
      %12 = vector.load %arg2[%c0_7, %11, %c0_8, %c0_9] : memref<1x46x46x128xf32, #tpu.memory_space<vmem>>, vector<1x1x46x128xf32>
      %13 = vector.shape_cast %12 : vector<1x1x46x128xf32> to vector<46x128xf32>
      %14 = vector.extract_strided_slice %13 {offsets = [0, 0], sizes = [44, 128], strides = [1, 1]} : vector<46x128xf32> to vector<44x128xf32>
      %15 = vector.extract_strided_slice %13 {offsets = [1, 0], sizes = [44, 128], strides = [1, 1]} : vector<46x128xf32> to vector<44x128xf32>
      %16 = vector.extract_strided_slice %13 {offsets = [2, 0], sizes = [44, 128], strides = [1, 1]} : vector<46x128xf32> to vector<44x128xf32>
      %17 = tpu.concatenate %14, %15, %16 in 1 : vector<44x128xf32>, vector<44x128xf32>, vector<44x128xf32> -> vector<44x384xf32>
      %c0_10 = arith.constant 0 : index
      %c0_11 = arith.constant 0 : index
      %c0_12 = arith.constant 0 : index
      %18 = vector.load %arg3[%c0_10, %c0_11, %c0_12] : memref<3x384x128xf32, #tpu.memory_space<vmem>>, vector<1x384x128xf32>
      %19 = vector.shape_cast %18 : vector<1x384x128xf32> to vector<384x128xf32>
      %cst_13 = arith.constant dense<0.000000e+00> : vector<44x128xf32>
      %20 = tpu.matmul %17, %19, %cst_13 {dimension_numbers = #tpu.dot_dimension_numbers<[1], [0], [0], [1], [0, 0, 1, 1], [], []>} : vector<44x384xf32>, vector<384x128xf32>, vector<44x128xf32> -> vector<44x128xf32>
      %21 = arith.addf %8, %20 : vector<44x128xf32>
      %22 = arith.addi %0, %arg7 : i32
      %c1_i32_14 = arith.constant 1 : i32
      %23 = arith.addi %22, %c1_i32_14 : i32
      %c0_15 = arith.constant 0 : index
      %24 = arith.index_cast %23 : i32 to index
      %c0_16 = arith.constant 0 : index
      %c0_17 = arith.constant 0 : index
      %25 = vector.load %arg2[%c0_15, %24, %c0_16, %c0_17] : memref<1x46x46x128xf32, #tpu.memory_space<vmem>>, vector<1x1x46x128xf32>
      %26 = vector.shape_cast %25 : vector<1x1x46x128xf32> to vector<46x128xf32>
      %27 = vector.extract_strided_slice %26 {offsets = [0, 0], sizes = [44, 128], strides = [1, 1]} : vector<46x128xf32> to vector<44x128xf32>
      %28 = vector.extract_strided_slice %26 {offsets = [1, 0], sizes = [44, 128], strides = [1, 1]} : vector<46x128xf32> to vector<44x128xf32>
      %29 = vector.extract_strided_slice %26 {offsets = [2, 0], sizes = [44, 128], strides = [1, 1]} : vector<46x128xf32> to vector<44x128xf32>
      %30 = tpu.concatenate %27, %28, %29 in 1 : vector<44x128xf32>, vector<44x128xf32>, vector<44x128xf32> -> vector<44x384xf32>
      %c1 = arith.constant 1 : index
      %c0_18 = arith.constant 0 : index
      %c0_19 = arith.constant 0 : index
      %31 = vector.load %arg3[%c1, %c0_18, %c0_19] : memref<3x384x128xf32, #tpu.memory_space<vmem>>, vector<1x384x128xf32>
      %32 = vector.shape_cast %31 : vector<1x384x128xf32> to vector<384x128xf32>
      %cst_20 = arith.constant dense<0.000000e+00> : vector<44x128xf32>
      %33 = tpu.matmul %30, %32, %cst_20 {dimension_numbers = #tpu.dot_dimension_numbers<[1], [0], [0], [1], [0, 0, 1, 1], [], []>} : vector<44x384xf32>, vector<384x128xf32>, vector<44x128xf32> -> vector<44x128xf32>
      %34 = arith.addf %21, %33 : vector<44x128xf32>
      %35 = arith.addi %0, %arg7 : i32
      %c2_i32 = arith.constant 2 : i32
      %36 = arith.addi %35, %c2_i32 : i32
      %c0_21 = arith.constant 0 : index
      %37 = arith.index_cast %36 : i32 to index
      %c0_22 = arith.constant 0 : index
      %c0_23 = arith.constant 0 : index
      %38 = vector.load %arg2[%c0_21, %37, %c0_22, %c0_23] : memref<1x46x46x128xf32, #tpu.memory_space<vmem>>, vector<1x1x46x128xf32>
      %39 = vector.shape_cast %38 : vector<1x1x46x128xf32> to vector<46x128xf32>
      %40 = vector.extract_strided_slice %39 {offsets = [0, 0], sizes = [44, 128], strides = [1, 1]} : vector<46x128xf32> to vector<44x128xf32>
      %41 = vector.extract_strided_slice %39 {offsets = [1, 0], sizes = [44, 128], strides = [1, 1]} : vector<46x128xf32> to vector<44x128xf32>
      %42 = vector.extract_strided_slice %39 {offsets = [2, 0], sizes = [44, 128], strides = [1, 1]} : vector<46x128xf32> to vector<44x128xf32>
      %43 = tpu.concatenate %40, %41, %42 in 1 : vector<44x128xf32>, vector<44x128xf32>, vector<44x128xf32> -> vector<44x384xf32>
      %c2 = arith.constant 2 : index
      %c0_24 = arith.constant 0 : index
      %c0_25 = arith.constant 0 : index
      %44 = vector.load %arg3[%c2, %c0_24, %c0_25] : memref<3x384x128xf32, #tpu.memory_space<vmem>>, vector<1x384x128xf32>
      %45 = vector.shape_cast %44 : vector<1x384x128xf32> to vector<384x128xf32>
      %cst_26 = arith.constant dense<0.000000e+00> : vector<44x128xf32>
      %46 = tpu.matmul %43, %45, %cst_26 {dimension_numbers = #tpu.dot_dimension_numbers<[1], [0], [0], [1], [0, 0, 1, 1], [], []>} : vector<44x384xf32>, vector<384x128xf32>, vector<44x128xf32> -> vector<44x128xf32>
      %47 = arith.addf %34, %46 : vector<44x128xf32>
      %c0_27 = arith.constant 0 : index
      %c0_28 = arith.constant 0 : index
      %48 = vector.load %arg4[%c0_27, %c0_28] : memref<1x128xf32, #tpu.memory_space<vmem>>, vector<1x128xf32>
      %49 = vector.shape_cast %48 : vector<1x128xf32> to vector<128xf32>
      %50 = vector.shape_cast %49 : vector<128xf32> to vector<1x128xf32>
      %51 = vector.broadcast %50 : vector<1x128xf32> to vector<44x128xf32>
      %52 = arith.addf %47, %51 : vector<44x128xf32>
      %c0_29 = arith.constant 0 : index
      %53 = arith.index_cast %arg7 : i32 to index
      %c0_30 = arith.constant 0 : index
      %c0_31 = arith.constant 0 : index
      %54 = vector.load %arg5[%c0_29, %53, %c0_30, %c0_31] : memref<1x44x44x128xf32, #tpu.memory_space<vmem>>, vector<1x1x44x128xf32>
      %55 = vector.shape_cast %54 : vector<1x1x44x128xf32> to vector<44x128xf32>
      %56 = vector.shape_cast %52 : vector<44x128xf32> to vector<1x1x44x128xf32>
      tpu.vector_store %arg5[%c0_29, %53, %c0_30, %c0_31], %56 {strides = array<i32>} : memref<1x44x44x128xf32, #tpu.memory_space<vmem>>, vector<1x1x44x128xf32>,
      %cst_32 = arith.constant dense<0.000000e+00> : vector<128xf32>
      %57 = vector.multi_reduction <add>, %52, %cst_32 [0] : vector<44x128xf32> to vector<128xf32>
      %58 = vector.shape_cast %57 : vector<128xf32> to vector<1x128xf32>
      %59 = arith.addf %arg8, %58 : vector<1x128xf32>
      %60 = arith.mulf %52, %52 : vector<44x128xf32>
      %cst_33 = arith.constant dense<0.000000e+00> : vector<128xf32>
      %61 = vector.multi_reduction <add>, %60, %cst_33 [0] : vector<44x128xf32> to vector<128xf32>
      %62 = vector.shape_cast %61 : vector<128xf32> to vector<1x128xf32>
      %63 = arith.addf %arg9, %62 : vector<1x128xf32>
      scf.yield %59, %63 : vector<1x128xf32>, vector<1x128xf32>
    }
    %c44_i32_1 = arith.constant 44 : i32
    %4 = tpu.concatenate %3#0, %3#1 in 0 : vector<1x128xf32>, vector<1x128xf32> -> vector<2x128xf32>
    %c0 = arith.constant 0 : index
    %c0_2 = arith.constant 0 : index
    %c0_3 = arith.constant 0 : index
    %c0_4 = arith.constant 0 : index
    %5 = vector.load %arg6[%c0, %c0_2, %c0_3, %c0_4] : memref<1x1x2x128xf32, #tpu.memory_space<vmem>>, vector<1x1x2x128xf32>
    %6 = vector.shape_cast %5 : vector<1x1x2x128xf32> to vector<2x128xf32>
    %7 = vector.shape_cast %4 : vector<2x128xf32> to vector<1x1x2x128xf32>
    tpu.vector_store %arg6[%c0, %c0_2, %c0_3, %c0_4], %7 {strides = array<i32>} : memref<1x1x2x128xf32, #tpu.memory_space<vmem>>, vector<1x1x2x128xf32>,
    return
  }
  func.func @transform_0(%arg0: i32, %arg1: i32) -> (i32, i32, i32, i32) {
    %c0_i32 = arith.constant 0 : i32
    %c0_i32_0 = arith.constant 0 : i32
    %c0_i32_1 = arith.constant 0 : i32
    %c0_i32_2 = arith.constant 0 : i32
    return %arg0, %c0_i32, %c0_i32_0, %c0_i32_1 : i32, i32, i32, i32
  }
  func.func @transform_1(%arg0: i32, %arg1: i32) -> (i32, i32, i32) {
    %c0_i32 = arith.constant 0 : i32
    %c0_i32_0 = arith.constant 0 : i32
    %c0_i32_1 = arith.constant 0 : i32
    %c0_i32_2 = arith.constant 0 : i32
    return %c0_i32, %c0_i32_0, %c0_i32_1 : i32, i32, i32
  }
  func.func @transform_2(%arg0: i32, %arg1: i32) -> (i32, i32) {
    %c0_i32 = arith.constant 0 : i32
    %c0_i32_0 = arith.constant 0 : i32
    %c0_i32_1 = arith.constant 0 : i32
    return %c0_i32, %c0_i32_0 : i32, i32
  }
  func.func @transform_3(%arg0: i32, %arg1: i32) -> (i32, i32, i32, i32) {
    %c0_i32 = arith.constant 0 : i32
    %c0_i32_0 = arith.constant 0 : i32
    %c0_i32_1 = arith.constant 0 : i32
    return %arg0, %arg1, %c0_i32, %c0_i32_0 : i32, i32, i32, i32
  }
  func.func @transform_4(%arg0: i32, %arg1: i32) -> (i32, i32, i32, i32) {
    %c0_i32 = arith.constant 0 : i32
    %c0_i32_0 = arith.constant 0 : i32
    %c0_i32_1 = arith.constant 0 : i32
    return %arg0, %arg1, %c0_i32, %c0_i32_0 : i32, i32, i32, i32
  }
}

module attributes {stable_mosaic.version = 11 : i64} {
  func.func @_bn_relu_pool_kernel(%arg0: i32, %arg1: i32, %arg2: memref<1x69x140x128xf32, #tpu.memory_space<vmem>>, %arg3: memref<1x128xf32, #tpu.memory_space<vmem>>, %arg4: memref<1x128xf32, #tpu.memory_space<vmem>>, %arg5: memref<1x23x46x128xf32, #tpu.memory_space<vmem>>) attributes {dimension_semantics = [#tpu.dimension_semantics<parallel>, #tpu.dimension_semantics<parallel>], iteration_bounds = array<i64: 2, 2>, scalar_prefetch = 0 : i64, scratch_operands = 0 : i64, tpu.core_type = #tpu.core_type<tc>, window_params = [{transform_indices = @transform_0, window_bounds = array<i64: 1, 69, 140, 128>}, {pipeline_mode = #tpu.pipeline_mode<synchronous>, transform_indices = @transform_1, window_bounds = array<i64: 1, 128>}, {pipeline_mode = #tpu.pipeline_mode<synchronous>, transform_indices = @transform_2, window_bounds = array<i64: 1, 128>}, {transform_indices = @transform_3, window_bounds = array<i64: 1, 23, 46, 128>}]} {
    %c0 = arith.constant 0 : index
    %c0_0 = arith.constant 0 : index
    %0 = vector.load %arg3[%c0, %c0_0] : memref<1x128xf32, #tpu.memory_space<vmem>>, vector<1x128xf32>
    %1 = vector.shape_cast %0 : vector<1x128xf32> to vector<128xf32>
    %c0_1 = arith.constant 0 : index
    %c0_2 = arith.constant 0 : index
    %2 = vector.load %arg4[%c0_1, %c0_2] : memref<1x128xf32, #tpu.memory_space<vmem>>, vector<1x128xf32>
    %3 = vector.shape_cast %2 : vector<1x128xf32> to vector<128xf32>
    %4 = tpu.iota {dimensions = array<i32: 0>} : vector<46x138xi32>
    %5 = tpu.iota {dimensions = array<i32: 1>} : vector<46x138xi32>
    %c3_i32 = arith.constant 3 : i32
    %6 = vector.broadcast %c3_i32 : i32 to vector<46x138xi32>
    %7 = arith.muli %6, %4 : vector<46x138xi32>
    %8 = arith.cmpi eq, %5, %7 : vector<46x138xi32>
    %9 = arith.extui %8 : vector<46x138xi1> to vector<46x138xi32>
    %10 = arith.sitofp %9 : vector<46x138xi32> to vector<46x138xf32>
    %c0_i32 = arith.constant 0 : i32
    %c23_i32 = arith.constant 23 : i32
    %11 = arith.addi %c0_i32, %c23_i32 : i32
    %c1_i32 = arith.constant 1 : i32
    scf.for %arg6 = %c0_i32 to %11 step %c1_i32  : i32 {
      %c3_i32_4 = arith.constant 3 : i32
      %12 = arith.muli %c3_i32_4, %arg6 : i32
      %c0_5 = arith.constant 0 : index
      %13 = arith.index_cast %12 : i32 to index
      %c0_6 = arith.constant 0 : index
      %c0_7 = arith.constant 0 : index
      %14 = vector.load %arg2[%c0_5, %13, %c0_6, %c0_7] : memref<1x69x140x128xf32, #tpu.memory_space<vmem>>, vector<1x3x140x128xf32>
      %15 = vector.shape_cast %14 : vector<1x3x140x128xf32> to vector<3x140x128xf32>
      %16 = vector.shape_cast %1 : vector<128xf32> to vector<1x1x128xf32>
      %17 = vector.broadcast %16 : vector<1x1x128xf32> to vector<3x140x128xf32>
      %18 = arith.mulf %15, %17 : vector<3x140x128xf32>
      %19 = vector.shape_cast %3 : vector<128xf32> to vector<1x1x128xf32>
      %20 = vector.broadcast %19 : vector<1x1x128xf32> to vector<3x140x128xf32>
      %21 = arith.addf %18, %20 : vector<3x140x128xf32>
      %cst = arith.constant dense<0xFF800000> : vector<140x128xf32>
      %22 = vector.multi_reduction <maximumf>, %21, %cst [0] : vector<3x140x128xf32> to vector<140x128xf32>
      %23 = vector.extract_strided_slice %22 {offsets = [0, 0], sizes = [138, 128], strides = [1, 1]} : vector<140x128xf32> to vector<138x128xf32>
      %24 = vector.extract_strided_slice %22 {offsets = [1, 0], sizes = [138, 128], strides = [1, 1]} : vector<140x128xf32> to vector<138x128xf32>
      %25 = vector.extract_strided_slice %22 {offsets = [2, 0], sizes = [138, 128], strides = [1, 1]} : vector<140x128xf32> to vector<138x128xf32>
      %26 = arith.maximumf %23, %24 : vector<138x128xf32>
      %27 = arith.maximumf %26, %25 : vector<138x128xf32>
      %cst_8 = arith.constant dense<0.000000e+00> : vector<46x128xf32>
      %28 = tpu.matmul %10, %27, %cst_8 {dimension_numbers = #tpu.dot_dimension_numbers<[1], [0], [0], [1], [0, 0, 1, 1], [], []>} : vector<46x138xf32>, vector<138x128xf32>, vector<46x128xf32> -> vector<46x128xf32>
      %cst_9 = arith.constant 0.000000e+00 : f32
      %29 = vector.broadcast %cst_9 : f32 to vector<46x128xf32>
      %30 = arith.maximumf %28, %29 : vector<46x128xf32>
      %c0_10 = arith.constant 0 : index
      %31 = arith.index_cast %arg6 : i32 to index
      %c0_11 = arith.constant 0 : index
      %c0_12 = arith.constant 0 : index
      %32 = vector.load %arg5[%c0_10, %31, %c0_11, %c0_12] : memref<1x23x46x128xf32, #tpu.memory_space<vmem>>, vector<1x1x46x128xf32>
      %33 = vector.shape_cast %32 : vector<1x1x46x128xf32> to vector<46x128xf32>
      %34 = vector.shape_cast %30 : vector<46x128xf32> to vector<1x1x46x128xf32>
      tpu.vector_store %arg5[%c0_10, %31, %c0_11, %c0_12], %34 {strides = array<i32>} : memref<1x23x46x128xf32, #tpu.memory_space<vmem>>, vector<1x1x46x128xf32>,
    }
    %c23_i32_3 = arith.constant 23 : i32
    return
  }
  func.func @transform_0(%arg0: i32, %arg1: i32) -> (i32, i32, i32, i32) {
    %c0_i32 = arith.constant 0 : i32
    %c0_i32_0 = arith.constant 0 : i32
    %c0_i32_1 = arith.constant 0 : i32
    return %arg0, %arg1, %c0_i32, %c0_i32_0 : i32, i32, i32, i32
  }
  func.func @transform_1(%arg0: i32, %arg1: i32) -> (i32, i32) {
    %c0_i32 = arith.constant 0 : i32
    %c0_i32_0 = arith.constant 0 : i32
    %c0_i32_1 = arith.constant 0 : i32
    return %c0_i32, %c0_i32_0 : i32, i32
  }
  func.func @transform_2(%arg0: i32, %arg1: i32) -> (i32, i32) {
    %c0_i32 = arith.constant 0 : i32
    %c0_i32_0 = arith.constant 0 : i32
    %c0_i32_1 = arith.constant 0 : i32
    return %c0_i32, %c0_i32_0 : i32, i32
  }
  func.func @transform_3(%arg0: i32, %arg1: i32) -> (i32, i32, i32, i32) {
    %c0_i32 = arith.constant 0 : i32
    %c0_i32_0 = arith.constant 0 : i32
    %c0_i32_1 = arith.constant 0 : i32
    return %arg0, %arg1, %c0_i32, %c0_i32_0 : i32, i32, i32, i32
  }
}

module attributes {stable_mosaic.version = 11 : i64} {
  func.func @_bn_relu_pool_kernel(%arg0: i32, %arg1: i32, %arg2: memref<1x42x44x128xf32, #tpu.memory_space<vmem>>, %arg3: memref<1x128xf32, #tpu.memory_space<vmem>>, %arg4: memref<1x128xf32, #tpu.memory_space<vmem>>, %arg5: memref<1x14x14x128xf32, #tpu.memory_space<vmem>>) attributes {dimension_semantics = [#tpu.dimension_semantics<parallel>, #tpu.dimension_semantics<parallel>], iteration_bounds = array<i64: 2, 1>, scalar_prefetch = 0 : i64, scratch_operands = 0 : i64, tpu.core_type = #tpu.core_type<tc>, window_params = [{transform_indices = @transform_0, window_bounds = array<i64: 1, 42, 44, 128>}, {pipeline_mode = #tpu.pipeline_mode<synchronous>, transform_indices = @transform_1, window_bounds = array<i64: 1, 128>}, {pipeline_mode = #tpu.pipeline_mode<synchronous>, transform_indices = @transform_2, window_bounds = array<i64: 1, 128>}, {transform_indices = @transform_3, window_bounds = array<i64: 1, 14, 14, 128>}]} {
    %c0 = arith.constant 0 : index
    %c0_0 = arith.constant 0 : index
    %0 = vector.load %arg3[%c0, %c0_0] : memref<1x128xf32, #tpu.memory_space<vmem>>, vector<1x128xf32>
    %1 = vector.shape_cast %0 : vector<1x128xf32> to vector<128xf32>
    %c0_1 = arith.constant 0 : index
    %c0_2 = arith.constant 0 : index
    %2 = vector.load %arg4[%c0_1, %c0_2] : memref<1x128xf32, #tpu.memory_space<vmem>>, vector<1x128xf32>
    %3 = vector.shape_cast %2 : vector<1x128xf32> to vector<128xf32>
    %4 = tpu.iota {dimensions = array<i32: 0>} : vector<14x42xi32>
    %5 = tpu.iota {dimensions = array<i32: 1>} : vector<14x42xi32>
    %c3_i32 = arith.constant 3 : i32
    %6 = vector.broadcast %c3_i32 : i32 to vector<14x42xi32>
    %7 = arith.muli %6, %4 : vector<14x42xi32>
    %8 = arith.cmpi eq, %5, %7 : vector<14x42xi32>
    %9 = arith.extui %8 : vector<14x42xi1> to vector<14x42xi32>
    %10 = arith.sitofp %9 : vector<14x42xi32> to vector<14x42xf32>
    %c0_i32 = arith.constant 0 : i32
    %c14_i32 = arith.constant 14 : i32
    %11 = arith.addi %c0_i32, %c14_i32 : i32
    %c1_i32 = arith.constant 1 : i32
    scf.for %arg6 = %c0_i32 to %11 step %c1_i32  : i32 {
      %c3_i32_4 = arith.constant 3 : i32
      %12 = arith.muli %c3_i32_4, %arg6 : i32
      %c0_5 = arith.constant 0 : index
      %13 = arith.index_cast %12 : i32 to index
      %c0_6 = arith.constant 0 : index
      %c0_7 = arith.constant 0 : index
      %14 = vector.load %arg2[%c0_5, %13, %c0_6, %c0_7] : memref<1x42x44x128xf32, #tpu.memory_space<vmem>>, vector<1x3x44x128xf32>
      %15 = vector.shape_cast %14 : vector<1x3x44x128xf32> to vector<3x44x128xf32>
      %16 = vector.shape_cast %1 : vector<128xf32> to vector<1x1x128xf32>
      %17 = vector.broadcast %16 : vector<1x1x128xf32> to vector<3x44x128xf32>
      %18 = arith.mulf %15, %17 : vector<3x44x128xf32>
      %19 = vector.shape_cast %3 : vector<128xf32> to vector<1x1x128xf32>
      %20 = vector.broadcast %19 : vector<1x1x128xf32> to vector<3x44x128xf32>
      %21 = arith.addf %18, %20 : vector<3x44x128xf32>
      %cst = arith.constant dense<0xFF800000> : vector<44x128xf32>
      %22 = vector.multi_reduction <maximumf>, %21, %cst [0] : vector<3x44x128xf32> to vector<44x128xf32>
      %23 = vector.extract_strided_slice %22 {offsets = [0, 0], sizes = [42, 128], strides = [1, 1]} : vector<44x128xf32> to vector<42x128xf32>
      %24 = vector.extract_strided_slice %22 {offsets = [1, 0], sizes = [42, 128], strides = [1, 1]} : vector<44x128xf32> to vector<42x128xf32>
      %25 = vector.extract_strided_slice %22 {offsets = [2, 0], sizes = [42, 128], strides = [1, 1]} : vector<44x128xf32> to vector<42x128xf32>
      %26 = arith.maximumf %23, %24 : vector<42x128xf32>
      %27 = arith.maximumf %26, %25 : vector<42x128xf32>
      %cst_8 = arith.constant dense<0.000000e+00> : vector<14x128xf32>
      %28 = tpu.matmul %10, %27, %cst_8 {dimension_numbers = #tpu.dot_dimension_numbers<[1], [0], [0], [1], [0, 0, 1, 1], [], []>} : vector<14x42xf32>, vector<42x128xf32>, vector<14x128xf32> -> vector<14x128xf32>
      %cst_9 = arith.constant 0.000000e+00 : f32
      %29 = vector.broadcast %cst_9 : f32 to vector<14x128xf32>
      %30 = arith.maximumf %28, %29 : vector<14x128xf32>
      %c0_10 = arith.constant 0 : index
      %31 = arith.index_cast %arg6 : i32 to index
      %c0_11 = arith.constant 0 : index
      %c0_12 = arith.constant 0 : index
      %32 = vector.load %arg5[%c0_10, %31, %c0_11, %c0_12] : memref<1x14x14x128xf32, #tpu.memory_space<vmem>>, vector<1x1x14x128xf32>
      %33 = vector.shape_cast %32 : vector<1x1x14x128xf32> to vector<14x128xf32>
      %34 = vector.shape_cast %30 : vector<14x128xf32> to vector<1x1x14x128xf32>
      tpu.vector_store %arg5[%c0_10, %31, %c0_11, %c0_12], %34 {strides = array<i32>} : memref<1x14x14x128xf32, #tpu.memory_space<vmem>>, vector<1x1x14x128xf32>,
    }
    %c14_i32_3 = arith.constant 14 : i32
    return
  }
  func.func @transform_0(%arg0: i32, %arg1: i32) -> (i32, i32, i32, i32) {
    %c0_i32 = arith.constant 0 : i32
    %c0_i32_0 = arith.constant 0 : i32
    %c0_i32_1 = arith.constant 0 : i32
    return %arg0, %arg1, %c0_i32, %c0_i32_0 : i32, i32, i32, i32
  }
  func.func @transform_1(%arg0: i32, %arg1: i32) -> (i32, i32) {
    %c0_i32 = arith.constant 0 : i32
    %c0_i32_0 = arith.constant 0 : i32
    %c0_i32_1 = arith.constant 0 : i32
    return %c0_i32, %c0_i32_0 : i32, i32
  }
  func.func @transform_2(%arg0: i32, %arg1: i32) -> (i32, i32) {
    %c0_i32 = arith.constant 0 : i32
    %c0_i32_0 = arith.constant 0 : i32
    %c0_i32_1 = arith.constant 0 : i32
    return %c0_i32, %c0_i32_0 : i32, i32
  }
  func.func @transform_3(%arg0: i32, %arg1: i32) -> (i32, i32, i32, i32) {
    %c0_i32 = arith.constant 0 : i32
    %c0_i32_0 = arith.constant 0 : i32
    %c0_i32_1 = arith.constant 0 : i32
    return %arg0, %arg1, %c0_i32, %c0_i32_0 : i32, i32, i32, i32
  }
}

module attributes {stable_mosaic.version = 11 : i64} {
  func.func @_conv3x3_kernel(%arg0: i32, %arg1: i32, %arg2: memref<1x16x16x128xf32, #tpu.memory_space<vmem>>, %arg3: memref<3x384x128xf32, #tpu.memory_space<vmem>>, %arg4: memref<1x128xf32, #tpu.memory_space<vmem>>, %arg5: memref<1x14x14x128xf32, #tpu.memory_space<vmem>>, %arg6: memref<1x1x2x128xf32, #tpu.memory_space<vmem>>) attributes {dimension_semantics = [#tpu.dimension_semantics<parallel>, #tpu.dimension_semantics<parallel>], iteration_bounds = array<i64: 2, 1>, scalar_prefetch = 0 : i64, scratch_operands = 0 : i64, tpu.core_type = #tpu.core_type<tc>, window_params = [{transform_indices = @transform_0, window_bounds = array<i64: 1, 16, 16, 128>}, {pipeline_mode = #tpu.pipeline_mode<synchronous>, transform_indices = @transform_1, window_bounds = array<i64: 3, 384, 128>}, {pipeline_mode = #tpu.pipeline_mode<synchronous>, transform_indices = @transform_2, window_bounds = array<i64: 1, 128>}, {transform_indices = @transform_3, window_bounds = array<i64: 1, 14, 14, 128>}, {transform_indices = @transform_4, window_bounds = array<i64: 1, 1, 2, 128>}]} {
    %c14_i32 = arith.constant 14 : i32
    %0 = arith.muli %arg1, %c14_i32 : i32
    %cst = arith.constant 0.000000e+00 : f32
    %1 = vector.broadcast %cst : f32 to vector<1x128xf32>
    %c0_i32 = arith.constant 0 : i32
    %c14_i32_0 = arith.constant 14 : i32
    %2 = arith.addi %c0_i32, %c14_i32_0 : i32
    %c1_i32 = arith.constant 1 : i32
    %3:2 = scf.for %arg7 = %c0_i32 to %2 step %c1_i32 iter_args(%arg8 = %1, %arg9 = %1) -> (vector<1x128xf32>, vector<1x128xf32>)  : i32 {
      %cst_5 = arith.constant 0.000000e+00 : f32
      %8 = vector.broadcast %cst_5 : f32 to vector<14x128xf32>
      %9 = arith.addi %0, %arg7 : i32
      %c0_i32_6 = arith.constant 0 : i32
      %10 = arith.addi %9, %c0_i32_6 : i32
      %c0_7 = arith.constant 0 : index
      %11 = arith.index_cast %10 : i32 to index
      %c0_8 = arith.constant 0 : index
      %c0_9 = arith.constant 0 : index
      %12 = vector.load %arg2[%c0_7, %11, %c0_8, %c0_9] : memref<1x16x16x128xf32, #tpu.memory_space<vmem>>, vector<1x1x16x128xf32>
      %13 = vector.shape_cast %12 : vector<1x1x16x128xf32> to vector<16x128xf32>
      %14 = vector.extract_strided_slice %13 {offsets = [0, 0], sizes = [14, 128], strides = [1, 1]} : vector<16x128xf32> to vector<14x128xf32>
      %15 = vector.extract_strided_slice %13 {offsets = [1, 0], sizes = [14, 128], strides = [1, 1]} : vector<16x128xf32> to vector<14x128xf32>
      %16 = vector.extract_strided_slice %13 {offsets = [2, 0], sizes = [14, 128], strides = [1, 1]} : vector<16x128xf32> to vector<14x128xf32>
      %17 = tpu.concatenate %14, %15, %16 in 1 : vector<14x128xf32>, vector<14x128xf32>, vector<14x128xf32> -> vector<14x384xf32>
      %c0_10 = arith.constant 0 : index
      %c0_11 = arith.constant 0 : index
      %c0_12 = arith.constant 0 : index
      %18 = vector.load %arg3[%c0_10, %c0_11, %c0_12] : memref<3x384x128xf32, #tpu.memory_space<vmem>>, vector<1x384x128xf32>
      %19 = vector.shape_cast %18 : vector<1x384x128xf32> to vector<384x128xf32>
      %cst_13 = arith.constant dense<0.000000e+00> : vector<14x128xf32>
      %20 = tpu.matmul %17, %19, %cst_13 {dimension_numbers = #tpu.dot_dimension_numbers<[1], [0], [0], [1], [0, 0, 1, 1], [], []>} : vector<14x384xf32>, vector<384x128xf32>, vector<14x128xf32> -> vector<14x128xf32>
      %21 = arith.addf %8, %20 : vector<14x128xf32>
      %22 = arith.addi %0, %arg7 : i32
      %c1_i32_14 = arith.constant 1 : i32
      %23 = arith.addi %22, %c1_i32_14 : i32
      %c0_15 = arith.constant 0 : index
      %24 = arith.index_cast %23 : i32 to index
      %c0_16 = arith.constant 0 : index
      %c0_17 = arith.constant 0 : index
      %25 = vector.load %arg2[%c0_15, %24, %c0_16, %c0_17] : memref<1x16x16x128xf32, #tpu.memory_space<vmem>>, vector<1x1x16x128xf32>
      %26 = vector.shape_cast %25 : vector<1x1x16x128xf32> to vector<16x128xf32>
      %27 = vector.extract_strided_slice %26 {offsets = [0, 0], sizes = [14, 128], strides = [1, 1]} : vector<16x128xf32> to vector<14x128xf32>
      %28 = vector.extract_strided_slice %26 {offsets = [1, 0], sizes = [14, 128], strides = [1, 1]} : vector<16x128xf32> to vector<14x128xf32>
      %29 = vector.extract_strided_slice %26 {offsets = [2, 0], sizes = [14, 128], strides = [1, 1]} : vector<16x128xf32> to vector<14x128xf32>
      %30 = tpu.concatenate %27, %28, %29 in 1 : vector<14x128xf32>, vector<14x128xf32>, vector<14x128xf32> -> vector<14x384xf32>
      %c1 = arith.constant 1 : index
      %c0_18 = arith.constant 0 : index
      %c0_19 = arith.constant 0 : index
      %31 = vector.load %arg3[%c1, %c0_18, %c0_19] : memref<3x384x128xf32, #tpu.memory_space<vmem>>, vector<1x384x128xf32>
      %32 = vector.shape_cast %31 : vector<1x384x128xf32> to vector<384x128xf32>
      %cst_20 = arith.constant dense<0.000000e+00> : vector<14x128xf32>
      %33 = tpu.matmul %30, %32, %cst_20 {dimension_numbers = #tpu.dot_dimension_numbers<[1], [0], [0], [1], [0, 0, 1, 1], [], []>} : vector<14x384xf32>, vector<384x128xf32>, vector<14x128xf32> -> vector<14x128xf32>
      %34 = arith.addf %21, %33 : vector<14x128xf32>
      %35 = arith.addi %0, %arg7 : i32
      %c2_i32 = arith.constant 2 : i32
      %36 = arith.addi %35, %c2_i32 : i32
      %c0_21 = arith.constant 0 : index
      %37 = arith.index_cast %36 : i32 to index
      %c0_22 = arith.constant 0 : index
      %c0_23 = arith.constant 0 : index
      %38 = vector.load %arg2[%c0_21, %37, %c0_22, %c0_23] : memref<1x16x16x128xf32, #tpu.memory_space<vmem>>, vector<1x1x16x128xf32>
      %39 = vector.shape_cast %38 : vector<1x1x16x128xf32> to vector<16x128xf32>
      %40 = vector.extract_strided_slice %39 {offsets = [0, 0], sizes = [14, 128], strides = [1, 1]} : vector<16x128xf32> to vector<14x128xf32>
      %41 = vector.extract_strided_slice %39 {offsets = [1, 0], sizes = [14, 128], strides = [1, 1]} : vector<16x128xf32> to vector<14x128xf32>
      %42 = vector.extract_strided_slice %39 {offsets = [2, 0], sizes = [14, 128], strides = [1, 1]} : vector<16x128xf32> to vector<14x128xf32>
      %43 = tpu.concatenate %40, %41, %42 in 1 : vector<14x128xf32>, vector<14x128xf32>, vector<14x128xf32> -> vector<14x384xf32>
      %c2 = arith.constant 2 : index
      %c0_24 = arith.constant 0 : index
      %c0_25 = arith.constant 0 : index
      %44 = vector.load %arg3[%c2, %c0_24, %c0_25] : memref<3x384x128xf32, #tpu.memory_space<vmem>>, vector<1x384x128xf32>
      %45 = vector.shape_cast %44 : vector<1x384x128xf32> to vector<384x128xf32>
      %cst_26 = arith.constant dense<0.000000e+00> : vector<14x128xf32>
      %46 = tpu.matmul %43, %45, %cst_26 {dimension_numbers = #tpu.dot_dimension_numbers<[1], [0], [0], [1], [0, 0, 1, 1], [], []>} : vector<14x384xf32>, vector<384x128xf32>, vector<14x128xf32> -> vector<14x128xf32>
      %47 = arith.addf %34, %46 : vector<14x128xf32>
      %c0_27 = arith.constant 0 : index
      %c0_28 = arith.constant 0 : index
      %48 = vector.load %arg4[%c0_27, %c0_28] : memref<1x128xf32, #tpu.memory_space<vmem>>, vector<1x128xf32>
      %49 = vector.shape_cast %48 : vector<1x128xf32> to vector<128xf32>
      %50 = vector.shape_cast %49 : vector<128xf32> to vector<1x128xf32>
      %51 = vector.broadcast %50 : vector<1x128xf32> to vector<14x128xf32>
      %52 = arith.addf %47, %51 : vector<14x128xf32>
      %c0_29 = arith.constant 0 : index
      %53 = arith.index_cast %arg7 : i32 to index
      %c0_30 = arith.constant 0 : index
      %c0_31 = arith.constant 0 : index
      %54 = vector.load %arg5[%c0_29, %53, %c0_30, %c0_31] : memref<1x14x14x128xf32, #tpu.memory_space<vmem>>, vector<1x1x14x128xf32>
      %55 = vector.shape_cast %54 : vector<1x1x14x128xf32> to vector<14x128xf32>
      %56 = vector.shape_cast %52 : vector<14x128xf32> to vector<1x1x14x128xf32>
      tpu.vector_store %arg5[%c0_29, %53, %c0_30, %c0_31], %56 {strides = array<i32>} : memref<1x14x14x128xf32, #tpu.memory_space<vmem>>, vector<1x1x14x128xf32>,
      %cst_32 = arith.constant dense<0.000000e+00> : vector<128xf32>
      %57 = vector.multi_reduction <add>, %52, %cst_32 [0] : vector<14x128xf32> to vector<128xf32>
      %58 = vector.shape_cast %57 : vector<128xf32> to vector<1x128xf32>
      %59 = arith.addf %arg8, %58 : vector<1x128xf32>
      %60 = arith.mulf %52, %52 : vector<14x128xf32>
      %cst_33 = arith.constant dense<0.000000e+00> : vector<128xf32>
      %61 = vector.multi_reduction <add>, %60, %cst_33 [0] : vector<14x128xf32> to vector<128xf32>
      %62 = vector.shape_cast %61 : vector<128xf32> to vector<1x128xf32>
      %63 = arith.addf %arg9, %62 : vector<1x128xf32>
      scf.yield %59, %63 : vector<1x128xf32>, vector<1x128xf32>
    }
    %c14_i32_1 = arith.constant 14 : i32
    %4 = tpu.concatenate %3#0, %3#1 in 0 : vector<1x128xf32>, vector<1x128xf32> -> vector<2x128xf32>
    %c0 = arith.constant 0 : index
    %c0_2 = arith.constant 0 : index
    %c0_3 = arith.constant 0 : index
    %c0_4 = arith.constant 0 : index
    %5 = vector.load %arg6[%c0, %c0_2, %c0_3, %c0_4] : memref<1x1x2x128xf32, #tpu.memory_space<vmem>>, vector<1x1x2x128xf32>
    %6 = vector.shape_cast %5 : vector<1x1x2x128xf32> to vector<2x128xf32>
    %7 = vector.shape_cast %4 : vector<2x128xf32> to vector<1x1x2x128xf32>
    tpu.vector_store %arg6[%c0, %c0_2, %c0_3, %c0_4], %7 {strides = array<i32>} : memref<1x1x2x128xf32, #tpu.memory_space<vmem>>, vector<1x1x2x128xf32>,
    return
  }
  func.func @transform_0(%arg0: i32, %arg1: i32) -> (i32, i32, i32, i32) {
    %c0_i32 = arith.constant 0 : i32
    %c0_i32_0 = arith.constant 0 : i32
    %c0_i32_1 = arith.constant 0 : i32
    %c0_i32_2 = arith.constant 0 : i32
    return %arg0, %c0_i32, %c0_i32_0, %c0_i32_1 : i32, i32, i32, i32
  }
  func.func @transform_1(%arg0: i32, %arg1: i32) -> (i32, i32, i32) {
    %c0_i32 = arith.constant 0 : i32
    %c0_i32_0 = arith.constant 0 : i32
    %c0_i32_1 = arith.constant 0 : i32
    %c0_i32_2 = arith.constant 0 : i32
    return %c0_i32, %c0_i32_0, %c0_i32_1 : i32, i32, i32
  }
  func.func @transform_2(%arg0: i32, %arg1: i32) -> (i32, i32) {
    %c0_i32 = arith.constant 0 : i32
    %c0_i32_0 = arith.constant 0 : i32
    %c0_i32_1 = arith.constant 0 : i32
    return %c0_i32, %c0_i32_0 : i32, i32
  }
  func.func @transform_3(%arg0: i32, %arg1: i32) -> (i32, i32, i32, i32) {
    %c0_i32 = arith.constant 0 : i32
    %c0_i32_0 = arith.constant 0 : i32
    %c0_i32_1 = arith.constant 0 : i32
    return %arg0, %arg1, %c0_i32, %c0_i32_0 : i32, i32, i32, i32
  }
  func.func @transform_4(%arg0: i32, %arg1: i32) -> (i32, i32, i32, i32) {
    %c0_i32 = arith.constant 0 : i32
    %c0_i32_0 = arith.constant 0 : i32
    %c0_i32_1 = arith.constant 0 : i32
    return %arg0, %arg1, %c0_i32, %c0_i32_0 : i32, i32, i32, i32
  }
}

module attributes {stable_mosaic.version = 11 : i64} {
  func.func @_bn_relu_kernel(%arg0: i32, %arg1: memref<392x128xf32, #tpu.memory_space<vmem>>, %arg2: memref<1x128xf32, #tpu.memory_space<vmem>>, %arg3: memref<1x128xf32, #tpu.memory_space<vmem>>, %arg4: memref<392x128xf32, #tpu.memory_space<vmem>>) attributes {dimension_semantics = [#tpu.dimension_semantics<arbitrary>], iteration_bounds = array<i64: 1>, scalar_prefetch = 0 : i64, scratch_operands = 0 : i64, tpu.core_type = #tpu.core_type<tc>, window_params = [{pipeline_mode = #tpu.pipeline_mode<synchronous>, transform_indices = @transform_0, window_bounds = array<i64: 392, 128>}, {pipeline_mode = #tpu.pipeline_mode<synchronous>, transform_indices = @transform_1, window_bounds = array<i64: 1, 128>}, {pipeline_mode = #tpu.pipeline_mode<synchronous>, transform_indices = @transform_2, window_bounds = array<i64: 1, 128>}, {pipeline_mode = #tpu.pipeline_mode<synchronous>, transform_indices = @transform_3, window_bounds = array<i64: 392, 128>}]} {
    %c0 = arith.constant 0 : index
    %c0_0 = arith.constant 0 : index
    %0 = vector.load %arg1[%c0, %c0_0] : memref<392x128xf32, #tpu.memory_space<vmem>>, vector<392x128xf32>
    %c0_1 = arith.constant 0 : index
    %c0_2 = arith.constant 0 : index
    %1 = vector.load %arg2[%c0_1, %c0_2] : memref<1x128xf32, #tpu.memory_space<vmem>>, vector<1x128xf32>
    %2 = vector.shape_cast %1 : vector<1x128xf32> to vector<128xf32>
    %3 = vector.shape_cast %2 : vector<128xf32> to vector<1x128xf32>
    %4 = vector.broadcast %3 : vector<1x128xf32> to vector<392x128xf32>
    %5 = arith.mulf %0, %4 : vector<392x128xf32>
    %c0_3 = arith.constant 0 : index
    %c0_4 = arith.constant 0 : index
    %6 = vector.load %arg3[%c0_3, %c0_4] : memref<1x128xf32, #tpu.memory_space<vmem>>, vector<1x128xf32>
    %7 = vector.shape_cast %6 : vector<1x128xf32> to vector<128xf32>
    %8 = vector.shape_cast %7 : vector<128xf32> to vector<1x128xf32>
    %9 = vector.broadcast %8 : vector<1x128xf32> to vector<392x128xf32>
    %10 = arith.addf %5, %9 : vector<392x128xf32>
    %cst = arith.constant 0.000000e+00 : f32
    %11 = vector.broadcast %cst : f32 to vector<392x128xf32>
    %12 = arith.maximumf %10, %11 : vector<392x128xf32>
    %c0_5 = arith.constant 0 : index
    %c0_6 = arith.constant 0 : index
    %13 = vector.load %arg4[%c0_5, %c0_6] : memref<392x128xf32, #tpu.memory_space<vmem>>, vector<392x128xf32>
    tpu.vector_store %arg4[%c0_5, %c0_6], %12 {strides = array<i32>} : memref<392x128xf32, #tpu.memory_space<vmem>>, vector<392x128xf32>,
    return
  }
  func.func @transform_0(%arg0: i32) -> (i32, i32) {
    %c0_i32 = arith.constant 0 : i32
    %c0_i32_0 = arith.constant 0 : i32
    %c0_i32_1 = arith.constant 0 : i32
    return %c0_i32, %c0_i32_0 : i32, i32
  }
  func.func @transform_1(%arg0: i32) -> (i32, i32) {
    %c0_i32 = arith.constant 0 : i32
    %c0_i32_0 = arith.constant 0 : i32
    %c0_i32_1 = arith.constant 0 : i32
    return %c0_i32, %c0_i32_0 : i32, i32
  }
  func.func @transform_2(%arg0: i32) -> (i32, i32) {
    %c0_i32 = arith.constant 0 : i32
    %c0_i32_0 = arith.constant 0 : i32
    %c0_i32_1 = arith.constant 0 : i32
    return %c0_i32, %c0_i32_0 : i32, i32
  }
  func.func @transform_3(%arg0: i32) -> (i32, i32) {
    %c0_i32 = arith.constant 0 : i32
    %c0_i32_0 = arith.constant 0 : i32
    %c0_i32_1 = arith.constant 0 : i32
    return %c0_i32, %c0_i32_0 : i32, i32
  }
}

module attributes {stable_mosaic.version = 11 : i64} {
  func.func @_fc_softmax_kernel(%arg0: i32, %arg1: memref<2x19600xf32, #tpu.memory_space<vmem>>, %arg2: memref<2x19600xf32, #tpu.memory_space<vmem>>, %arg3: memref<1x2xf32, #tpu.memory_space<vmem>>, %arg4: memref<2x2xf32, #tpu.memory_space<vmem>>) attributes {dimension_semantics = [#tpu.dimension_semantics<arbitrary>], iteration_bounds = array<i64: 1>, scalar_prefetch = 0 : i64, scratch_operands = 0 : i64, tpu.core_type = #tpu.core_type<tc>, window_params = [{pipeline_mode = #tpu.pipeline_mode<synchronous>, transform_indices = @transform_0, window_bounds = array<i64: 2, 19600>}, {pipeline_mode = #tpu.pipeline_mode<synchronous>, transform_indices = @transform_1, window_bounds = array<i64: 2, 19600>}, {pipeline_mode = #tpu.pipeline_mode<synchronous>, transform_indices = @transform_2, window_bounds = array<i64: 1, 2>}, {pipeline_mode = #tpu.pipeline_mode<synchronous>, transform_indices = @transform_3, window_bounds = array<i64: 2, 2>}]} {
    %c0 = arith.constant 0 : index
    %c0_0 = arith.constant 0 : index
    %0 = vector.load %arg1[%c0, %c0_0] : memref<2x19600xf32, #tpu.memory_space<vmem>>, vector<2x19600xf32>
    %c0_1 = arith.constant 0 : index
    %c0_2 = arith.constant 0 : index
    %1 = vector.load %arg2[%c0_1, %c0_2] : memref<2x19600xf32, #tpu.memory_space<vmem>>, vector<1x19600xf32>
    %2 = vector.broadcast %1 : vector<1x19600xf32> to vector<2x19600xf32>
    %3 = arith.mulf %0, %2 : vector<2x19600xf32>
    %cst = arith.constant dense<0.000000e+00> : vector<2xf32>
    %4 = vector.multi_reduction <add>, %3, %cst [1] : vector<2x19600xf32> to vector<2xf32>
    %5 = vector.shape_cast %4 : vector<2xf32> to vector<2x1xf32>
    %c1 = arith.constant 1 : index
    %c0_3 = arith.constant 0 : index
    %6 = vector.load %arg2[%c1, %c0_3] : memref<2x19600xf32, #tpu.memory_space<vmem>>, vector<1x19600xf32>
    %7 = vector.broadcast %6 : vector<1x19600xf32> to vector<2x19600xf32>
    %8 = arith.mulf %0, %7 : vector<2x19600xf32>
    %cst_4 = arith.constant dense<0.000000e+00> : vector<2xf32>
    %9 = vector.multi_reduction <add>, %8, %cst_4 [1] : vector<2x19600xf32> to vector<2xf32>
    %10 = vector.shape_cast %9 : vector<2xf32> to vector<2x1xf32>
    %11 = tpu.concatenate %5, %10 in 1 : vector<2x1xf32>, vector<2x1xf32> -> vector<2x2xf32>
    %c0_5 = arith.constant 0 : index
    %c0_6 = arith.constant 0 : index
    %12 = vector.load %arg3[%c0_5, %c0_6] : memref<1x2xf32, #tpu.memory_space<vmem>>, vector<1x2xf32>
    %13 = vector.shape_cast %12 : vector<1x2xf32> to vector<2xf32>
    %14 = vector.shape_cast %13 : vector<2xf32> to vector<1x2xf32>
    %15 = vector.broadcast %14 : vector<1x2xf32> to vector<2x2xf32>
    %16 = arith.addf %11, %15 : vector<2x2xf32>
    %cst_7 = arith.constant dense<0xFF800000> : vector<2xf32>
    %17 = vector.multi_reduction <maximumf>, %16, %cst_7 [1] : vector<2x2xf32> to vector<2xf32>
    %18 = vector.shape_cast %17 : vector<2xf32> to vector<2x1xf32>
    %19 = vector.broadcast %18 : vector<2x1xf32> to vector<2x2xf32>
    %20 = arith.subf %16, %19 : vector<2x2xf32>
    %21 = math.exp %20 : vector<2x2xf32>
    %cst_8 = arith.constant dense<0.000000e+00> : vector<2xf32>
    %22 = vector.multi_reduction <add>, %21, %cst_8 [1] : vector<2x2xf32> to vector<2xf32>
    %23 = vector.shape_cast %22 : vector<2xf32> to vector<2x1xf32>
    %24 = vector.broadcast %23 : vector<2x1xf32> to vector<2x2xf32>
    %25 = arith.divf %21, %24 : vector<2x2xf32>
    %c0_9 = arith.constant 0 : index
    %c0_10 = arith.constant 0 : index
    %26 = vector.load %arg4[%c0_9, %c0_10] : memref<2x2xf32, #tpu.memory_space<vmem>>, vector<2x2xf32>
    tpu.vector_store %arg4[%c0_9, %c0_10], %25 {strides = array<i32>} : memref<2x2xf32, #tpu.memory_space<vmem>>, vector<2x2xf32>,
    return
  }
  func.func @transform_0(%arg0: i32) -> (i32, i32) {
    %c0_i32 = arith.constant 0 : i32
    %c0_i32_0 = arith.constant 0 : i32
    %c0_i32_1 = arith.constant 0 : i32
    return %c0_i32, %c0_i32_0 : i32, i32
  }
  func.func @transform_1(%arg0: i32) -> (i32, i32) {
    %c0_i32 = arith.constant 0 : i32
    %c0_i32_0 = arith.constant 0 : i32
    %c0_i32_1 = arith.constant 0 : i32
    return %c0_i32, %c0_i32_0 : i32, i32
  }
  func.func @transform_2(%arg0: i32) -> (i32, i32) {
    %c0_i32 = arith.constant 0 : i32
    %c0_i32_0 = arith.constant 0 : i32
    %c0_i32_1 = arith.constant 0 : i32
    return %c0_i32, %c0_i32_0 : i32, i32
  }
  func.func @transform_3(%arg0: i32) -> (i32, i32) {
    %c0_i32 = arith.constant 0 : i32
    %c0_i32_0 = arith.constant 0 : i32
    %c0_i32_1 = arith.constant 0 : i32
    return %c0_i32, %c0_i32_0 : i32, i32
  }
}

</mosaic_0001>

<bundles_post_ra>
// kernel: discriminator_cnn_forward.9
= control target key start
LH: loop header
LB: loop body
LE: loop exit
PB: predicated region body
PF: predicated region fallthrough
CT: control target
= control target key end

     0   :  { %s1907_s15 = smov 0   ;;  %s1909_s16 = smov 0   ;;  %s2166_s0 = inlined_call_operand.vmem [shape: f32[2,142,8,142], index: 0, kind: input, shape index: {}]   ;;  %s2167_s1 = inlined_call_operand.vmem [shape: f32[3,24,128], index: 1, kind: input, shape index: {}]   ;;  %s2168_s2 = inlined_call_operand.vmem [shape: f32[1,128], index: 2, kind: input, shape index: {}]   ;;  %s2169_s3 = inlined_call_operand.vmem [shape: f32[2,140,140,128], index: 3, kind: output, shape index: {0}]   ;;  %s2170_s4 = inlined_call_operand.vmem [shape: f32[2,4,2,128], index: 4, kind: output, shape index: {1}]  }
   0x1   :  { %s1911_s17 = smov 0   ;;  %s1913_s18 = smov 0  }
   0x2   :  { %s1915_s19 = smov 0  }
   0x3 LB: > { %s24_s20 = sadd.s32 1, %s1858_s17  ;;  %s27_s21 = sadd.s32 1, %s1862_s18  ;;  %s1866_s19 = sphi %s1915_s19, %s15_s19   ;;  %s1862_s18 = sphi %s1913_s18, %s2176_s18   ;;  %s1858_s17 = sphi %s1911_s17, %s2175_s17   ;;  %s1854_s16 = sphi %s1909_s16, %s2174_s16   ;;  %s1850_s15 = sphi %s1907_s15, %s2173_s15  }
   0x4   : > { %p25_p0 = scmp.ge.s32.totalorder %s24_s20, 4  ;;  %p1455_p1 = scmp.ge.s32.totalorder %s1866_s19, 1 }
   0x5   : > { %p181_p2 = scmp.lt.s32.totalorder %s1866_s19, 9 }
   0x6   : > { %s2178_s20 = smov (%p25_p0, %s24_s20), 0  ;;  %s2180_s21 = smov (!%p25_p0, %s27_s21), %s1862_s18 }
   0x7   : > { %p182_p3 = pnand %p1455_p1, %p181_p2  ;;  %p29_p4 = scmp.ge.s32.totalorder %s2180_s21, 2 }
   0x8   : > { %p220_p5 = scmp.lt.s32.totalorder (!%p182_p3), %s1854_s16, 1  ;;  %s1937_s22 = smul.u32 (!%p182_p3), 35, %s1850_s15  ;;  %v1956_v0 = vmov (!%p182_p3), 0.0   ;;  %v1958_v1 = vmov (!%p182_p3), 0.0  }
   0x9   : > { %s2182_s21 = smov (%p29_p4, %s2180_s21), 0  ;;  %185 = sbr.rel (%p182_p3) target bundleno = 645 (0x285), region = 32 }
   0xa   : > { %p228_p6 = scmp.lt.s32.totalorder (!%p182_p3), %s1937_s22, 139  ;;  %p238_p7 = scmp.lt.s32.totalorder (!%p182_p3), %s1850_s15, 3 }
  0x10   : > { %s2184_s16 = smov (!%p220_p5, %s1854_s16), 1  ;;  %s2186_s15 = smov (!%p238_p7, %s1850_s15), 3 }
  0x11   : > { %s1746_s23 = smul.u32 2272, %s2184_s16  ;;  %s1458_s30 = sshll.u32 %s2184_s16, 2 }
  0x12   : > { %s229_s24 = scalar_select %p228_p6, %s1937_s22, 139 }
  0x13   : > { %s1944_s27 = scalar_lea.vmem %s2166_s0, %s1746_s23  ;;  %s1748_s28 = smul.u32 2520, %s2184_s16 }
  0x14   : > { %s1747_s29 = smul.u32 18, %s229_s24  ;;  %s241_s7 = sadd.s32 %s1458_s30, %s2186_s15 }
  0x15   : > { %s1459_s11 = sshll.u32 %s241_s7, 1  ;;  %s1960_s16 = smov 0  }
  0x16   : > { %s232_s5 = sadd.s32 %s1748_s28, %s1747_s29  ;;  %s1954_s14 = scalar_lea.vmem %s2170_s4, %s1459_s11 }
  0x17   : > { %s1457_s6 = sshll.u32 %s232_s5, 3 }
  0x18   : > { %s1949_s10 = scalar_lea.vmem %s2169_s3, %s1457_s6 }
  0x19 LB: >> { %s253_s15 = sadd.s32 %s1878_s16, %s1937_s22  ;;  %s1880_s25 = smov 126   ;;  %v277_v8 = vld [vmem:[%s2167_s1] sm:$0xff]  ;;  %v278_v9 = vld [vmem:[%s2167_s1 + $0x8] sm:$0xff]  ;;  %vm265_vm0 = vcmask 1039360   ;;  %v1991_v15 = vld [vmem:[%s2167_s1 + $0x10] sm:$0xff]  ;;  %vm273_vm1 = vcmask 1031168   ;;  %s1878_s16 = sphi %s1960_s16, %s250_s16   ;;  %v1874_v1 = vphi %v1958_v1, %v2172_v1   ;;  %v1870_v0 = vphi %v1956_v0, %v2171_v0  }
  0x1a   : >> { %s1531_s23 = sshll.u32 %s253_s15, 4  ;;  %s1881_s26 = smov 127   ;;  %v1984_v10 = vpack.c.bf16 %v278_v9, %v277_v8  ;;  %v1465_v24 = vld [vmem:[%s2167_s1 + $0x18] sm:$0xff]  ;;  %v1466_v25 = vld [vmem:[%s2167_s1 + $0x20] sm:$0xff]  ;;  %v1467_v27 = vld [vmem:[%s2167_s1 + $0x28] sm:$0xff]  ;;  %vm370_vm2 = vcmask 195584  }
  0x1b   : >> { %s256_s24 = scalar_lea.vmem %s1944_s27, %s1531_s23  ;;  %v1694_v26 = vpack.c.bf16 %v1466_v25, %v1465_v24  ;;  %v1507_v30 = vld [vmem:[%s2167_s1 + $0x30] sm:$0xff]  ;;  %v1508_v31 = vld [vmem:[%s2167_s1 + $0x38] sm:$0xff]  ;;  %v1509_v40 = vld [vmem:[%s2167_s1 + $0x40] sm:$0xff]  ;;  %s1195_s30 = smul.u32 144, %s1878_s16  ;;  %vm1231_vm3 = vcmask 1043456  }
  0x1c   : >> { %v257_v2 = vld [vmem:[%s256_s24] sm:$0xff]  ;;  %v1974_v3 = vld [vmem:[%s256_s24 + $0x8] sm:$0xff]  ;;  %v1464_v4 = vld [vmem:[%s256_s24 + $0x18] sm:$0xff]  ;;  %1699 = vmatprep.subr.bf16.mxu0 %v1984_v10  ;;  %v1702_v32 = vpack.c.bf16 %v1508_v31, %v1507_v30  ;;  %s250_s16 = sadd.s32 1, %s1878_s16  }
  0x1d   : >> { %269 = vrot.lane.b32.xlu1 %v257_v2, %s1880_s25  ;;  %261 = vrot.lane.b32.xlu0 %v257_v2, %s1881_s26  ;;  %v1463_v5 = vld [vmem:[%s256_s24 + $0x10] sm:$0xff]  ;;  %v1506_v6 = vld [vmem:[%s256_s24 + $0x28] sm:$0xff]  ;;  %s2089_s7 = scalar_lea.vmem %s1949_s10, %s1195_s30  ;;  %p247_p8 = scmp.ge.s32.totalorder %s250_s16, 35  }
  0x1e   : >> { %v1505_v7 = vld [vmem:[%s256_s24 + $0x20] sm:$0xff]  ;;  %1701 = vmatpush3.bf16.msra.mxu0 %v1984_v10  ;;  %1695 = vmatprep.subr.bf16.mxu1 %v1694_v26  ;;  %vm1284_vm4 = vcmask (%p247_p8), 1040384  }
  0x1f   : >> { %1632 = vmatprep.subr.mxu0 %v1991_v15  ;;  %1697 = vmatpush3.bf16.msra.mxu1 %v1694_v26 }
  0x20   : >> { %1599 = vmatprep.subr.mxu1 %v1467_v27 }
  0x21   : >> { %271 = vrot.lane.b32.xlu1 %v1974_v3, %s1880_s25  ;;  %263 = vrot.lane.b32.xlu0 %v1974_v3, %s1881_s26 }
  0x22   : >> { %1633 = vmatpush3.msra.mxu0 %v1991_v15 }
  0x23   : >> { %1600 = vmatpush3.msra.mxu1 %v1467_v27  ;;  %1703 = vmatprep.subr.bf16.mxu0 %v1702_v32 }
  0x24   : >> { %1706 = vmatprep.subr.bf16.mxu1 %v1984_v10 }
  0x25   : >> { %290 = vrot.lane.b32.xlu1 %v1464_v4, %s1881_s26  ;;  %288 = vrot.lane.b32.xlu0 %v1463_v5, %s1881_s26 }
  0x29   : >> { %297 = vrot.lane.b32.xlu1 %v1464_v4, %s1880_s25  ;;  %295 = vrot.lane.b32.xlu0 %v1463_v5, %s1880_s25 }
  0x2d   : >> { %863 = vrot.lane.b32.xlu1 %v1506_v6, %s1881_s26  ;;  %861 = vrot.lane.b32.xlu0 %v1505_v7, %s1881_s26 }
  0x31   : >> { %870 = vrot.lane.b32.xlu1 %v1506_v6, %s1880_s25  ;;  %868 = vrot.lane.b32.xlu0 %v1505_v7, %s1880_s25 }
  0x4f   : >> { %580 = vxpose.xlu0.b32.start [1/3] (short) %v257_v2, 128 }
  0x5a   : >> { %306 = vxpose.xlu1.b32.start [1/3] (short) %v1463_v5, 128 }
  0x8f   : >> { %v270_v11 = vpop.permute.xlu1 %269  ;;  %v262_v12 = vpop.permute.xlu0 %261 }
  0x93   : >> { %v272_v13 = vpop.permute.xlu1 %271  ;;  %v264_v14 = vpop.permute.xlu0 %263 }
  0x94   : >> { %v266_v16 = vsel %vm265_vm0, %v262_v12, %v264_v14  ;;  %v274_v19 = vsel %vm273_vm1, %v270_v11, %v272_v13 }
  0x95   : >> { %581 = vxpose.xlu0.b32.cont [2/3] (short) %v266_v16, 128 }
  0x97   : >> { %v291_v17 = vpop.permute.xlu1 %290  ;;  %v289_v18 = vpop.permute.xlu0 %288 }
  0x98   : >> { %v292_v20 = vsel %vm265_vm0, %v289_v18, %v291_v17 }
  0x99   : >> { %582 = vxpose.xlu0.b32.end [3/3] (short) %v274_v19, 128  ;;  %307 = vxpose.xlu1.b32.cont [2/3] (short) %v292_v20, 128 }
  0x9b   : >> { %v298_v21 = vpop.permute.xlu1 %297  ;;  %v296_v22 = vpop.permute.xlu0 %295 }
  0x9c   : >> { %v299_v23 = vsel %vm273_vm1, %v296_v22, %v298_v21 }
  0x9d   : >> { %308 = vxpose.xlu1.b32.end [3/3] (short) %v299_v23, 128 }
  0x9f   : >> { %v864_v28 = vpop.permute.xlu1 %863  ;;  %v862_v29 = vpop.permute.xlu0 %861 }
  0xa0   : >> { %v865_v33 = vsel %vm265_vm0, %v862_v29, %v864_v28 }
  0xa3   : >> { %v871_v34 = vpop.permute.xlu1 %870  ;;  %v869_v35 = vpop.permute.xlu0 %868 }
  0xa4   : >> { %v872_v36 = vsel %vm273_vm1, %v869_v35, %v871_v34 }
  0xce   : >> { %879 = vxpose.xlu0.b32.start [1/3] (short) %v1505_v7, 128 }
  0xd2   : >> { %338 = vxpose.xlu1.b32.start [1/3] (short) (narrow) %v1464_v4, 16  ;;  %880 = vxpose.xlu0.b32.cont [2/3] (short) %v865_v33, 128 }
  0xd6   : >> { %339 = vxpose.xlu1.b32.cont [2/3] (short) (narrow) %v291_v17, 16  ;;  %881 = vxpose.xlu0.b32.end [3/3] (short) %v872_v36, 128 }
  0xda   : >> { %340 = vxpose.xlu1.b32.end [3/3] (short) (narrow) %v298_v21, 16 }
  0xde   : >> { %911 = vxpose.xlu1.b32.start [1/3] (short) (narrow) %v1506_v6, 16 }
  0xe2   : >> { %912 = vxpose.xlu1.b32.cont [2/3] (short) (narrow) %v864_v28, 16 }
  0xe6   : >> { %913 = vxpose.xlu1.b32.end [3/3] (short) (narrow) %v871_v34, 16 }
 0x10b   : >> { %612 = vxpose.xlu0.b32.start [1/3] (short) (narrow) %v1974_v3, 16 }
 0x10f   : >> { %613 = vxpose.xlu0.b32.cont [2/3] (short) (narrow) %v264_v14, 16 }
 0x111   : >> { %v596_v37 = vpop.trf.xlu0 }
 0x112   : >> { %1634 = vmatprep.mubr.msk.f32.mxu0 %vm370_vm2, %v596_v37 }
 0x113   : >> { %614 = vxpose.xlu0.b32.end [3/3] (short) (narrow) %v272_v13, 16 }
 0x115   : >> { %v322_v38 = vpop.trf.xlu1  ;;  %v597_v39 = vpop.trf.xlu0 }
 0x116   : >> { %1635 = vmatmul.mubr.msk.f32.vlgmr.msra.gmra.mrb[0].mxu0 %vm370_vm2, %v597_v39  ;;  %1601 = vmatprep.mubr.msk.f32.mxu1 %vm370_vm2, %v322_v38 }
 0x117   : >> { %1705 = vmatpush3.bf16.msra.mxu0 %v1702_v32 }
 0x118   : >> { %1665 = vmatprep.subr.mxu0 %v1509_v40 }
 0x119   : >> { %v323_v41 = vpop.trf.xlu1  ;;  %v598_v42 = vpop.trf.xlu0 }
 0x11a   : >> { %1637 = vmatprep.mubr.msk.f32.mxu0 %vm370_vm2, %v598_v42  ;;  %1602 = vmatmul.mubr.msk.f32.vlgmr.msra.gmra.mrb[0].mxu1 %vm370_vm2, %v323_v41  ;;  %v2086_v41 = vld [vmem:[%s2168_s2] ss:$0 sm:$0xff] }
 0x11b   : >> { %1666 = vmatpush3.msra.mxu0 %v1509_v40  ;;  %1708 = vmatpush3.bf16.msra.mxu1 %v1984_v10 }
 0x11c   : >> { %1707 = vmatprep.subr.mxu1 %v1991_v15 }
 0x11d   : >> { %v324_v43 = vpop.trf.xlu1  ;;  %v599_v44 = vpop.trf.xlu0 }
 0x11e   : >> { %1638 = vmatmul.mubr.msk.f32.gmra.mrb[2].mxu0 %vm370_vm2, %v599_v44  ;;  %1604 = vmatprep.mubr.msk.f32.mxu1 %vm370_vm2, %v324_v43 }
 0x11f   : >> { %1709 = vmatpush3.msra.mxu1 %v1991_v15 }
 0x121   : >> { %v325_v45 = vpop.trf.xlu1  ;;  %v600_v46 = vpop.trf.xlu0 }
 0x122   : >> { %1640 = vmatprep.mubr.msk.f32.mxu0 %vm370_vm2, %v600_v46  ;;  %1605 = vmatmul.mubr.msk.f32.gmra.mrb[2].mxu1 %vm370_vm2, %v325_v45 }
 0x125   : >> { %v326_v47 = vpop.trf.xlu1  ;;  %v601_v48 = vpop.trf.xlu0 }
 0x126   : >> { %1641 = vmatmul.mubr.msk.f32.gmra.mrb[4].mxu0 %vm370_vm2, %v601_v48  ;;  %1607 = vmatprep.mubr.msk.f32.mxu1 %vm370_vm2, %v326_v47 }
 0x129   : >> { %v327_v49 = vpop.trf.xlu1  ;;  %v602_v50 = vpop.trf.xlu0 }
 0x12a   : >> { %1643 = vmatprep.mubr.msk.f32.mxu0 %vm370_vm2, %v602_v50  ;;  %1608 = vmatmul.mubr.msk.f32.gmra.mrb[4].mxu1 %vm370_vm2, %v327_v49 }
 0x12d   : >> { %v328_v51 = vpop.trf.xlu1  ;;  %v603_v52 = vpop.trf.xlu0 }
 0x12e   : >> { %1644 = vmatmul.mubr.msk.f32.gmra.mrb[6].mxu0 %vm370_vm2, %v603_v52  ;;  %1610 = vmatprep.mubr.msk.f32.mxu1 %vm370_vm2, %v328_v51 }
 0x131   : >> { %v329_v53 = vpop.trf.xlu1  ;;  %v604_v54 = vpop.trf.xlu0 }
 0x132   : >> { %1646 = vmatprep.mubr.msk.f32.mxu0 %vm370_vm2, %v604_v54  ;;  %1611 = vmatmul.mubr.msk.f32.gmra.mrb[6].mxu1 %vm370_vm2, %v329_v53 }
 0x135   : >> { %v330_v55 = vpop.trf.xlu1  ;;  %v605_v56 = vpop.trf.xlu0 }
 0x136   : >> { %1647 = vmatmul.mubr.msk.f32.gmra.mrb[8].mxu0 %vm370_vm2, %v605_v56  ;;  %1613 = vmatprep.mubr.msk.f32.mxu1 %vm370_vm2, %v330_v55 }
 0x139   : >> { %v331_v57 = vpop.trf.xlu1  ;;  %v606_v58 = vpop.trf.xlu0 }
 0x13a   : >> { %1614 = vmatmul.mubr.msk.f32.gmra.mrb[8].mxu1 %vm370_vm2, %v331_v57 }
 0x13d   : >> { %v332_v59 = vpop.trf.xlu1  ;;  %v607_v60 = vpop.trf.xlu0 }
 0x13e   : >> { %1616 = vmatprep.mubr.msk.f32.mxu1 %vm370_vm2, %v332_v59 }
 0x141   : >> { %v333_v61 = vpop.trf.xlu1  ;;  %v608_v62 = vpop.trf.xlu0 }
 0x142   : >> { %1617 = vmatmul.mubr.msk.f32.gmra.mrb[10].mxu1 %vm370_vm2, %v333_v61 }
 0x145   : >> { %v334_v63 = vpop.trf.xlu1  ;;  %v609_v2 = vpop.trf.xlu0 }
 0x146   : >> { %1619 = vmatprep.mubr.msk.f32.mxu1 %vm370_vm2, %v334_v63 }
 0x149   : >> { %v335_v3 = vpop.trf.xlu1  ;;  %v610_v4 = vpop.trf.xlu0 }
 0x14a   : >> { %1620 = vmatmul.mubr.msk.f32.gmra.mrb[12].mxu1 %vm370_vm2, %v335_v3 }
 0x14d   : >> { %v336_v5 = vpop.trf.xlu1  ;;  %v611_v6 = vpop.trf.xlu0 }
 0x14e   : >> { %1622 = vmatprep.mubr.msk.f32.mxu1 %vm370_vm2, %v336_v5 }
 0x151   : >> { %v337_v7 = vpop.trf.xlu1  ;;  %v895_v8 = vpop.trf.xlu0 }
 0x152   : >> { %1667 = vmatprep.mubr.msk.f32.mxu0 %vm370_vm2, %v895_v8  ;;  %1623 = vmatmul.mubr.msk.f32.gmra.mrb[14].mxu1 %vm370_vm2, %v337_v7 }
 0x155   : >> { %v354_v9 = vpop.trf.xlu1  ;;  %v896_v10 = vpop.trf.xlu0 }
 0x156   : >> { %1668 = vmatmul.mubr.msk.f32.vlgmr.msra.gmra.mrb[0].mxu0 %vm370_vm2, %v896_v10  ;;  %1625 = vmatprep.mubr.msk.f32.mxu1 %vm370_vm2, %v354_v9 }
 0x159   : >> { %v355_v11 = vpop.trf.xlu1  ;;  %v897_v12 = vpop.trf.xlu0 }
 0x15a   : >> { %1626 = vmatmul.mubr.msk.f32.gmra.mrb[16].mxu1 %vm370_vm2, %v355_v11  ;;  %1670 = vmatprep.mubr.msk.f32.mxu0 %vm370_vm2, %v897_v12 }
 0x15b   : >> { %1649 = vmatprep.mubr.msk.f32.mxu1 %vm370_vm2, %v606_v58 }
 0x15d   : >> { %v898_v13 = vpop.trf.xlu0 }
 0x15e   : >> { %1650 = vmatmul.mubr.msk.f32.vlgmr.msra.gmra.mrb[10].mxu1 %vm370_vm2, %v607_v60  ;;  %1671 = vmatmul.mubr.msk.f32.gmra.mrb[2].mxu0 %vm370_vm2, %v898_v13  ;;  %v927_v25 = vpop.trf.xlu1 }
 0x15f   : >> { %1652 = vmatprep.mubr.msk.f32.mxu1 %vm370_vm2, %v608_v62 }
 0x161   : >> { %v899_v14 = vpop.trf.xlu0 }
 0x162   : >> { %1653 = vmatmul.mubr.msk.f32.gmra.mrb[12].mxu1 %vm370_vm2, %v609_v2  ;;  %1673 = vmatprep.mubr.msk.f32.mxu0 %vm370_vm2, %v899_v14  ;;  %v928_v27 = vpop.trf.xlu1 }
 0x163   : >> { %1655 = vmatprep.mubr.msk.f32.mxu1 %vm370_vm2, %v610_v4 }
 0x165   : >> { %v900_v15 = vpop.trf.xlu0 }
 0x166   : >> { %1656 = vmatmul.mubr.msk.f32.gmra.mrb[14].mxu1 %vm370_vm2, %v611_v6  ;;  %1674 = vmatmul.mubr.msk.f32.gmra.mrb[4].mxu0 %vm370_vm2, %v900_v15 }
 0x169   : >> { %v901_v16 = vpop.trf.xlu0 }
 0x16a   : >> { %1676 = vmatprep.mubr.msk.f32.mxu0 %vm370_vm2, %v901_v16 }
 0x16d   : >> { %v902_v17 = vpop.trf.xlu0 }
 0x16e   : >> { %1677 = vmatmul.mubr.msk.f32.gmra.mrb[6].mxu0 %vm370_vm2, %v902_v17 }
 0x171   : >> { %v903_v18 = vpop.trf.xlu0 }
 0x172   : >> { %1679 = vmatprep.mubr.msk.f32.mxu0 %vm370_vm2, %v903_v18 }
 0x175   : >> { %v904_v19 = vpop.trf.xlu0 }
 0x176   : >> { %1680 = vmatmul.mubr.msk.f32.gmra.mrb[8].mxu0 %vm370_vm2, %v904_v19 }
 0x179   : >> { %v905_v20 = vpop.trf.xlu0 }
 0x17a   : >> { %1682 = vmatprep.mubr.msk.f32.mxu0 %vm370_vm2, %v905_v20 }
 0x17d   : >> { %v906_v21 = vpop.trf.xlu0 }
 0x17e   : >> { %1683 = vmatmul.mubr.msk.f32.gmra.mrb[10].mxu0 %vm370_vm2, %v906_v21 }
 0x181   : >> { %v907_v22 = vpop.trf.xlu0 }
 0x182   : >> { %1685 = vmatprep.mubr.msk.f32.mxu0 %vm370_vm2, %v907_v22 }
 0x185   : >> { %v908_v23 = vpop.trf.xlu0 }
 0x186   : >> { %1686 = vmatmul.mubr.msk.f32.gmra.mrb[12].mxu0 %vm370_vm2, %v908_v23 }
 0x189   : >> { %v909_v24 = vpop.trf.xlu0 }
 0x18a   : >> { %1688 = vmatprep.mubr.msk.f32.mxu0 %vm370_vm2, %v909_v24 }
 0x18d   : >> { %v910_v26 = vpop.trf.xlu0 }
 0x18e   : >> { %1689 = vmatmul.mubr.msk.f32.gmra.mrb[14].mxu0 %vm370_vm2, %v910_v26 }
 0x18f   : >> { %1691 = vmatprep.mubr.msk.f32.mxu0 %vm370_vm2, %v927_v25 }
 0x191   : >> { %v628_v28 = vpop.trf.xlu0 }
 0x192   : >> { %1658 = vmatprep.mubr.msk.f32.mxu1 %vm370_vm2, %v628_v28  ;;  %1692 = vmatmul.mubr.msk.f32.gmra.mrb[16].mxu0 %vm370_vm2, %v928_v27 }
 0x195   : >> { %v629_v29 = vpop.trf.xlu0 }
 0x196   : >> { %1659 = vmatmul.mubr.msk.f32.gmra.mrb[16].mxu1 %vm370_vm2, %v629_v29 }
 0x1ed   : >> { %v1603_v30 = vpop.f32.mrb[0].mxu1 }
 0x1ee   : >> { %v491_v31 = vpop.f32.mrb[1].mxu1 }
 0x1f5   : >> { %v1606_v32 = vpop.f32.mrb[2].mxu1 }
 0x1f6   : >> { %v501_v33 = vpop.f32.mrb[3].mxu1 }
 0x1fd   : >> { %v1609_v34 = vpop.f32.mrb[4].mxu1 }
 0x1fe   : >> { %v511_v35 = vpop.f32.mrb[5].mxu1 }
 0x205   : >> { %v1612_v36 = vpop.f32.mrb[6].mxu1 }
 0x206   : >> { %v521_v37 = vpop.f32.mrb[7].mxu1 }
 0x20d   : >> { %v2078_v38 = vpop.f32.mrb[8].mxu1 }
 0x20e   : >> { %v2080_v39 = vpop.f32.mrb[9].mxu1 }
 0x229   : >> { %v1669_v40 = vpop.f32.mrb[0].mxu0 }
 0x22a   : >> { %v1710_v42 = vadd.f32 %v1669_v40, %v1603_v30  ;;  %v1063_v43 = vpop.f32.mrb[1].mxu0 }
 0x22b   : >> { %v1711_v44 = vadd.f32 %v1063_v43, %v491_v31 }
 0x22c   : >> { %v1178_v45 = vadd.f32 %v1710_v42, %v2086_v41 }
 0x22d   : >> { %v1177_v46 = vadd.f32 %v1711_v44, %v2086_v41 }
 0x22e   : >> { %1198 = vst [vmem:[%s2089_s7 + $0x8] sm:$0xff] %v1178_v45  ;;  %v1242_v47 = vmul.f32 %v1178_v45, %v1178_v45 }
 0x22f   : >> { %1197 = vst [vmem:[%s2089_s7] sm:$0xff] %v1177_v46  ;;  %v1215_v48 = vadd.f32 %v1178_v45, %v1177_v46  ;;  %v1241_v49 = vmul.f32 %v1177_v46, %v1177_v46 }
 0x231   : >> { %v1259_v50 = vadd.f32 %v1242_v47, %v1241_v49  ;;  %v1651_v51 = vpop.f32.mrb[10].mxu1  ;;  %v1672_v52 = vpop.f32.mrb[2].mxu0 }
 0x232   : >> { %v1712_v53 = vadd.f32 %v1672_v52, %v1606_v32  ;;  %v814_v54 = vpop.f32.mrb[11].mxu1  ;;  %v1073_v55 = vpop.f32.mrb[3].mxu0 }
 0x233   : >> { %v1713_v56 = vadd.f32 %v1073_v55, %v501_v33 }
 0x234   : >> { %v1180_v57 = vadd.f32 %v1712_v53, %v2086_v41 }
 0x235   : >> { %v1179_v58 = vadd.f32 %v1713_v56, %v2086_v41  ;;  %v2097_v59 = vpop.f32.mrb[12].mxu1 }
 0x236   : >> { %1200 = vst [vmem:[%s2089_s7 + $0x18] sm:$0xff] %v1180_v57  ;;  %v2100_v60 = vpop.f32.mrb[13].mxu1  ;;  %v1244_v63 = vmul.f32 %v1180_v57, %v1180_v57 }
 0x237   : >> { %1199 = vst [vmem:[%s2089_s7 + $0x10] sm:$0xff] %v1179_v58  ;;  %v1216_v61 = vadd.f32 %v1215_v48, %v1179_v58  ;;  %v1243_v62 = vmul.f32 %v1179_v58, %v1179_v58 }
 0x239   : >> { %v1260_v2 = vadd.f32 %v1259_v50, %v1243_v62  ;;  %v2103_v3 = vpop.f32.mrb[14].mxu1  ;;  %v1675_v4 = vpop.f32.mrb[4].mxu0  ;;  %v1217_v5 = vadd.f32 %v1216_v61, %v1180_v57 }
 0x23a   : >> { %v1714_v6 = vadd.f32 %v1675_v4, %v1609_v34  ;;  %v2105_v7 = vpop.f32.mrb[15].mxu1  ;;  %v1083_v8 = vpop.f32.mrb[5].mxu0 }
 0x23b   : >> { %v1715_v9 = vadd.f32 %v1083_v8, %v511_v35  ;;  %v1261_v10 = vadd.f32 %v1260_v2, %v1244_v63 }
 0x23c   : >> { %v1182_v11 = vadd.f32 %v1714_v6, %v2086_v41 }
 0x23d   : >> { %v1181_v12 = vadd.f32 %v1715_v9, %v2086_v41 }
 0x23e   : >> { %1202 = vst [vmem:[%s2089_s7 + $0x28] sm:$0xff] %v1182_v11  ;;  %v1246_v15 = vmul.f32 %v1182_v11, %v1182_v11 }
 0x23f   : >> { %1201 = vst [vmem:[%s2089_s7 + $0x20] sm:$0xff] %v1181_v12  ;;  %v1218_v13 = vadd.f32 %v1217_v5, %v1181_v12  ;;  %v1245_v14 = vmul.f32 %v1181_v12, %v1181_v12 }
 0x241   : >> { %v1262_v16 = vadd.f32 %v1261_v10, %v1245_v14  ;;  %v1678_v17 = vpop.f32.mrb[6].mxu0  ;;  %v1219_v18 = vadd.f32 %v1218_v13, %v1182_v11 }
 0x242   : >> { %v1716_v19 = vadd.f32 %v1678_v17, %v1612_v36  ;;  %v1093_v20 = vpop.f32.mrb[7].mxu0 }
 0x243   : >> { %v1717_v21 = vadd.f32 %v1093_v20, %v521_v37  ;;  %v1263_v22 = vadd.f32 %v1262_v16, %v1246_v15 }
 0x244   : >> { %v1184_v23 = vadd.f32 %v1716_v19, %v2086_v41 }
 0x245   : >> { %v1183_v24 = vadd.f32 %v1717_v21, %v2086_v41 }
 0x246   : >> { %1204 = vst [vmem:[%s2089_s7 + $0x38] sm:$0xff] %v1184_v23  ;;  %v1248_v27 = vmul.f32 %v1184_v23, %v1184_v23 }
 0x247   : >> { %1203 = vst [vmem:[%s2089_s7 + $0x30] sm:$0xff] %v1183_v24  ;;  %v1220_v25 = vadd.f32 %v1219_v18, %v1183_v24  ;;  %v1247_v26 = vmul.f32 %v1183_v24, %v1183_v24 }
 0x249   : >> { %v1264_v28 = vadd.f32 %v1263_v22, %v1247_v26  ;;  %v1681_v29 = vpop.f32.mrb[8].mxu0  ;;  %v1221_v30 = vadd.f32 %v1220_v25, %v1184_v23 }
 0x24a   : >> { %v1718_v31 = vadd.f32 %v1681_v29, %v2078_v38  ;;  %v1103_v32 = vpop.f32.mrb[9].mxu0 }
 0x24b   : >> { %v1719_v33 = vadd.f32 %v1103_v32, %v2080_v39  ;;  %v1265_v34 = vadd.f32 %v1264_v28, %v1248_v27 }
 0x24c   : >> { %v1186_v35 = vadd.f32 %v1718_v31, %v2086_v41 }
 0x24d   : >> { %v1185_v36 = vadd.f32 %v1719_v33, %v2086_v41 }
 0x24e   : >> { %1206 = vst [vmem:[%s2089_s7 + $0x48] sm:$0xff] %v1186_v35  ;;  %v1250_v42 = vmul.f32 %v1186_v35, %v1186_v35 }
 0x24f   : >> { %1205 = vst [vmem:[%s2089_s7 + $0x40] sm:$0xff] %v1185_v36  ;;  %v1222_v37 = vadd.f32 %v1221_v30, %v1185_v36  ;;  %v1249_v40 = vmul.f32 %v1185_v36, %v1185_v36 }
 0x251   : >> { %v1266_v43 = vadd.f32 %v1265_v34, %v1249_v40  ;;  %v1684_v44 = vpop.f32.mrb[10].mxu0  ;;  %v1223_v45 = vadd.f32 %v1222_v37, %v1186_v35 }
 0x252   : >> { %v1720_v46 = vadd.f32 %v1684_v44, %v1651_v51  ;;  %v1113_v38 = vpop.f32.mrb[11].mxu0 }
 0x253   : >> { %v1721_v47 = vadd.f32 %v1113_v38, %v814_v54  ;;  %v1267_v48 = vadd.f32 %v1266_v43, %v1250_v42 }
 0x254   : >> { %v1188_v39 = vadd.f32 %v1720_v46, %v2086_v41 }
 0x255   : >> { %v1187_v49 = vadd.f32 %v1721_v47, %v2086_v41 }
 0x256   : >> { %1208 = vst [vmem:[%s2089_s7 + $0x58] sm:$0xff] %v1188_v39  ;;  %v1252_v53 = vmul.f32 %v1188_v39, %v1188_v39 }
 0x257   : >> { %1207 = vst [vmem:[%s2089_s7 + $0x50] sm:$0xff] %v1187_v49  ;;  %v1224_v50 = vadd.f32 %v1223_v45, %v1187_v49  ;;  %v1251_v52 = vmul.f32 %v1187_v49, %v1187_v49 }
 0x259   : >> { %v1268_v55 = vadd.f32 %v1267_v48, %v1251_v52  ;;  %v1687_v56 = vpop.f32.mrb[12].mxu0  ;;  %v1225_v57 = vadd.f32 %v1224_v50, %v1188_v39 }
 0x25a   : >> { %v1722_v58 = vadd.f32 %v1687_v56, %v2097_v59  ;;  %v1123_v51 = vpop.f32.mrb[13].mxu0 }
 0x25b   : >> { %v1723_v54 = vadd.f32 %v1123_v51, %v2100_v60  ;;  %v1269_v61 = vadd.f32 %v1268_v55, %v1252_v53 }
 0x25c   : >> { %v1190_v62 = vadd.f32 %v1722_v58, %v2086_v41 }
 0x25d   : >> { %v1189_v63 = vadd.f32 %v1723_v54, %v2086_v41 }
 0x25e   : >> { %1210 = vst [vmem:[%s2089_s7 + $0x68] sm:$0xff] %v1190_v62  ;;  %v1254_v5 = vmul.f32 %v1190_v62, %v1190_v62 }
 0x25f   : >> { %1209 = vst [vmem:[%s2089_s7 + $0x60] sm:$0xff] %v1189_v63  ;;  %v1226_v2 = vadd.f32 %v1225_v57, %v1189_v63  ;;  %v1253_v4 = vmul.f32 %v1189_v63, %v1189_v63 }
 0x261   : >> { %v1270_v6 = vadd.f32 %v1269_v61, %v1253_v4  ;;  %v1690_v8 = vpop.f32.mrb[14].mxu0  ;;  %v1227_v9 = vadd.f32 %v1226_v2, %v1190_v62 }
 0x262   : >> { %v1724_v59 = vadd.f32 %v1690_v8, %v2103_v3  ;;  %v1133_v10 = vpop.f32.mrb[15].mxu0 }
 0x263   : >> { %v1725_v60 = vadd.f32 %v1133_v10, %v2105_v7  ;;  %v1271_v11 = vadd.f32 %v1270_v6, %v1254_v5 }
 0x264   : >> { %v1192_v12 = vadd.f32 %v1724_v59, %v2086_v41 }
 0x265   : >> { %v1191_v13 = vadd.f32 %v1725_v60, %v2086_v41  ;;  %v1693_v14 = vpop.f32.mrb[16].mxu0 }
 0x266   : >> { %1212 = vst [vmem:[%s2089_s7 + $0x78] sm:$0xff] %v1192_v12  ;;  %v1143_v15 = vpop.f32.mrb[17].mxu0  ;;  %v1256_v18 = vmul.f32 %v1192_v12, %v1192_v12 }
 0x267   : >> { %1211 = vst [vmem:[%s2089_s7 + $0x70] sm:$0xff] %v1191_v13  ;;  %v1228_v16 = vadd.f32 %v1227_v9, %v1191_v13  ;;  %v1255_v17 = vmul.f32 %v1191_v13, %v1191_v13 }
 0x269   : >> { %v1272_v19 = vadd.f32 %v1271_v11, %v1255_v17  ;;  %v1660_v20 = vpop.f32.mrb[16].mxu1  ;;  %v1229_v3 = vadd.f32 %v1228_v16, %v1192_v12 }
 0x26a   : >> { %v1726_v21 = vadd.f32 %v1693_v14, %v1660_v20  ;;  %v844_v22 = vpop.f32.mrb[17].mxu1 }
 0x26b   : >> { %v1727_v7 = vadd.f32 %v1143_v15, %v844_v22  ;;  %v1273_v23 = vadd.f32 %v1272_v19, %v1256_v18 }
 0x26c   : >> { %v1194_v24 = vadd.f32 %v1726_v21, %v2086_v41 }
 0x26d   : >> { %v1193_v25 = vadd.f32 %v1727_v7, %v2086_v41 }
 0x26e   : >> { %1214 = vst [vmem:[%s2089_s7 + $0x88] sm:$0xf] %v1194_v24  ;;  %v1258_v26 = vmul.f32 %v1194_v24, %v1194_v24  ;;  %v1232_v29 = vsel %vm1231_vm3, %v1194_v24, 0.0 }
 0x26f   : >> { %1213 = vst [vmem:[%s2089_s7 + $0x80] sm:$0xff] %v1193_v25  ;;  %v1230_v27 = vadd.f32 %v1229_v3, %v1193_v25  ;;  %v1257_v28 = vmul.f32 %v1193_v25, %v1193_v25 }
 0x270   : >> { %v1275_v32 = vsel %vm1231_vm3, %v1258_v26, 0.0 }
 0x271   : >> { %v1233_v30 = vadd.f32 %v1232_v29, %v1230_v27  ;;  %v1274_v31 = vadd.f32 %v1273_v23, %v1257_v28 }
 0x273   : >> { %v1234_v33 = vrot.slane %v1233_v30, 4  ;;  %v1276_v34 = vadd.f32 %v1275_v32, %v1274_v31 }
 0x275   : >> { %v1235_v35 = vadd.f32 %v1234_v33, %v1233_v30  ;;  %v1277_v36 = vrot.slane %v1276_v34, 4 }
 0x277   : >> { %v1236_v37 = vrot.slane %v1235_v35, 2  ;;  %v1278_v40 = vadd.f32 %v1277_v36, %v1276_v34 }
 0x279   : >> { %v1237_v42 = vadd.f32 %v1236_v37, %v1235_v35  ;;  %v1279_v43 = vrot.slane %v1278_v40, 2 }
 0x27b   : >> { %v1238_v44 = vrot.slane %v1237_v42, 1  ;;  %v1280_v45 = vadd.f32 %v1279_v43, %v1278_v40 }
 0x27d   : >> { %v1239_v41 = vadd.f32 %v1238_v44, %v1237_v42  ;;  %v1281_v46 = vrot.slane %v1280_v45, 1  ;;  %249 = sbr.rel (!%p247_p8) target bundleno = 25 (0x19), region = 87 }
 0x27f   : >> { %v1240_v38 = vadd.f32 %v1874_v1, %v1239_v41   ;;  %v1282_v47 = vadd.f32 %v1281_v46, %v1280_v45 }
 0x281   : >> { %v1283_v48 = vadd.f32 %v1870_v0, %v1282_v47   ;;  %v2172_v1 = vmov %v1240_v38 }
 0x283   : >> { %v2171_v0 = vmov %v1283_v48  ;;  %v1285_v39 = vsel (%p247_p8), %vm1284_vm4, %v1240_v38, %v1283_v48 }
 0x284   : > { %1286 = vst [vmem:[%s1954_s14] sm:$0x3] %v1285_v39 }
 0x285 PF: > { %s15_s19 = sadd.s32 1, %s1866_s19   ;;  %s2173_s15 = smov %s1858_s17 }
 0x286   : > { %p12_p9 = scmp.ge.s32.totalorder %s15_s19, 10   ;;  %s2174_s16 = smov %s1862_s18 }
 0x287   : > { %s2175_s17 = smov %s2178_s20  ;;  %s2176_s18 = smov %s2182_s21 }
 0x288   :  { %14 = sbr.rel (!%p12_p9) target bundleno = 3 (0x3), region = 98 }

// kernel: discriminator_cnn_forward.10
= control target key start
LH: loop header
LB: loop body
LE: loop exit
PB: predicated region body
PF: predicated region fallthrough
CT: control target
= control target key end

     0   :  { %s1130_s12 = smov 0   ;;  %s1132_s13 = smov 0   ;;  %s1536_s0 = inlined_call_operand.vmem [shape: f32[2,140,140,128], index: 0, kind: input, shape index: {}]   ;;  %s1537_s1 = inlined_call_operand.vmem [shape: f32[1,128], index: 1, kind: input, shape index: {}]   ;;  %s1538_s2 = inlined_call_operand.vmem [shape: f32[1,128], index: 2, kind: input, shape index: {}]   ;;  %s1539_s3 = inlined_call_operand.vmem [shape: f32[2,46,46,128], index: 3, kind: output, shape index: {}]  }
   0x1   :  { %s1134_s14 = smov 0   ;;  %s1136_s15 = smov 0  }
   0x2   :  { %s1138_s16 = smov 0  }
   0x3 LB: > { %s22_s17 = sadd.s32 1, %s1092_s14  ;;  %s25_s18 = sadd.s32 1, %s1096_s15  ;;  %s1100_s16 = sphi %s1138_s16, %s13_s16   ;;  %s1096_s15 = sphi %s1136_s15, %s1559_s15   ;;  %s1092_s14 = sphi %s1134_s14, %s1558_s14   ;;  %s1088_s13 = sphi %s1132_s13, %s1557_s13   ;;  %s1084_s12 = sphi %s1130_s12, %s1556_s12  }
   0x4   : > { %p23_p0 = scmp.ge.s32.totalorder %s22_s17, 2  ;;  %p923_p1 = scmp.ge.s32.totalorder %s1100_s16, 1 }
   0x5   : > { %p169_p2 = scmp.lt.s32.totalorder %s1100_s16, 5 }
   0x6   : > { %s1561_s17 = smov (%p23_p0, %s22_s17), 0  ;;  %s1563_s18 = smov (!%p23_p0, %s25_s18), %s1096_s15 }
   0x7   : > { %p170_p3 = pnand %p923_p1, %p169_p2  ;;  %p27_p4 = scmp.ge.s32.totalorder %s1563_s18, 2 }
   0x8   : > { %s208_s19 = smul.u32 (!%p170_p3), 69, %s1084_s12  ;;  %p214_p5 = scmp.lt.s32.totalorder (!%p170_p3), %s1088_s13, 1  ;;  %v1166_v0 = vld [vmem:[%s1537_s1] ss:$0 sm:$0xff] (!%p170_p3)  ;;  %v242_v2 = vlaneseq (!%p170_p3)  ;;  %v1106_v25 = vmov (!%p170_p3), 0.0  }
   0x9   : > { %s1565_s18 = smov (%p27_p4, %s1563_s18), 0  ;;  %173 = sbr.rel (%p170_p3) target bundleno = 332 (0x14c), region = 32 }
   0xa   : > { %v1171_v1 = vld [vmem:[%s1538_s2] ss:$0 sm:$0xff] (!%p170_p3)  ;;  %s229_s24 = smul.u32 (!%p170_p3), 23, %s1084_s12  ;;  %v243_v3 = vshrl.u32 (!%p170_p3), %v242_v2, 7  ;;  %v250_v4 = vand.u32 (!%p170_p3), 127, %v242_v2  ;;  %p216_p6 = scmp.lt.s32.totalorder (!%p170_p3), %s208_s19, 139 }
   0xb   : > { %s1236_s12 = smov (!%p170_p3), 0  }
   0xc   : > { %p232_p7 = scmp.lt.s32.totalorder (!%p170_p3), %s229_s24, 45  ;;  %v244_v5 = vadd.s32 (!%p170_p3), 8, %v243_v3  ;;  %v245_v6 = vadd.s32 (!%p170_p3), 16, %v243_v3  ;;  %v246_v7 = vadd.s32 (!%p170_p3), 24, %v243_v3  ;;  %v247_v8 = vadd.s32 (!%p170_p3), 32, %v243_v3 }
   0xd   : > { %v248_v9 = vadd.s32 (!%p170_p3), 40, %v243_v3  ;;  %v251_v10 = vadd.s32 (!%p170_p3), 128, %v250_v4  ;;  %v252_v11 = vmul.u32 (!%p170_p3), 3, %v243_v3 }
   0xe   : > { %v253_v12 = vmul.u32 (!%p170_p3), 3, %v244_v5  ;;  %v254_v13 = vmul.u32 (!%p170_p3), 3, %v245_v6 }
   0xf   : > { %v255_v14 = vmul.u32 (!%p170_p3), 3, %v246_v7  ;;  %v256_v15 = vmul.u32 (!%p170_p3), 3, %v247_v8  ;;  %vm1177_vm0 = vcmp.eq.s32.totalorder (!%p170_p3), %v250_v4, %v252_v11  ;;  %vm1181_vm1 = vcmp.eq.s32.totalorder (!%p170_p3), %v251_v10, %v252_v11 }
  0x10   : > { %s1567_s13 = smov (!%p214_p5, %s1088_s13), 1  ;;  %s1569_s19 = smov (!%p216_p6, %s208_s19), 139  ;;  %v257_v18 = vmul.u32 3, %v248_v9  ;;  %vm1185_vm2 = vcmp.eq.s32.totalorder %v250_v4, %v253_v12  ;;  %vm1189_vm3 = vcmp.eq.s32.totalorder %v251_v10, %v253_v12  ;;  %vm1193_vm4 = vcmp.eq.s32.totalorder %v250_v4, %v254_v13 }
  0x11   : > { %s1003_s25 = smul.u32 2520, %s1567_s13  ;;  %s1571_s24 = smov (!%p232_p7, %s229_s24), 45  ;;  %vm263_vm5 = vcmp.eq.s32.totalorder %v251_v10, %v254_v13  ;;  %vm1198_vm6 = vcmp.eq.s32.totalorder %v250_v4, %v255_v14  ;;  %vm265_vm7 = vcmp.eq.s32.totalorder %v251_v10, %v255_v14  ;;  %vm1202_vm8 = vcmp.eq.s32.totalorder %v250_v4, %v256_v15 }
  0x12   : > { %s1002_s26 = smul.u32 18, %s1569_s19  ;;  %vm267_vm9 = vcmp.eq.s32.totalorder %v251_v10, %v256_v15  ;;  %vm1206_vm10 = vcmp.eq.s32.totalorder %v250_v4, %v257_v18  ;;  %vm269_vm11 = vcmp.eq.s32.totalorder %v251_v10, %v257_v18  ;;  %v1212_v26 = vsel %vm1181_vm1, 1.0, %v1106_v25 }
  0x13   : > { %s1004_s27 = smul.u32 6, %s1571_s24  ;;  %v1221_v27 = vsel %vm1189_vm3, 1.0, %v1106_v25  ;;  %v1223_v28 = vsel %vm263_vm5, 1.0, %v1106_v25  ;;  %v1225_v29 = vsel %vm265_vm7, 1.0, %v1106_v25  ;;  %v1227_v30 = vsel %vm267_vm9, 1.0, %v1106_v25 }
  0x14   : > { %s220_s28 = sadd.s32 %s1003_s25, %s1002_s26  ;;  %s1005_s29 = smul.u32 276, %s1567_s13  ;;  %v1229_v31 = vsel %vm269_vm11, 1.0, %v1106_v25 }
  0x15   : > { %s924_s30 = sshll.u32 %s220_s28, 3 }
  0x16   : > { %s1217_s6 = scalar_lea.vmem %s1536_s0, %s924_s30  ;;  %s236_s7 = sadd.s32 %s1005_s29, %s1004_s27 }
  0x17   : > { %s925_s8 = sshll.u32 %s236_s7, 3 }
  0x18   : > { %s1234_s11 = scalar_lea.vmem %s1539_s3, %s925_s8 }
  0x19 LB: >> { %v1107_v32 = vmov 0.0|0.0   ;;  %vm679_vm12 = vcmask 80896   ;;  %s938_s13 = smul.u32 432, %s1104_s12  ;;  %vm535_vm13 = vcmask 1046528   ;;  %vm607_vm14 = vcmask 1045504   ;;  %s1104_s12 = sphi %s1236_s12, %s299_s12  }
  0x1a   : >> { %956 = vmatprep.subr.bf16.mxu0 %v1107_v32  ;;  %984 = vmatprep.subr.bf16.mxu1 %v1107_v32  ;;  %vm511_vm15 = vcmask 1043456   ;;  %vm698_vm1 = vcmask 1041408   ;;  %vm1108_vm3 = vmmov 1   ;;  %s803_s20 = smul.u32 48, %s1104_s12  ;;  %s299_s12 = sadd.s32 1, %s1104_s12  }
  0x1b   : >> { %942 = vmatprep.mubr.msk.f32.mxu0 %vm679_vm12, %v1212_v26  ;;  %948 = vmatprep.mubr.msk.f32.mxu1 %vm679_vm12, %v1225_v29  ;;  %s1249_s19 = scalar_lea.vmem %s1217_s6, %s938_s13  ;;  %vm982_vm5 = vmpackc.low %vm698_vm1, %vm1108_vm3  ;;  %p296_p8 = scmp.ge.s32.totalorder %s299_s12, 23  }
  0x1c   : >> { %v303_v33 = vld [vmem:[%s1249_s19] sm:$0xff]  ;;  %v304_v34 = vld [vmem:[%s1249_s19 + $0x8] sm:$0xff]  ;;  %v305_v35 = vld [vmem:[%s1249_s19 + $0x10] sm:$0xff]  ;;  %s804_s21 = scalar_lea.vmem %s1234_s11, %s803_s20 }
  0x1d   : >> { %v321_v36 = vld [vmem:[%s1249_s19 + $0x90] sm:$0xff]  ;;  %v322_v37 = vld [vmem:[%s1249_s19 + $0x98] sm:$0xff]  ;;  %v323_v38 = vld [vmem:[%s1249_s19 + $0xa0] sm:$0xff]  ;;  %v363_v39 = vmul.f32 %v1166_v0, %v303_v33  ;;  %v364_v40 = vmul.f32 %v1166_v0, %v304_v34  ;;  %v365_v41 = vmul.f32 %v1166_v0, %v305_v35 }
  0x1e   : >> { %v339_v42 = vld [vmem:[%s1249_s19 + $0x120] sm:$0xff]  ;;  %v340_v43 = vld [vmem:[%s1249_s19 + $0x128] sm:$0xff]  ;;  %v341_v44 = vld [vmem:[%s1249_s19 + $0x130] sm:$0xff]  ;;  %v381_v45 = vmul.f32 %v1166_v0, %v321_v36  ;;  %v382_v46 = vmul.f32 %v1166_v0, %v322_v37  ;;  %v383_v47 = vmul.f32 %v1166_v0, %v323_v38 }
  0x1f   : >> { %v399_v48 = vmul.f32 %v1166_v0, %v339_v42  ;;  %v400_v49 = vmul.f32 %v1166_v0, %v340_v43  ;;  %v401_v50 = vmul.f32 %v1166_v0, %v341_v44  ;;  %v423_v51 = vadd.f32 %v1171_v1, %v363_v39  ;;  %v306_v52 = vld [vmem:[%s1249_s19 + $0x18] sm:$0xff]  ;;  %v307_v53 = vld [vmem:[%s1249_s19 + $0x20] sm:$0xff]  ;;  %v324_v58 = vld [vmem:[%s1249_s19 + $0xa8] sm:$0xff] }
  0x20   : >> { %v424_v54 = vadd.f32 %v1171_v1, %v364_v40  ;;  %v425_v55 = vadd.f32 %v1171_v1, %v365_v41  ;;  %v441_v56 = vadd.f32 %v1171_v1, %v381_v45  ;;  %v442_v57 = vadd.f32 %v1171_v1, %v382_v46  ;;  %v325_v59 = vld [vmem:[%s1249_s19 + $0xb0] sm:$0xff]  ;;  %v342_v60 = vld [vmem:[%s1249_s19 + $0x138] sm:$0xff]  ;;  %v343_v3 = vld [vmem:[%s1249_s19 + $0x140] sm:$0xff] }
  0x21   : >> { %v443_v61 = vadd.f32 %v1171_v1, %v383_v47  ;;  %v459_v62 = vadd.f32 %v1171_v1, %v399_v48  ;;  %v460_v63 = vadd.f32 %v1171_v1, %v400_v49  ;;  %v461_v2 = vadd.f32 %v1171_v1, %v401_v50  ;;  %v308_v37 = vld [vmem:[%s1249_s19 + $0x28] sm:$0xff]  ;;  %v309_v42 = vld [vmem:[%s1249_s19 + $0x30] sm:$0xff]  ;;  %v326_v47 = vld [vmem:[%s1249_s19 + $0xb8] sm:$0xff] }
  0x22   : >> { %v477_v4 = vmax.f32 %v423_v51, %v441_v56  ;;  %v479_v5 = vmax.f32 %v424_v54, %v442_v57  ;;  %v366_v6 = vmul.f32 %v1166_v0, %v306_v52  ;;  %v367_v7 = vmul.f32 %v1166_v0, %v307_v53  ;;  %v327_v48 = vld [vmem:[%s1249_s19 + $0xc0] sm:$0xff]  ;;  %v344_v49 = vld [vmem:[%s1249_s19 + $0x148] sm:$0xff]  ;;  %v345_v57 = vld [vmem:[%s1249_s19 + $0x150] sm:$0xff] }
  0x23   : >> { %v481_v8 = vmax.f32 %v425_v55, %v443_v61  ;;  %v384_v9 = vmul.f32 %v1166_v0, %v324_v58  ;;  %v385_v10 = vmul.f32 %v1166_v0, %v325_v59  ;;  %v402_v11 = vmul.f32 %v1166_v0, %v342_v60 }
  0x24   : >> { %v478_v12 = vmax.f32 %v477_v4, %v459_v62  ;;  %v480_v13 = vmax.f32 %v479_v5, %v460_v63  ;;  %v403_v14 = vmul.f32 %v1166_v0, %v343_v3  ;;  %v426_v15 = vadd.f32 %v1171_v1, %v366_v6 }
  0x25   : >> { %v1291_v17 = vmax.f32 %v481_v8, %v461_v2  ;;  %v427_v18 = vadd.f32 %v1171_v1, %v367_v7  ;;  %v444_v20 = vadd.f32 %v1171_v1, %v384_v9  ;;  %v445_v25 = vadd.f32 %v1171_v1, %v385_v10 }
  0x26   : >> { %v536_v33 = vrot.slane %v478_v12, 1  ;;  %v537_v34 = vrot.slane %v480_v13, 1  ;;  %v608_v35 = vrot.slane %v478_v12, 2  ;;  %v609_v36 = vrot.slane %v480_v13, 2 }
  0x27   : >> { %v539_v38 = vrot.slane %v1291_v17, 1  ;;  %v611_v39 = vrot.slane %v1291_v17, 2  ;;  %v462_v40 = vadd.f32 %v1171_v1, %v402_v11  ;;  %v463_v41 = vadd.f32 %v1171_v1, %v403_v14 }
  0x28   : >> { %v538_v43 = vsel %vm535_vm13, %v536_v33, %v537_v34  ;;  %v610_v44 = vsel %vm607_vm14, %v608_v35, %v609_v36  ;;  %v483_v45 = vmax.f32 %v426_v15, %v444_v20  ;;  %v485_v46 = vmax.f32 %v427_v18, %v445_v25  ;;  %v310_v20 = vld [vmem:[%s1249_s19 + $0x38] sm:$0xff]  ;;  %v311_v25 = vld [vmem:[%s1249_s19 + $0x40] sm:$0xff]  ;;  %v328_v33 = vld [vmem:[%s1249_s19 + $0xc8] sm:$0xff] }
  0x29   : >> { %v540_v50 = vsel %vm535_vm13, %v537_v34, %v539_v38  ;;  %v589_v51 = vmax.f32 %v478_v12, %v538_v43  ;;  %v612_v52 = vsel %vm607_vm14, %v609_v36, %v611_v39  ;;  %v368_v53 = vmul.f32 %v1166_v0, %v308_v37  ;;  %v329_v37 = vld [vmem:[%s1249_s19 + $0xd0] sm:$0xff] }
  0x2a   : >> { %v590_v54 = vmax.f32 %v480_v13, %v540_v50  ;;  %v484_v55 = vmax.f32 %v483_v45, %v462_v40  ;;  %v1310_v56 = vmax.f32 %v485_v46, %v463_v41  ;;  %v369_v58 = vmul.f32 %v1166_v0, %v309_v42  ;;  %v347_v41 = vld [vmem:[%s1249_s19 + $0x160] sm:$0xff] }
  0x2b   : >> { %v661_v59 = vmax.f32 %v589_v51, %v610_v44  ;;  %v386_v60 = vmul.f32 %v1166_v0, %v326_v47  ;;  %v387_v61 = vmul.f32 %v1166_v0, %v327_v48  ;;  %v404_v62 = vmul.f32 %v1166_v0, %v344_v49 }
  0x2c   : >> { %v662_v63 = vmax.f32 %v590_v54, %v612_v52  ;;  %v541_v2 = vrot.slane %v484_v55, 1  ;;  %v543_v3 = vrot.slane %v1310_v56, 1  ;;  %v613_v4 = vrot.slane %v484_v55, 2 }
  0x2d   : >> { %v615_v5 = vrot.slane %v1310_v56, 2  ;;  %v405_v6 = vmul.f32 %v1166_v0, %v345_v57  ;;  %v428_v7 = vadd.f32 %v1171_v1, %v368_v53  ;;  %v429_v8 = vadd.f32 %v1171_v1, %v369_v58 }
  0x2e   : >> { %v957_v9 = vpack.c.bf16 %v662_v63, %v661_v59  ;;  %v542_v10 = vsel %vm535_vm13, %v539_v38, %v541_v2  ;;  %v544_v11 = vsel %vm535_vm13, %v541_v2, %v543_v3  ;;  %v614_v12 = vsel %vm607_vm14, %v611_v39, %v613_v4  ;;  %v346_v38 = vld [vmem:[%s1249_s19 + $0x158] sm:$0xff]  ;;  %v312_v59 = vld [vmem:[%s1249_s19 + $0x48] sm:$0xff]  ;;  %v313_v2 = vld [vmem:[%s1249_s19 + $0x50] sm:$0xff] }
  0x2f   : >> { %v591_v13 = vmax.f32 %v1291_v17, %v542_v10  ;;  %v592_v14 = vmax.f32 %v484_v55, %v544_v11  ;;  %v616_v15 = vsel %vm607_vm14, %v613_v4, %v615_v5  ;;  %v446_v18 = vadd.f32 %v1171_v1, %v386_v60  ;;  %v331_v10 = vld [vmem:[%s1249_s19 + $0xe0] sm:$0xff]  ;;  %v348_v11 = vld [vmem:[%s1249_s19 + $0x168] sm:$0xff] }
  0x30   : >> { %958 = vmatpush1.bf16.msra.mxu0 %v957_v9  ;;  %993 = vmatpush1.bf16.msra.mxu1 %v957_v9  ;;  %v447_v34 = vadd.f32 %v1171_v1, %v387_v61  ;;  %v464_v35 = vadd.f32 %v1171_v1, %v404_v62  ;;  %v465_v36 = vadd.f32 %v1171_v1, %v405_v6  ;;  %v330_v9 = vld [vmem:[%s1249_s19 + $0xd8] sm:$0xff] }
  0x31   : >> { %959 = vmatprep.subr.bf16.mxu0 %v1107_v32  ;;  %985 = vmatprep.subr.bf16.mxu1 %v1107_v32  ;;  %v663_v17 = vmax.f32 %v591_v13, %v614_v12  ;;  %v664_v39 = vmax.f32 %v592_v14, %v616_v15  ;;  %v487_v40 = vmax.f32 %v428_v7, %v446_v18 }
  0x32   : >> { %v489_v42 = vmax.f32 %v429_v8, %v447_v34  ;;  %v370_v43 = vmul.f32 %v1166_v0, %v310_v20  ;;  %v371_v44 = vmul.f32 %v1166_v0, %v311_v25  ;;  %v388_v45 = vmul.f32 %v1166_v0, %v328_v33 }
  0x33   : >> { %v960_v46 = vpack.c.bf16 %v664_v39, %v663_v17  ;;  %v488_v47 = vmax.f32 %v487_v40, %v464_v35  ;;  %v389_v48 = vmul.f32 %v1166_v0, %v329_v37  ;;  %v406_v49 = vmul.f32 %v1166_v0, %v346_v38 }
  0x34   : >> { %v1344_v50 = vmax.f32 %v489_v42, %v465_v36  ;;  %v407_v51 = vmul.f32 %v1166_v0, %v347_v41  ;;  %v430_v52 = vadd.f32 %v1171_v1, %v370_v43  ;;  %v431_v53 = vadd.f32 %v1171_v1, %v371_v44 }
  0x35   : >> { %961 = vmatpush1.bf16.msra.mxu0 %v960_v46  ;;  %994 = vmatpush1.bf16.msra.mxu1 %v960_v46  ;;  %v545_v54 = vrot.slane %v488_v47, 1  ;;  %v617_v55 = vrot.slane %v488_v47, 2  ;;  %v448_v57 = vadd.f32 %v1171_v1, %v388_v45  ;;  %v449_v58 = vadd.f32 %v1171_v1, %v389_v48 }
  0x36   : >> { %962 = vmatprep.subr.bf16.mxu0 %v1107_v32  ;;  %986 = vmatprep.subr.bf16.mxu1 %v1107_v32  ;;  %v547_v60 = vrot.slane %v1344_v50, 1  ;;  %v619_v61 = vrot.slane %v1344_v50, 2  ;;  %v466_v62 = vadd.f32 %v1171_v1, %v406_v49  ;;  %v467_v63 = vadd.f32 %v1171_v1, %v407_v51 }
  0x37   : >> { %v546_v4 = vsel %vm535_vm13, %v543_v3, %v545_v54  ;;  %v618_v6 = vsel %vm607_vm14, %v615_v5, %v617_v55  ;;  %v491_v7 = vmax.f32 %v430_v52, %v448_v57  ;;  %v493_v8 = vmax.f32 %v431_v53, %v449_v58  ;;  %v349_v3 = vld [vmem:[%s1249_s19 + $0x170] sm:$0xff]  ;;  %v314_v52 = vld [vmem:[%s1249_s19 + $0x58] sm:$0xff]  ;;  %v315_v53 = vld [vmem:[%s1249_s19 + $0x60] sm:$0xff] }
  0x38   : >> { %v548_v12 = vsel %vm535_vm13, %v545_v54, %v547_v60  ;;  %v593_v13 = vmax.f32 %v1310_v56, %v546_v4  ;;  %v620_v14 = vsel %vm607_vm14, %v617_v55, %v619_v61  ;;  %v372_v15 = vmul.f32 %v1166_v0, %v312_v59  ;;  %v332_v54 = vld [vmem:[%s1249_s19 + $0xe8] sm:$0xff]  ;;  %v333_v59 = vld [vmem:[%s1249_s19 + $0xf0] sm:$0xff] }
  0x39   : >> { %v594_v18 = vmax.f32 %v488_v47, %v548_v12  ;;  %v492_v20 = vmax.f32 %v491_v7, %v466_v62  ;;  %v1368_v25 = vmax.f32 %v493_v8, %v467_v63  ;;  %v373_v5 = vmul.f32 %v1166_v0, %v313_v2  ;;  %v351_v63 = vld [vmem:[%s1249_s19 + $0x180] sm:$0xff] }
  0x3a   : >> { %v665_v33 = vmax.f32 %v593_v13, %v618_v6  ;;  %v390_v34 = vmul.f32 %v1166_v0, %v330_v9  ;;  %v391_v35 = vmul.f32 %v1166_v0, %v331_v10  ;;  %v408_v36 = vmul.f32 %v1166_v0, %v348_v11 }
  0x3b   : >> { %v666_v37 = vmax.f32 %v594_v18, %v620_v14  ;;  %v549_v56 = vrot.slane %v492_v20, 1  ;;  %v551_v38 = vrot.slane %v1368_v25, 1  ;;  %v621_v17 = vrot.slane %v492_v20, 2 }
  0x3c   : >> { %v623_v39 = vrot.slane %v1368_v25, 2  ;;  %v409_v40 = vmul.f32 %v1166_v0, %v349_v3  ;;  %v432_v41 = vadd.f32 %v1171_v1, %v372_v15  ;;  %v433_v42 = vadd.f32 %v1171_v1, %v373_v5 }
  0x3d   : >> { %v963_v43 = vpack.c.bf16 %v666_v37, %v665_v33  ;;  %v550_v44 = vsel %vm535_vm13, %v547_v60, %v549_v56  ;;  %v552_v45 = vsel %vm535_vm13, %v549_v56, %v551_v38  ;;  %v622_v46 = vsel %vm607_vm14, %v619_v61, %v621_v17  ;;  %v350_v60 = vld [vmem:[%s1249_s19 + $0x178] sm:$0xff]  ;;  %v316_v33 = vld [vmem:[%s1249_s19 + $0x68] sm:$0xff]  ;;  %v317_v56 = vld [vmem:[%s1249_s19 + $0x70] sm:$0xff] }
  0x3e   : >> { %v595_v47 = vmax.f32 %v1344_v50, %v550_v44  ;;  %v596_v48 = vmax.f32 %v492_v20, %v552_v45  ;;  %v624_v49 = vsel %vm607_vm14, %v621_v17, %v623_v39  ;;  %v450_v51 = vadd.f32 %v1171_v1, %v390_v34  ;;  %v335_v44 = vld [vmem:[%s1249_s19 + $0x100] sm:$0xff]  ;;  %v352_v45 = vld [vmem:[%s1249_s19 + $0x188] sm:$0xff] }
  0x3f   : >> { %964 = vmatpush1.bf16.msra.mxu0 %v963_v43  ;;  %995 = vmatpush1.bf16.msra.mxu1 %v963_v43  ;;  %v451_v55 = vadd.f32 %v1171_v1, %v391_v35  ;;  %v468_v57 = vadd.f32 %v1171_v1, %v408_v36  ;;  %v469_v58 = vadd.f32 %v1171_v1, %v409_v40  ;;  %v334_v43 = vld [vmem:[%s1249_s19 + $0xf8] sm:$0xff] }
  0x40   : >> { %965 = vmatprep.subr.bf16.mxu0 %v1107_v32  ;;  %987 = vmatprep.subr.bf16.mxu1 %v1107_v32  ;;  %v667_v50 = vmax.f32 %v595_v47, %v622_v46  ;;  %v668_v61 = vmax.f32 %v596_v48, %v624_v49  ;;  %v495_v62 = vmax.f32 %v432_v41, %v450_v51 }
  0x41   : >> { %v497_v2 = vmax.f32 %v433_v42, %v451_v55  ;;  %v374_v4 = vmul.f32 %v1166_v0, %v314_v52  ;;  %v375_v6 = vmul.f32 %v1166_v0, %v315_v53  ;;  %v392_v7 = vmul.f32 %v1166_v0, %v332_v54 }
  0x42   : >> { %v966_v8 = vpack.c.bf16 %v668_v61, %v667_v50  ;;  %v496_v9 = vmax.f32 %v495_v62, %v468_v57  ;;  %v393_v10 = vmul.f32 %v1166_v0, %v333_v59  ;;  %v410_v11 = vmul.f32 %v1166_v0, %v350_v60 }
  0x43   : >> { %v1402_v12 = vmax.f32 %v497_v2, %v469_v58  ;;  %v411_v13 = vmul.f32 %v1166_v0, %v351_v63  ;;  %v434_v14 = vadd.f32 %v1171_v1, %v374_v4  ;;  %v435_v15 = vadd.f32 %v1171_v1, %v375_v6 }
  0x44   : >> { %967 = vmatpush1.bf16.msra.mxu0 %v966_v8  ;;  %996 = vmatpush1.bf16.msra.mxu1 %v966_v8  ;;  %v553_v18 = vrot.slane %v496_v9, 1  ;;  %v625_v20 = vrot.slane %v496_v9, 2  ;;  %v452_v3 = vadd.f32 %v1171_v1, %v392_v7  ;;  %v453_v5 = vadd.f32 %v1171_v1, %v393_v10 }
  0x45   : >> { %968 = vmatprep.subr.bf16.mxu0 %v1107_v32  ;;  %988 = vmatprep.subr.bf16.mxu1 %v1107_v32  ;;  %v555_v34 = vrot.slane %v1402_v12, 1  ;;  %v627_v35 = vrot.slane %v1402_v12, 2  ;;  %v470_v36 = vadd.f32 %v1171_v1, %v410_v11  ;;  %v471_v37 = vadd.f32 %v1171_v1, %v411_v13 }
  0x46   : >> { %v554_v17 = vsel %vm535_vm13, %v551_v38, %v553_v18  ;;  %v626_v40 = vsel %vm607_vm14, %v623_v39, %v625_v20  ;;  %v499_v41 = vmax.f32 %v434_v14, %v452_v3  ;;  %v501_v42 = vmax.f32 %v435_v15, %v453_v5  ;;  %v353_v38 = vld [vmem:[%s1249_s19 + $0x190] sm:$0xff]  ;;  %v318_v14 = vld [vmem:[%s1249_s19 + $0x78] sm:$0xff]  ;;  %v319_v15 = vld [vmem:[%s1249_s19 + $0x80] sm:$0xff] }
  0x47   : >> { %v556_v46 = vsel %vm535_vm13, %v553_v18, %v555_v34  ;;  %v597_v47 = vmax.f32 %v1368_v25, %v554_v17  ;;  %v628_v48 = vsel %vm607_vm14, %v625_v20, %v627_v35  ;;  %v376_v49 = vmul.f32 %v1166_v0, %v316_v33  ;;  %v336_v18 = vld [vmem:[%s1249_s19 + $0x108] sm:$0xff]  ;;  %v337_v33 = vld [vmem:[%s1249_s19 + $0x110] sm:$0xff] }
  0x48   : >> { %v598_v51 = vmax.f32 %v496_v9, %v556_v46  ;;  %v500_v52 = vmax.f32 %v499_v41, %v470_v36  ;;  %v1426_v53 = vmax.f32 %v501_v42, %v471_v37  ;;  %v377_v39 = vmul.f32 %v1166_v0, %v317_v56  ;;  %v355_v37 = vld [vmem:[%s1249_s19 + $0x1a0] sm:$0xff] }
  0x49   : >> { %v669_v54 = vmax.f32 %v597_v47, %v626_v40  ;;  %v394_v55 = vmul.f32 %v1166_v0, %v334_v43  ;;  %v395_v57 = vmul.f32 %v1166_v0, %v335_v44  ;;  %v412_v58 = vmul.f32 %v1166_v0, %v352_v45 }
  0x4a   : >> { %v670_v59 = vmax.f32 %v598_v51, %v628_v48  ;;  %v557_v25 = vrot.slane %v500_v52, 1  ;;  %v559_v60 = vrot.slane %v1426_v53, 1  ;;  %v629_v50 = vrot.slane %v500_v52, 2 }
  0x4b   : >> { %v631_v61 = vrot.slane %v1426_v53, 2  ;;  %v413_v62 = vmul.f32 %v1166_v0, %v353_v38  ;;  %v436_v63 = vadd.f32 %v1171_v1, %v376_v49  ;;  %v437_v2 = vadd.f32 %v1171_v1, %v377_v39 }
  0x4c   : >> { %v969_v4 = vpack.c.bf16 %v670_v59, %v669_v54  ;;  %v558_v6 = vsel %vm535_vm13, %v555_v34, %v557_v25  ;;  %v560_v7 = vsel %vm535_vm13, %v557_v25, %v559_v60  ;;  %v630_v8 = vsel %vm607_vm14, %v627_v35, %v629_v50  ;;  %v354_v34 = vld [vmem:[%s1249_s19 + $0x198] sm:$0xff]  ;;  %v320_v54 = vld [vmem:[%s1249_s19 + $0x88] sm:$0xf] }
  0x4d   : >> { %v599_v9 = vmax.f32 %v1402_v12, %v558_v6  ;;  %v600_v10 = vmax.f32 %v500_v52, %v560_v7  ;;  %v632_v11 = vsel %vm607_vm14, %v629_v50, %v631_v61  ;;  %v454_v13 = vadd.f32 %v1171_v1, %v394_v55  ;;  %v338_v25 = vld [vmem:[%s1249_s19 + $0x118] sm:$0xf] }
  0x4e   : >> { %970 = vmatpush1.bf16.msra.mxu0 %v969_v4  ;;  %997 = vmatpush1.bf16.msra.mxu1 %v969_v4  ;;  %v455_v20 = vadd.f32 %v1171_v1, %v395_v57  ;;  %v472_v3 = vadd.f32 %v1171_v1, %v412_v58  ;;  %v473_v5 = vadd.f32 %v1171_v1, %v413_v62  ;;  %v356_v4 = vld [vmem:[%s1249_s19 + $0x1a8] sm:$0xf] }
  0x4f   : >> { %971 = vmatprep.subr.bf16.mxu0 %v1107_v32  ;;  %989 = vmatprep.subr.bf16.mxu1 %v1107_v32  ;;  %v671_v12 = vmax.f32 %v599_v9, %v630_v8  ;;  %v672_v35 = vmax.f32 %v600_v10, %v632_v11  ;;  %v503_v36 = vmax.f32 %v436_v63, %v454_v13 }
  0x50   : >> { %v505_v56 = vmax.f32 %v437_v2, %v455_v20  ;;  %v378_v17 = vmul.f32 %v1166_v0, %v318_v14  ;;  %v379_v40 = vmul.f32 %v1166_v0, %v319_v15  ;;  %v396_v41 = vmul.f32 %v1166_v0, %v336_v18 }
  0x51   : >> { %v972_v42 = vpack.c.bf16 %v672_v35, %v671_v12  ;;  %v504_v43 = vmax.f32 %v503_v36, %v472_v3  ;;  %v397_v44 = vmul.f32 %v1166_v0, %v337_v33  ;;  %v414_v45 = vmul.f32 %v1166_v0, %v354_v34 }
  0x52   : >> { %v506_v46 = vmax.f32 %v505_v56, %v473_v5  ;;  %v415_v47 = vmul.f32 %v1166_v0, %v355_v37  ;;  %v438_v48 = vadd.f32 %v1171_v1, %v378_v17  ;;  %v439_v49 = vadd.f32 %v1171_v1, %v379_v40 }
  0x53   : >> { %973 = vmatpush1.bf16.msra.mxu0 %v972_v42  ;;  %998 = vmatpush1.bf16.msra.mxu1 %v972_v42  ;;  %v561_v51 = vrot.slane %v504_v43, 1  ;;  %v633_v52 = vrot.slane %v504_v43, 2  ;;  %v456_v38 = vadd.f32 %v1171_v1, %v396_v41  ;;  %v457_v39 = vadd.f32 %v1171_v1, %v397_v44 }
  0x54   : >> { %974 = vmatprep.subr.bf16.mxu0 %v1107_v32  ;;  %990 = vmatprep.subr.bf16.mxu1 %v1107_v32  ;;  %v563_v55 = vrot.slane %v506_v46, 1  ;;  %v635_v57 = vrot.slane %v506_v46, 2  ;;  %v474_v58 = vadd.f32 %v1171_v1, %v414_v45  ;;  %v475_v59 = vadd.f32 %v1171_v1, %v415_v47 }
  0x55   : >> { %v562_v50 = vsel %vm535_vm13, %v559_v60, %v561_v51  ;;  %v634_v62 = vsel %vm607_vm14, %v631_v61, %v633_v52  ;;  %v507_v63 = vmax.f32 %v438_v48, %v456_v38  ;;  %v509_v2 = vmax.f32 %v439_v49, %v457_v39 }
  0x56   : >> { %v564_v6 = vsel %vm535_vm13, %v561_v51, %v563_v55  ;;  %v601_v7 = vmax.f32 %v1426_v53, %v562_v50  ;;  %v636_v8 = vsel %vm607_vm14, %v633_v52, %v635_v57  ;;  %v380_v9 = vmul.f32 %v1166_v0, %v320_v54 }
  0x57   : >> { %v602_v10 = vmax.f32 %v504_v43, %v564_v6  ;;  %v508_v11 = vmax.f32 %v507_v63, %v474_v58  ;;  %v510_v13 = vmax.f32 %v509_v2, %v475_v59  ;;  %v398_v14 = vmul.f32 %v1166_v0, %v338_v25 }
  0x58   : >> { %v673_v15 = vmax.f32 %v601_v7, %v634_v62  ;;  %v416_v60 = vmul.f32 %v1166_v0, %v356_v4  ;;  %v440_v61 = vadd.f32 %v1171_v1, %v380_v9  ;;  %v1109_v59 = vmov 1.0  }
  0x59   : >> { %v674_v18 = vmax.f32 %v602_v10, %v636_v8  ;;  %v565_v20 = vrot.slane %v508_v11, 1  ;;  %v567_v3 = vrot.slane %v510_v13, 1  ;;  %v637_v5 = vrot.slane %v508_v11, 2 }
  0x5a   : >> { %v639_v33 = vrot.slane %v510_v13, 2  ;;  %v458_v53 = vadd.f32 %v1171_v1, %v398_v14  ;;  %v476_v34 = vadd.f32 %v1171_v1, %v416_v60  ;;  %v512_v12 = vsel %vm511_vm15, %v440_v61, -inf }
  0x5b   : >> { %v975_v35 = vpack.c.bf16 %v674_v18, %v673_v15  ;;  %v566_v36 = vsel %vm535_vm13, %v563_v55, %v565_v20  ;;  %v568_v37 = vsel %vm535_vm13, %v565_v20, %v567_v3  ;;  %v638_v56 = vsel %vm607_vm14, %v635_v57, %v637_v5 }
  0x5c   : >> { %v603_v17 = vmax.f32 %v506_v46, %v566_v36  ;;  %v604_v40 = vmax.f32 %v508_v11, %v568_v37  ;;  %v640_v41 = vsel %vm607_vm14, %v637_v5, %v639_v33  ;;  %v513_v42 = vsel %vm511_vm15, %v458_v53, -inf }
  0x5d   : >> { %976 = vmatpush1.bf16.msra.mxu0 %v975_v35  ;;  %999 = vmatpush1.bf16.msra.mxu1 %v975_v35  ;;  %v514_v43 = vmax.f32 %v512_v12, %v513_v42  ;;  %v515_v44 = vsel %vm511_vm15, %v476_v34, -inf }
  0x5e   : >> { %977 = vmatprep.subr.bf16.mxu0 %v1107_v32  ;;  %991 = vmatprep.subr.bf16.mxu1 %v1107_v32  ;;  %v675_v45 = vmax.f32 %v603_v17, %v638_v56  ;;  %v676_v47 = vmax.f32 %v604_v40, %v640_v41 }
  0x5f   : >> { %v516_v48 = vmax.f32 %v514_v43, %v515_v44 }
  0x60   : >> { %v978_v49 = vpack.c.bf16 %v676_v47, %v675_v45 }
  0x61   : >> { %v569_v51 = vrot.slane %v516_v48, 1  ;;  %v641_v46 = vrot.slane %v516_v48, 2 }
  0x62   : >> { %979 = vmatpush1.bf16.msra.mxu0 %v978_v49  ;;  %1000 = vmatpush1.bf16.msra.mxu1 %v978_v49 }
  0x63   : >> { %980 = vmatprep.subr.bf16.mxu0 %v1107_v32  ;;  %992 = vmatprep.subr.bf16.mxu1 %v1107_v32  ;;  %v570_v52 = vsel %vm535_vm13, %v567_v3, %v569_v51  ;;  %v606_v38 = vmax.f32 %v516_v48, %v569_v51  ;;  %v642_v39 = vsel %vm607_vm14, %v639_v33, %v641_v46 }
  0x64   : >> { %v605_v54 = vmax.f32 %v510_v13, %v570_v52 }
  0x65   : >> { %v678_v55 = vmax.f32 %v606_v38, %v641_v46 }
  0x66   : >> { %v677_v57 = vmax.f32 %v605_v54, %v642_v39 }
  0x68   : >> { %v981_v58 = vpack.c.bf16 %v678_v55, %v677_v57 }
  0x6a   : >> { %983 = vmatpush1.bf16.msk.msra.mxu0 %vm982_vm5, %v981_v58  ;;  %1001 = vmatpush1.bf16.msk.msra.mxu1 %vm982_vm5, %v981_v58 }
  0x6d   : >> { %943 = vmatmul.mubr.msk.f32.vlgmr.msra.gmra.mrb[0].mxu0 %vm1177_vm0, %v1109_v59  ;;  %949 = vmatmul.mubr.msk.f32.vlgmr.msra.gmra.mrb[0].mxu1 %vm1198_vm6, %v1109_v59 }
  0x6e   : >> { %944 = vmatprep.mubr.msk.f32.mxu0 %vm679_vm12, %v1221_v27  ;;  %950 = vmatprep.mubr.msk.f32.mxu1 %vm679_vm12, %v1227_v30 }
  0x71   : >> { %945 = vmatmul.mubr.msk.f32.gmra.mrb[2].mxu0 %vm1185_vm2, %v1109_v59  ;;  %951 = vmatmul.mubr.msk.f32.gmra.mrb[2].mxu1 %vm1202_vm8, %v1109_v59 }
  0x72   : >> { %946 = vmatprep.mubr.msk.f32.mxu0 %vm679_vm12, %v1223_v28  ;;  %952 = vmatprep.mubr.msk.f32.mxu1 %vm679_vm12, %v1229_v31 }
  0x75   : >> { %947 = vmatmul.mubr.msk.f32.gmra.mrb[4].mxu0 %vm1193_vm4, %v1109_v59  ;;  %953 = vmatmul.mubr.msk.f32.gmra.mrb[4].mxu1 %vm1206_vm10, %v1109_v59 }
 0x140   : >> { %v768_v32 = vpop.f32.mrb[0].mxu0  ;;  %v783_v25 = vpop.f32.mrb[0].mxu1 }
 0x141   : >> { %v797_v50 = vmax.f32 %v768_v32, 0.0  ;;  %v800_v62 = vmax.f32 %v783_v25, 0.0  ;;  %v770_v63 = vpop.f32.mrb[1].mxu0  ;;  %v785_v2 = vpop.f32.mrb[1].mxu1 }
 0x143   : >> { %805 = vst [vmem:[%s804_s21] sm:$0xff] %v797_v50  ;;  %808 = vst [vmem:[%s804_s21 + $0x18] sm:$0xff] %v800_v62 }
 0x144   : >> { %v773_v4 = vpop.f32.mrb[2].mxu0  ;;  %v788_v6 = vpop.f32.mrb[2].mxu1 }
 0x145   : >> { %v798_v7 = vmax.f32 %v773_v4, 0.0  ;;  %v801_v8 = vmax.f32 %v788_v6, 0.0  ;;  %v775_v9 = vpop.f32.mrb[3].mxu0  ;;  %v790_v10 = vpop.f32.mrb[3].mxu1  ;;  %298 = sbr.rel (!%p296_p8) target bundleno = 25 (0x19), region = 71 }
 0x147   : >> { %806 = vst [vmem:[%s804_s21 + $0x8] sm:$0xff] %v798_v7  ;;  %809 = vst [vmem:[%s804_s21 + $0x20] sm:$0xff] %v801_v8 }
 0x148   : >> { %v778_v11 = vpop.f32.mrb[4].mxu0  ;;  %v793_v13 = vpop.f32.mrb[4].mxu1 }
 0x149   : >> { %v799_v14 = vmax.f32 %v778_v11, 0.0  ;;  %v802_v15 = vmax.f32 %v793_v13, 0.0  ;;  %v780_v60 = vpop.f32.mrb[5].mxu0  ;;  %v795_v61 = vpop.f32.mrb[5].mxu1 }
 0x14b   : >> { %807 = vst [vmem:[%s804_s21 + $0x10] sm:$0xff] %v799_v14  ;;  %810 = vst [vmem:[%s804_s21 + $0x28] sm:$0x3f] %v802_v15 }
 0x14c PF: > { %s13_s16 = sadd.s32 1, %s1100_s16   ;;  %s1556_s12 = smov %s1092_s14 }
 0x14d   : > { %p10_p9 = scmp.ge.s32.totalorder %s13_s16, 6   ;;  %s1557_s13 = smov %s1096_s15 }
 0x14e   : > { %s1558_s14 = smov %s1561_s17  ;;  %s1559_s15 = smov %s1565_s18 }
 0x14f   :  { %12 = sbr.rel (!%p10_p9) target bundleno = 3 (0x3), region = 82 }

// kernel: discriminator_cnn_forward.11
= control target key start
LH: loop header
LB: loop body
LE: loop exit
PB: predicated region body
PF: predicated region fallthrough
CT: control target
= control target key end

     0   :  { %s2137_s15 = smov 0   ;;  %s2139_s16 = smov 0   ;;  %s2846_s0 = inlined_call_operand.vmem [shape: f32[2,46,46,128], index: 0, kind: input, shape index: {}]   ;;  %s2847_s1 = inlined_call_operand.vmem [shape: f32[3,384,128], index: 1, kind: input, shape index: {}]   ;;  %s2848_s2 = inlined_call_operand.vmem [shape: f32[1,128], index: 2, kind: input, shape index: {}]   ;;  %s2849_s3 = inlined_call_operand.vmem [shape: f32[2,44,44,128], index: 3, kind: output, shape index: {0}]   ;;  %s2850_s4 = inlined_call_operand.vmem [shape: f32[2,1,2,128], index: 4, kind: output, shape index: {1}]  }
   0x1   :  { %s2141_s17 = smov 0  }
   0x2 LB: > { %s27_s18 = sadd.s32 1, %s2094_s16  ;;  %p1338_p0 = scmp.ge.s32.totalorder %s2098_s17, 1  ;;  %s2098_s17 = sphi %s2141_s17, %s15_s17   ;;  %s2094_s16 = sphi %s2139_s16, %s2854_s16   ;;  %s2090_s15 = sphi %s2137_s15, %s2853_s15  }
   0x3   : > { %p29_p1 = scmp.ge.s32.totalorder %s27_s18, 2  ;;  %p181_p2 = scmp.lt.s32.totalorder %s2098_s17, 3 }
   0x5   : > { %s2856_s18 = smov (%p29_p1, %s27_s18), 0  ;;  %p182_p3 = pnand %p1338_p0, %p181_p2 }
   0x6   : > { %p219_p4 = scmp.lt.s32.totalorder (!%p182_p3), %s2090_s15, 1  ;;  %v2170_v0 = vmov (!%p182_p3), 0.0   ;;  %v2172_v1 = vmov (!%p182_p3), 0.0   ;;  %s2174_s5 = smov (!%p182_p3), 0  }
   0x7   : > { %185 = sbr.rel (%p182_p3) target bundleno = 381 (0x17d), region = 32 }
   0xe   : > { %s2858_s15 = smov (!%p219_p4, %s2090_s15), 1 }
   0xf   : > { %s2014_s19 = smul.u32 2208, %s2858_s15  ;;  %s1341_s20 = sshll.u32 %s2858_s15, 1 }
  0x10   : > { %s2015_s21 = smul.u32 2112, %s2858_s15  ;;  %s2158_s24 = scalar_lea.vmem %s2850_s4, %s1341_s20 }
  0x11   : > { %s2163_s27 = scalar_lea.vmem %s2846_s0, %s2014_s19 }
  0x12   : > { %s2168_s30 = scalar_lea.vmem %s2849_s3, %s2015_s21 }
  0x13 LB: >> { %v1364_v2 = vld [vmem:[%s2847_s1 + $0x200] sm:$0xff]  ;;  %v1365_v3 = vld [vmem:[%s2847_s1 + $0x208] sm:$0xff]  ;;  %v1366_v11 = vld [vmem:[%s2847_s1 + $0x210] sm:$0xff]  ;;  %s252_s19 = smul.u32 48, %s2110_s5  ;;  %vm266_vm0 = vcmask 1046528   ;;  %vm284_vm1 = vcmask 1045504   ;;  %s2110_s5 = sphi %s2174_s5, %s248_s5   ;;  %v2106_v1 = vphi %v2172_v1, %v2852_v1   ;;  %v2102_v0 = vphi %v2170_v0, %v2851_v0  }
  0x14   : >> { %v1380_v4 = vld [vmem:[%s2847_s1 + $0x280] sm:$0xff]  ;;  %v1792_v5 = vpack.c.bf16 %v1365_v3, %v1364_v2  ;;  %v1381_v6 = vld [vmem:[%s2847_s1 + $0x288] sm:$0xff]  ;;  %v1367_v12 = vld [vmem:[%s2847_s1 + $0x218] sm:$0xff]  ;;  %vm1147_vm2 = vcmask 1043456   ;;  %s248_s5 = sadd.s32 1, %s2110_s5  }
  0x15   : >> { %v1348_v7 = vld [vmem:[%s2847_s1 + $0x180] sm:$0xff]  ;;  %v1349_v8 = vld [vmem:[%s2847_s1 + $0x188] sm:$0xff]  ;;  %v1824_v9 = vpack.c.bf16 %v1381_v6, %v1380_v4  ;;  %v1382_v13 = vld [vmem:[%s2847_s1 + $0x290] sm:$0xff]  ;;  %v1796_v14 = vpack.c.bf16 %v1367_v12, %v1366_v11  ;;  %s2285_s14 = scalar_lea.vmem %s2163_s27, %s252_s19  ;;  %s2819_s20 = scalar_lea.vmem %s2168_s30, %s252_s19 }
  0x16   : >> { %v1794_v10 = vpack.c.bf16 %v1349_v8, %v1348_v7  ;;  %1793 = vmatprep.subr.bf16.mxu0 %v1792_v5  ;;  %v1383_v15 = vld [vmem:[%s2847_s1 + $0x298] sm:$0xff]  ;;  %v1350_v16 = vld [vmem:[%s2847_s1 + $0x190] sm:$0xff]  ;;  %v1368_v20 = vld [vmem:[%s2847_s1 + $0x220] sm:$0xff]  ;;  %p245_p5 = scmp.ge.s32.totalorder %s248_s5, 44  }
  0x17   : >> { %v1351_v17 = vld [vmem:[%s2847_s1 + $0x198] sm:$0xff]  ;;  %1825 = vmatprep.subr.bf16.mxu1 %v1824_v9  ;;  %v1828_v18 = vpack.c.bf16 %v1383_v15, %v1382_v13  ;;  %v1369_v21 = vld [vmem:[%s2847_s1 + $0x228] sm:$0xff]  ;;  %v1384_v22 = vld [vmem:[%s2847_s1 + $0x2a0] sm:$0xff]  ;;  %vm1176_vm3 = vcmask (%p245_p5), 1040384  }
  0x18   : >> { %1795 = vmatpush3.bf16.msra.mxu0 %v1794_v10  ;;  %v1798_v19 = vpack.c.bf16 %v1351_v17, %v1350_v16  ;;  %1827 = vmatpush3.bf16.msra.mxu1 %v1824_v9  ;;  %v1800_v23 = vpack.c.bf16 %v1369_v21, %v1368_v20  ;;  %v1385_v24 = vld [vmem:[%s2847_s1 + $0x2a8] sm:$0xff]  ;;  %v1352_v25 = vld [vmem:[%s2847_s1 + $0x1a0] sm:$0xff]  ;;  %v1370_v28 = vld [vmem:[%s2847_s1 + $0x230] sm:$0xff] }
  0x19   : >> { %1797 = vmatprep.subr.bf16.mxu0 %v1796_v14  ;;  %v1353_v26 = vld [vmem:[%s2847_s1 + $0x1a8] sm:$0xff]  ;;  %1829 = vmatprep.subr.bf16.mxu1 %v1828_v18  ;;  %v1832_v27 = vpack.c.bf16 %v1385_v24, %v1384_v22  ;;  %v1371_v29 = vld [vmem:[%s2847_s1 + $0x238] sm:$0xff]  ;;  %v1386_v30 = vld [vmem:[%s2847_s1 + $0x2b0] sm:$0xff] }
  0x1a   : >> { %v1387_v31 = vld [vmem:[%s2847_s1 + $0x2b8] sm:$0xff]  ;;  %v1802_v32 = vpack.c.bf16 %v1353_v26, %v1352_v25  ;;  %v1804_v33 = vpack.c.bf16 %v1371_v29, %v1370_v28  ;;  %v1354_v34 = vld [vmem:[%s2847_s1 + $0x1b0] sm:$0xff]  ;;  %v1372_v37 = vld [vmem:[%s2847_s1 + $0x240] sm:$0xff] }
  0x1b   : >> { %v1355_v35 = vld [vmem:[%s2847_s1 + $0x1b8] sm:$0xff]  ;;  %v1836_v36 = vpack.c.bf16 %v1387_v31, %v1386_v30  ;;  %v1373_v38 = vld [vmem:[%s2847_s1 + $0x248] sm:$0xff]  ;;  %v1388_v39 = vld [vmem:[%s2847_s1 + $0x2c0] sm:$0xff] }
  0x1c   : >> { %1799 = vmatpush3.bf16.msra.mxu0 %v1798_v19  ;;  %1831 = vmatpush3.bf16.msra.mxu1 %v1828_v18  ;;  %v1389_v40 = vld [vmem:[%s2847_s1 + $0x2c8] sm:$0xff]  ;;  %v1806_v41 = vpack.c.bf16 %v1355_v35, %v1354_v34  ;;  %v1356_v42 = vld [vmem:[%s2847_s1 + $0x1c0] sm:$0xff]  ;;  %v1808_v43 = vpack.c.bf16 %v1373_v38, %v1372_v37  ;;  %v1374_v45 = vld [vmem:[%s2847_s1 + $0x250] sm:$0xff] }
  0x1d   : >> { %1801 = vmatprep.subr.bf16.mxu0 %v1800_v23  ;;  %1833 = vmatprep.subr.bf16.mxu1 %v1832_v27  ;;  %v1357_v44 = vld [vmem:[%s2847_s1 + $0x1c8] sm:$0xff]  ;;  %v1375_v46 = vld [vmem:[%s2847_s1 + $0x258] sm:$0xff]  ;;  %v1840_v47 = vpack.c.bf16 %v1389_v40, %v1388_v39  ;;  %v1390_v48 = vld [vmem:[%s2847_s1 + $0x2d0] sm:$0xff] }
  0x1e   : >> { %v1391_v49 = vld [vmem:[%s2847_s1 + $0x2d8] sm:$0xff]  ;;  %v1810_v50 = vpack.c.bf16 %v1357_v44, %v1356_v42  ;;  %v1812_v51 = vpack.c.bf16 %v1375_v46, %v1374_v45  ;;  %v2294_v52 = vld [vmem:[%s2285_s14 + $0x30] sm:$0xff]  ;;  %v1376_v61 = vld [vmem:[%s2847_s1 + $0x260] sm:$0xff] }
  0x1f   : >> { %v2297_v53 = vld [vmem:[%s2285_s14 + $0x38] sm:$0xff]  ;;  %v1358_v54 = vld [vmem:[%s2847_s1 + $0x1d0] sm:$0xff]  ;;  %v365_v56 = vrot.slane %v2294_v52, 1  ;;  %v382_v58 = vrot.slane %v2294_v52, 2  ;;  %v1844_v60 = vpack.c.bf16 %v1391_v49, %v1390_v48  ;;  %v1377_v62 = vld [vmem:[%s2847_s1 + $0x268] sm:$0xff] }
  0x20   : >> { %1803 = vmatpush3.bf16.msra.mxu0 %v1802_v32  ;;  %1835 = vmatpush3.bf16.msra.mxu1 %v1832_v27  ;;  %v1359_v55 = vld [vmem:[%s2847_s1 + $0x1d8] sm:$0xff]  ;;  %v366_v57 = vrot.slane %v2297_v53, 1  ;;  %v383_v59 = vrot.slane %v2297_v53, 2  ;;  %v1392_v63 = vld [vmem:[%s2847_s1 + $0x2e0] sm:$0xff]  ;;  %v1393_v2 = vld [vmem:[%s2847_s1 + $0x2e8] sm:$0xff]  ;;  %v1816_v6 = vpack.c.bf16 %v1377_v62, %v1376_v61 }
  0x21   : >> { %1805 = vmatprep.subr.bf16.mxu0 %v1804_v33  ;;  %1837 = vmatprep.subr.bf16.mxu1 %v1836_v36  ;;  %v1814_v5 = vpack.c.bf16 %v1359_v55, %v1358_v54  ;;  %v1360_v7 = vld [vmem:[%s2847_s1 + $0x1e0] sm:$0xff]  ;;  %v1361_v8 = vld [vmem:[%s2847_s1 + $0x1e8] sm:$0xff]  ;;  %v1848_v9 = vpack.c.bf16 %v1393_v2, %v1392_v63  ;;  %v1378_v10 = vld [vmem:[%s2847_s1 + $0x270] sm:$0xff] }
  0x22   : >> { %v367_v3 = vsel %vm266_vm0, %v365_v56, %v366_v57  ;;  %v384_v4 = vsel %vm284_vm1, %v382_v58, %v383_v59  ;;  %v1379_v11 = vld [vmem:[%s2847_s1 + $0x278] sm:$0xff]  ;;  %v1394_v12 = vld [vmem:[%s2847_s1 + $0x2f0] sm:$0xff]  ;;  %v1818_v14 = vpack.c.bf16 %v1361_v8, %v1360_v7  ;;  %v318_v19 = vld [vmem:[%s2847_s1 + $0x80] sm:$0xff] }
  0x23   : >> { %512 = vmatprep.mubr.f32.mxu0 %v367_v3  ;;  %1701 = vmatprep.mubr.f32.mxu1 %v384_v4  ;;  %v1395_v13 = vld [vmem:[%s2847_s1 + $0x2f8] sm:$0xff]  ;;  %v1820_v15 = vpack.c.bf16 %v1379_v11, %v1378_v10  ;;  %v1362_v16 = vld [vmem:[%s2847_s1 + $0x1f0] sm:$0xff]  ;;  %v319_v20 = vld [vmem:[%s2847_s1 + $0x88] sm:$0xff] }
  0x24   : >> { %1807 = vmatpush3.bf16.msra.mxu0 %v1806_v41  ;;  %1839 = vmatpush3.bf16.msra.mxu1 %v1836_v36  ;;  %v1363_v17 = vld [vmem:[%s2847_s1 + $0x1f8] sm:$0xff]  ;;  %v1852_v18 = vpack.c.bf16 %v1395_v13, %v1394_v12  ;;  %v2356_v21 = vld [vmem:[%s2285_s14 + $0x40] sm:$0xff]  ;;  %v335_v23 = vld [vmem:[%s2847_s1 + $0x108] sm:$0xff]  ;;  %v1856_v25 = vpack.c.bf16 %v319_v20, %v318_v19 }
  0x25   : >> { %1809 = vmatprep.subr.bf16.mxu0 %v1808_v43  ;;  %1841 = vmatprep.subr.bf16.mxu1 %v1840_v47  ;;  %v334_v22 = vld [vmem:[%s2847_s1 + $0x100] sm:$0xff]  ;;  %v1822_v24 = vpack.c.bf16 %v1363_v17, %v1362_v16  ;;  %v385_v26 = vrot.slane %v2356_v21, 2  ;;  %v303_v28 = vld [vmem:[%s2847_s1 + $0x8] sm:$0xff]  ;;  %v320_v30 = vld [vmem:[%s2847_s1 + $0x90] sm:$0xff]  ;;  %v368_v35 = vrot.slane %v2356_v21, 1 }
  0x26   : >> { %v302_v27 = vld [vmem:[%s2847_s1] sm:$0xff]  ;;  %v1888_v29 = vpack.c.bf16 %v335_v23, %v334_v22  ;;  %v321_v31 = vld [vmem:[%s2847_s1 + $0x98] sm:$0xff]  ;;  %v2378_v32 = vld [vmem:[%s2285_s14 + $0x48] sm:$0xff] }
  0x27   : >> { %v336_v33 = vld [vmem:[%s2847_s1 + $0x110] sm:$0xff]  ;;  %v337_v34 = vld [vmem:[%s2847_s1 + $0x118] sm:$0xff]  ;;  %v1858_v36 = vpack.c.bf16 %v303_v28, %v302_v27  ;;  %v387_v37 = vrot.slane %v2378_v32, 2  ;;  %v386_v38 = vsel %vm284_vm1, %v383_v59, %v385_v26  ;;  %v1860_v39 = vpack.c.bf16 %v321_v31, %v320_v30  ;;  %v322_v44 = vld [vmem:[%s2847_s1 + $0xa0] sm:$0xff] }
  0x28   : >> { %1811 = vmatpush3.bf16.msra.mxu0 %v1810_v50  ;;  %1843 = vmatpush3.bf16.msra.mxu1 %v1840_v47  ;;  %v304_v40 = vld [vmem:[%s2847_s1 + $0x10] sm:$0xff]  ;;  %v305_v41 = vld [vmem:[%s2847_s1 + $0x18] sm:$0xff]  ;;  %v370_v42 = vrot.slane %v2378_v32, 1  ;;  %v1892_v43 = vpack.c.bf16 %v337_v34, %v336_v33  ;;  %v323_v45 = vld [vmem:[%s2847_s1 + $0xa8] sm:$0xff]  ;;  %v369_v49 = vsel %vm266_vm0, %v366_v57, %v368_v35 }
  0x29   : >> { %1813 = vmatprep.subr.bf16.mxu0 %v1812_v51  ;;  %1845 = vmatprep.subr.bf16.mxu1 %v1844_v60  ;;  %v2403_v46 = vld [vmem:[%s2285_s14 + $0x50] sm:$0xff]  ;;  %v338_v47 = vld [vmem:[%s2847_s1 + $0x120] sm:$0xff]  ;;  %v339_v48 = vld [vmem:[%s2847_s1 + $0x128] sm:$0xff]  ;;  %v388_v55 = vsel %vm284_vm1, %v385_v26, %v387_v37  ;;  %v1864_v58 = vpack.c.bf16 %v323_v45, %v322_v44 }
  0x2a   : >> { %v2416_v50 = vld [vmem:[%s2285_s14 + $0x58] sm:$0x3f]  ;;  %v389_v51 = vrot.slane %v2403_v46, 2  ;;  %v306_v54 = vld [vmem:[%s2847_s1 + $0x20] sm:$0xff]  ;;  %v307_v57 = vld [vmem:[%s2847_s1 + $0x28] sm:$0xff]  ;;  %v371_v59 = vsel %vm266_vm0, %v368_v35, %v370_v42  ;;  %v1896_v63 = vpack.c.bf16 %v339_v48, %v338_v47 }
  0x2b   : >> { %v391_v56 = vrot.slane %v2416_v50, 2  ;;  %v2430_v61 = vld [vmem:[%s2285_s14] sm:$0xff]  ;;  %v2433_v62 = vld [vmem:[%s2285_s14 + $0x8] sm:$0xff]  ;;  %v324_v2 = vld [vmem:[%s2847_s1 + $0xb0] sm:$0xff]  ;;  %v1866_v7 = vpack.c.bf16 %v307_v57, %v306_v54 }
  0x2c   : >> { %1815 = vmatpush3.bf16.msra.mxu0 %v1814_v5  ;;  %1847 = vmatpush3.bf16.msra.mxu1 %v1844_v60  ;;  %v372_v60 = vrot.slane %v2403_v46, 1  ;;  %v325_v3 = vld [vmem:[%s2847_s1 + $0xb8] sm:$0xff]  ;;  %v340_v4 = vld [vmem:[%s2847_s1 + $0x130] sm:$0xff]  ;;  %v326_v16 = vld [vmem:[%s2847_s1 + $0xc0] sm:$0xff] }
  0x2d   : >> { %1817 = vmatprep.subr.bf16.mxu0 %v1816_v6  ;;  %1849 = vmatprep.subr.bf16.mxu1 %v1848_v9  ;;  %v341_v5 = vld [vmem:[%s2847_s1 + $0x138] sm:$0xff]  ;;  %v390_v6 = vsel %vm284_vm1, %v387_v37, %v389_v51  ;;  %v392_v8 = vsel %vm284_vm1, %v389_v51, %v391_v56  ;;  %v1868_v10 = vpack.c.bf16 %v325_v3, %v324_v2  ;;  %v308_v11 = vld [vmem:[%s2847_s1 + $0x30] sm:$0xff]  ;;  %v327_v17 = vld [vmem:[%s2847_s1 + $0xc8] sm:$0xff]  ;;  %v268_v37 = vrot.slane %v2433_v62, 1 }
  0x2e   : >> { %v309_v12 = vld [vmem:[%s2847_s1 + $0x38] sm:$0xff]  ;;  %v373_v13 = vsel %vm266_vm0, %v370_v42, %v372_v60  ;;  %v343_v19 = vld [vmem:[%s2847_s1 + $0x148] sm:$0xff]  ;;  %v1872_v23 = vpack.c.bf16 %v327_v17, %v326_v16  ;;  %v328_v27 = vld [vmem:[%s2847_s1 + $0xd0] sm:$0xff] }
  0x2f   : >> { %v1870_v20 = vpack.c.bf16 %v309_v12, %v308_v11  ;;  %v329_v28 = vld [vmem:[%s2847_s1 + $0xd8] sm:$0xff]  ;;  %v312_v34 = vld [vmem:[%s2847_s1 + $0x50] sm:$0xff]  ;;  %v330_v35 = vld [vmem:[%s2847_s1 + $0xe0] sm:$0xff] }
  0x30   : >> { %1819 = vmatpush3.bf16.msra.mxu0 %v1818_v14  ;;  %1851 = vmatpush3.bf16.msra.mxu1 %v1848_v9  ;;  %v285_v9 = vrot.slane %v2430_v61, 2  ;;  %v374_v14 = vrot.slane %v2416_v50, 1  ;;  %v345_v30 = vld [vmem:[%s2847_s1 + $0x158] sm:$0xff]  ;;  %v1876_v33 = vpack.c.bf16 %v329_v28, %v328_v27  ;;  %v314_v42 = vld [vmem:[%s2847_s1 + $0x60] sm:$0xff]  ;;  %v332_v45 = vld [vmem:[%s2847_s1 + $0xf0] sm:$0xff] }
  0x31   : >> { %1821 = vmatprep.subr.bf16.mxu0 %v1820_v15  ;;  %1853 = vmatprep.subr.bf16.mxu1 %v1852_v18  ;;  %v1900_v15 = vpack.c.bf16 %v341_v5, %v340_v4  ;;  %v2530_v47 = vld [vmem:[%s2285_s14 + $0x68] sm:$0xff]  ;;  %v2537_v54 = vld [vmem:[%s2285_s14 + $0x70] sm:$0xff]  ;;  %v349_v4 = vld [vmem:[%s2847_s1 + $0x178] sm:$0xff] }
  0x32   : >> { %v863_v57 = vrot.slane %v2537_v54, 2  ;;  %v348_v3 = vld [vmem:[%s2847_s1 + $0x170] sm:$0xff]  ;;  %v317_v12 = vld [vmem:[%s2847_s1 + $0x78] sm:$0xff] }
  0x33   : >> { %v316_v11 = vld [vmem:[%s2847_s1 + $0x70] sm:$0xff]  ;;  %v1916_v17 = vpack.c.bf16 %v349_v4, %v348_v3 }
  0x34   : >> { %1823 = vmatpush3.bf16.msra.mxu0 %v1822_v24  ;;  %1855 = vmatpush3.bf16.msra.mxu1 %v1852_v18  ;;  %v342_v18 = vld [vmem:[%s2847_s1 + $0x140] sm:$0xff]  ;;  %v311_v24 = vld [vmem:[%s2847_s1 + $0x48] sm:$0xff] }
  0x35   : >> { %1857 = vmatprep.subr.bf16.mxu0 %v1856_v25  ;;  %1889 = vmatprep.subr.bf16.mxu1 %v1888_v29  ;;  %v375_v25 = vsel %vm266_vm0, %v372_v60, %v374_v14  ;;  %v1904_v26 = vpack.c.bf16 %v343_v19, %v342_v18  ;;  %v1418_v18 = vld [vmem:[%s2847_s1 + $0x380] sm:$0xff]  ;;  %v1419_v19 = vld [vmem:[%s2847_s1 + $0x388] sm:$0xff] }
  0x36   : >> { %v1920_v27 = vpack.c.bf16 %v1419_v19, %v1418_v18  ;;  %v1425_v18 = vld [vmem:[%s2847_s1 + $0x3b8] sm:$0xff]  ;;  %v1440_v19 = vld [vmem:[%s2847_s1 + $0x430] sm:$0xff] }
  0x37   : >> { %513 = vmatmul.mubr.f32.vlgmr.msra.gmra.mrb[0].mxu0 %v2294_v52  ;;  %1702 = vmatmul.mubr.f32.vlgmr.msra.gmra.mrb[0].mxu1 %v386_v38  ;;  %v1862_v52 = vpack.c.bf16 %v305_v41, %v304_v40  ;;  %v346_v40 = vld [vmem:[%s2847_s1 + $0x160] sm:$0xff]  ;;  %v347_v41 = vld [vmem:[%s2847_s1 + $0x168] sm:$0xff] }
  0x38   : >> { %1859 = vmatpush3.bf16.msra.mxu0 %v1858_v36  ;;  %1891 = vmatpush3.bf16.msra.mxu1 %v1888_v29  ;;  %v344_v29 = vld [vmem:[%s2847_s1 + $0x150] sm:$0xff]  ;;  %v267_v36 = vrot.slane %v2430_v61, 1 }
  0x39   : >> { %1861 = vmatprep.subr.bf16.mxu0 %v1860_v39  ;;  %1893 = vmatprep.subr.bf16.mxu1 %v1892_v43  ;;  %v1908_v38 = vpack.c.bf16 %v345_v30, %v344_v29  ;;  %v331_v39 = vld [vmem:[%s2847_s1 + $0xe8] sm:$0xff]  ;;  %v1402_v29 = vld [vmem:[%s2847_s1 + $0x300] sm:$0xff] }
  0x3a   : >> { %517 = vmatprep.mubr.f32.mxu0 %v369_v49  ;;  %1704 = vmatprep.mubr.f32.mxu1 %v388_v55  ;;  %v1880_v48 = vpack.c.bf16 %v331_v39, %v330_v35  ;;  %v1912_v49 = vpack.c.bf16 %v347_v41, %v346_v40  ;;  %v269_v51 = vsel %vm266_vm0, %v267_v36, %v268_v37  ;;  %v2540_v55 = vld [vmem:[%s2285_s14 + $0x78] sm:$0xff]  ;;  %v1403_v30 = vld [vmem:[%s2847_s1 + $0x308] sm:$0xff]  ;;  %v1436_v36 = vld [vmem:[%s2847_s1 + $0x410] sm:$0xff] }
  0x3b   : >> { %518 = vmatmul.mubr.f32.gmra.mrb[2].mxu0 %v2297_v53  ;;  %v286_v53 = vrot.slane %v2433_v62, 2  ;;  %1705 = vmatmul.mubr.f32.gmra.mrb[2].mxu1 %v390_v6  ;;  %v865_v60 = vrot.slane %v2540_v55, 2  ;;  %v848_v6 = vrot.slane %v2540_v55, 1  ;;  %v1421_v35 = vld [vmem:[%s2847_s1 + $0x398] sm:$0xff]  ;;  %v1922_v39 = vpack.c.bf16 %v1403_v30, %v1402_v29  ;;  %v1408_v30 = vld [vmem:[%s2847_s1 + $0x330] sm:$0xff] }
  0x3c   : >> { %1863 = vmatpush3.bf16.msra.mxu0 %v1862_v52  ;;  %522 = vmatprep.mubr.f32.mxu0 %v371_v59  ;;  %v844_v52 = vrot.slane %v2530_v47, 1  ;;  %v846_v59 = vrot.slane %v2537_v54, 1 }
  0x3d   : >> { %1895 = vmatpush3.bf16.msra.mxu1 %v1892_v43  ;;  %1865 = vmatprep.subr.bf16.mxu0 %v1864_v58  ;;  %v287_v22 = vsel %vm284_vm1, %v285_v9, %v286_v53  ;;  %v315_v43 = vld [vmem:[%s2847_s1 + $0x68] sm:$0xff]  ;;  %v861_v58 = vrot.slane %v2530_v47, 2 }
  0x3e   : >> { %1897 = vmatprep.subr.bf16.mxu1 %v1896_v63  ;;  %1707 = vmatprep.mubr.f32.mxu1 %v392_v8  ;;  %v1882_v2 = vpack.c.bf16 %v315_v43, %v314_v42  ;;  %v2570_v9 = vsel %vm266_vm0, %v844_v52, %v846_v59  ;;  %v1404_v42 = vld [vmem:[%s2847_s1 + $0x310] sm:$0xff]  ;;  %v1405_v43 = vld [vmem:[%s2847_s1 + $0x318] sm:$0xff] }
  0x3f   : >> { %523 = vmatmul.mubr.f32.gmra.mrb[4].mxu0 %v2356_v21  ;;  %v310_v21 = vld [vmem:[%s2847_s1 + $0x40] sm:$0xff]  ;;  %1708 = vmatmul.mubr.f32.gmra.mrb[4].mxu1 %v391_v56 }
  0x40   : >> { %1867 = vmatpush3.bf16.msra.mxu0 %v1866_v7  ;;  %527 = vmatprep.mubr.f32.mxu0 %v373_v13  ;;  %v1874_v31 = vpack.c.bf16 %v311_v24, %v310_v21  ;;  %v2543_v56 = vld [vmem:[%s2285_s14 + $0x80] sm:$0xff]  ;;  %v2580_v13 = vsel %vm284_vm1, %v863_v57, %v865_v60  ;;  %v1435_v24 = vld [vmem:[%s2847_s1 + $0x408] sm:$0xff] }
  0x41   : >> { %1899 = vmatpush3.bf16.msra.mxu1 %v1896_v63  ;;  %1869 = vmatprep.subr.bf16.mxu0 %v1868_v10  ;;  %v2550_v63 = vld [vmem:[%s2285_s14 + $0x88] sm:$0x3f]  ;;  %v867_v5 = vrot.slane %v2543_v56, 2  ;;  %v850_v10 = vrot.slane %v2543_v56, 1  ;;  %v1434_v21 = vld [vmem:[%s2847_s1 + $0x400] sm:$0xff] }
  0x42   : >> { %1901 = vmatprep.subr.bf16.mxu1 %v1900_v15  ;;  %1742 = vmatprep.mubr.f32.mxu1 %v287_v22  ;;  %v869_v7 = vrot.slane %v2550_v63, 2  ;;  %v852_v16 = vrot.slane %v2550_v63, 1 }
  0x43   : >> { %528 = vmatmul.mubr.f32.gmra.mrb[6].mxu0 %v2378_v32  ;;  %v313_v32 = vld [vmem:[%s2847_s1 + $0x58] sm:$0xff] }
  0x44   : >> { %1871 = vmatpush3.bf16.msra.mxu0 %v1870_v20  ;;  %532 = vmatprep.mubr.f32.mxu0 %v375_v25  ;;  %v1878_v44 = vpack.c.bf16 %v313_v32, %v312_v34  ;;  %v2596_v20 = vld [vmem:[%s2285_s14 + $0x10] sm:$0xff]  ;;  %v2601_v22 = vsel %vm284_vm1, %v867_v5, %v869_v7  ;;  %v2615_v25 = vsel %vm266_vm0, %v850_v10, %v852_v16  ;;  %v2629_v32 = vld [vmem:[%s2285_s14 + $0x18] sm:$0xff] }
  0x45   : >> { %1903 = vmatpush3.bf16.msra.mxu1 %v1900_v15  ;;  %1873 = vmatprep.subr.bf16.mxu0 %v1872_v23  ;;  %v2586_v15 = vsel %vm266_vm0, %v846_v59, %v848_v6  ;;  %v2604_v23 = vsel %vm266_vm0, %v848_v6, %v850_v10  ;;  %v288_v28 = vrot.slane %v2596_v20, 2  ;;  %v1420_v34 = vld [vmem:[%s2847_s1 + $0x390] sm:$0xff]  ;;  %v290_v40 = vrot.slane %v2629_v32, 2  ;;  %v2671_v59 = vld [vmem:[%s2285_s14 + $0x28] sm:$0x3f]  ;;  %v1406_v6 = vld [vmem:[%s2847_s1 + $0x320] sm:$0xff] }
  0x46   : >> { %1905 = vmatprep.subr.bf16.mxu1 %v1904_v26 }
  0x47   : >> { %533 = vmatmul.mubr.f32.gmra.mrb[8].mxu0 %v2403_v46  ;;  %v333_v46 = vld [vmem:[%s2847_s1 + $0xf8] sm:$0xff]  ;;  %v289_v41 = vsel %vm284_vm1, %v286_v53, %v288_v28  ;;  %v1422_v53 = vld [vmem:[%s2847_s1 + $0x3a0] sm:$0xff]  ;;  %v291_v3 = vsel %vm284_vm1, %v288_v28, %v290_v40 }
  0x48   : >> { %1875 = vmatpush3.bf16.msra.mxu0 %v1874_v31  ;;  %537 = vmatprep.mubr.f32.mxu0 %v374_v14  ;;  %v1884_v8 = vpack.c.bf16 %v333_v46, %v332_v45  ;;  %v2583_v14 = vsel %vm284_vm1, %v865_v60, %v867_v5  ;;  %v1952_v31 = vpack.c.bf16 %v1435_v24, %v1434_v21  ;;  %v1441_v21 = vld [vmem:[%s2847_s1 + $0x438] sm:$0xff] }
  0x49   : >> { %1907 = vmatpush3.bf16.msra.mxu1 %v1904_v26  ;;  %1877 = vmatprep.subr.bf16.mxu0 %v1876_v33  ;;  %v1886_v26 = vpack.c.bf16 %v317_v12, %v316_v11  ;;  %v270_v33 = vrot.slane %v2596_v20, 1  ;;  %v1924_v46 = vpack.c.bf16 %v1421_v35, %v1420_v34  ;;  %v2685_v11 = vld [vmem:[%s2285_s14 + $0x60] sm:$0xff]  ;;  %v1964_v34 = vpack.c.bf16 %v1441_v21, %v1440_v19  ;;  %v1433_v19 = vld [vmem:[%s2847_s1 + $0x3f8] sm:$0xff]  ;;  %v1448_v21 = vld [vmem:[%s2847_s1 + $0x470] sm:$0xff] }
  0x4a   : >> { %1909 = vmatprep.subr.bf16.mxu1 %v1908_v38  ;;  %v860_v28 = vrot.slane %v2685_v11, 2  ;;  %v1426_v35 = vld [vmem:[%s2847_s1 + $0x3c0] sm:$0xff] }
  0x4b   : >> { %538 = vmatmul.mubr.f32.gmra.mrb[10].mxu0 %v2416_v50  ;;  %v2565_v50 = vsel %vm284_vm1, %v861_v58, %v863_v57  ;;  %v271_v45 = vsel %vm266_vm0, %v268_v37, %v270_v33  ;;  %v1438_v57 = vld [vmem:[%s2847_s1 + $0x420] sm:$0xff]  ;;  %v1439_v37 = vld [vmem:[%s2847_s1 + $0x428] sm:$0xff] }
  0x4c   : >> { %1879 = vmatpush3.bf16.msra.mxu0 %v1878_v44  ;;  %702 = vmatprep.mubr.f32.mxu0 %v269_v51  ;;  %v272_v44 = vrot.slane %v2629_v32, 1  ;;  %v2661_v51 = vld [vmem:[%s2285_s14 + $0x20] sm:$0xff]  ;;  %v1960_v12 = vpack.c.bf16 %v1439_v37, %v1438_v57  ;;  %v1412_v37 = vld [vmem:[%s2847_s1 + $0x350] sm:$0xff] }
  0x4d   : >> { %1911 = vmatpush3.bf16.msra.mxu1 %v1908_v38  ;;  %1881 = vmatprep.subr.bf16.mxu0 %v1880_v48  ;;  %v1437_v38 = vld [vmem:[%s2847_s1 + $0x418] sm:$0xff]  ;;  %v292_v60 = vrot.slane %v2661_v51, 2  ;;  %v274_v10 = vrot.slane %v2661_v51, 1 }
  0x4e   : >> { %1913 = vmatprep.subr.bf16.mxu1 %v1912_v49  ;;  %v1956_v48 = vpack.c.bf16 %v1437_v38, %v1436_v36  ;;  %v273_v4 = vsel %vm266_vm0, %v270_v33, %v272_v44  ;;  %v276_v33 = vrot.slane %v2671_v59, 1  ;;  %v1427_v36 = vld [vmem:[%s2847_s1 + $0x3c8] sm:$0xff]  ;;  %v1442_v38 = vld [vmem:[%s2847_s1 + $0x440] sm:$0xff] }
  0x4f   : >> { %v293_v24 = vsel %vm284_vm1, %v290_v40, %v292_v60 }
  0x50   : >> { %1883 = vmatpush3.bf16.msra.mxu0 %v1882_v2  ;;  %v1926_v2 = vpack.c.bf16 %v1405_v43, %v1404_v42  ;;  %v1936_v42 = vpack.c.bf16 %v1427_v36, %v1426_v35  ;;  %v1410_v43 = vld [vmem:[%s2847_s1 + $0x340] sm:$0xff] }
  0x51   : >> { %1915 = vmatpush3.bf16.msra.mxu1 %v1912_v49  ;;  %1885 = vmatprep.subr.bf16.mxu0 %v1884_v8  ;;  %v1423_v49 = vld [vmem:[%s2847_s1 + $0x3a8] sm:$0xff] }
  0x52   : >> { %1917 = vmatprep.subr.bf16.mxu1 %v1916_v17  ;;  %v1928_v5 = vpack.c.bf16 %v1423_v49, %v1422_v53  ;;  %v1407_v8 = vld [vmem:[%s2847_s1 + $0x328] sm:$0xff]  ;;  %v1445_v53 = vld [vmem:[%s2847_s1 + $0x458] sm:$0xff] }
  0x54   : >> { %1887 = vmatpush3.bf16.msra.mxu0 %v1886_v26  ;;  %v1930_v26 = vpack.c.bf16 %v1407_v8, %v1406_v6 }
  0x55   : >> { %1919 = vmatpush3.bf16.msra.mxu1 %v1916_v17  ;;  %1921 = vmatprep.subr.bf16.mxu0 %v1920_v27  ;;  %v1424_v17 = vld [vmem:[%s2847_s1 + $0x3b0] sm:$0xff] }
  0x56   : >> { %1953 = vmatprep.subr.bf16.mxu1 %v1952_v31  ;;  %v1932_v29 = vpack.c.bf16 %v1425_v18, %v1424_v17  ;;  %v1432_v18 = vld [vmem:[%s2847_s1 + $0x3f0] sm:$0xff] }
  0x57   : >> { %703 = vmatmul.mubr.f32.vlgmr.msra.gmra.mrb[12].mxu0 %v2430_v61  ;;  %v294_v61 = vrot.slane %v2671_v59, 2 }
  0x58   : >> { %1743 = vmatmul.mubr.f32.vlgmr.msra.gmra.mrb[0].mxu1 %v289_v41  ;;  %1923 = vmatpush3.bf16.msra.mxu0 %v1922_v39  ;;  %v1443_v39 = vld [vmem:[%s2847_s1 + $0x448] sm:$0xff]  ;;  %v862_v41 = vsel %vm284_vm1, %v860_v28, %v861_v58  ;;  %v1429_v58 = vld [vmem:[%s2847_s1 + $0x3d8] sm:$0xff] }
  0x59   : >> { %1955 = vmatpush3.bf16.msra.mxu1 %v1952_v31  ;;  %707 = vmatprep.mubr.f32.mxu0 %v271_v45  ;;  %v295_v27 = vsel %vm284_vm1, %v292_v60, %v294_v61  ;;  %v1409_v31 = vld [vmem:[%s2847_s1 + $0x338] sm:$0xff]  ;;  %v1968_v45 = vpack.c.bf16 %v1443_v39, %v1442_v38  ;;  %v843_v60 = vrot.slane %v2685_v11, 1 }
  0x5a   : >> { %1925 = vmatprep.subr.bf16.mxu0 %v1924_v46  ;;  %1957 = vmatprep.subr.bf16.mxu1 %v1956_v48  ;;  %v1934_v40 = vpack.c.bf16 %v1409_v31, %v1408_v30  ;;  %v1428_v46 = vld [vmem:[%s2847_s1 + $0x3d0] sm:$0xff] }
  0x5b   : >> { %708 = vmatmul.mubr.f32.gmra.mrb[14].mxu0 %v2433_v62  ;;  %1745 = vmatprep.mubr.f32.mxu1 %v291_v3  ;;  %v275_v62 = vsel %vm266_vm0, %v272_v44, %v274_v10  ;;  %v1411_v44 = vld [vmem:[%s2847_s1 + $0x348] sm:$0xff]  ;;  %v1940_v57 = vpack.c.bf16 %v1429_v58, %v1428_v46  ;;  %v1430_v3 = vld [vmem:[%s2847_s1 + $0x3e0] sm:$0xff] }
  0x5c   : >> { %1927 = vmatpush3.bf16.msra.mxu0 %v1926_v2  ;;  %712 = vmatprep.mubr.f32.mxu0 %v273_v4  ;;  %v1938_v49 = vpack.c.bf16 %v1411_v44, %v1410_v43  ;;  %v1446_v4 = vld [vmem:[%s2847_s1 + $0x460] sm:$0xff] }
  0x5d   : >> { %1959 = vmatpush3.bf16.msra.mxu1 %v1956_v48  ;;  %1929 = vmatprep.subr.bf16.mxu0 %v1928_v5  ;;  %v1444_v48 = vld [vmem:[%s2847_s1 + $0x450] sm:$0xff]  ;;  %v1447_v5 = vld [vmem:[%s2847_s1 + $0x468] sm:$0xff] }
  0x5e   : >> { %1961 = vmatprep.subr.bf16.mxu1 %v1960_v12  ;;  %1746 = vmatmul.mubr.f32.gmra.mrb[2].mxu1 %v293_v24  ;;  %v1972_v2 = vpack.c.bf16 %v1445_v53, %v1444_v48  ;;  %v1976_v17 = vpack.c.bf16 %v1447_v5, %v1446_v4 }
  0x5f   : >> { %713 = vmatmul.mubr.f32.gmra.mrb[16].mxu0 %v2596_v20  ;;  %1748 = vmatprep.mubr.f32.mxu1 %v295_v27  ;;  %v277_v20 = vsel %vm266_vm0, %v274_v10, %v276_v33  ;;  %v1414_v10 = vld [vmem:[%s2847_s1 + $0x360] sm:$0xff]  ;;  %v1416_v27 = vld [vmem:[%s2847_s1 + $0x370] sm:$0xff] }
  0x60   : >> { %1931 = vmatpush3.bf16.msra.mxu0 %v1930_v26  ;;  %717 = vmatprep.mubr.f32.mxu0 %v275_v62  ;;  %v1948_v26 = vpack.c.bf16 %v1433_v19, %v1432_v18 }
  0x61   : >> { %1963 = vmatpush3.bf16.msra.mxu1 %v1960_v12  ;;  %1933 = vmatprep.subr.bf16.mxu0 %v1932_v29  ;;  %v845_v12 = vsel %vm266_vm0, %v843_v60, %v844_v52  ;;  %v1449_v52 = vld [vmem:[%s2847_s1 + $0x478] sm:$0xff] }
  0x62   : >> { %1965 = vmatprep.subr.bf16.mxu1 %v1964_v34  ;;  %1749 = vmatmul.mubr.f32.gmra.mrb[4].mxu1 %v294_v61  ;;  %v1431_v61 = vld [vmem:[%s2847_s1 + $0x3e8] sm:$0xff]  ;;  %v1980_v28 = vpack.c.bf16 %v1449_v52, %v1448_v21 }
  0x63   : >> { %718 = vmatmul.mubr.f32.gmra.mrb[18].mxu0 %v2629_v32  ;;  %1783 = vmatprep.mubr.f32.mxu1 %v862_v41  ;;  %v1413_v32 = vld [vmem:[%s2847_s1 + $0x358] sm:$0xff]  ;;  %v1944_v8 = vpack.c.bf16 %v1431_v61, %v1430_v3 }
  0x64   : >> { %1935 = vmatpush3.bf16.msra.mxu0 %v1934_v40  ;;  %722 = vmatprep.mubr.f32.mxu0 %v277_v20  ;;  %v1942_v6 = vpack.c.bf16 %v1413_v32, %v1412_v37 }
  0x65   : >> { %1967 = vmatpush3.bf16.msra.mxu1 %v1964_v34  ;;  %1937 = vmatprep.subr.bf16.mxu0 %v1936_v42 }
  0x66   : >> { %1969 = vmatprep.subr.bf16.mxu1 %v1968_v45 }
  0x67   : >> { %723 = vmatmul.mubr.f32.gmra.mrb[20].mxu0 %v2661_v51  ;;  %v1415_v51 = vld [vmem:[%s2847_s1 + $0x368] sm:$0xff] }
  0x68   : >> { %1939 = vmatpush3.bf16.msra.mxu0 %v1938_v49  ;;  %727 = vmatprep.mubr.f32.mxu0 %v276_v33  ;;  %v1946_v24 = vpack.c.bf16 %v1415_v51, %v1414_v10  ;;  %v1450_v51 = vld [vmem:[%s2848_s2] ss:$0 sm:$0xff] }
  0x69   : >> { %1971 = vmatpush3.bf16.msra.mxu1 %v1968_v45  ;;  %1941 = vmatprep.subr.bf16.mxu0 %v1940_v57 }
  0x6a   : >> { %1973 = vmatprep.subr.bf16.mxu1 %v1972_v2 }
  0x6b   : >> { %728 = vmatmul.mubr.f32.gmra.mrb[22].mxu0 %v2671_v59  ;;  %v1417_v59 = vld [vmem:[%s2847_s1 + $0x378] sm:$0xff] }
  0x6c   : >> { %1943 = vmatpush3.bf16.msra.mxu0 %v1942_v6  ;;  %990 = vmatprep.mubr.f32.mxu0 %v845_v12  ;;  %v1950_v62 = vpack.c.bf16 %v1417_v59, %v1416_v27 }
  0x6d   : >> { %1975 = vmatpush3.bf16.msra.mxu1 %v1972_v2  ;;  %1945 = vmatprep.subr.bf16.mxu0 %v1944_v8 }
  0x6e   : >> { %1977 = vmatprep.subr.bf16.mxu1 %v1976_v17 }
  0x70   : >> { %1947 = vmatpush3.bf16.msra.mxu0 %v1946_v24 }
  0x71   : >> { %1979 = vmatpush3.bf16.msra.mxu1 %v1976_v17  ;;  %1949 = vmatprep.subr.bf16.mxu0 %v1948_v26 }
  0x72   : >> { %1981 = vmatprep.subr.bf16.mxu1 %v1980_v28 }
  0x74   : >> { %1951 = vmatpush3.bf16.msra.mxu0 %v1950_v62 }
  0x75   : >> { %1983 = vmatpush3.bf16.msra.mxu1 %v1980_v28 }
  0x77   : >> { %991 = vmatmul.mubr.f32.vlgmr.msra.gmra.mrb[24].mxu0 %v2685_v11 }
  0x78   : >> { %1784 = vmatmul.mubr.f32.vlgmr.msra.gmra.mrb[0].mxu1 %v2565_v50  ;;  %995 = vmatprep.mubr.f32.mxu0 %v2570_v9 }
  0x79   : >> { %1786 = vmatprep.mubr.f32.mxu1 %v2580_v13 }
  0x7b   : >> { %996 = vmatmul.mubr.f32.gmra.mrb[26].mxu0 %v2530_v47 }
  0x7c   : >> { %1787 = vmatmul.mubr.f32.gmra.mrb[2].mxu1 %v2583_v14  ;;  %1000 = vmatprep.mubr.f32.mxu0 %v2586_v15 }
  0x7d   : >> { %1789 = vmatprep.mubr.f32.mxu1 %v2601_v22 }
  0x7f   : >> { %1001 = vmatmul.mubr.f32.gmra.mrb[28].mxu0 %v2537_v54 }
  0x80   : >> { %1790 = vmatmul.mubr.f32.gmra.mrb[4].mxu1 %v869_v7  ;;  %1005 = vmatprep.mubr.f32.mxu0 %v2604_v23 }
  0x83   : >> { %1006 = vmatmul.mubr.f32.gmra.mrb[30].mxu0 %v2540_v55 }
  0x84   : >> { %1010 = vmatprep.mubr.f32.mxu0 %v2615_v25 }
  0x87   : >> { %1011 = vmatmul.mubr.f32.gmra.mrb[32].mxu0 %v2543_v56 }
  0x88   : >> { %1015 = vmatprep.mubr.f32.mxu0 %v852_v16 }
  0x8b   : >> { %1016 = vmatmul.mubr.f32.gmra.mrb[34].mxu0 %v2550_v63 }
 0x10a   : >> { %v1485_v47 = vpop.f32.mrb[0].mxu0 }
 0x10b   : >> { %v1486_v50 = vpop.f32.mrb[1].mxu0 }
 0x10c   : >> { %v1487_v9 = vadd.f32 %v1486_v50, %v1485_v47 }
 0x10e   : >> { %v1488_v54 = vpop.f32.mrb[2].mxu0 }
 0x10f   : >> { %v1489_v13 = vpop.f32.mrb[3].mxu0 }
 0x110   : >> { %v1490_v14 = vadd.f32 %v1489_v13, %v1488_v54 }
 0x112   : >> { %v1491_v7 = vpop.f32.mrb[4].mxu0 }
 0x113   : >> { %v1492_v15 = vpop.f32.mrb[5].mxu0 }
 0x114   : >> { %v1493_v22 = vadd.f32 %v1492_v15, %v1491_v7 }
 0x116   : >> { %v1494_v23 = vpop.f32.mrb[6].mxu0 }
 0x117   : >> { %v1495_v55 = vpop.f32.mrb[7].mxu0 }
 0x118   : >> { %v1496_v11 = vadd.f32 %v1495_v55, %v1494_v23 }
 0x11a   : >> { %v1497_v25 = vpop.f32.mrb[8].mxu0 }
 0x11b   : >> { %v1498_v29 = vpop.f32.mrb[9].mxu0 }
 0x11c   : >> { %v1499_v56 = vadd.f32 %v1498_v29, %v1497_v25 }
 0x11e   : >> { %v1500_v30 = vpop.f32.mrb[10].mxu0 }
 0x11f   : >> { %v1501_v31 = vpop.f32.mrb[11].mxu0 }
 0x120   : >> { %v1502_v16 = vadd.f32 %v1501_v31, %v1500_v30 }
 0x12a   : >> { %v1557_v33 = vpop.f32.mrb[12].mxu0 }
 0x12b   : >> { %v1558_v63 = vpop.f32.mrb[13].mxu0 }
 0x12c   : >> { %v1559_v34 = vadd.f32 %v1558_v63, %v1557_v33 }
 0x12e   : >> { %v1987_v35 = vadd.f32 %v1559_v34, %v1487_v9  ;;  %v1560_v36 = vpop.f32.mrb[14].mxu0 }
 0x12f   : >> { %v1561_v38 = vpop.f32.mrb[15].mxu0 }
 0x130   : >> { %v1562_v39 = vadd.f32 %v1561_v38, %v1560_v36 }
 0x132   : >> { %v1984_v40 = vadd.f32 %v1562_v39, %v1490_v14  ;;  %v1563_v41 = vpop.f32.mrb[16].mxu0 }
 0x133   : >> { %v1564_v20 = vpop.f32.mrb[17].mxu0 }
 0x134   : >> { %v1565_v42 = vadd.f32 %v1564_v20, %v1563_v41 }
 0x136   : >> { %v1993_v43 = vadd.f32 %v1565_v42, %v1493_v22  ;;  %v1566_v44 = vpop.f32.mrb[18].mxu0 }
 0x137   : >> { %v1567_v45 = vpop.f32.mrb[19].mxu0 }
 0x138   : >> { %v1568_v46 = vadd.f32 %v1567_v45, %v1566_v44 }
 0x13a   : >> { %v1990_v58 = vadd.f32 %v1568_v46, %v1496_v11  ;;  %v1569_v48 = vpop.f32.mrb[20].mxu0 }
 0x13b   : >> { %v1570_v53 = vpop.f32.mrb[21].mxu0 }
 0x13c   : >> { %v1571_v49 = vadd.f32 %v1570_v53, %v1569_v48 }
 0x13e   : >> { %v1999_v57 = vadd.f32 %v1571_v49, %v1499_v56  ;;  %v1572_v37 = vpop.f32.mrb[22].mxu0 }
 0x13f   : >> { %v1573_v32 = vpop.f32.mrb[23].mxu0 }
 0x140   : >> { %v1574_v60 = vadd.f32 %v1573_v32, %v1572_v37 }
 0x142   : >> { %v1996_v2 = vadd.f32 %v1574_v60, %v1502_v16 }
 0x14a   : >> { %v1629_v3 = vpop.f32.mrb[24].mxu0 }
 0x14b   : >> { %v1785_v61 = vpop.f32.mrb[0].mxu1  ;;  %v1630_v4 = vpop.f32.mrb[25].mxu0 }
 0x14c   : >> { %v1631_v5 = vadd.f32 %v1630_v4, %v1629_v3  ;;  %v1087_v6 = vpop.f32.mrb[1].mxu1 }
 0x14e   : >> { %v1988_v8 = vadd.f32 %v1987_v35, %v1631_v5  ;;  %v1632_v10 = vpop.f32.mrb[26].mxu0 }
 0x14f   : >> { %v1788_v12 = vpop.f32.mrb[2].mxu1  ;;  %v1633_v17 = vpop.f32.mrb[27].mxu0 }
 0x150   : >> { %v1989_v18 = vadd.f32 %v1988_v8, %v1087_v6  ;;  %v1634_v19 = vadd.f32 %v1633_v17, %v1632_v10  ;;  %v1097_v21 = vpop.f32.mrb[3].mxu1 }
 0x152   : >> { %v1129_v52 = vadd.f32 %v1989_v18, %v1450_v51  ;;  %v1985_v24 = vadd.f32 %v1984_v40, %v1634_v19  ;;  %v1635_v26 = vpop.f32.mrb[28].mxu0 }
 0x153   : >> { %v1791_v27 = vpop.f32.mrb[4].mxu1  ;;  %v1636_v59 = vpop.f32.mrb[29].mxu0 }
 0x154   : >> { %1137 = vst [vmem:[%s2819_s20] sm:$0xff] %v1129_v52  ;;  %v1986_v28 = vadd.f32 %v1985_v24, %v1785_v61  ;;  %v1637_v62 = vadd.f32 %v1636_v59, %v1635_v26  ;;  %v1107_v47 = vpop.f32.mrb[5].mxu1  ;;  %v1157_v13 = vmul.f32 %v1129_v52, %v1129_v52 }
 0x156   : >> { %v1130_v50 = vadd.f32 %v1986_v28, %v1450_v51  ;;  %v1994_v9 = vadd.f32 %v1993_v43, %v1637_v62  ;;  %v1638_v54 = vpop.f32.mrb[30].mxu0 }
 0x157   : >> { %v1639_v14 = vpop.f32.mrb[31].mxu0 }
 0x158   : >> { %1138 = vst [vmem:[%s2819_s20 + $0x8] sm:$0xff] %v1130_v50  ;;  %v1143_v7 = vadd.f32 %v1130_v50, %v1129_v52  ;;  %v1158_v15 = vmul.f32 %v1130_v50, %v1130_v50  ;;  %v1995_v22 = vadd.f32 %v1994_v9, %v1097_v21  ;;  %v1640_v23 = vadd.f32 %v1639_v14, %v1638_v54 }
 0x15a   : >> { %v1163_v55 = vadd.f32 %v1158_v15, %v1157_v13  ;;  %v1131_v11 = vadd.f32 %v1995_v22, %v1450_v51  ;;  %v1991_v25 = vadd.f32 %v1990_v58, %v1640_v23  ;;  %v1641_v29 = vpop.f32.mrb[32].mxu0 }
 0x15b   : >> { %v1642_v56 = vpop.f32.mrb[33].mxu0 }
 0x15c   : >> { %1139 = vst [vmem:[%s2819_s20 + $0x10] sm:$0xff] %v1131_v11  ;;  %v1144_v30 = vadd.f32 %v1143_v7, %v1131_v11  ;;  %v1159_v31 = vmul.f32 %v1131_v11, %v1131_v11  ;;  %v1992_v16 = vadd.f32 %v1991_v25, %v1788_v12  ;;  %v1643_v33 = vadd.f32 %v1642_v56, %v1641_v29 }
 0x15e   : >> { %v1164_v63 = vadd.f32 %v1163_v55, %v1159_v31  ;;  %v1132_v34 = vadd.f32 %v1992_v16, %v1450_v51  ;;  %v2000_v35 = vadd.f32 %v1999_v57, %v1643_v33  ;;  %v1644_v36 = vpop.f32.mrb[34].mxu0 }
 0x15f   : >> { %v1645_v38 = vpop.f32.mrb[35].mxu0 }
 0x160   : >> { %1140 = vst [vmem:[%s2819_s20 + $0x18] sm:$0xff] %v1132_v34  ;;  %v1145_v39 = vadd.f32 %v1144_v30, %v1132_v34  ;;  %v1160_v40 = vmul.f32 %v1132_v34, %v1132_v34  ;;  %v2001_v41 = vadd.f32 %v2000_v35, %v1107_v47  ;;  %v1646_v20 = vadd.f32 %v1645_v38, %v1644_v36 }
 0x162   : >> { %v1165_v42 = vadd.f32 %v1164_v63, %v1160_v40  ;;  %v1133_v43 = vadd.f32 %v2001_v41, %v1450_v51  ;;  %v1997_v44 = vadd.f32 %v1996_v2, %v1646_v20 }
 0x164   : >> { %1141 = vst [vmem:[%s2819_s20 + $0x20] sm:$0xff] %v1133_v43  ;;  %v1146_v45 = vadd.f32 %v1145_v39, %v1133_v43  ;;  %v1161_v46 = vmul.f32 %v1133_v43, %v1133_v43  ;;  %v1998_v58 = vadd.f32 %v1997_v44, %v1791_v27 }
 0x166   : >> { %v1166_v48 = vadd.f32 %v1165_v42, %v1161_v46  ;;  %v1134_v53 = vadd.f32 %v1998_v58, %v1450_v51 }
 0x168   : >> { %1142 = vst [vmem:[%s2819_s20 + $0x28] sm:$0xf] %v1134_v53  ;;  %v1148_v49 = vsel %vm1147_vm2, %v1134_v53, 0.0  ;;  %v1162_v57 = vmul.f32 %v1134_v53, %v1134_v53 }
 0x169   : >> { %v1149_v37 = vadd.f32 %v1148_v49, %v1146_v45 }
 0x16a   : >> { %v1167_v32 = vsel %vm1147_vm2, %v1162_v57, 0.0 }
 0x16b   : >> { %v1150_v60 = vrot.slane %v1149_v37, 4  ;;  %v1168_v3 = vadd.f32 %v1167_v32, %v1166_v48 }
 0x16d   : >> { %v1151_v61 = vadd.f32 %v1150_v60, %v1149_v37  ;;  %v1169_v4 = vrot.slane %v1168_v3, 4 }
 0x16f   : >> { %v1152_v5 = vrot.slane %v1151_v61, 2  ;;  %v1170_v6 = vadd.f32 %v1169_v4, %v1168_v3 }
 0x171   : >> { %v1153_v8 = vadd.f32 %v1152_v5, %v1151_v61  ;;  %v1171_v2 = vrot.slane %v1170_v6, 2 }
 0x173   : >> { %v1154_v10 = vrot.slane %v1153_v8, 1  ;;  %v1172_v12 = vadd.f32 %v1171_v2, %v1170_v6 }
 0x175   : >> { %v1155_v17 = vadd.f32 %v1154_v10, %v1153_v8  ;;  %v1173_v18 = vrot.slane %v1172_v12, 1  ;;  %247 = sbr.rel (!%p245_p5) target bundleno = 19 (0x13), region = 87 }
 0x177   : >> { %v1156_v19 = vadd.f32 %v2106_v1, %v1155_v17   ;;  %v1174_v51 = vadd.f32 %v1173_v18, %v1172_v12 }
 0x179   : >> { %v1175_v21 = vadd.f32 %v2102_v0, %v1174_v51   ;;  %v2852_v1 = vmov %v1156_v19 }
 0x17b   : >> { %v2851_v0 = vmov %v1175_v21  ;;  %v1177_v52 = vsel (%p245_p5), %vm1176_vm3, %v1156_v19, %v1175_v21 }
 0x17c   : > { %1178 = vst [vmem:[%s2158_s24] sm:$0x3] %v1177_v52 }
 0x17d PF: > { %s15_s17 = sadd.s32 1, %s2098_s17   ;;  %s2853_s15 = smov %s2094_s16 }
 0x17e   : > { %p12_p6 = scmp.ge.s32.totalorder %s15_s17, 4   ;;  %s2854_s16 = smov %s2856_s18 }
 0x180   :  { %14 = sbr.rel (!%p12_p6) target bundleno = 2 (0x2), region = 98 }

// kernel: discriminator_cnn_forward.12
= control target key start
LH: loop header
LB: loop body
LE: loop exit
PB: predicated region body
PF: predicated region fallthrough
CT: control target
= control target key end

     0   :  { %s742_s12 = smov 0   ;;  %s744_s13 = smov 0   ;;  %s878_s0 = inlined_call_operand.vmem [shape: f32[2,44,44,128], index: 0, kind: input, shape index: {}]   ;;  %s879_s1 = inlined_call_operand.vmem [shape: f32[1,128], index: 1, kind: input, shape index: {}]   ;;  %s880_s2 = inlined_call_operand.vmem [shape: f32[1,128], index: 2, kind: input, shape index: {}]   ;;  %s881_s3 = inlined_call_operand.vmem [shape: f32[2,14,14,128], index: 3, kind: output, shape index: {}]  }
   0x1   :  { %s746_s14 = smov 0  }
   0x2 LB: > { %s25_s15 = sadd.s32 1, %s710_s13  ;;  %p601_p0 = scmp.ge.s32.totalorder %s714_s14, 1  ;;  %s714_s14 = sphi %s746_s14, %s13_s14   ;;  %s710_s13 = sphi %s744_s13, %s883_s13   ;;  %s706_s12 = sphi %s742_s12, %s882_s12  }
   0x3   : > { %p27_p1 = scmp.ge.s32.totalorder %s25_s15, 2  ;;  %p169_p2 = scmp.lt.s32.totalorder %s714_s14, 3 }
   0x5   : > { %s885_s15 = smov (%p27_p1, %s25_s15), 0  ;;  %p170_p3 = pnand %p601_p0, %p169_p2 }
   0x6   : > { %p214_p4 = scmp.lt.s32.totalorder (!%p170_p3), %s706_s12, 1  ;;  %v763_v0 = vld [vmem:[%s879_s1] ss:$0 sm:$0xff] (!%p170_p3)  ;;  %v242_v2 = vlaneseq (!%p170_p3)  ;;  %v720_v8 = vmov (!%p170_p3), 0.0   ;;  %s784_s28 = smov (!%p170_p3), 0  }
   0x7   : > { %173 = sbr.rel (%p170_p3) target bundleno = 275 (0x113), region = 32  ;;  %v768_v1 = vld [vmem:[%s880_s2] ss:$0 sm:$0xff] (!%p170_p3) }
   0x8   : > { %v243_v3 = vshrl.u32 (!%p170_p3), %v242_v2, 7  ;;  %v246_v4 = vand.u32 (!%p170_p3), 127, %v242_v2 }
   0xa   : > { %v244_v5 = vadd.s32 (!%p170_p3), 8, %v243_v3  ;;  %v247_v6 = vmul.u32 (!%p170_p3), 3, %v243_v3 }
   0xc   : > { %v248_v7 = vmul.u32 (!%p170_p3), 3, %v244_v5  ;;  %vm249_vm0 = vcmp.eq.s32.totalorder (!%p170_p3), %v246_v4, %v247_v6 }
   0xd   : > { %v780_v9 = vsel (!%p170_p3), %vm249_vm0, 1.0, %v720_v8 }
   0xe   : > { %s887_s12 = smov (!%p214_p4, %s706_s12), 1  ;;  %vm250_vm1 = vcmp.eq.s32.totalorder %v246_v4, %v248_v7 }
   0xf   : > { %s652_s20 = smul.u32 2112, %s887_s12  ;;  %v782_v10 = vsel %vm250_vm1, 1.0, %v720_v8 }
  0x10   : > { %s653_s21 = smul.u32 224, %s887_s12 }
  0x11   : > { %s773_s24 = scalar_lea.vmem %s878_s0, %s652_s20 }
  0x12   : > { %s778_s27 = scalar_lea.vmem %s881_s3, %s653_s21 }
  0x13 LB: >> { %vm400_vm2 = vcmask 343040   ;;  %s606_s29 = smul.u32 144, %s718_s28  ;;  %vm352_vm3 = vcmask 1046528   ;;  %vm376_vm4 = vcmask 1045504   ;;  %vm340_vm5 = vcmask 1043456   ;;  %s612_s4 = sshll.u32 %s718_s28, 4  ;;  %s718_s28 = sphi %s784_s28, %s260_s28  }
  0x14   : >> { %635 = vmatprep.mubr.msk.f32.mxu0 %vm400_vm2, %v780_v9  ;;  %vm407_vm6 = vcmask 1041408   ;;  %vm721_vm7 = vmmov 1   ;;  %s489_s5 = scalar_lea.vmem %s778_s27, %s612_s4  ;;  %s260_s28 = sadd.s32 1, %s718_s28  }
  0x15   : >> { %s793_s30 = scalar_lea.vmem %s773_s24, %s606_s29  ;;  %vm647_vm8 = vmpackc.low %vm407_vm6, %vm721_vm7  ;;  %p257_p5 = scmp.ge.s32.totalorder %s260_s28, 14  }
  0x16   : >> { %v264_v11 = vld [vmem:[%s793_s30] sm:$0xff]  ;;  %v265_v12 = vld [vmem:[%s793_s30 + $0x8] sm:$0xff]  ;;  %v266_v13 = vld [vmem:[%s793_s30 + $0x10] sm:$0xff] }
  0x17   : >> { %v270_v14 = vld [vmem:[%s793_s30 + $0x30] sm:$0xff]  ;;  %v271_v15 = vld [vmem:[%s793_s30 + $0x38] sm:$0xff]  ;;  %v272_v16 = vld [vmem:[%s793_s30 + $0x40] sm:$0xff]  ;;  %v288_v17 = vmul.f32 %v763_v0, %v264_v11  ;;  %v289_v18 = vmul.f32 %v763_v0, %v265_v12  ;;  %v290_v19 = vmul.f32 %v763_v0, %v266_v13 }
  0x18   : >> { %v276_v20 = vld [vmem:[%s793_s30 + $0x60] sm:$0xff]  ;;  %v277_v21 = vld [vmem:[%s793_s30 + $0x68] sm:$0xff]  ;;  %v278_v22 = vld [vmem:[%s793_s30 + $0x70] sm:$0xff]  ;;  %v294_v23 = vmul.f32 %v763_v0, %v270_v14  ;;  %v295_v24 = vmul.f32 %v763_v0, %v271_v15  ;;  %v296_v25 = vmul.f32 %v763_v0, %v272_v16 }
  0x19   : >> { %v300_v26 = vmul.f32 %v763_v0, %v276_v20  ;;  %v301_v27 = vmul.f32 %v763_v0, %v277_v21  ;;  %v302_v28 = vmul.f32 %v763_v0, %v278_v22  ;;  %v312_v29 = vadd.f32 %v768_v1, %v288_v17  ;;  %v267_v30 = vld [vmem:[%s793_s30 + $0x18] sm:$0xff]  ;;  %v268_v31 = vld [vmem:[%s793_s30 + $0x20] sm:$0xff]  ;;  %v273_v36 = vld [vmem:[%s793_s30 + $0x48] sm:$0xff] }
  0x1a   : >> { %v313_v32 = vadd.f32 %v768_v1, %v289_v18  ;;  %v314_v33 = vadd.f32 %v768_v1, %v290_v19  ;;  %v318_v34 = vadd.f32 %v768_v1, %v294_v23  ;;  %v319_v35 = vadd.f32 %v768_v1, %v295_v24  ;;  %v274_v37 = vld [vmem:[%s793_s30 + $0x50] sm:$0xff]  ;;  %v279_v38 = vld [vmem:[%s793_s30 + $0x78] sm:$0xff]  ;;  %v280_v43 = vld [vmem:[%s793_s30 + $0x80] sm:$0xff] }
  0x1b   : >> { %v320_v39 = vadd.f32 %v768_v1, %v296_v25  ;;  %v324_v40 = vadd.f32 %v768_v1, %v300_v26  ;;  %v325_v41 = vadd.f32 %v768_v1, %v301_v27  ;;  %v326_v42 = vadd.f32 %v768_v1, %v302_v28  ;;  %v269_v2 = vld [vmem:[%s793_s30 + $0x28] sm:$0xf]  ;;  %v275_v7 = vld [vmem:[%s793_s30 + $0x58] sm:$0xf] }
  0x1c   : >> { %v330_v44 = vmax.f32 %v312_v29, %v318_v34  ;;  %v332_v45 = vmax.f32 %v313_v32, %v319_v35  ;;  %v291_v46 = vmul.f32 %v763_v0, %v267_v30  ;;  %v292_v47 = vmul.f32 %v763_v0, %v268_v31  ;;  %v281_v14 = vld [vmem:[%s793_s30 + $0x88] sm:$0xf] }
  0x1d   : >> { %v334_v48 = vmax.f32 %v314_v33, %v320_v39  ;;  %v297_v49 = vmul.f32 %v763_v0, %v273_v36  ;;  %v298_v50 = vmul.f32 %v763_v0, %v274_v37  ;;  %v303_v51 = vmul.f32 %v763_v0, %v279_v38 }
  0x1e   : >> { %v331_v52 = vmax.f32 %v330_v44, %v324_v40  ;;  %v333_v53 = vmax.f32 %v332_v45, %v325_v41  ;;  %v304_v54 = vmul.f32 %v763_v0, %v280_v43  ;;  %v315_v55 = vadd.f32 %v768_v1, %v291_v46 }
  0x1f   : >> { %v335_v56 = vmax.f32 %v334_v48, %v326_v42  ;;  %v316_v57 = vadd.f32 %v768_v1, %v292_v47  ;;  %v321_v58 = vadd.f32 %v768_v1, %v297_v49  ;;  %v322_v59 = vadd.f32 %v768_v1, %v298_v50 }
  0x20   : >> { %v353_v60 = vrot.slane %v331_v52, 1  ;;  %v354_v61 = vrot.slane %v333_v53, 1  ;;  %v377_v62 = vrot.slane %v331_v52, 2  ;;  %v378_v63 = vrot.slane %v333_v53, 2 }
  0x21   : >> { %v356_v3 = vrot.slane %v335_v56, 1  ;;  %v380_v4 = vrot.slane %v335_v56, 2  ;;  %v327_v5 = vadd.f32 %v768_v1, %v303_v51  ;;  %v328_v6 = vadd.f32 %v768_v1, %v304_v54 }
  0x22   : >> { %v355_v8 = vsel %vm352_vm3, %v353_v60, %v354_v61  ;;  %v379_v11 = vsel %vm376_vm4, %v377_v62, %v378_v63  ;;  %v336_v12 = vmax.f32 %v315_v55, %v321_v58  ;;  %v338_v13 = vmax.f32 %v316_v57, %v322_v59 }
  0x23   : >> { %v357_v15 = vsel %vm352_vm3, %v354_v61, %v356_v3  ;;  %v370_v16 = vmax.f32 %v331_v52, %v355_v8  ;;  %v381_v17 = vsel %vm376_vm4, %v378_v63, %v380_v4  ;;  %v293_v18 = vmul.f32 %v763_v0, %v269_v2 }
  0x24   : >> { %v371_v19 = vmax.f32 %v333_v53, %v357_v15  ;;  %v337_v20 = vmax.f32 %v336_v12, %v327_v5  ;;  %v339_v21 = vmax.f32 %v338_v13, %v328_v6  ;;  %v299_v22 = vmul.f32 %v763_v0, %v275_v7 }
  0x25   : >> { %v394_v23 = vmax.f32 %v370_v16, %v379_v11  ;;  %v305_v24 = vmul.f32 %v763_v0, %v281_v14  ;;  %v317_v25 = vadd.f32 %v768_v1, %v293_v18 }
  0x26   : >> { %v395_v26 = vmax.f32 %v371_v19, %v381_v17  ;;  %v358_v27 = vrot.slane %v337_v20, 1  ;;  %v360_v28 = vrot.slane %v339_v21, 1  ;;  %v382_v29 = vrot.slane %v337_v20, 2 }
  0x27   : >> { %v384_v30 = vrot.slane %v339_v21, 2  ;;  %v323_v31 = vadd.f32 %v768_v1, %v299_v22  ;;  %v329_v32 = vadd.f32 %v768_v1, %v305_v24  ;;  %v341_v33 = vsel %vm340_vm5, %v317_v25, -inf }
  0x28   : >> { %v638_v34 = vpack.c.bf16 %v395_v26, %v394_v23  ;;  %v359_v35 = vsel %vm352_vm3, %v356_v3, %v358_v27  ;;  %v361_v36 = vsel %vm352_vm3, %v358_v27, %v360_v28  ;;  %v383_v37 = vsel %vm376_vm4, %v380_v4, %v382_v29 }
  0x29   : >> { %v372_v38 = vmax.f32 %v335_v56, %v359_v35  ;;  %v373_v39 = vmax.f32 %v337_v20, %v361_v36  ;;  %v385_v40 = vsel %vm376_vm4, %v382_v29, %v384_v30  ;;  %v342_v41 = vsel %vm340_vm5, %v323_v31, -inf }
  0x2a   : >> { %639 = vmatprep.subr.bf16.mxu0 %v638_v34  ;;  %v343_v42 = vmax.f32 %v341_v33, %v342_v41  ;;  %v344_v43 = vsel %vm340_vm5, %v329_v32, -inf }
  0x2b   : >> { %641 = vmatpush3.bf16.msra.mxu0 %v638_v34  ;;  %v396_v44 = vmax.f32 %v372_v38, %v383_v37  ;;  %v397_v45 = vmax.f32 %v373_v39, %v385_v40 }
  0x2c   : >> { %v345_v46 = vmax.f32 %v343_v42, %v344_v43 }
  0x2d   : >> { %v642_v47 = vpack.c.bf16 %v397_v45, %v396_v44 }
  0x2e   : >> { %v362_v48 = vrot.slane %v345_v46, 1  ;;  %v386_v49 = vrot.slane %v345_v46, 2 }
  0x2f   : >> { %643 = vmatprep.subr.bf16.mxu0 %v642_v47 }
  0x30   : >> { %645 = vmatpush3.bf16.msra.mxu0 %v642_v47  ;;  %v363_v50 = vsel %vm352_vm3, %v360_v28, %v362_v48  ;;  %v375_v51 = vmax.f32 %v345_v46, %v362_v48  ;;  %v387_v52 = vsel %vm376_vm4, %v384_v30, %v386_v49 }
  0x31   : >> { %v374_v53 = vmax.f32 %v339_v21, %v363_v50 }
  0x32   : >> { %v399_v54 = vmax.f32 %v375_v51, %v386_v49 }
  0x33   : >> { %v398_v55 = vmax.f32 %v374_v53, %v387_v52 }
  0x35   : >> { %v646_v56 = vpack.c.bf16 %v399_v54, %v398_v55 }
  0x37   : >> { %648 = vmatprep.subr.msk.bf16.mxu0 %vm647_vm8, %v646_v56 }
  0x38   : >> { %651 = vmatpush3.bf16.msk.msra.mxu0 %vm647_vm8, %v646_v56 }
  0x3b   : >> { %636 = vmatmul.mubr.msk.f32.vlgmr.msra.gmra.mrb[0].mxu0 %vm400_vm2, %v782_v10 }
 0x10c   : > { %259 = sbr.rel (!%p257_p5) target bundleno = 19 (0x13), region = 71 }
 0x10e   : >> { %v637_v57 = vpop.f32.mrb[0].mxu0 }
 0x10f   : >> { %v487_v58 = vmax.f32 %v637_v57, 0.0  ;;  %v477_v59 = vpop.f32.mrb[1].mxu0 }
 0x110   : >> { %v486_v60 = vmax.f32 %v477_v59, 0.0 }
 0x111   : >> { %491 = vst [vmem:[%s489_s5 + $0x8] sm:$0x3f] %v487_v58 }
 0x112   : >> { %490 = vst [vmem:[%s489_s5] sm:$0xff] %v486_v60 }
 0x113 PF: > { %s13_s14 = sadd.s32 1, %s714_s14   ;;  %s882_s12 = smov %s710_s13 }
 0x114   : > { %p10_p6 = scmp.ge.s32.totalorder %s13_s14, 4   ;;  %s883_s13 = smov %s885_s15 }
 0x116   :  { %12 = sbr.rel (!%p10_p6) target bundleno = 2 (0x2), region = 82 }

// kernel: discriminator_cnn_forward.14
= control target key start
LH: loop header
LB: loop body
LE: loop exit
PB: predicated region body
PF: predicated region fallthrough
CT: control target
= control target key end

     0   :  { %s701_s0 = inlined_call_operand.vmem [shape: f32[392,128], index: 0, kind: input, shape index: {}]   ;;  %s702_s1 = inlined_call_operand.vmem [shape: f32[1,128], index: 1, kind: input, shape index: {}]   ;;  %s703_s2 = inlined_call_operand.vmem [shape: f32[1,128], index: 2, kind: input, shape index: {}]   ;;  %s704_s3 = inlined_call_operand.vmem [shape: f32[392,128], index: 3, kind: output, shape index: {}]  }
   0x1   :  { %v14_v0 = vld [vmem:[%s701_s0] sm:$0xff]  ;;  %v15_v4 = vld [vmem:[%s701_s0 + $0x8] sm:$0xff]  ;;  %v16_v5 = vld [vmem:[%s701_s0 + $0x10] sm:$0xff] }
   0x2   :  { %v305_v1 = vld [vmem:[%s702_s1] ss:$0 sm:$0xff]  ;;  %v17_v6 = vld [vmem:[%s701_s0 + $0x18] sm:$0xff]  ;;  %v19_v11 = vld [vmem:[%s701_s0 + $0x28] sm:$0xff] }
   0x3   :  { %v310_v2 = vld [vmem:[%s703_s2] ss:$0 sm:$0xff]  ;;  %v70_v3 = vmul.f32 %v305_v1, %v14_v0  ;;  %v71_v7 = vmul.f32 %v305_v1, %v15_v4  ;;  %v72_v8 = vmul.f32 %v305_v1, %v16_v5  ;;  %v73_v9 = vmul.f32 %v305_v1, %v17_v6  ;;  %v20_v12 = vld [vmem:[%s701_s0 + $0x30] sm:$0xff]  ;;  %v21_v17 = vld [vmem:[%s701_s0 + $0x38] sm:$0xff] }
   0x4   :  { %v18_v10 = vld [vmem:[%s701_s0 + $0x20] sm:$0xff]  ;;  %v75_v15 = vmul.f32 %v305_v1, %v19_v11  ;;  %v76_v16 = vmul.f32 %v305_v1, %v20_v12  ;;  %v77_v21 = vmul.f32 %v305_v1, %v21_v17  ;;  %v23_v27 = vld [vmem:[%s701_s0 + $0x48] sm:$0xff]  ;;  %v24_v28 = vld [vmem:[%s701_s0 + $0x50] sm:$0xff] }
   0x5   :  { %v126_v13 = vadd.f32 %v310_v2, %v70_v3  ;;  %v74_v14 = vmul.f32 %v305_v1, %v18_v10  ;;  %v127_v18 = vadd.f32 %v310_v2, %v71_v7  ;;  %v128_v19 = vadd.f32 %v310_v2, %v72_v8  ;;  %v22_v22 = vld [vmem:[%s701_s0 + $0x40] sm:$0xff]  ;;  %v25_v29 = vld [vmem:[%s701_s0 + $0x58] sm:$0xff]  ;;  %v27_v35 = vld [vmem:[%s701_s0 + $0x68] sm:$0xff] }
   0x6   :  { %v129_v20 = vadd.f32 %v310_v2, %v73_v9  ;;  %v131_v25 = vadd.f32 %v310_v2, %v75_v15  ;;  %v132_v26 = vadd.f32 %v310_v2, %v76_v16  ;;  %v133_v33 = vadd.f32 %v310_v2, %v77_v21  ;;  %v26_v34 = vld [vmem:[%s701_s0 + $0x60] sm:$0xff]  ;;  %v28_v36 = vld [vmem:[%s701_s0 + $0x70] sm:$0xff]  ;;  %v29_v41 = vld [vmem:[%s701_s0 + $0x78] sm:$0xff] }
   0x7   :  { %v175_v23 = vmax.f32 %v126_v13, 0.0  ;;  %v130_v24 = vadd.f32 %v310_v2, %v74_v14  ;;  %v176_v30 = vmax.f32 %v127_v18, 0.0  ;;  %v177_v31 = vmax.f32 %v128_v19, 0.0  ;;  %v30_v54 = vld [vmem:[%s701_s0 + $0x80] sm:$0xff]  ;;  %v31_v59 = vld [vmem:[%s701_s0 + $0x88] sm:$0xff]  ;;  %v32_v60 = vld [vmem:[%s701_s0 + $0x90] sm:$0xff] }
   0x8   :  { %v178_v32 = vmax.f32 %v129_v20, 0.0  ;;  %v180_v38 = vmax.f32 %v131_v25, 0.0  ;;  %v181_v39 = vmax.f32 %v132_v26, 0.0  ;;  %v78_v40 = vmul.f32 %v305_v1, %v22_v22  ;;  %v33_v61 = vld [vmem:[%s701_s0 + $0x98] sm:$0xff]  ;;  %v34_v4 = vld [vmem:[%s701_s0 + $0xa0] sm:$0xff]  ;;  %v35_v5 = vld [vmem:[%s701_s0 + $0xa8] sm:$0xff] }
   0x9   :  { %224 = vst [vmem:[%s704_s3] sm:$0xff] %v175_v23  ;;  %v179_v37 = vmax.f32 %v130_v24, 0.0  ;;  %225 = vst [vmem:[%s704_s3 + $0x8] sm:$0xff] %v176_v30  ;;  %v182_v42 = vmax.f32 %v133_v33, 0.0  ;;  %v79_v43 = vmul.f32 %v305_v1, %v23_v27  ;;  %v80_v44 = vmul.f32 %v305_v1, %v24_v28  ;;  %v36_v6 = vld [vmem:[%s701_s0 + $0xb0] sm:$0xff]  ;;  %v37_v11 = vld [vmem:[%s701_s0 + $0xb8] sm:$0xff] }
   0xa   :  { %226 = vst [vmem:[%s704_s3 + $0x10] sm:$0xff] %v177_v31  ;;  %227 = vst [vmem:[%s704_s3 + $0x18] sm:$0xff] %v178_v32  ;;  %v81_v45 = vmul.f32 %v305_v1, %v25_v29  ;;  %v134_v46 = vadd.f32 %v310_v2, %v78_v40  ;;  %v82_v47 = vmul.f32 %v305_v1, %v26_v34  ;;  %v38_v24 = vld [vmem:[%s701_s0 + $0xc0] sm:$0xff]  ;;  %v39_v29 = vld [vmem:[%s701_s0 + $0xc8] sm:$0xff] }
   0xb   :  { %228 = vst [vmem:[%s704_s3 + $0x20] sm:$0xff] %v179_v37  ;;  %229 = vst [vmem:[%s704_s3 + $0x28] sm:$0xff] %v180_v38  ;;  %v83_v48 = vmul.f32 %v305_v1, %v27_v35  ;;  %v84_v49 = vmul.f32 %v305_v1, %v28_v36  ;;  %v135_v50 = vadd.f32 %v310_v2, %v79_v43  ;;  %v40_v30 = vld [vmem:[%s701_s0 + $0xd0] sm:$0xff]  ;;  %v41_v31 = vld [vmem:[%s701_s0 + $0xd8] sm:$0xff] }
   0xc   :  { %230 = vst [vmem:[%s704_s3 + $0x30] sm:$0xff] %v181_v39  ;;  %231 = vst [vmem:[%s704_s3 + $0x38] sm:$0xff] %v182_v42  ;;  %v136_v51 = vadd.f32 %v310_v2, %v80_v44  ;;  %v137_v52 = vadd.f32 %v310_v2, %v81_v45  ;;  %v85_v53 = vmul.f32 %v305_v1, %v29_v41  ;;  %v183_v55 = vmax.f32 %v134_v46, 0.0  ;;  %v42_v36 = vld [vmem:[%s701_s0 + $0xe0] sm:$0xff]  ;;  %v43_v37 = vld [vmem:[%s701_s0 + $0xe8] sm:$0xff] }
   0xd   :  { %v138_v56 = vadd.f32 %v310_v2, %v82_v47  ;;  %v139_v57 = vadd.f32 %v310_v2, %v83_v48  ;;  %v140_v58 = vadd.f32 %v310_v2, %v84_v49  ;;  %v184_v62 = vmax.f32 %v135_v50, 0.0  ;;  %v44_v38 = vld [vmem:[%s701_s0 + $0xf0] sm:$0xff]  ;;  %v45_v43 = vld [vmem:[%s701_s0 + $0xf8] sm:$0xff] }
   0xe   :  { %v185_v63 = vmax.f32 %v136_v51, 0.0  ;;  %v186_v0 = vmax.f32 %v137_v52, 0.0  ;;  %v141_v3 = vadd.f32 %v310_v2, %v85_v53  ;;  %232 = vst [vmem:[%s704_s3 + $0x40] sm:$0xff] %v183_v55  ;;  %v86_v10 = vmul.f32 %v305_v1, %v30_v54 }
   0xf   :  { %v187_v7 = vmax.f32 %v138_v56, 0.0  ;;  %v188_v8 = vmax.f32 %v139_v57, 0.0  ;;  %v189_v9 = vmax.f32 %v140_v58, 0.0  ;;  %233 = vst [vmem:[%s704_s3 + $0x48] sm:$0xff] %v184_v62  ;;  %v87_v13 = vmul.f32 %v305_v1, %v31_v59  ;;  %v46_v56 = vld [vmem:[%s701_s0 + $0x100] sm:$0xff]  ;;  %v48_v62 = vld [vmem:[%s701_s0 + $0x110] sm:$0xff] }
  0x10   :  { %234 = vst [vmem:[%s704_s3 + $0x50] sm:$0xff] %v185_v63  ;;  %235 = vst [vmem:[%s704_s3 + $0x58] sm:$0xff] %v186_v0  ;;  %v190_v12 = vmax.f32 %v141_v3, 0.0  ;;  %v88_v14 = vmul.f32 %v305_v1, %v32_v60  ;;  %v89_v15 = vmul.f32 %v305_v1, %v33_v61  ;;  %v142_v16 = vadd.f32 %v310_v2, %v86_v10  ;;  %v47_v61 = vld [vmem:[%s701_s0 + $0x108] sm:$0xff]  ;;  %v49_v63 = vld [vmem:[%s701_s0 + $0x118] sm:$0xff] }
  0x11   :  { %236 = vst [vmem:[%s704_s3 + $0x60] sm:$0xff] %v187_v7  ;;  %237 = vst [vmem:[%s704_s3 + $0x68] sm:$0xff] %v188_v8  ;;  %v90_v17 = vmul.f32 %v305_v1, %v34_v4  ;;  %v91_v18 = vmul.f32 %v305_v1, %v35_v5  ;;  %v92_v19 = vmul.f32 %v305_v1, %v36_v6  ;;  %v50_v6 = vld [vmem:[%s701_s0 + $0x120] sm:$0xff]  ;;  %v51_v7 = vld [vmem:[%s701_s0 + $0x128] sm:$0xff] }
  0x12   :  { %238 = vst [vmem:[%s704_s3 + $0x70] sm:$0xff] %v189_v9  ;;  %239 = vst [vmem:[%s704_s3 + $0x78] sm:$0xff] %v190_v12  ;;  %v143_v20 = vadd.f32 %v310_v2, %v87_v13  ;;  %v144_v21 = vadd.f32 %v310_v2, %v88_v14  ;;  %v145_v22 = vadd.f32 %v310_v2, %v89_v15  ;;  %v191_v25 = vmax.f32 %v142_v16, 0.0  ;;  %v52_v8 = vld [vmem:[%s701_s0 + $0x130] sm:$0xff]  ;;  %v53_v13 = vld [vmem:[%s701_s0 + $0x138] sm:$0xff] }
  0x13   :  { %v93_v23 = vmul.f32 %v305_v1, %v37_v11  ;;  %v146_v26 = vadd.f32 %v310_v2, %v90_v17  ;;  %v147_v27 = vadd.f32 %v310_v2, %v91_v18  ;;  %v148_v28 = vadd.f32 %v310_v2, %v92_v19 }
  0x14   :  { %v192_v32 = vmax.f32 %v143_v20, 0.0  ;;  %v193_v33 = vmax.f32 %v144_v21, 0.0  ;;  %v194_v34 = vmax.f32 %v145_v22, 0.0  ;;  %240 = vst [vmem:[%s704_s3 + $0x80] sm:$0xff] %v191_v25  ;;  %v94_v42 = vmul.f32 %v305_v1, %v38_v24 }
  0x15   :  { %v149_v35 = vadd.f32 %v310_v2, %v93_v23  ;;  %v195_v39 = vmax.f32 %v146_v26, 0.0  ;;  %v196_v40 = vmax.f32 %v147_v27, 0.0  ;;  %v197_v41 = vmax.f32 %v148_v28, 0.0  ;;  %v54_v26 = vld [vmem:[%s701_s0 + $0x140] sm:$0xff] }
  0x16   :  { %241 = vst [vmem:[%s704_s3 + $0x88] sm:$0xff] %v192_v32  ;;  %242 = vst [vmem:[%s704_s3 + $0x90] sm:$0xff] %v193_v33  ;;  %v95_v45 = vmul.f32 %v305_v1, %v39_v29  ;;  %v96_v46 = vmul.f32 %v305_v1, %v40_v30  ;;  %v97_v47 = vmul.f32 %v305_v1, %v41_v31  ;;  %v55_v31 = vld [vmem:[%s701_s0 + $0x148] sm:$0xff]  ;;  %v56_v32 = vld [vmem:[%s701_s0 + $0x150] sm:$0xff] }
  0x17   :  { %243 = vst [vmem:[%s704_s3 + $0x98] sm:$0xff] %v194_v34  ;;  %v198_v44 = vmax.f32 %v149_v35, 0.0  ;;  %244 = vst [vmem:[%s704_s3 + $0xa0] sm:$0xff] %v195_v39  ;;  %v150_v48 = vadd.f32 %v310_v2, %v94_v42  ;;  %v98_v49 = vmul.f32 %v305_v1, %v42_v36  ;;  %v99_v50 = vmul.f32 %v305_v1, %v43_v37  ;;  %v57_v33 = vld [vmem:[%s701_s0 + $0x158] sm:$0xff]  ;;  %v59_v39 = vld [vmem:[%s701_s0 + $0x168] sm:$0xff] }
  0x18   :  { %245 = vst [vmem:[%s704_s3 + $0xa8] sm:$0xff] %v196_v40  ;;  %246 = vst [vmem:[%s704_s3 + $0xb0] sm:$0xff] %v197_v41  ;;  %v100_v51 = vmul.f32 %v305_v1, %v44_v38  ;;  %v151_v52 = vadd.f32 %v310_v2, %v95_v45  ;;  %v152_v53 = vadd.f32 %v310_v2, %v96_v46  ;;  %v58_v38 = vld [vmem:[%s701_s0 + $0x160] sm:$0xff]  ;;  %v60_v40 = vld [vmem:[%s701_s0 + $0x170] sm:$0xff] }
  0x19   :  { %247 = vst [vmem:[%s704_s3 + $0xb8] sm:$0xff] %v198_v44  ;;  %v153_v54 = vadd.f32 %v310_v2, %v97_v47  ;;  %v101_v55 = vmul.f32 %v305_v1, %v45_v43  ;;  %v199_v57 = vmax.f32 %v150_v48, 0.0  ;;  %v154_v58 = vadd.f32 %v310_v2, %v98_v49  ;;  %v61_v45 = vld [vmem:[%s701_s0 + $0x178] sm:$0xff] }
  0x1a   :  { %v155_v59 = vadd.f32 %v310_v2, %v99_v50  ;;  %v156_v60 = vadd.f32 %v310_v2, %v100_v51  ;;  %v200_v0 = vmax.f32 %v151_v52, 0.0  ;;  %v201_v3 = vmax.f32 %v152_v53, 0.0 }
  0x1b   :  { %v202_v4 = vmax.f32 %v153_v54, 0.0  ;;  %v157_v5 = vadd.f32 %v310_v2, %v101_v55  ;;  %248 = vst [vmem:[%s704_s3 + $0xc0] sm:$0xff] %v199_v57  ;;  %v203_v9 = vmax.f32 %v154_v58, 0.0  ;;  %v102_v12 = vmul.f32 %v305_v1, %v46_v56  ;;  %v62_v58 = vld [vmem:[%s701_s0 + $0x180] sm:$0xff] }
  0x1c   :  { %v204_v10 = vmax.f32 %v155_v59, 0.0  ;;  %v205_v11 = vmax.f32 %v156_v60, 0.0  ;;  %249 = vst [vmem:[%s704_s3 + $0xc8] sm:$0xff] %v200_v0  ;;  %250 = vst [vmem:[%s704_s3 + $0xd0] sm:$0xff] %v201_v3  ;;  %v103_v15 = vmul.f32 %v305_v1, %v47_v61  ;;  %v104_v16 = vmul.f32 %v305_v1, %v48_v62 }
  0x1d   :  { %251 = vst [vmem:[%s704_s3 + $0xd8] sm:$0xff] %v202_v4  ;;  %v206_v14 = vmax.f32 %v157_v5, 0.0  ;;  %v105_v17 = vmul.f32 %v305_v1, %v49_v63  ;;  %252 = vst [vmem:[%s704_s3 + $0xe0] sm:$0xff] %v203_v9  ;;  %v158_v18 = vadd.f32 %v310_v2, %v102_v12  ;;  %v106_v19 = vmul.f32 %v305_v1, %v50_v6 }
  0x1e   :  { %253 = vst [vmem:[%s704_s3 + $0xe8] sm:$0xff] %v204_v10  ;;  %254 = vst [vmem:[%s704_s3 + $0xf0] sm:$0xff] %v205_v11  ;;  %v107_v20 = vmul.f32 %v305_v1, %v51_v7  ;;  %v108_v21 = vmul.f32 %v305_v1, %v52_v8  ;;  %v159_v22 = vadd.f32 %v310_v2, %v103_v15 }
  0x1f   :  { %255 = vst [vmem:[%s704_s3 + $0xf8] sm:$0xff] %v206_v14  ;;  %v160_v23 = vadd.f32 %v310_v2, %v104_v16  ;;  %v161_v24 = vadd.f32 %v310_v2, %v105_v17  ;;  %v109_v25 = vmul.f32 %v305_v1, %v53_v13  ;;  %v207_v27 = vmax.f32 %v158_v18, 0.0 }
  0x20   :  { %v162_v28 = vadd.f32 %v310_v2, %v106_v19  ;;  %v163_v29 = vadd.f32 %v310_v2, %v107_v20  ;;  %v164_v30 = vadd.f32 %v310_v2, %v108_v21  ;;  %v208_v34 = vmax.f32 %v159_v22, 0.0 }
  0x21   :  { %v209_v35 = vmax.f32 %v160_v23, 0.0  ;;  %v210_v36 = vmax.f32 %v161_v24, 0.0  ;;  %v165_v37 = vadd.f32 %v310_v2, %v109_v25  ;;  %256 = vst [vmem:[%s704_s3 + $0x100] sm:$0xff] %v207_v27  ;;  %v110_v44 = vmul.f32 %v305_v1, %v54_v26 }
  0x22   :  { %v211_v41 = vmax.f32 %v162_v28, 0.0  ;;  %v212_v42 = vmax.f32 %v163_v29, 0.0  ;;  %v213_v43 = vmax.f32 %v164_v30, 0.0  ;;  %257 = vst [vmem:[%s704_s3 + $0x108] sm:$0xff] %v208_v34  ;;  %v111_v47 = vmul.f32 %v305_v1, %v55_v31 }
  0x23   :  { %258 = vst [vmem:[%s704_s3 + $0x110] sm:$0xff] %v209_v35  ;;  %259 = vst [vmem:[%s704_s3 + $0x118] sm:$0xff] %v210_v36  ;;  %v214_v46 = vmax.f32 %v165_v37, 0.0  ;;  %v112_v48 = vmul.f32 %v305_v1, %v56_v32  ;;  %v113_v49 = vmul.f32 %v305_v1, %v57_v33  ;;  %v166_v50 = vadd.f32 %v310_v2, %v110_v44 }
  0x24   :  { %260 = vst [vmem:[%s704_s3 + $0x120] sm:$0xff] %v211_v41  ;;  %261 = vst [vmem:[%s704_s3 + $0x128] sm:$0xff] %v212_v42  ;;  %v114_v51 = vmul.f32 %v305_v1, %v58_v38  ;;  %v115_v52 = vmul.f32 %v305_v1, %v59_v39  ;;  %v116_v53 = vmul.f32 %v305_v1, %v60_v40 }
  0x25   :  { %262 = vst [vmem:[%s704_s3 + $0x130] sm:$0xff] %v213_v43  ;;  %263 = vst [vmem:[%s704_s3 + $0x138] sm:$0xff] %v214_v46  ;;  %v167_v54 = vadd.f32 %v310_v2, %v111_v47  ;;  %v168_v55 = vadd.f32 %v310_v2, %v112_v48  ;;  %v169_v56 = vadd.f32 %v310_v2, %v113_v49  ;;  %v215_v59 = vmax.f32 %v166_v50, 0.0 }
  0x26   :  { %v117_v57 = vmul.f32 %v305_v1, %v61_v45  ;;  %v170_v60 = vadd.f32 %v310_v2, %v114_v51  ;;  %v171_v61 = vadd.f32 %v310_v2, %v115_v52  ;;  %v172_v62 = vadd.f32 %v310_v2, %v116_v53 }
  0x27   :  { %v216_v63 = vmax.f32 %v167_v54, 0.0  ;;  %v217_v0 = vmax.f32 %v168_v55, 0.0  ;;  %v218_v3 = vmax.f32 %v169_v56, 0.0  ;;  %264 = vst [vmem:[%s704_s3 + $0x140] sm:$0xff] %v215_v59  ;;  %v118_v8 = vmul.f32 %v305_v1, %v62_v58 }
  0x28   :  { %v173_v4 = vadd.f32 %v310_v2, %v117_v57  ;;  %v219_v5 = vmax.f32 %v170_v60, 0.0  ;;  %v220_v6 = vmax.f32 %v171_v61, 0.0  ;;  %v221_v7 = vmax.f32 %v172_v62, 0.0 }
  0x29   :  { %265 = vst [vmem:[%s704_s3 + $0x148] sm:$0xff] %v216_v63  ;;  %266 = vst [vmem:[%s704_s3 + $0x150] sm:$0xff] %v217_v0  ;;  %v174_v1 = vadd.f32 %v310_v2, %v118_v8 }
  0x2a   :  { %267 = vst [vmem:[%s704_s3 + $0x158] sm:$0xff] %v218_v3  ;;  %v222_v9 = vmax.f32 %v173_v4, 0.0  ;;  %268 = vst [vmem:[%s704_s3 + $0x160] sm:$0xff] %v219_v5 }
  0x2b   :  { %269 = vst [vmem:[%s704_s3 + $0x168] sm:$0xff] %v220_v6  ;;  %270 = vst [vmem:[%s704_s3 + $0x170] sm:$0xff] %v221_v7  ;;  %v223_v10 = vmax.f32 %v174_v1, 0.0 }
  0x2c   :  { %271 = vst [vmem:[%s704_s3 + $0x178] sm:$0xff] %v222_v9 }
  0x2d   :  { %272 = vst [vmem:[%s704_s3 + $0x180] sm:$0xff] %v223_v10 }

// kernel: discriminator_cnn_forward.13
= control target key start
LH: loop header
LB: loop body
LE: loop exit
PB: predicated region body
PF: predicated region fallthrough
CT: control target
= control target key end

     0   :  { %s1807_s15 = smov 0   ;;  %s1809_s16 = smov 0   ;;  %s2386_s0 = inlined_call_operand.vmem [shape: f32[2,16,16,128], index: 0, kind: input, shape index: {}]   ;;  %s2387_s1 = inlined_call_operand.vmem [shape: f32[3,384,128], index: 1, kind: input, shape index: {}]   ;;  %s2388_s2 = inlined_call_operand.vmem [shape: f32[1,128], index: 2, kind: input, shape index: {}]   ;;  %s2389_s3 = inlined_call_operand.vmem [shape: f32[2,14,14,128], index: 3, kind: output, shape index: {0}]   ;;  %s2390_s4 = inlined_call_operand.vmem [shape: f32[2,1,2,128], index: 4, kind: output, shape index: {1}]  }
   0x1   :  { %s1811_s17 = smov 0  }
   0x2 LB: > { %s27_s18 = sadd.s32 1, %s1764_s16  ;;  %p1097_p0 = scmp.ge.s32.totalorder %s1768_s17, 1  ;;  %s1768_s17 = sphi %s1811_s17, %s15_s17   ;;  %s1764_s16 = sphi %s1809_s16, %s2394_s16   ;;  %s1760_s15 = sphi %s1807_s15, %s2393_s15  }
   0x3   : > { %p29_p1 = scmp.ge.s32.totalorder %s27_s18, 2  ;;  %p181_p2 = scmp.lt.s32.totalorder %s1768_s17, 3 }
   0x5   : > { %s2396_s18 = smov (%p29_p1, %s27_s18), 0  ;;  %p182_p3 = pnand %p1097_p0, %p181_p2 }
   0x6   : > { %p219_p4 = scmp.lt.s32.totalorder (!%p182_p3), %s1760_s15, 1  ;;  %v1840_v0 = vmov (!%p182_p3), 0.0   ;;  %v1842_v1 = vmov (!%p182_p3), 0.0   ;;  %s1844_s5 = smov (!%p182_p3), 0  }
   0x7   : > { %185 = sbr.rel (%p182_p3) target bundleno = 364 (0x16c), region = 32 }
   0xe   : > { %s2398_s15 = smov (!%p219_p4, %s1760_s15), 1 }
   0xf   : > { %s1209_s19 = sshll.u32 %s2398_s15, 8  ;;  %s1685_s20 = smul.u32 224, %s2398_s15 }
  0x10   : > { %s1828_s23 = scalar_lea.vmem %s2386_s0, %s1209_s19  ;;  %s1101_s24 = sshll.u32 %s2398_s15, 1 }
  0x11   : > { %s1833_s27 = scalar_lea.vmem %s2389_s3, %s1685_s20  ;;  %s1838_s30 = scalar_lea.vmem %s2390_s4, %s1101_s24 }
  0x12 LB: >> { %v1122_v2 = vld [vmem:[%s2387_s1 + $0x200] sm:$0xff]  ;;  %v1123_v3 = vld [vmem:[%s2387_s1 + $0x208] sm:$0xff]  ;;  %v1124_v11 = vld [vmem:[%s2387_s1 + $0x210] sm:$0xff]  ;;  %s1102_s24 = sshll.u32 %s1780_s5, 4  ;;  %vm258_vm0 = vcmask 1046528   ;;  %vm264_vm1 = vcmask 1045504   ;;  %s1780_s5 = sphi %s1844_s5, %s248_s5   ;;  %v1776_v1 = vphi %v1842_v1, %v2392_v1   ;;  %v1772_v0 = vphi %v1840_v0, %v2391_v0  }
  0x13   : >> { %v1138_v4 = vld [vmem:[%s2387_s1 + $0x280] sm:$0xff]  ;;  %v1483_v5 = vpack.c.bf16 %v1123_v3, %v1122_v2  ;;  %v1139_v6 = vld [vmem:[%s2387_s1 + $0x288] sm:$0xff]  ;;  %v1125_v12 = vld [vmem:[%s2387_s1 + $0x218] sm:$0xff]  ;;  %s1955_s14 = scalar_lea.vmem %s1828_s23, %s1102_s24  ;;  %s912_s15 = scalar_lea.vmem %s1833_s27, %s1102_s24 }
  0x14   : >> { %v1106_v7 = vld [vmem:[%s2387_s1 + $0x180] sm:$0xff]  ;;  %v1107_v8 = vld [vmem:[%s2387_s1 + $0x188] sm:$0xff]  ;;  %v1515_v9 = vpack.c.bf16 %v1139_v6, %v1138_v4  ;;  %v1140_v13 = vld [vmem:[%s2387_s1 + $0x290] sm:$0xff]  ;;  %v1487_v14 = vpack.c.bf16 %v1125_v12, %v1124_v11  ;;  %s248_s5 = sadd.s32 1, %s1780_s5  }
  0x15   : >> { %v1485_v10 = vpack.c.bf16 %v1107_v8, %v1106_v7  ;;  %1484 = vmatprep.subr.bf16.mxu0 %v1483_v5  ;;  %v1141_v15 = vld [vmem:[%s2387_s1 + $0x298] sm:$0xff]  ;;  %v1108_v16 = vld [vmem:[%s2387_s1 + $0x190] sm:$0xff]  ;;  %v1126_v20 = vld [vmem:[%s2387_s1 + $0x220] sm:$0xff]  ;;  %p245_p5 = scmp.ge.s32.totalorder %s248_s5, 14  }
  0x16   : >> { %v1109_v17 = vld [vmem:[%s2387_s1 + $0x198] sm:$0xff]  ;;  %1516 = vmatprep.subr.bf16.mxu1 %v1515_v9  ;;  %v1519_v18 = vpack.c.bf16 %v1141_v15, %v1140_v13  ;;  %v1127_v21 = vld [vmem:[%s2387_s1 + $0x228] sm:$0xff]  ;;  %v1142_v22 = vld [vmem:[%s2387_s1 + $0x2a0] sm:$0xff]  ;;  %vm935_vm2 = vcmask (%p245_p5), 1040384  }
  0x17   : >> { %1486 = vmatpush3.bf16.msra.mxu0 %v1485_v10  ;;  %v1489_v19 = vpack.c.bf16 %v1109_v17, %v1108_v16  ;;  %1518 = vmatpush3.bf16.msra.mxu1 %v1515_v9  ;;  %v1491_v23 = vpack.c.bf16 %v1127_v21, %v1126_v20  ;;  %v1143_v24 = vld [vmem:[%s2387_s1 + $0x2a8] sm:$0xff]  ;;  %v1110_v25 = vld [vmem:[%s2387_s1 + $0x1a0] sm:$0xff]  ;;  %v1128_v28 = vld [vmem:[%s2387_s1 + $0x230] sm:$0xff] }
  0x18   : >> { %1488 = vmatprep.subr.bf16.mxu0 %v1487_v14  ;;  %v1111_v26 = vld [vmem:[%s2387_s1 + $0x1a8] sm:$0xff]  ;;  %1520 = vmatprep.subr.bf16.mxu1 %v1519_v18  ;;  %v1523_v27 = vpack.c.bf16 %v1143_v24, %v1142_v22  ;;  %v1129_v29 = vld [vmem:[%s2387_s1 + $0x238] sm:$0xff]  ;;  %v1144_v30 = vld [vmem:[%s2387_s1 + $0x2b0] sm:$0xff] }
  0x19   : >> { %v1145_v31 = vld [vmem:[%s2387_s1 + $0x2b8] sm:$0xff]  ;;  %v1493_v32 = vpack.c.bf16 %v1111_v26, %v1110_v25  ;;  %v1495_v33 = vpack.c.bf16 %v1129_v29, %v1128_v28  ;;  %v1112_v34 = vld [vmem:[%s2387_s1 + $0x1b0] sm:$0xff]  ;;  %v1130_v37 = vld [vmem:[%s2387_s1 + $0x240] sm:$0xff] }
  0x1a   : >> { %v1113_v35 = vld [vmem:[%s2387_s1 + $0x1b8] sm:$0xff]  ;;  %v1527_v36 = vpack.c.bf16 %v1145_v31, %v1144_v30  ;;  %v1131_v38 = vld [vmem:[%s2387_s1 + $0x248] sm:$0xff]  ;;  %v1146_v39 = vld [vmem:[%s2387_s1 + $0x2c0] sm:$0xff] }
  0x1b   : >> { %1490 = vmatpush3.bf16.msra.mxu0 %v1489_v19  ;;  %1522 = vmatpush3.bf16.msra.mxu1 %v1519_v18  ;;  %v1147_v40 = vld [vmem:[%s2387_s1 + $0x2c8] sm:$0xff]  ;;  %v1497_v41 = vpack.c.bf16 %v1113_v35, %v1112_v34  ;;  %v1114_v42 = vld [vmem:[%s2387_s1 + $0x1c0] sm:$0xff]  ;;  %v1499_v43 = vpack.c.bf16 %v1131_v38, %v1130_v37  ;;  %v1132_v45 = vld [vmem:[%s2387_s1 + $0x250] sm:$0xff] }
  0x1c   : >> { %1492 = vmatprep.subr.bf16.mxu0 %v1491_v23  ;;  %1524 = vmatprep.subr.bf16.mxu1 %v1523_v27  ;;  %v1115_v44 = vld [vmem:[%s2387_s1 + $0x1c8] sm:$0xff]  ;;  %v1133_v46 = vld [vmem:[%s2387_s1 + $0x258] sm:$0xff]  ;;  %v1531_v47 = vpack.c.bf16 %v1147_v40, %v1146_v39  ;;  %v1148_v48 = vld [vmem:[%s2387_s1 + $0x2d0] sm:$0xff] }
  0x1d   : >> { %v1149_v49 = vld [vmem:[%s2387_s1 + $0x2d8] sm:$0xff]  ;;  %v1501_v50 = vpack.c.bf16 %v1115_v44, %v1114_v42  ;;  %v1503_v51 = vpack.c.bf16 %v1133_v46, %v1132_v45  ;;  %v1964_v52 = vld [vmem:[%s1955_s14 + $0x10] sm:$0xff]  ;;  %v1134_v61 = vld [vmem:[%s2387_s1 + $0x260] sm:$0xff] }
  0x1e   : >> { %v1967_v53 = vld [vmem:[%s1955_s14 + $0x18] sm:$0xff]  ;;  %v1116_v54 = vld [vmem:[%s2387_s1 + $0x1d0] sm:$0xff]  ;;  %v325_v56 = vrot.slane %v1964_v52, 1  ;;  %v330_v58 = vrot.slane %v1964_v52, 2  ;;  %v1535_v60 = vpack.c.bf16 %v1149_v49, %v1148_v48  ;;  %v1135_v62 = vld [vmem:[%s2387_s1 + $0x268] sm:$0xff] }
  0x1f   : >> { %1494 = vmatpush3.bf16.msra.mxu0 %v1493_v32  ;;  %1526 = vmatpush3.bf16.msra.mxu1 %v1523_v27  ;;  %v1117_v55 = vld [vmem:[%s2387_s1 + $0x1d8] sm:$0xff]  ;;  %v326_v57 = vrot.slane %v1967_v53, 1  ;;  %v331_v59 = vrot.slane %v1967_v53, 2  ;;  %v1150_v63 = vld [vmem:[%s2387_s1 + $0x2e0] sm:$0xff]  ;;  %v1151_v2 = vld [vmem:[%s2387_s1 + $0x2e8] sm:$0xff]  ;;  %v1507_v6 = vpack.c.bf16 %v1135_v62, %v1134_v61 }
  0x20   : >> { %1496 = vmatprep.subr.bf16.mxu0 %v1495_v33  ;;  %1528 = vmatprep.subr.bf16.mxu1 %v1527_v36  ;;  %v1505_v5 = vpack.c.bf16 %v1117_v55, %v1116_v54  ;;  %v1118_v7 = vld [vmem:[%s2387_s1 + $0x1e0] sm:$0xff]  ;;  %v1119_v8 = vld [vmem:[%s2387_s1 + $0x1e8] sm:$0xff]  ;;  %v1539_v9 = vpack.c.bf16 %v1151_v2, %v1150_v63  ;;  %v1136_v10 = vld [vmem:[%s2387_s1 + $0x270] sm:$0xff] }
  0x21   : >> { %v327_v3 = vsel %vm258_vm0, %v325_v56, %v326_v57  ;;  %v332_v4 = vsel %vm264_vm1, %v330_v58, %v331_v59  ;;  %v1137_v11 = vld [vmem:[%s2387_s1 + $0x278] sm:$0xff]  ;;  %v1152_v12 = vld [vmem:[%s2387_s1 + $0x2f0] sm:$0xff]  ;;  %v1509_v14 = vpack.c.bf16 %v1119_v8, %v1118_v7  ;;  %v286_v19 = vld [vmem:[%s2387_s1 + $0x80] sm:$0xff] }
  0x22   : >> { %448 = vmatprep.mubr.f32.mxu0 %v327_v3  ;;  %1410 = vmatprep.mubr.f32.mxu1 %v332_v4  ;;  %v1153_v13 = vld [vmem:[%s2387_s1 + $0x2f8] sm:$0xff]  ;;  %v1511_v15 = vpack.c.bf16 %v1137_v11, %v1136_v10  ;;  %v1120_v16 = vld [vmem:[%s2387_s1 + $0x1f0] sm:$0xff]  ;;  %v287_v20 = vld [vmem:[%s2387_s1 + $0x88] sm:$0xff] }
  0x23   : >> { %1498 = vmatpush3.bf16.msra.mxu0 %v1497_v41  ;;  %1530 = vmatpush3.bf16.msra.mxu1 %v1527_v36  ;;  %v1121_v17 = vld [vmem:[%s2387_s1 + $0x1f8] sm:$0xff]  ;;  %v1543_v18 = vpack.c.bf16 %v1153_v13, %v1152_v12  ;;  %v302_v21 = vld [vmem:[%s2387_s1 + $0x100] sm:$0xff]  ;;  %v303_v22 = vld [vmem:[%s2387_s1 + $0x108] sm:$0xff]  ;;  %v1547_v24 = vpack.c.bf16 %v287_v20, %v286_v19 }
  0x24   : >> { %1500 = vmatprep.subr.bf16.mxu0 %v1499_v43  ;;  %1532 = vmatprep.subr.bf16.mxu1 %v1531_v47  ;;  %v1513_v23 = vpack.c.bf16 %v1121_v17, %v1120_v16  ;;  %v270_v25 = vld [vmem:[%s2387_s1] sm:$0xff]  ;;  %v271_v26 = vld [vmem:[%s2387_s1 + $0x8] sm:$0xff]  ;;  %v288_v27 = vld [vmem:[%s2387_s1 + $0x90] sm:$0xff]  ;;  %v1579_v28 = vpack.c.bf16 %v303_v22, %v302_v21 }
  0x25   : >> { %v289_v29 = vld [vmem:[%s2387_s1 + $0x98] sm:$0xff]  ;;  %v304_v30 = vld [vmem:[%s2387_s1 + $0x110] sm:$0xff]  ;;  %v1549_v32 = vpack.c.bf16 %v271_v26, %v270_v25  ;;  %v2058_v37 = vld [vmem:[%s1955_s14] sm:$0xff] }
  0x26   : >> { %v305_v31 = vld [vmem:[%s2387_s1 + $0x118] sm:$0xff]  ;;  %v272_v33 = vld [vmem:[%s2387_s1 + $0x10] sm:$0xff]  ;;  %v1551_v34 = vpack.c.bf16 %v289_v29, %v288_v27  ;;  %v2061_v38 = vld [vmem:[%s1955_s14 + $0x8] sm:$0xff]  ;;  %v259_v41 = vrot.slane %v2058_v37, 1  ;;  %v265_v43 = vrot.slane %v2058_v37, 2 }
  0x27   : >> { %1502 = vmatpush3.bf16.msra.mxu0 %v1501_v50  ;;  %1534 = vmatpush3.bf16.msra.mxu1 %v1531_v47  ;;  %v1583_v35 = vpack.c.bf16 %v305_v31, %v304_v30  ;;  %v273_v36 = vld [vmem:[%s2387_s1 + $0x18] sm:$0xff]  ;;  %v290_v39 = vld [vmem:[%s2387_s1 + $0xa0] sm:$0xff]  ;;  %v291_v40 = vld [vmem:[%s2387_s1 + $0xa8] sm:$0xff]  ;;  %v260_v42 = vrot.slane %v2061_v38, 1  ;;  %v266_v44 = vrot.slane %v2061_v38, 2 }
  0x28   : >> { %1504 = vmatprep.subr.bf16.mxu0 %v1503_v51  ;;  %1536 = vmatprep.subr.bf16.mxu1 %v1535_v60  ;;  %v306_v45 = vld [vmem:[%s2387_s1 + $0x120] sm:$0xff]  ;;  %v307_v46 = vld [vmem:[%s2387_s1 + $0x128] sm:$0xff]  ;;  %v1553_v47 = vpack.c.bf16 %v273_v36, %v272_v33  ;;  %v1555_v49 = vpack.c.bf16 %v291_v40, %v290_v39  ;;  %v292_v55 = vld [vmem:[%s2387_s1 + $0xb0] sm:$0xff] }
  0x29   : >> { %v267_v48 = vsel %vm264_vm1, %v265_v43, %v266_v44  ;;  %v274_v50 = vld [vmem:[%s2387_s1 + $0x20] sm:$0xff]  ;;  %v275_v51 = vld [vmem:[%s2387_s1 + $0x28] sm:$0xff]  ;;  %v1587_v54 = vpack.c.bf16 %v307_v46, %v306_v45  ;;  %v293_v56 = vld [vmem:[%s2387_s1 + $0xb8] sm:$0xff] }
  0x2a   : >> { %v308_v58 = vld [vmem:[%s2387_s1 + $0x130] sm:$0xff]  ;;  %v1559_v61 = vpack.c.bf16 %v293_v56, %v292_v55  ;;  %v277_v62 = vld [vmem:[%s2387_s1 + $0x38] sm:$0xff]  ;;  %v295_v2 = vld [vmem:[%s2387_s1 + $0xc8] sm:$0xff] }
  0x2b   : >> { %1506 = vmatpush3.bf16.msra.mxu0 %v1505_v5  ;;  %1538 = vmatpush3.bf16.msra.mxu1 %v1535_v60  ;;  %v1557_v60 = vpack.c.bf16 %v275_v51, %v274_v50  ;;  %v310_v3 = vld [vmem:[%s2387_s1 + $0x140] sm:$0xff]  ;;  %v311_v4 = vld [vmem:[%s2387_s1 + $0x148] sm:$0xff]  ;;  %v296_v10 = vld [vmem:[%s2387_s1 + $0xd0] sm:$0xff] }
  0x2c   : >> { %1508 = vmatprep.subr.bf16.mxu0 %v1507_v6  ;;  %1540 = vmatprep.subr.bf16.mxu1 %v1539_v9  ;;  %v278_v7 = vld [vmem:[%s2387_s1 + $0x40] sm:$0xff]  ;;  %v279_v8 = vld [vmem:[%s2387_s1 + $0x48] sm:$0xff]  ;;  %v297_v11 = vld [vmem:[%s2387_s1 + $0xd8] sm:$0xff] }
  0x2d   : >> { %v312_v12 = vld [vmem:[%s2387_s1 + $0x150] sm:$0xff]  ;;  %v313_v13 = vld [vmem:[%s2387_s1 + $0x158] sm:$0xff]  ;;  %v298_v19 = vld [vmem:[%s2387_s1 + $0xe0] sm:$0xff] }
  0x2e   : >> { %v280_v16 = vld [vmem:[%s2387_s1 + $0x50] sm:$0xff]  ;;  %v281_v17 = vld [vmem:[%s2387_s1 + $0x58] sm:$0xff]  ;;  %v299_v20 = vld [vmem:[%s2387_s1 + $0xe8] sm:$0xff] }
  0x2f   : >> { %1510 = vmatpush3.bf16.msra.mxu0 %v1509_v14  ;;  %1542 = vmatpush3.bf16.msra.mxu1 %v1539_v9  ;;  %v1595_v9 = vpack.c.bf16 %v311_v4, %v310_v3  ;;  %v1565_v14 = vpack.c.bf16 %v279_v8, %v278_v7  ;;  %v314_v21 = vld [vmem:[%s2387_s1 + $0x160] sm:$0xff]  ;;  %v315_v22 = vld [vmem:[%s2387_s1 + $0x168] sm:$0xff]  ;;  %v301_v29 = vld [vmem:[%s2387_s1 + $0xf8] sm:$0xff] }
  0x30   : >> { %1512 = vmatprep.subr.bf16.mxu0 %v1511_v15  ;;  %1544 = vmatprep.subr.bf16.mxu1 %v1543_v18  ;;  %v1567_v15 = vpack.c.bf16 %v297_v11, %v296_v10  ;;  %v282_v25 = vld [vmem:[%s2387_s1 + $0x60] sm:$0xff]  ;;  %v283_v26 = vld [vmem:[%s2387_s1 + $0x68] sm:$0xff]  ;;  %v1603_v27 = vpack.c.bf16 %v315_v22, %v314_v21  ;;  %v316_v30 = vld [vmem:[%s2387_s1 + $0x170] sm:$0xff] }
  0x31   : >> { %v317_v31 = vld [vmem:[%s2387_s1 + $0x178] sm:$0xff]  ;;  %v1173_v39 = vld [vmem:[%s2387_s1 + $0x380] sm:$0xff]  ;;  %v1174_v40 = vld [vmem:[%s2387_s1 + $0x388] sm:$0xff] }
  0x32   : >> { %v1607_v36 = vpack.c.bf16 %v317_v31, %v316_v30  ;;  %v1190_v43 = vld [vmem:[%s2387_s1 + $0x408] sm:$0xff]  ;;  %v1157_v46 = vld [vmem:[%s2387_s1 + $0x300] sm:$0xff]  ;;  %v1191_v55 = vld [vmem:[%s2387_s1 + $0x410] sm:$0xff] }
  0x33   : >> { %1514 = vmatpush3.bf16.msra.mxu0 %v1513_v23  ;;  %1546 = vmatpush3.bf16.msra.mxu1 %v1543_v18  ;;  %v1599_v18 = vpack.c.bf16 %v313_v13, %v312_v12  ;;  %v1569_v23 = vpack.c.bf16 %v281_v17, %v280_v16  ;;  %v2209_v50 = vld [vmem:[%s1955_s14 + $0x28] sm:$0xff]  ;;  %v1192_v56 = vld [vmem:[%s2387_s1 + $0x418] sm:$0xff]  ;;  %v1177_v3 = vld [vmem:[%s2387_s1 + $0x3a0] sm:$0xff] }
  0x34   : >> { %1548 = vmatprep.subr.bf16.mxu0 %v1547_v24  ;;  %1580 = vmatprep.subr.bf16.mxu1 %v1579_v28  ;;  %v1571_v24 = vpack.c.bf16 %v299_v20, %v298_v19  ;;  %v1178_v4 = vld [vmem:[%s2387_s1 + $0x3a8] sm:$0xff]  ;;  %v1180_v12 = vld [vmem:[%s2387_s1 + $0x3b8] sm:$0xff]  ;;  %v1195_v13 = vld [vmem:[%s2387_s1 + $0x430] sm:$0xff] }
  0x35   : >> { %v1162_v10 = vld [vmem:[%s2387_s1 + $0x328] sm:$0xff]  ;;  %v1163_v17 = vld [vmem:[%s2387_s1 + $0x330] sm:$0xff]  ;;  %v1181_v19 = vld [vmem:[%s2387_s1 + $0x3c0] sm:$0xff] }
  0x36   : >> { %449 = vmatmul.mubr.f32.vlgmr.msra.gmra.mrb[0].mxu0 %v1964_v52  ;;  %1411 = vmatmul.mubr.f32.vlgmr.msra.gmra.mrb[0].mxu1 %v331_v59  ;;  %v261_v52 = vsel %vm258_vm0, %v259_v41, %v260_v42  ;;  %v309_v59 = vld [vmem:[%s2387_s1 + $0x138] sm:$0xff]  ;;  %v1189_v41 = vld [vmem:[%s2387_s1 + $0x400] sm:$0xff]  ;;  %v1182_v20 = vld [vmem:[%s2387_s1 + $0x3c8] sm:$0xff] }
  0x37   : >> { %1550 = vmatpush3.bf16.msra.mxu0 %v1549_v32  ;;  %1582 = vmatpush3.bf16.msra.mxu1 %v1579_v28  ;;  %v1591_v63 = vpack.c.bf16 %v309_v59, %v308_v58  ;;  %v300_v28 = vld [vmem:[%s2387_s1 + $0xf0] sm:$0xff]  ;;  %v1573_v32 = vpack.c.bf16 %v283_v26, %v282_v25  ;;  %v1643_v51 = vpack.c.bf16 %v1190_v43, %v1189_v41  ;;  %v1197_v21 = vld [vmem:[%s2387_s1 + $0x440] sm:$0xff]  ;;  %v1198_v22 = vld [vmem:[%s2387_s1 + $0x448] sm:$0xff] }
  0x38   : >> { %1552 = vmatprep.subr.bf16.mxu0 %v1551_v34  ;;  %1584 = vmatprep.subr.bf16.mxu1 %v1583_v35  ;;  %v1575_v33 = vpack.c.bf16 %v301_v29, %v300_v28  ;;  %v284_v34 = vld [vmem:[%s2387_s1 + $0x70] sm:$0xff]  ;;  %v1165_v25 = vld [vmem:[%s2387_s1 + $0x340] sm:$0xff]  ;;  %v1166_v26 = vld [vmem:[%s2387_s1 + $0x348] sm:$0xff] }
  0x39   : >> { %453 = vmatprep.mubr.f32.mxu0 %v326_v57  ;;  %1445 = vmatprep.mubr.f32.mxu1 %v267_v48  ;;  %v276_v57 = vld [vmem:[%s2387_s1 + $0x30] sm:$0xff]  ;;  %v1158_v48 = vld [vmem:[%s2387_s1 + $0x308] sm:$0xff]  ;;  %v1184_v29 = vld [vmem:[%s2387_s1 + $0x3d8] sm:$0xff] }
  0x3a   : >> { %454 = vmatmul.mubr.f32.gmra.mrb[2].mxu0 %v1967_v53  ;;  %v294_v53 = vld [vmem:[%s2387_s1 + $0xc0] sm:$0xff]  ;;  %v1561_v5 = vpack.c.bf16 %v277_v62, %v276_v57  ;;  %v1613_v58 = vpack.c.bf16 %v1158_v48, %v1157_v46  ;;  %v1160_v57 = vld [vmem:[%s2387_s1 + $0x318] sm:$0xff]  ;;  %v1183_v28 = vld [vmem:[%s2387_s1 + $0x3d0] sm:$0xff] }
  0x3b   : >> { %1554 = vmatpush3.bf16.msra.mxu0 %v1553_v47  ;;  %598 = vmatprep.mubr.f32.mxu0 %v261_v52  ;;  %v1563_v6 = vpack.c.bf16 %v295_v2, %v294_v53  ;;  %v1611_v47 = vpack.c.bf16 %v1174_v40, %v1173_v39  ;;  %v1175_v52 = vld [vmem:[%s2387_s1 + $0x390] sm:$0xff]  ;;  %v1647_v2 = vpack.c.bf16 %v1192_v56, %v1191_v55  ;;  %v1200_v31 = vld [vmem:[%s2387_s1 + $0x458] sm:$0xff]  ;;  %v1185_v39 = vld [vmem:[%s2387_s1 + $0x3e0] sm:$0xff] }
  0x3c   : >> { %1586 = vmatpush3.bf16.msra.mxu1 %v1583_v35  ;;  %1556 = vmatprep.subr.bf16.mxu0 %v1555_v49  ;;  %v285_v35 = vld [vmem:[%s2387_s1 + $0x78] sm:$0xff]  ;;  %v2206_v49 = vld [vmem:[%s1955_s14 + $0x20] sm:$0xff]  ;;  %v1199_v30 = vld [vmem:[%s2387_s1 + $0x450] sm:$0xff] }
  0x3d   : >> { %1588 = vmatprep.subr.bf16.mxu1 %v1587_v54  ;;  %v1577_v45 = vpack.c.bf16 %v285_v35, %v284_v34  ;;  %v696_v59 = vrot.slane %v2206_v49, 2  ;;  %v691_v62 = vrot.slane %v2206_v49, 1  ;;  %v1167_v34 = vld [vmem:[%s2387_s1 + $0x350] sm:$0xff]  ;;  %v1168_v35 = vld [vmem:[%s2387_s1 + $0x358] sm:$0xff]  ;;  %v1186_v40 = vld [vmem:[%s2387_s1 + $0x3e8] sm:$0xff] }
  0x3e   : >> { %v1201_v41 = vld [vmem:[%s2387_s1 + $0x460] sm:$0xff]  ;;  %v1202_v43 = vld [vmem:[%s2387_s1 + $0x468] sm:$0xff]  ;;  %v1635_v46 = vpack.c.bf16 %v1186_v40, %v1185_v39  ;;  %v1203_v55 = vld [vmem:[%s2387_s1 + $0x470] sm:$0xff] }
  0x3f   : >> { %1558 = vmatpush3.bf16.msra.mxu0 %v1557_v60  ;;  %v697_v60 = vrot.slane %v2209_v50, 2  ;;  %v1170_v48 = vld [vmem:[%s2387_s1 + $0x368] sm:$0xff]  ;;  %v1204_v56 = vld [vmem:[%s2387_s1 + $0x478] sm:$0xff] }
  0x40   : >> { %1590 = vmatpush3.bf16.msra.mxu1 %v1587_v54  ;;  %1560 = vmatprep.subr.bf16.mxu0 %v1559_v61  ;;  %v1176_v54 = vld [vmem:[%s2387_s1 + $0x398] sm:$0xff]  ;;  %v1159_v61 = vld [vmem:[%s2387_s1 + $0x310] sm:$0xff] }
  0x41   : >> { %1592 = vmatprep.subr.bf16.mxu1 %v1591_v63  ;;  %v1615_v53 = vpack.c.bf16 %v1176_v54, %v1175_v52  ;;  %v1617_v7 = vpack.c.bf16 %v1160_v57, %v1159_v61  ;;  %v698_v8 = vsel %vm264_vm1, %v696_v59, %v697_v60  ;;  %v1187_v52 = vld [vmem:[%s2387_s1 + $0x3f0] sm:$0xff]  ;;  %v1188_v54 = vld [vmem:[%s2387_s1 + $0x3f8] sm:$0xff] }
  0x42   : >> { %v1639_v59 = vpack.c.bf16 %v1188_v54, %v1187_v52  ;;  %v1171_v61 = vld [vmem:[%s2387_s1 + $0x370] sm:$0xff]  ;;  %v1172_v57 = vld [vmem:[%s2387_s1 + $0x378] sm:$0xff] }
  0x43   : >> { %1562 = vmatpush3.bf16.msra.mxu0 %v1561_v5  ;;  %v1193_v5 = vld [vmem:[%s2387_s1 + $0x420] sm:$0xff] }
  0x44   : >> { %1594 = vmatpush3.bf16.msra.mxu1 %v1591_v63  ;;  %1564 = vmatprep.subr.bf16.mxu0 %v1563_v6  ;;  %v692_v63 = vrot.slane %v2209_v50, 1  ;;  %v1194_v6 = vld [vmem:[%s2387_s1 + $0x428] sm:$0xff] }
  0x45   : >> { %1596 = vmatprep.subr.bf16.mxu1 %v1595_v9  ;;  %v1651_v11 = vpack.c.bf16 %v1194_v6, %v1193_v5 }
  0x47   : >> { %1566 = vmatpush3.bf16.msra.mxu0 %v1565_v14  ;;  %v1196_v14 = vld [vmem:[%s2387_s1 + $0x438] sm:$0xff] }
  0x48   : >> { %1598 = vmatpush3.bf16.msra.mxu1 %v1595_v9  ;;  %1568 = vmatprep.subr.bf16.mxu0 %v1567_v15  ;;  %v1161_v9 = vld [vmem:[%s2387_s1 + $0x320] sm:$0xff] }
  0x49   : >> { %1600 = vmatprep.subr.bf16.mxu1 %v1599_v18  ;;  %v1621_v15 = vpack.c.bf16 %v1162_v10, %v1161_v9 }
  0x4b   : >> { %1570 = vmatpush3.bf16.msra.mxu0 %v1569_v23 }
  0x4c   : >> { %1602 = vmatpush3.bf16.msra.mxu1 %v1599_v18  ;;  %1572 = vmatprep.subr.bf16.mxu0 %v1571_v24  ;;  %v1655_v18 = vpack.c.bf16 %v1196_v14, %v1195_v13  ;;  %v1627_v24 = vpack.c.bf16 %v1182_v20, %v1181_v19 }
  0x4d   : >> { %1604 = vmatprep.subr.bf16.mxu1 %v1603_v27 }
  0x4f   : >> { %1574 = vmatpush3.bf16.msra.mxu0 %v1573_v32  ;;  %v1629_v32 = vpack.c.bf16 %v1166_v26, %v1165_v25 }
  0x50   : >> { %1606 = vmatpush3.bf16.msra.mxu1 %v1603_v27  ;;  %1576 = vmatprep.subr.bf16.mxu0 %v1575_v33  ;;  %v1659_v27 = vpack.c.bf16 %v1198_v22, %v1197_v21  ;;  %v1631_v33 = vpack.c.bf16 %v1184_v29, %v1183_v28 }
  0x51   : >> { %1608 = vmatprep.subr.bf16.mxu1 %v1607_v36 }
  0x53   : >> { %1578 = vmatpush3.bf16.msra.mxu0 %v1577_v45  ;;  %v1633_v45 = vpack.c.bf16 %v1168_v35, %v1167_v34 }
  0x54   : >> { %1610 = vmatpush3.bf16.msra.mxu1 %v1607_v36  ;;  %1612 = vmatprep.subr.bf16.mxu0 %v1611_v47  ;;  %v1663_v36 = vpack.c.bf16 %v1200_v31, %v1199_v30  ;;  %v1169_v47 = vld [vmem:[%s2387_s1 + $0x360] sm:$0xff] }
  0x55   : >> { %1644 = vmatprep.subr.bf16.mxu1 %v1643_v51 }
  0x56   : >> { %599 = vmatmul.mubr.f32.vlgmr.msra.gmra.mrb[4].mxu0 %v2058_v37  ;;  %v1619_v37 = vpack.c.bf16 %v1178_v4, %v1177_v3 }
  0x57   : >> { %1446 = vmatmul.mubr.f32.vlgmr.msra.gmra.mrb[0].mxu1 %v266_v44  ;;  %1614 = vmatpush3.bf16.msra.mxu0 %v1613_v58  ;;  %v693_v44 = vsel %vm258_vm0, %v691_v62, %v692_v63  ;;  %v1637_v58 = vpack.c.bf16 %v1170_v48, %v1169_v47  ;;  %v1671_v62 = vpack.c.bf16 %v1204_v56, %v1203_v55 }
  0x58   : >> { %1646 = vmatpush3.bf16.msra.mxu1 %v1643_v51  ;;  %603 = vmatprep.mubr.f32.mxu0 %v260_v42  ;;  %v1179_v42 = vld [vmem:[%s2387_s1 + $0x3b0] sm:$0xff]  ;;  %v1667_v51 = vpack.c.bf16 %v1202_v43, %v1201_v41 }
  0x59   : >> { %1616 = vmatprep.subr.bf16.mxu0 %v1615_v53  ;;  %1648 = vmatprep.subr.bf16.mxu1 %v1647_v2  ;;  %v1623_v16 = vpack.c.bf16 %v1180_v12, %v1179_v42  ;;  %v1641_v53 = vpack.c.bf16 %v1172_v57, %v1171_v61 }
  0x5a   : >> { %604 = vmatmul.mubr.f32.gmra.mrb[6].mxu0 %v2061_v38  ;;  %1480 = vmatprep.mubr.f32.mxu1 %v698_v8  ;;  %v1164_v38 = vld [vmem:[%s2387_s1 + $0x338] sm:$0xff] }
  0x5b   : >> { %1618 = vmatpush3.bf16.msra.mxu0 %v1617_v7  ;;  %814 = vmatprep.mubr.f32.mxu0 %v693_v44  ;;  %v1625_v23 = vpack.c.bf16 %v1164_v38, %v1163_v17 }
  0x5c   : >> { %1650 = vmatpush3.bf16.msra.mxu1 %v1647_v2  ;;  %1620 = vmatprep.subr.bf16.mxu0 %v1619_v37 }
  0x5d   : >> { %1652 = vmatprep.subr.bf16.mxu1 %v1651_v11 }
  0x5f   : >> { %1622 = vmatpush3.bf16.msra.mxu0 %v1621_v15 }
  0x60   : >> { %1654 = vmatpush3.bf16.msra.mxu1 %v1651_v11  ;;  %1624 = vmatprep.subr.bf16.mxu0 %v1623_v16  ;;  %v1205_v16 = vld [vmem:[%s2388_s2] ss:$0 sm:$0xff] }
  0x61   : >> { %1656 = vmatprep.subr.bf16.mxu1 %v1655_v18 }
  0x63   : >> { %1626 = vmatpush3.bf16.msra.mxu0 %v1625_v23 }
  0x64   : >> { %1658 = vmatpush3.bf16.msra.mxu1 %v1655_v18  ;;  %1628 = vmatprep.subr.bf16.mxu0 %v1627_v24 }
  0x65   : >> { %1660 = vmatprep.subr.bf16.mxu1 %v1659_v27 }
  0x67   : >> { %1630 = vmatpush3.bf16.msra.mxu0 %v1629_v32 }
  0x68   : >> { %1662 = vmatpush3.bf16.msra.mxu1 %v1659_v27  ;;  %1632 = vmatprep.subr.bf16.mxu0 %v1631_v33 }
  0x69   : >> { %1664 = vmatprep.subr.bf16.mxu1 %v1663_v36 }
  0x6b   : >> { %1634 = vmatpush3.bf16.msra.mxu0 %v1633_v45 }
  0x6c   : >> { %1666 = vmatpush3.bf16.msra.mxu1 %v1663_v36  ;;  %1636 = vmatprep.subr.bf16.mxu0 %v1635_v46 }
  0x6d   : >> { %1668 = vmatprep.subr.bf16.mxu1 %v1667_v51 }
  0x6f   : >> { %1638 = vmatpush3.bf16.msra.mxu0 %v1637_v58 }
  0x70   : >> { %1670 = vmatpush3.bf16.msra.mxu1 %v1667_v51  ;;  %1640 = vmatprep.subr.bf16.mxu0 %v1639_v59 }
  0x71   : >> { %1672 = vmatprep.subr.bf16.mxu1 %v1671_v62 }
  0x73   : >> { %1642 = vmatpush3.bf16.msra.mxu0 %v1641_v53 }
  0x74   : >> { %1674 = vmatpush3.bf16.msra.mxu1 %v1671_v62 }
  0x76   : >> { %815 = vmatmul.mubr.f32.vlgmr.msra.gmra.mrb[8].mxu0 %v2206_v49 }
  0x77   : >> { %1481 = vmatmul.mubr.f32.vlgmr.msra.gmra.mrb[0].mxu1 %v697_v60  ;;  %819 = vmatprep.mubr.f32.mxu0 %v692_v63 }
  0x7a   : >> { %820 = vmatmul.mubr.f32.gmra.mrb[10].mxu0 %v2209_v50 }
 0x109   : >> { %v1242_v2 = vpop.f32.mrb[0].mxu0 }
 0x10a   : >> { %v1243_v3 = vpop.f32.mrb[1].mxu0 }
 0x10b   : >> { %v1244_v4 = vadd.f32 %v1243_v3, %v1242_v2 }
 0x10d   : >> { %v1245_v5 = vpop.f32.mrb[2].mxu0 }
 0x10e   : >> { %v1246_v6 = vpop.f32.mrb[3].mxu0 }
 0x10f   : >> { %v1247_v7 = vadd.f32 %v1246_v6, %v1245_v5 }
 0x129   : >> { %v1298_v8 = vpop.f32.mrb[4].mxu0 }
 0x12a   : >> { %v1299_v37 = vpop.f32.mrb[5].mxu0 }
 0x12b   : >> { %v1300_v9 = vadd.f32 %v1299_v37, %v1298_v8 }
 0x12d   : >> { %v1678_v10 = vadd.f32 %v1300_v9, %v1244_v4  ;;  %v1301_v49 = vpop.f32.mrb[6].mxu0 }
 0x12e   : >> { %v1302_v44 = vpop.f32.mrb[7].mxu0 }
 0x12f   : >> { %v1303_v60 = vadd.f32 %v1302_v44, %v1301_v49 }
 0x131   : >> { %v1675_v11 = vadd.f32 %v1303_v60, %v1247_v7 }
 0x149   : >> { %v1354_v42 = vpop.f32.mrb[8].mxu0 }
 0x14a   : >> { %v1482_v63 = vpop.f32.mrb[0].mxu1  ;;  %v1355_v12 = vpop.f32.mrb[9].mxu0 }
 0x14b   : >> { %v1356_v50 = vadd.f32 %v1355_v12, %v1354_v42  ;;  %v891_v13 = vpop.f32.mrb[1].mxu1 }
 0x14d   : >> { %v1679_v14 = vadd.f32 %v1678_v10, %v1356_v50  ;;  %v1357_v15 = vpop.f32.mrb[10].mxu0 }
 0x14e   : >> { %v1358_v17 = vpop.f32.mrb[11].mxu0 }
 0x14f   : >> { %v1680_v38 = vadd.f32 %v1679_v14, %v891_v13  ;;  %v1359_v18 = vadd.f32 %v1358_v17, %v1357_v15 }
 0x151   : >> { %v909_v19 = vadd.f32 %v1680_v38, %v1205_v16  ;;  %v1676_v20 = vadd.f32 %v1675_v11, %v1359_v18 }
 0x153   : >> { %913 = vst [vmem:[%s912_s15] sm:$0xff] %v909_v19  ;;  %v1677_v21 = vadd.f32 %v1676_v20, %v1482_v63  ;;  %v924_v25 = vmul.f32 %v909_v19, %v909_v19 }
 0x155   : >> { %v910_v22 = vadd.f32 %v1677_v21, %v1205_v16 }
 0x157   : >> { %914 = vst [vmem:[%s912_s15 + $0x8] sm:$0x3f] %v910_v22  ;;  %v915_v23 = vsel %vm264_vm1, %v910_v22, 0.0  ;;  %v925_v24 = vmul.f32 %v910_v22, %v910_v22 }
 0x158   : >> { %v916_v26 = vadd.f32 %v915_v23, %v909_v19 }
 0x159   : >> { %v926_v27 = vsel %vm264_vm1, %v925_v24, 0.0 }
 0x15a   : >> { %v917_v28 = vrot.slane %v916_v26, 4  ;;  %v927_v29 = vadd.f32 %v926_v27, %v924_v25 }
 0x15c   : >> { %v918_v30 = vadd.f32 %v917_v28, %v916_v26  ;;  %v928_v31 = vrot.slane %v927_v29, 4 }
 0x15e   : >> { %v919_v32 = vrot.slane %v918_v30, 2  ;;  %v929_v33 = vadd.f32 %v928_v31, %v927_v29 }
 0x160   : >> { %v920_v34 = vadd.f32 %v919_v32, %v918_v30  ;;  %v930_v35 = vrot.slane %v929_v33, 2 }
 0x162   : >> { %v921_v36 = vrot.slane %v920_v34, 1  ;;  %v931_v39 = vadd.f32 %v930_v35, %v929_v33 }
 0x164   : >> { %v922_v40 = vadd.f32 %v921_v36, %v920_v34  ;;  %v932_v41 = vrot.slane %v931_v39, 1  ;;  %247 = sbr.rel (!%p245_p5) target bundleno = 18 (0x12), region = 87 }
 0x166   : >> { %v923_v43 = vadd.f32 %v1776_v1, %v922_v40   ;;  %v933_v45 = vadd.f32 %v932_v41, %v931_v39 }
 0x168   : >> { %v934_v46 = vadd.f32 %v1772_v0, %v933_v45   ;;  %v2392_v1 = vmov %v923_v43 }
 0x16a   : >> { %v2391_v0 = vmov %v934_v46  ;;  %v936_v47 = vsel (%p245_p5), %vm935_vm2, %v923_v43, %v934_v46 }
 0x16b   : > { %937 = vst [vmem:[%s1838_s30] sm:$0x3] %v936_v47 }
 0x16c PF: > { %s15_s17 = sadd.s32 1, %s1768_s17   ;;  %s2393_s15 = smov %s1764_s16 }
 0x16d   : > { %p12_p6 = scmp.ge.s32.totalorder %s15_s17, 4   ;;  %s2394_s16 = smov %s2396_s18 }
 0x16f   :  { %14 = sbr.rel (!%p12_p6) target bundleno = 2 (0x2), region = 98 }

// kernel: discriminator_cnn_forward.17
= control target key start
LH: loop header
LB: loop body
LE: loop exit
PB: predicated region body
PF: predicated region fallthrough
CT: control target
= control target key end

     0   :  { %8 = vsyncpa [#allocation3], 0  ;;  %v113_v0 = vlaneseq  ;;  %v5329_v2 = vmov 1983009808   ;;  %vm2308_vm0 = vcmask 1041408   ;;  %vm2614_vm1 = vcmask 123904   ;;  %s7549_s0 = inlined_call_operand.vmem [shape: f32[2,19600], index: 0, kind: input, shape index: {}]   ;;  %s7550_s1 = inlined_call_operand.vmem [shape: f32[2,19600], index: 1, kind: input, shape index: {}]   ;;  %s7551_s2 = inlined_call_operand.vmem [shape: f32[1,2], index: 2, kind: input, shape index: {}]   ;;  %s7552_s3 = inlined_call_operand.hbm [shape: f32[2,2], index: 3, kind: output, shape index: {}]  }
   0x1   :  { %v732_v3 = vunpack.c.l.s4 %v5329_v2  ;;  %v54_v8 = vld [vmem:[%s7550_s1] ss:$2 sm:$0xff]  ;;  %v5220_v27 = vld [vmem:[%s7550_s1 + $0x10] ss:$2 sm:$0xff]  ;;  %vm5183_vm2 = vcmask 7168   ;;  %vm5193_vm3 = vcmask 9216  }
   0x2   :  { %v114_v1 = vshrl.u32 %v113_v0, 7  ;;  %v15_v31 = vld [vmem:[%s7549_s0] sm:$0xff]  ;;  %v16_v43 = vld [vmem:[%s7549_s0 + $0x8] sm:$0xff]  ;;  %v17_v61 = vld [vmem:[%s7549_s0 + $0x10] sm:$0xff]  ;;  %s5330_s5 = smov [#allocation2]  }
   0x3   :  { %v733_v9 = vunpack.c.0.s8 %v732_v3  ;;  %v5221_v53 = vld [vmem:[%s7550_s1 + $0x20] ss:$2 sm:$0xff]  ;;  %s5212_s6 = sshll.u32 %s5330_s5, 4  ;;  %s5213_s6 = int_to_ptr.vmem [resolvable:$true] %s5212_s6 }
   0x4   :  { %v5351_v4 = vsub.s32 0, %v114_v1  ;;  %v5353_v5 = vsub.s32 1, %v114_v1  ;;  %v5355_v6 = vsub.s32 2, %v114_v1  ;;  %v5357_v7 = vsub.s32 3, %v114_v1  ;;  %p5310_p1 = scmp.lt.s32.totalorder %s5213_s6, %s5213_s6 }
   0x5   :  { %v5366_v14 = vsub.s32 4, %v114_v1  ;;  %v5368_v15 = vsub.s32 5, %v114_v1  ;;  %v5370_v16 = vsub.s32 6, %v114_v1  ;;  %v5372_v17 = vsub.s32 7, %v114_v1 }
   0x6   :  { %v116_v10 = vrot.slane %v54_v8, %v5351_v4  ;;  %v120_v11 = vrot.slane %v54_v8, %v5353_v5  ;;  %v124_v12 = vrot.slane %v54_v8, %v5355_v6  ;;  %v128_v13 = vrot.slane %v54_v8, %v5357_v7 }
   0x7   :  { %v5374_v20 = vsub.s32 %v733_v9, %v114_v1  ;;  %v132_v21 = vrot.slane %v54_v8, %v5366_v14  ;;  %v136_v22 = vrot.slane %v54_v8, %v5368_v15  ;;  %v140_v23 = vrot.slane %v54_v8, %v5370_v16 }
   0x8   :  { %v729_v18 = vcombine.low %v116_v10, %v120_v11  ;;  %v730_v19 = vcombine.low %v124_v12, %v128_v13  ;;  %v144_v24 = vrot.slane %v54_v8, %v5372_v17  ;;  %v148_v32 = vrot.slane %v5220_v27, %v5351_v4 }
   0x9   :  { %v746_v28 = vcombine.low %v132_v21, %v136_v22  ;;  %v152_v33 = vrot.slane %v5220_v27, %v5353_v5  ;;  %v156_v34 = vrot.slane %v5220_v27, %v5355_v6  ;;  %v160_v35 = vrot.slane %v5220_v27, %v5357_v7 }
   0xa   :  { %v737_v25 = vrot.slane %v729_v18, %v5374_v20  ;;  %v744_v26 = vrot.slane %v730_v19, %v5374_v20  ;;  %v747_v29 = vcombine.low %v140_v23, %v144_v24  ;;  %v164_v45 = vrot.slane %v5220_v27, %v5366_v14 }
   0xb   :  { %v754_v36 = vrot.slane %v746_v28, %v5374_v20  ;;  %v763_v40 = vcombine.low %v148_v32, %v152_v33  ;;  %v764_v41 = vcombine.low %v156_v34, %v160_v35  ;;  %v168_v46 = vrot.slane %v5220_v27, %v5368_v15 }
   0xc   :  { %v745_v30 = vcombine.low %v737_v25, %v744_v26  ;;  %v761_v37 = vrot.slane %v747_v29, %v5374_v20  ;;  %v172_v47 = vrot.slane %v5220_v27, %v5370_v16  ;;  %v176_v48 = vrot.slane %v5220_v27, %v5372_v17 }
   0xd   :  { %v771_v49 = vrot.slane %v763_v40, %v5374_v20  ;;  %v778_v50 = vrot.slane %v764_v41, %v5374_v20  ;;  %v780_v55 = vcombine.low %v164_v45, %v168_v46  ;;  %v180_v62 = vrot.slane %v5221_v53, %v5351_v4 }
   0xe   :  { %v1422_v38 = vmul.f32 %v745_v30, %v15_v31  ;;  %v762_v39 = vcombine.low %v754_v36, %v761_v37  ;;  %v781_v56 = vcombine.low %v172_v47, %v176_v48  ;;  %v184_v63 = vrot.slane %v5221_v53, %v5353_v5  ;;  %v18_v31 = vld [vmem:[%s7549_s0 + $0x18] sm:$0xff] }
   0xf   :  { %v779_v57 = vcombine.low %v771_v49, %v778_v50  ;;  %v188_v0 = vrot.slane %v5221_v53, %v5355_v6  ;;  %v192_v1 = vrot.slane %v5221_v53, %v5357_v7  ;;  %v788_v8 = vrot.slane %v780_v55, %v5374_v20  ;;  %v5222_v47 = vld [vmem:[%s7550_s1 + $0x30] ss:$2 sm:$0xff] }
  0x10   :  { %v1500_v42 = vcombine.high %v1422_v38, %v1422_v38  ;;  %v1507_v44 = vrot.slane %v1422_v38, %v5374_v20  ;;  %v1423_v51 = vmul.f32 %v762_v39, %v16_v43  ;;  %v795_v9 = vrot.slane %v781_v56, %v5374_v20  ;;  %v19_v56 = vld [vmem:[%s7549_s0 + $0x20] sm:$0xff] }
  0x11   :  { %v1424_v12 = vmul.f32 %v779_v57, %v17_v61  ;;  %v797_v24 = vcombine.low %v180_v62, %v184_v63  ;;  %v798_v25 = vcombine.low %v188_v0, %v192_v1  ;;  %v196_v33 = vrot.slane %v5221_v53, %v5366_v14 }
  0x12   :  { %v1514_v52 = vrot.slane %v1500_v42, %v5374_v20  ;;  %v1515_v54 = vcombine.high %v1507_v44, %v1507_v44  ;;  %v1517_v59 = vcombine.high %v1423_v51, %v1423_v51  ;;  %v1524_v60 = vrot.slane %v1423_v51, %v5374_v20 }
  0x13   :  { %v2309_v2 = vsel %vm2308_vm0, %v1507_v44, 0.0  ;;  %v796_v23 = vcombine.low %v788_v8, %v795_v9  ;;  %v1534_v28 = vcombine.high %v1424_v12, %v1424_v12  ;;  %v1541_v29 = vrot.slane %v1424_v12, %v5374_v20 }
  0x14   :  { %v1516_v58 = vcombine.high %v1514_v52, %v1514_v52  ;;  %v2310_v3 = vsel %vm2308_vm0, %v1515_v54, 0.0  ;;  %v2312_v11 = vsel %vm2308_vm0, %v1514_v52, 0.0  ;;  %v1531_v13 = vrot.slane %v1517_v59, %v5374_v20 }
  0x15   :  { %v2311_v10 = vadd.f32 %v2310_v3, %v2309_v2  ;;  %v1532_v18 = vcombine.high %v1524_v60, %v1524_v60  ;;  %v2316_v22 = vsel %vm2308_vm0, %v1524_v60, 0.0  ;;  %v200_v34 = vrot.slane %v5221_v53, %v5368_v15 }
  0x16   :  { %v2314_v19 = vsel %vm2308_vm0, %v1516_v58, 0.0  ;;  %v1533_v27 = vcombine.high %v1531_v13, %v1531_v13  ;;  %v204_v35 = vrot.slane %v5221_v53, %v5370_v16  ;;  %v2320_v36 = vsel %vm2308_vm0, %v1531_v13, 0.0 }
  0x17   :  { %v2313_v21 = vadd.f32 %v2312_v11, %v2311_v10  ;;  %v2318_v30 = vsel %vm2308_vm0, %v1532_v18, 0.0  ;;  %v208_v37 = vrot.slane %v5221_v53, %v5372_v17  ;;  %v805_v38 = vrot.slane %v797_v24, %v5374_v20 }
  0x18   :  { %v812_v39 = vrot.slane %v798_v25, %v5374_v20  ;;  %v1425_v41 = vmul.f32 %v796_v23, %v18_v31  ;;  %v1548_v42 = vrot.slane %v1534_v28, %v5374_v20  ;;  %v1549_v43 = vcombine.high %v1541_v29, %v1541_v29  ;;  %v20_v25 = vld [vmem:[%s7549_s0 + $0x28] sm:$0xff] }
  0x19   :  { %v2315_v26 = vadd.f32 %v2314_v19, %v2313_v21  ;;  %v2322_v44 = vsel %vm2308_vm0, %v1533_v27, 0.0  ;;  %v2324_v46 = vsel %vm2308_vm0, %v1541_v29, 0.0  ;;  %v814_v49 = vcombine.low %v196_v33, %v200_v34 }
  0x1a   :  { %v813_v48 = vcombine.low %v805_v38, %v812_v39  ;;  %v815_v50 = vcombine.low %v204_v35, %v208_v37  ;;  %v1550_v52 = vcombine.high %v1548_v42, %v1548_v42  ;;  %v1551_v53 = vcombine.high %v1425_v41, %v1425_v41 }
  0x1b   :  { %v2317_v32 = vadd.f32 %v2316_v22, %v2315_v26  ;;  %v1558_v54 = vrot.slane %v1425_v41, %v5374_v20  ;;  %v2326_v55 = vsel %vm2308_vm0, %v1549_v43, 0.0  ;;  %v212_v58 = vrot.slane %v5222_v47, %v5351_v4  ;;  %v5223_v41 = vld [vmem:[%s7550_s1 + $0x40] ss:$2 sm:$0xff] }
  0x1c   :  { %v216_v59 = vrot.slane %v5222_v47, %v5353_v5  ;;  %v220_v60 = vrot.slane %v5222_v47, %v5355_v6  ;;  %v2328_v61 = vsel %vm2308_vm0, %v1548_v42, 0.0  ;;  %v224_v62 = vrot.slane %v5222_v47, %v5357_v7 }
  0x1d   :  { %v2319_v40 = vadd.f32 %v2318_v30, %v2317_v32  ;;  %v822_v63 = vrot.slane %v814_v49, %v5374_v20  ;;  %v829_v0 = vrot.slane %v815_v50, %v5374_v20  ;;  %v1426_v2 = vmul.f32 %v813_v48, %v19_v56  ;;  %v21_v50 = vld [vmem:[%s7549_s0 + $0x30] sm:$0xff] }
  0x1e   :  { %v1565_v3 = vrot.slane %v1551_v53, %v5374_v20  ;;  %v1566_v8 = vcombine.high %v1558_v54, %v1558_v54  ;;  %v2330_v9 = vsel %vm2308_vm0, %v1550_v52, 0.0  ;;  %v2332_v11 = vsel %vm2308_vm0, %v1558_v54, 0.0 }
  0x1f   :  { %v2321_v45 = vadd.f32 %v2320_v36, %v2319_v40  ;;  %v830_v12 = vcombine.low %v822_v63, %v829_v0  ;;  %v831_v13 = vcombine.low %v212_v58, %v216_v59  ;;  %v832_v18 = vcombine.low %v220_v60, %v224_v62 }
  0x20   :  { %v1567_v21 = vcombine.high %v1565_v3, %v1565_v3  ;;  %v1568_v22 = vcombine.high %v1426_v2, %v1426_v2  ;;  %v1575_v23 = vrot.slane %v1426_v2, %v5374_v20  ;;  %v2334_v24 = vsel %vm2308_vm0, %v1566_v8, 0.0 }
  0x21   :  { %v2323_v51 = vadd.f32 %v2322_v44, %v2321_v45  ;;  %v228_v27 = vrot.slane %v5222_v47, %v5366_v14  ;;  %v232_v28 = vrot.slane %v5222_v47, %v5368_v15  ;;  %v236_v29 = vrot.slane %v5222_v47, %v5370_v16 }
  0x22   :  { %v2336_v30 = vsel %vm2308_vm0, %v1565_v3, 0.0  ;;  %v240_v31 = vrot.slane %v5222_v47, %v5372_v17  ;;  %v839_v32 = vrot.slane %v831_v13, %v5374_v20  ;;  %v846_v33 = vrot.slane %v832_v18, %v5374_v20  ;;  %v22_v18 = vld [vmem:[%s7549_s0 + $0x38] sm:$0xff] }
  0x23   :  { %v2325_v57 = vadd.f32 %v2324_v46, %v2323_v51  ;;  %v1427_v35 = vmul.f32 %v830_v12, %v20_v25  ;;  %v1582_v36 = vrot.slane %v1568_v22, %v5374_v20  ;;  %v1583_v37 = vcombine.high %v1575_v23, %v1575_v23 }
  0x24   :  { %v2338_v38 = vsel %vm2308_vm0, %v1567_v21, 0.0  ;;  %v2340_v40 = vsel %vm2308_vm0, %v1575_v23, 0.0  ;;  %v847_v42 = vcombine.low %v839_v32, %v846_v33  ;;  %v848_v43 = vcombine.low %v228_v27, %v232_v28  ;;  %v5498_v21 = vld [vmem:[%s7550_s1 + $0x50] ss:$2 sm:$0xff] }
  0x25   :  { %v2327_v1 = vadd.f32 %v2326_v55, %v2325_v57  ;;  %v849_v44 = vcombine.low %v236_v29, %v240_v31  ;;  %v1584_v46 = vcombine.high %v1582_v36, %v1582_v36  ;;  %v1585_v47 = vcombine.high %v1427_v35, %v1427_v35 }
  0x26   :  { %v1592_v48 = vrot.slane %v1427_v35, %v5374_v20  ;;  %v2342_v49 = vsel %vm2308_vm0, %v1583_v37, 0.0  ;;  %v244_v52 = vrot.slane %v5223_v41, %v5351_v4  ;;  %v248_v53 = vrot.slane %v5223_v41, %v5353_v5 }
  0x27   :  { %v2329_v10 = vadd.f32 %v2328_v61, %v2327_v1  ;;  %v252_v54 = vrot.slane %v5223_v41, %v5355_v6  ;;  %v2344_v55 = vsel %vm2308_vm0, %v1582_v36, 0.0  ;;  %v256_v56 = vrot.slane %v5223_v41, %v5357_v7 }
  0x28   :  { %v856_v57 = vrot.slane %v848_v43, %v5374_v20  ;;  %v863_v58 = vrot.slane %v849_v44, %v5374_v20  ;;  %v1428_v60 = vmul.f32 %v847_v42, %v21_v50  ;;  %v1599_v61 = vrot.slane %v1585_v47, %v5374_v20 }
  0x29   :  { %v2331_v19 = vadd.f32 %v2330_v9, %v2329_v10  ;;  %v1600_v62 = vcombine.high %v1592_v48, %v1592_v48  ;;  %v2346_v63 = vsel %vm2308_vm0, %v1584_v46, 0.0  ;;  %v2348_v1 = vsel %vm2308_vm0, %v1592_v48, 0.0 }
  0x2a   :  { %v864_v2 = vcombine.low %v856_v57, %v863_v58  ;;  %v865_v3 = vcombine.low %v244_v52, %v248_v53  ;;  %v866_v8 = vcombine.low %v252_v54, %v256_v56  ;;  %v1601_v10 = vcombine.high %v1599_v61, %v1599_v61  ;;  %v5544_v58 = vld [vmem:[%s7550_s1 + $0x70] ss:$2 sm:$0xff] }
  0x2b   :  { %v2333_v26 = vadd.f32 %v2332_v11, %v2331_v19  ;;  %v1602_v11 = vcombine.high %v1428_v60, %v1428_v60  ;;  %v1609_v12 = vrot.slane %v1428_v60, %v5374_v20  ;;  %v2350_v13 = vsel %vm2308_vm0, %v1600_v62, 0.0 }
  0x2c   :  { %v260_v22 = vrot.slane %v5223_v41, %v5366_v14  ;;  %v264_v23 = vrot.slane %v5223_v41, %v5368_v15  ;;  %v2352_v25 = vsel %vm2308_vm0, %v1599_v61, 0.0  ;;  %v873_v27 = vrot.slane %v865_v3, %v5374_v20 }
  0x2d   :  { %v2335_v34 = vadd.f32 %v2334_v24, %v2333_v26  ;;  %v268_v24 = vrot.slane %v5223_v41, %v5370_v16  ;;  %v272_v26 = vrot.slane %v5223_v41, %v5372_v17  ;;  %v880_v28 = vrot.slane %v866_v8, %v5374_v20 }
  0x2e   :  { %v1616_v31 = vrot.slane %v1602_v11, %v5374_v20  ;;  %v1617_v32 = vcombine.high %v1609_v12, %v1609_v12  ;;  %v2354_v33 = vsel %vm2308_vm0, %v1601_v10, 0.0  ;;  %v280_v36 = vrot.slane %v5498_v21, %v5353_v5 }
  0x2f   :  { %v2337_v39 = vadd.f32 %v2336_v30, %v2335_v34  ;;  %v1429_v30 = vmul.f32 %v864_v2, %v22_v18  ;;  %v276_v34 = vrot.slane %v5498_v21, %v5351_v4  ;;  %v284_v37 = vrot.slane %v5498_v21, %v5355_v6 }
  0x30   :  { %v881_v41 = vcombine.low %v873_v27, %v880_v28  ;;  %v882_v42 = vcombine.low %v260_v22, %v264_v23  ;;  %v883_v43 = vcombine.low %v268_v24, %v272_v26  ;;  %v2358_v48 = vsel %vm2308_vm0, %v1617_v32, 0.0  ;;  %v24_v28 = vld [vmem:[%s7549_s0 + $0x48] sm:$0xff] }
  0x31   :  { %v2339_v45 = vadd.f32 %v2338_v38, %v2337_v39  ;;  %v288_v38 = vrot.slane %v5498_v21, %v5357_v7  ;;  %v2356_v39 = vsel %vm2308_vm0, %v1609_v12, 0.0  ;;  %v1619_v46 = vcombine.high %v1429_v30, %v1429_v30 }
  0x32   :  { %v1626_v47 = vrot.slane %v1429_v30, %v5374_v20  ;;  %v292_v50 = vrot.slane %v5498_v21, %v5366_v14  ;;  %v300_v52 = vrot.slane %v5498_v21, %v5370_v16  ;;  %v304_v54 = vrot.slane %v5498_v21, %v5372_v17 }
  0x33   :  { %v2341_v51 = vadd.f32 %v2340_v40, %v2339_v45  ;;  %v5521_v40 = vld [vmem:[%s7550_s1 + $0x60] ss:$2 sm:$0xff]  ;;  %v1618_v45 = vcombine.high %v1616_v31, %v1616_v31  ;;  %v2360_v57 = vsel %vm2308_vm0, %v1616_v31, 0.0  ;;  %v890_v60 = vrot.slane %v882_v42, %v5374_v20 }
  0x34   :  { %v312_v56 = vrot.slane %v5521_v40, %v5353_v5  ;;  %v897_v61 = vrot.slane %v883_v43, %v5374_v20  ;;  %v320_v3 = vrot.slane %v5521_v40, %v5357_v7  ;;  %v324_v8 = vrot.slane %v5521_v40, %v5366_v14 }
  0x35   :  { %v2343_v59 = vadd.f32 %v2342_v49, %v2341_v51  ;;  %v23_v49 = vld [vmem:[%s7549_s0 + $0x40] sm:$0xff]  ;;  %v296_v51 = vrot.slane %v5498_v21, %v5368_v15  ;;  %v2362_v2 = vsel %vm2308_vm0, %v1618_v45, 0.0  ;;  %v332_v11 = vrot.slane %v5521_v40, %v5370_v16 }
  0x36   :  { %v336_v12 = vrot.slane %v5521_v40, %v5372_v17  ;;  %v2364_v18 = vsel %vm2308_vm0, %v1626_v47, 0.0  ;;  %v899_v21 = vcombine.low %v276_v34, %v280_v36  ;;  %v900_v22 = vcombine.low %v284_v37, %v288_v38 }
  0x37   :  { %v2345_v0 = vadd.f32 %v2344_v55, %v2343_v59  ;;  %v308_v55 = vrot.slane %v5521_v40, %v5351_v4  ;;  %v316_v59 = vrot.slane %v5521_v40, %v5355_v6  ;;  %v348_v30 = vrot.slane %v5544_v58, %v5355_v6 }
  0x38   :  { %v352_v31 = vrot.slane %v5544_v58, %v5357_v7  ;;  %v356_v34 = vrot.slane %v5544_v58, %v5366_v14  ;;  %v364_v36 = vrot.slane %v5544_v58, %v5370_v16  ;;  %v368_v38 = vrot.slane %v5544_v58, %v5372_v17 }
  0x39   :  { %v2347_v9 = vadd.f32 %v2346_v63, %v2345_v0  ;;  %v1430_v63 = vmul.f32 %v881_v41, %v23_v49  ;;  %v1633_v0 = vrot.slane %v1619_v46, %v5374_v20  ;;  %v914_v41 = vrot.slane %v900_v22, %v5374_v20 }
  0x3b   :  { %v2349_v19 = vadd.f32 %v2348_v1, %v2347_v9  ;;  %v1634_v1 = vcombine.high %v1626_v47, %v1626_v47  ;;  %v328_v9 = vrot.slane %v5521_v40, %v5368_v15  ;;  %v1635_v24 = vcombine.high %v1633_v0, %v1633_v0 }
  0x3c   :  { %v1643_v26 = vrot.slane %v1430_v63, %v5374_v20  ;;  %v2368_v37 = vsel %vm2308_vm0, %v1633_v0, 0.0 }
  0x3d   :  { %v2351_v29 = vadd.f32 %v2350_v13, %v2349_v19  ;;  %v340_v13 = vrot.slane %v5544_v58, %v5351_v4  ;;  %v898_v19 = vcombine.low %v890_v60, %v897_v61  ;;  %v2366_v27 = vsel %vm2308_vm0, %v1634_v1, 0.0 }
  0x3e   :  { %v1651_v45 = vcombine.high %v1643_v26, %v1643_v26  ;;  %v2370_v46 = vsel %vm2308_vm0, %v1635_v24, 0.0  ;;  %v916_v1 = vcombine.low %v292_v50, %v296_v51 }
  0x3f   :  { %v2353_v35 = vadd.f32 %v2352_v25, %v2351_v29  ;;  %v1636_v25 = vcombine.high %v1430_v63, %v1430_v63  ;;  %v344_v29 = vrot.slane %v5544_v58, %v5353_v5  ;;  %v1431_v43 = vmul.f32 %v898_v19, %v24_v28  ;;  %v5633_v28 = vld [vmem:[%s7550_s1 + $0xa0] ss:$2 sm:$0xff] }
  0x40   :  { %v2372_v63 = vsel %vm2308_vm0, %v1643_v26, 0.0  ;;  %v2374_v22 = vsel %vm2308_vm0, %v1651_v45, 0.0 }
  0x41   :  { %v2355_v44 = vadd.f32 %v2354_v33, %v2353_v35  ;;  %v5579_v33 = vld [vmem:[%s7550_s1 + $0x80] ss:$2 sm:$0xff]  ;;  %v360_v35 = vrot.slane %v5544_v58, %v5368_v15  ;;  %v1653_v19 = vcombine.high %v1431_v43, %v1431_v43 }
  0x42   :  { %v372_v47 = vrot.slane %v5579_v33, %v5351_v4  ;;  %v380_v49 = vrot.slane %v5579_v33, %v5355_v6  ;;  %v384_v60 = vrot.slane %v5579_v33, %v5357_v7  ;;  %v388_v61 = vrot.slane %v5579_v33, %v5366_v14 }
  0x43   :  { %v2357_v53 = vadd.f32 %v2356_v39, %v2355_v44  ;;  %v907_v39 = vrot.slane %v899_v21, %v5374_v20  ;;  %v1650_v44 = vrot.slane %v1636_v25, %v5374_v20  ;;  %v1660_v21 = vrot.slane %v1431_v43, %v5374_v20 }
  0x44   :  { %v396_v24 = vrot.slane %v5579_v33, %v5370_v16  ;;  %v400_v25 = vrot.slane %v5579_v33, %v5372_v17  ;;  %v1667_v43 = vrot.slane %v1653_v19, %v5374_v20  ;;  %v5657_v19 = vld [vmem:[%s7550_s1 + $0xb0] ss:$2 sm:$0xff] }
  0x45   :  { %v2359_v62 = vadd.f32 %v2358_v48, %v2357_v53  ;;  %v376_v48 = vrot.slane %v5579_v33, %v5353_v5  ;;  %v915_v0 = vcombine.low %v907_v39, %v914_v41  ;;  %v1668_v45 = vcombine.high %v1660_v21, %v1660_v21 }
  0x47   :  { %v2361_v10 = vadd.f32 %v2360_v57, %v2359_v62  ;;  %v5603_v57 = vld [vmem:[%s7550_s1 + $0x90] ss:$2 sm:$0xff]  ;;  %v392_v62 = vrot.slane %v5579_v33, %v5368_v15 }
  0x48   :  { %v404_v50 = vrot.slane %v5603_v57, %v5351_v4  ;;  %v416_v26 = vrot.slane %v5603_v57, %v5357_v7 }
  0x49   :  { %v2363_v23 = vadd.f32 %v2362_v2, %v2361_v10  ;;  %v917_v2 = vcombine.low %v300_v52, %v304_v54  ;;  %v408_v52 = vrot.slane %v5603_v57, %v5353_v5  ;;  %v412_v54 = vrot.slane %v5603_v57, %v5355_v6 }
  0x4b   :  { %v2365_v32 = vadd.f32 %v2364_v18, %v2363_v23  ;;  %v1652_v18 = vcombine.high %v1650_v44, %v1650_v44  ;;  %v25_v23 = vld [vmem:[%s7549_s0 + $0x50] sm:$0xff]  ;;  %v931_v39 = vrot.slane %v917_v2, %v5374_v20 }
  0x4d   :  { %v2367_v42 = vadd.f32 %v2366_v27, %v2365_v32  ;;  %v2376_v27 = vsel %vm2308_vm0, %v1650_v44, 0.0  ;;  %v420_v32 = vrot.slane %v5603_v57, %v5366_v14  ;;  %v424_v44 = vrot.slane %v5603_v57, %v5368_v15 }
  0x4f   :  { %v2369_v53 = vadd.f32 %v2368_v37, %v2367_v42  ;;  %v924_v37 = vrot.slane %v916_v1, %v5374_v20  ;;  %v1432_v42 = vmul.f32 %v915_v0, %v25_v23  ;;  %v933_v23 = vcombine.low %v308_v55, %v312_v56 }
  0x51   :  { %v2371_v10 = vadd.f32 %v2370_v46, %v2369_v53  ;;  %v2378_v46 = vsel %vm2308_vm0, %v1652_v18, 0.0  ;;  %v428_v53 = vrot.slane %v5603_v57, %v5370_v16  ;;  %v2380_v18 = vsel %vm2308_vm0, %v1660_v21, 0.0 }
  0x52   :  { %v934_v21 = vcombine.low %v316_v59, %v320_v3  ;;  %v1677_v2 = vrot.slane %v1432_v42, %v5374_v20  ;;  %v941_v56 = vrot.slane %v933_v23, %v5374_v20  ;;  %v5704_v23 = vld [vmem:[%s7550_s1 + $0xc0] ss:$2 sm:$0xff] }
  0x53   :  { %v2373_v51 = vadd.f32 %v2372_v63, %v2371_v10  ;;  %v432_v63 = vrot.slane %v5603_v57, %v5372_v17  ;;  %v7556_v57 = vrot.slane %v5633_v28, %v5355_v6 }
  0x54   :  { %v948_v1 = vrot.slane %v934_v21, %v5374_v20 }
  0x55   :  { %v2375_v41 = vadd.f32 %v2374_v22, %v2373_v51  ;;  %v932_v22 = vcombine.low %v924_v37, %v931_v39  ;;  %v2382_v37 = vsel %vm2308_vm0, %v1668_v45, 0.0  ;;  %v26_v39 = vld [vmem:[%s7549_s0 + $0x58] sm:$0xff] }
  0x57   :  { %v2377_v10 = vadd.f32 %v2376_v27, %v2375_v41  ;;  %v1669_v27 = vcombine.high %v1667_v43, %v1667_v43  ;;  %v1670_v41 = vcombine.high %v1432_v42, %v1432_v42  ;;  %v476_v42 = vrot.slane %v5657_v19, %v5355_v6 }
  0x59   :  { %v2379_v51 = vadd.f32 %v2378_v46, %v2377_v10  ;;  %v2384_v10 = vsel %vm2308_vm0, %v1667_v43, 0.0  ;;  %v1685_v46 = vcombine.high %v1677_v2, %v1677_v2  ;;  %v2386_v0 = vsel %vm2308_vm0, %v1669_v27, 0.0 }
  0x5a   :  { %v480_v43 = vrot.slane %v5657_v19, %v5357_v7 }
  0x5b   :  { %v2381_v3 = vadd.f32 %v2380_v18, %v2379_v51  ;;  %v1433_v18 = vmul.f32 %v932_v22, %v26_v39  ;;  %v1684_v51 = vrot.slane %v1670_v41, %v5374_v20  ;;  %v488_v22 = vrot.slane %v5657_v19, %v5368_v15 }
  0x5c   :  { %v2388_v41 = vsel %vm2308_vm0, %v1677_v2, 0.0  ;;  %v950_v39 = vcombine.low %v324_v8, %v328_v9 }
  0x5d   :  { %v2383_v59 = vadd.f32 %v2382_v37, %v2381_v3  ;;  %v949_v37 = vcombine.low %v941_v56, %v948_v1  ;;  %v1687_v21 = vcombine.high %v1433_v18, %v1433_v18  ;;  %v1694_v2 = vrot.slane %v1433_v18, %v5374_v20  ;;  %v27_v56 = vld [vmem:[%s7549_s0 + $0x60] sm:$0xff] }
  0x5e   :  { %v2390_v1 = vsel %vm2308_vm0, %v1685_v46, 0.0  ;;  %v2392_v18 = vsel %vm2308_vm0, %v1684_v51, 0.0 }
  0x5f   :  { %v2385_v55 = vadd.f32 %v2384_v10, %v2383_v59  ;;  %v951_v59 = vcombine.low %v332_v11, %v336_v12  ;;  %v1686_v10 = vcombine.high %v1684_v51, %v1684_v51  ;;  %v5739_v12 = vld [vmem:[%s7550_s1 + $0xd0] ss:$2 sm:$0xff]  ;;  %v1434_v9 = vmul.f32 %v949_v37, %v27_v56 }
  0x60   :  { %v1701_v27 = vrot.slane %v1687_v21, %v5374_v20  ;;  %v536_v40 = vrot.slane %v5739_v12, %v5353_v5  ;;  %v967_v56 = vcombine.low %v340_v13, %v344_v29  ;;  %v5805_v13 = vld [vmem:[%s7550_s1 + $0xf0] ss:$2 sm:$0xff] }
  0x61   :  { %v2387_v3 = vadd.f32 %v2386_v0, %v2385_v55  ;;  %v1702_v0 = vcombine.high %v1694_v2, %v1694_v2  ;;  %v2394_v45 = vsel %vm2308_vm0, %v1686_v10, 0.0  ;;  %v528_v55 = vrot.slane %v5704_v23, %v5372_v17  ;;  %v5770_v10 = vld [vmem:[%s7550_s1 + $0xe0] ss:$2 sm:$0xff] }
  0x62   :  { %v1711_v21 = vrot.slane %v1434_v9, %v5374_v20  ;;  %v584_v37 = vrot.slane %v5770_v10, %v5368_v15  ;;  %v588_v29 = vrot.slane %v5770_v10, %v5370_v16 }
  0x63   :  { %v2389_v11 = vadd.f32 %v2388_v41, %v2387_v3  ;;  %v958_v41 = vrot.slane %v950_v39, %v5374_v20  ;;  %v965_v3 = vrot.slane %v951_v59, %v5374_v20  ;;  %v2396_v59 = vsel %vm2308_vm0, %v1694_v2, 0.0 }
  0x64   :  { %v968_v2 = vcombine.low %v348_v30, %v352_v31  ;;  %v1719_v39 = vcombine.high %v1711_v21, %v1711_v21 }
  0x65   :  { %v2391_v8 = vadd.f32 %v2390_v1, %v2389_v11  ;;  %v966_v1 = vcombine.low %v958_v41, %v965_v3  ;;  %v1703_v11 = vcombine.high %v1701_v27, %v1701_v27  ;;  %v2398_v41 = vsel %vm2308_vm0, %v1702_v0, 0.0  ;;  %v28_v3 = vld [vmem:[%s7549_s0 + $0x68] sm:$0xff] }
  0x67   :  { %v2393_v46 = vadd.f32 %v2392_v18, %v2391_v8  ;;  %v1704_v18 = vcombine.high %v1434_v9, %v1434_v9  ;;  %v1435_v30 = vmul.f32 %v966_v1, %v28_v3  ;;  %v2402_v0 = vsel %vm2308_vm0, %v1703_v11, 0.0 }
  0x68   :  { %v2404_v11 = vsel %vm2308_vm0, %v1711_v21, 0.0  ;;  %v985_v3 = vcombine.low %v364_v36, %v368_v38  ;;  %v5841_v21 = vld [vmem:[%s7550_s1 + $0x100] ss:$2 sm:$0xff] }
  0x69   :  { %v2395_v8 = vadd.f32 %v2394_v45, %v2393_v46  ;;  %v2400_v46 = vsel %vm2308_vm0, %v1701_v27, 0.0  ;;  %v1718_v9 = vrot.slane %v1704_v18, %v5374_v20  ;;  %v580_v27 = vrot.slane %v5770_v10, %v5366_v14 }
  0x6a   :  { %v999_v1 = vrot.slane %v985_v3, %v5374_v20  ;;  %v640_v58 = vrot.slane %v5841_v21, %v5357_v7 }
  0x6b   :  { %v2397_v31 = vadd.f32 %v2396_v59, %v2395_v8  ;;  %v975_v59 = vrot.slane %v967_v56, %v5374_v20  ;;  %v982_v8 = vrot.slane %v968_v2, %v5374_v20  ;;  %v592_v56 = vrot.slane %v5770_v10, %v5372_v17 }
  0x6d   :  { %v2399_v45 = vadd.f32 %v2398_v41, %v2397_v31  ;;  %v983_v18 = vcombine.low %v975_v59, %v982_v8  ;;  %v984_v41 = vcombine.low %v356_v34, %v360_v35  ;;  %v1728_v59 = vrot.slane %v1435_v30, %v5374_v20  ;;  %v29_v34 = vld [vmem:[%s7549_s0 + $0x70] sm:$0xff] }
  0x6e   :  { %v2406_v8 = vsel %vm2308_vm0, %v1719_v39, 0.0  ;;  %v632_v39 = vrot.slane %v5841_v21, %v5353_v5 }
  0x6f   :  { %v2401_v51 = vadd.f32 %v2400_v46, %v2399_v45  ;;  %v1720_v45 = vcombine.high %v1718_v9, %v1718_v9  ;;  %v1721_v46 = vcombine.high %v1435_v30, %v1435_v30  ;;  %v992_v35 = vrot.slane %v984_v41, %v5374_v20  ;;  %v5876_v41 = vld [vmem:[%s7550_s1 + $0x110] ss:$2 sm:$0xff] }
  0x71   :  { %v2403_v31 = vadd.f32 %v2402_v0, %v2401_v51  ;;  %v2408_v0 = vsel %vm2308_vm0, %v1718_v9, 0.0  ;;  %v1736_v51 = vcombine.high %v1728_v59, %v1728_v59  ;;  %v2410_v2 = vsel %vm2308_vm0, %v1720_v45, 0.0 }
  0x73   :  { %v2405_v38 = vadd.f32 %v2404_v11, %v2403_v31  ;;  %v1436_v11 = vmul.f32 %v983_v18, %v29_v34  ;;  %v1735_v31 = vrot.slane %v1721_v46, %v5374_v20  ;;  %v2412_v46 = vsel %vm2308_vm0, %v1728_v59, 0.0 }
  0x74   :  { %v1001_v34 = vcombine.low %v372_v47, %v376_v48 }
  0x75   :  { %v2407_v36 = vadd.f32 %v2406_v8, %v2405_v38  ;;  %v1000_v8 = vcombine.low %v992_v35, %v999_v1  ;;  %v1738_v45 = vcombine.high %v1436_v11, %v1436_v11  ;;  %v1745_v59 = vrot.slane %v1436_v11, %v5374_v20  ;;  %v30_v35 = vld [vmem:[%s7549_s0 + $0x78] sm:$0xff] }
  0x76   :  { %v2414_v1 = vsel %vm2308_vm0, %v1736_v51, 0.0  ;;  %v2416_v48 = vsel %vm2308_vm0, %v1735_v31, 0.0 }
  0x77   :  { %v2409_v30 = vadd.f32 %v2408_v0, %v2407_v36  ;;  %v1002_v36 = vcombine.low %v380_v49, %v384_v60  ;;  %v1737_v0 = vcombine.high %v1735_v31, %v1735_v31  ;;  %v1437_v18 = vmul.f32 %v1000_v8, %v30_v35 }
  0x78   :  { %v1752_v3 = vrot.slane %v1738_v45, %v5374_v20  ;;  %v1753_v51 = vcombine.high %v1745_v59, %v1745_v59  ;;  %v688_v31 = vrot.slane %v5876_v41, %v5372_v17  ;;  %v1018_v45 = vcombine.low %v388_v61, %v392_v62  ;;  %v5954_v61 = vld [vmem:[%s7550_s1 + $0x130] ss:$2 sm:$0x3] }
  0x79   :  { %v2411_v38 = vadd.f32 %v2410_v2, %v2409_v30  ;;  %v5911_v2 = vld [vmem:[%s7550_s1 + $0x120] ss:$2 sm:$0xff]  ;;  %v2418_v9 = vsel %vm2308_vm0, %v1737_v0, 0.0  ;;  %v684_v30 = vrot.slane %v5876_v41, %v5370_v16  ;;  %v1019_v8 = vcombine.low %v396_v24, %v400_v25 }
  0x7a   :  { %v692_v11 = vrot.slane %v5911_v2, %v5351_v4  ;;  %v700_v0 = vrot.slane %v5911_v2, %v5355_v6  ;;  %v1754_v62 = vcombine.high %v1752_v3, %v1752_v3  ;;  %v1762_v33 = vrot.slane %v1437_v18, %v5374_v20  ;;  %v31_v25 = vld [vmem:[%s7549_s0 + $0x80] sm:$0xff] }
  0x7b   :  { %v2413_v60 = vadd.f32 %v2412_v46, %v2411_v38  ;;  %v1009_v46 = vrot.slane %v1001_v34, %v5374_v20  ;;  %v1016_v38 = vrot.slane %v1002_v36, %v5374_v20  ;;  %v696_v34 = vrot.slane %v5911_v2, %v5353_v5 }
  0x7c   :  { %v2420_v36 = vsel %vm2308_vm0, %v1745_v59, 0.0  ;;  %v2422_v24 = vsel %vm2308_vm0, %v1753_v51, 0.0  ;;  %v1033_v51 = vrot.slane %v1019_v8, %v5374_v20  ;;  %v716_v59 = vrot.slane %v5911_v2, %v5370_v16 }
  0x7d   :  { %v2415_v47 = vadd.f32 %v2414_v1, %v2413_v60  ;;  %v704_v1 = vrot.slane %v5911_v2, %v5357_v7  ;;  %v1017_v35 = vcombine.low %v1009_v46, %v1016_v38  ;;  %v1026_v60 = vrot.slane %v1018_v45, %v5374_v20 }
  0x7e   :  { %v1036_v46 = vcombine.low %v412_v54, %v416_v26  ;;  %v2424_v38 = vsel %vm2308_vm0, %v1752_v3, 0.0  ;;  %v1052_v26 = vcombine.low %v420_v32, %v424_v44  ;;  %v1053_v3 = vcombine.low %v428_v53, %v432_v63 }
  0x7f   :  { %v2417_v49 = vadd.f32 %v2416_v48, %v2415_v47  ;;  %v1755_v48 = vcombine.high %v1437_v18, %v1437_v18  ;;  %v1438_v8 = vmul.f32 %v1017_v35, %v31_v25  ;;  %v2428_v25 = vsel %vm2308_vm0, %v1762_v33, 0.0 }
  0x80   :  { %v7554_v32 = vrot.slane %v5633_v28, %v5351_v4  ;;  %v7557_v63 = vrot.slane %v5633_v28, %v5368_v15 }
  0x81   :  { %v2419_v47 = vadd.f32 %v2418_v9, %v2417_v49  ;;  %v1035_v49 = vcombine.low %v404_v50, %v408_v52  ;;  %v720_v50 = vrot.slane %v5911_v2, %v5372_v17  ;;  %v2426_v9 = vsel %vm2308_vm0, %v1754_v62, 0.0 }
  0x82   :  { %v7555_v52 = vrot.slane %v5633_v28, %v5357_v7 }
  0x83   :  { %v2421_v18 = vadd.f32 %v2420_v36, %v2419_v47  ;;  %v1769_v36 = vrot.slane %v1755_v48, %v5374_v20  ;;  %v1770_v47 = vcombine.high %v1762_v33, %v1762_v33  ;;  %v1034_v48 = vcombine.low %v1026_v60, %v1033_v51 }
  0x84   :  { %v1043_v62 = vrot.slane %v1035_v49, %v5374_v20  ;;  %v1070_v53 = vcombine.low %v7556_v57, %v7555_v52  ;;  %v7558_v33 = vrot.slane %v5633_v28, %v5366_v14  ;;  %v1060_v52 = vrot.slane %v1052_v26, %v5374_v20 }
  0x85   :  { %v2423_v45 = vadd.f32 %v2422_v24, %v2421_v18  ;;  %v1050_v24 = vrot.slane %v1036_v46, %v5374_v20  ;;  %v7553_v18 = vrot.slane %v5633_v28, %v5353_v5  ;;  %v1771_v51 = vcombine.high %v1769_v36, %v1769_v36 }
  0x86   :  { %v1086_v49 = vcombine.low %v7558_v33, %v7557_v63  ;;  %v1772_v46 = vcombine.high %v1438_v8, %v1438_v8  ;;  %v7559_v57 = vrot.slane %v5633_v28, %v5372_v17  ;;  %v1104_v26 = vcombine.low %v476_v42, %v480_v43 }
  0x87   :  { %v2425_v35 = vadd.f32 %v2424_v38, %v2423_v45  ;;  %v1069_v44 = vcombine.low %v7554_v32, %v7553_v18  ;;  %v1779_v38 = vrot.slane %v1438_v8, %v5374_v20  ;;  %v2430_v45 = vsel %vm2308_vm0, %v1770_v47, 0.0  ;;  %v32_v18 = vld [vmem:[%s7549_s0 + $0x88] sm:$0xff] }
  0x88   :  { %v1067_v32 = vrot.slane %v1053_v3, %v5374_v20  ;;  %v1051_v33 = vcombine.low %v1043_v62, %v1050_v24  ;;  %v7561_v8 = vrot.slane %v5657_v19, %v5353_v5  ;;  %v7562_v47 = vrot.slane %v5657_v19, %v5351_v4 }
  0x89   :  { %v2427_v60 = vadd.f32 %v2426_v9, %v2425_v35  ;;  %v7560_v9 = vrot.slane %v5633_v28, %v5370_v16  ;;  %v2432_v3 = vsel %vm2308_vm0, %v1769_v36, 0.0  ;;  %v1077_v28 = vrot.slane %v1069_v44, %v5374_v20 }
  0x8a   :  { %v1103_v54 = vcombine.low %v7562_v47, %v7561_v8  ;;  %v1084_v62 = vrot.slane %v1070_v53, %v5374_v20  ;;  %v1094_v24 = vrot.slane %v1086_v49, %v5374_v20  ;;  %v2434_v8 = vsel %vm2308_vm0, %v1771_v51, 0.0 }
  0x8b   :  { %v1087_v35 = vcombine.low %v7560_v9, %v7559_v57  ;;  %v2429_v63 = vadd.f32 %v2428_v25, %v2427_v60  ;;  %v1439_v60 = vmul.f32 %v1034_v48, %v32_v18  ;;  %v1786_v57 = vrot.slane %v1772_v46, %v5374_v20 }
  0x8c   :  { %v1787_v9 = vcombine.high %v1779_v38, %v1779_v38  ;;  %v7563_v42 = vrot.slane %v5657_v19, %v5366_v14  ;;  %v7564_v36 = vrot.slane %v5657_v19, %v5372_v17  ;;  %v7565_v48 = vrot.slane %v5657_v19, %v5370_v16 }
  0x8d   :  { %v2431_v25 = vadd.f32 %v2430_v45, %v2429_v63  ;;  %v1101_v47 = vrot.slane %v1087_v35, %v5374_v20  ;;  %v1068_v49 = vcombine.low %v1060_v52, %v1067_v32  ;;  %v1111_v51 = vrot.slane %v1103_v54, %v5374_v20 }
  0x8e   :  { %v1120_v43 = vcombine.low %v7563_v42, %v488_v22  ;;  %v1121_v44 = vcombine.low %v7565_v48, %v7564_v36  ;;  %v1118_v46 = vrot.slane %v1104_v26, %v5374_v20  ;;  %v2436_v45 = vsel %vm2308_vm0, %v1779_v38, 0.0 }
  0x8f   :  { %v2433_v53 = vadd.f32 %v2432_v3, %v2431_v25  ;;  %v6070_v18 = vcombine.low %v1077_v28, %v1084_v62  ;;  %v7566_v22 = vrot.slane %v5704_v23, %v5353_v5  ;;  %v7567_v35 = vrot.slane %v5704_v23, %v5351_v4  ;;  %v33_v62 = vld [vmem:[%s7549_s0 + $0x90] sm:$0xff] }
  0x90   :  { %v7568_v19 = vrot.slane %v5704_v23, %v5357_v7  ;;  %v7569_v52 = vrot.slane %v5704_v23, %v5355_v6  ;;  %v1788_v26 = vcombine.high %v1786_v57, %v1786_v57  ;;  %v1789_v3 = vcombine.high %v1439_v60, %v1439_v60 }
  0x91   :  { %v1137_v63 = vcombine.low %v7567_v35, %v7566_v22  ;;  %v2435_v32 = vadd.f32 %v2434_v8, %v2433_v53  ;;  %v1796_v38 = vrot.slane %v1439_v60, %v5374_v20  ;;  %v2438_v28 = vsel %vm2308_vm0, %v1787_v9, 0.0 }
  0x92   :  { %v1138_v54 = vcombine.low %v7569_v52, %v7568_v19  ;;  %v6089_v25 = vcombine.low %v1094_v24, %v1101_v47  ;;  %v1128_v42 = vrot.slane %v1120_v43, %v5374_v20  ;;  %v1135_v36 = vrot.slane %v1121_v44, %v5374_v20 }
  0x93   :  { %v2437_v48 = vadd.f32 %v2436_v45, %v2435_v32  ;;  %v6093_v22 = vcombine.low %v1111_v51, %v1118_v46  ;;  %v7570_v8 = vrot.slane %v5704_v23, %v5368_v15  ;;  %v7571_v60 = vrot.slane %v5704_v23, %v5366_v14 }
  0x94   :  { %v7572_v24 = vrot.slane %v5704_v23, %v5370_v16  ;;  %v2440_v43 = vsel %vm2308_vm0, %v1786_v57, 0.0  ;;  %v1145_v44 = vrot.slane %v1137_v63, %v5374_v20  ;;  %v1152_v53 = vrot.slane %v1138_v54, %v5374_v20 }
  0x95   :  { %v1154_v9 = vcombine.low %v7571_v60, %v7570_v8  ;;  %v7573_v51 = vrot.slane %v5739_v12, %v5351_v4  ;;  %v2439_v45 = vadd.f32 %v2438_v28, %v2437_v48  ;;  %v1440_v35 = vmul.f32 %v1051_v33, %v33_v62 }
  0x96   :  { %v1155_v47 = vcombine.low %v7572_v24, %v528_v55  ;;  %v1803_v19 = vrot.slane %v1789_v3, %v5374_v20  ;;  %v1804_v52 = vcombine.high %v1796_v38, %v1796_v38  ;;  %v2442_v23 = vsel %vm2308_vm0, %v1788_v26, 0.0 }
  0x97   :  { %v1171_v46 = vcombine.low %v7573_v51, %v536_v40  ;;  %v7574_v55 = vrot.slane %v5739_v12, %v5357_v7  ;;  %v7575_v57 = vrot.slane %v5739_v12, %v5355_v6  ;;  %v7576_v54 = vrot.slane %v5739_v12, %v5368_v15 }
  0x98   :  { %v7577_v40 = vrot.slane %v5739_v12, %v5366_v14  ;;  %v7578_v33 = vrot.slane %v5739_v12, %v5372_v17  ;;  %v7579_v26 = vrot.slane %v5739_v12, %v5370_v16  ;;  %v2441_v28 = vadd.f32 %v2440_v43, %v2439_v45  ;;  %v34_v45 = vld [vmem:[%s7549_s0 + $0x98] sm:$0xff] }
  0x99   :  { %v1172_v63 = vcombine.low %v7575_v57, %v7574_v55  ;;  %v6136_v62 = vcombine.low %v1128_v42, %v1135_v36  ;;  %v1162_v48 = vrot.slane %v1154_v9, %v5374_v20  ;;  %v1169_v8 = vrot.slane %v1155_v47, %v5374_v20 }
  0x9a   :  { %v1188_v32 = vcombine.low %v7577_v40, %v7576_v54  ;;  %v1189_v3 = vcombine.low %v7579_v26, %v7578_v33  ;;  %v2444_v60 = vsel %vm2308_vm0, %v1796_v38, 0.0  ;;  %v1179_v24 = vrot.slane %v1171_v46, %v5374_v20 }
  0x9b   :  { %v7580_v51 = vrot.slane %v5770_v10, %v5353_v5  ;;  %v7581_v55 = vrot.slane %v5770_v10, %v5351_v4  ;;  %v7582_v12 = vrot.slane %v5770_v10, %v5357_v7  ;;  %v7583_v42 = vrot.slane %v5770_v10, %v5355_v6 }
  0x9c   :  { %v2443_v9 = vadd.f32 %v2442_v23, %v2441_v28  ;;  %v1805_v47 = vcombine.high %v1803_v19, %v1803_v19  ;;  %v1806_v43 = vcombine.high %v1440_v35, %v1440_v35  ;;  %v1813_v38 = vrot.slane %v1440_v35, %v5374_v20 }
  0x9d   :  { %v1205_v57 = vcombine.low %v7581_v55, %v7580_v51  ;;  %v1206_v36 = vcombine.low %v7583_v42, %v7582_v12  ;;  %v2446_v46 = vsel %vm2308_vm0, %v1804_v52, 0.0  ;;  %v1186_v54 = vrot.slane %v1172_v63, %v5374_v20 }
  0x9e   :  { %v1196_v40 = vrot.slane %v1188_v32, %v5374_v20  ;;  %v1203_v33 = vrot.slane %v1189_v3, %v5374_v20  ;;  %v2445_v26 = vadd.f32 %v2444_v60, %v2443_v9  ;;  %v6162_v51 = vcombine.low %v1145_v44, %v1152_v53 }
  0x9f   :  { %v1222_v35 = vcombine.low %v580_v27, %v584_v37  ;;  %v1223_v52 = vcombine.low %v588_v29, %v592_v56  ;;  %v2448_v23 = vsel %vm2308_vm0, %v1803_v19, 0.0  ;;  %v6177_v63 = vcombine.low %v1162_v48, %v1169_v8 }
  0xa0   :  { %v1213_v44 = vrot.slane %v1205_v57, %v5374_v20  ;;  %v1220_v53 = vrot.slane %v1206_v36, %v5374_v20  ;;  %v2447_v32 = vadd.f32 %v2446_v46, %v2445_v26  ;;  %v1441_v3 = vmul.f32 %v1068_v49, %v34_v45 }
  0xa1   :  { %v1820_v28 = vrot.slane %v1806_v43, %v5374_v20  ;;  %v1821_v37 = vcombine.high %v1813_v38, %v1813_v38  ;;  %v2450_v27 = vsel %vm2308_vm0, %v1805_v47, 0.0  ;;  %v6183_v60 = vcombine.low %v1179_v24, %v1186_v54 }
  0xa2   :  { %v6185_v55 = vcombine.low %v1196_v40, %v1203_v33  ;;  %v7584_v10 = vrot.slane %v5805_v13, %v5353_v5  ;;  %v7585_v29 = vrot.slane %v5805_v13, %v5351_v4  ;;  %v2449_v19 = vadd.f32 %v2448_v23, %v2447_v32 }
  0xa3   :  { %v1230_v49 = vrot.slane %v1222_v35, %v5374_v20  ;;  %v1237_v48 = vrot.slane %v1223_v52, %v5374_v20  ;;  %v7586_v8 = vrot.slane %v5805_v13, %v5357_v7  ;;  %v7587_v24 = vrot.slane %v5805_v13, %v5355_v6  ;;  %v35_v35 = vld [vmem:[%s7549_s0 + $0xa0] sm:$0xff] }
  0xa4   :  { %v6193_v56 = vcombine.low %v7585_v29, %v7584_v10  ;;  %v2452_v12 = vsel %vm2308_vm0, %v1813_v38, 0.0  ;;  %v6206_v42 = vcombine.low %v1213_v44, %v1220_v53  ;;  %v7588_v36 = vrot.slane %v5805_v13, %v5368_v15 }
  0xa5   :  { %v6203_v57 = vcombine.low %v7587_v24, %v7586_v8  ;;  %v7589_v9 = vrot.slane %v5805_v13, %v5366_v14  ;;  %v7590_v43 = vrot.slane %v5805_v13, %v5372_v17  ;;  %v7591_v46 = vrot.slane %v5805_v13, %v5370_v16 }
  0xa6   :  { %v2451_v54 = vadd.f32 %v2450_v27, %v2449_v19  ;;  %v1822_v40 = vcombine.high %v1820_v28, %v1820_v28  ;;  %v1823_v38 = vcombine.high %v1441_v3, %v1441_v3  ;;  %v1830_v33 = vrot.slane %v1441_v3, %v5374_v20 }
  0xa7   :  { %v6214_v47 = vcombine.low %v7589_v9, %v7588_v36  ;;  %v1257_v45 = vcombine.low %v7591_v46, %v7590_v43  ;;  %v2454_v26 = vsel %vm2308_vm0, %v1821_v37, 0.0  ;;  %v1247_v52 = vrot.slane %v6193_v56, %v5374_v20 }
  0xa8   :  { %v7592_v13 = vrot.slane %v5841_v21, %v5351_v4  ;;  %v7593_v44 = vrot.slane %v5841_v21, %v5355_v6  ;;  %v2453_v32 = vadd.f32 %v2452_v12, %v2451_v54  ;;  %v6241_v3 = vcombine.low %v1230_v49, %v1237_v48 }
  0xa9   :  { %v1254_v37 = vrot.slane %v6203_v57, %v5374_v20  ;;  %v7594_v27 = vrot.slane %v5841_v21, %v5368_v15  ;;  %v7595_v10 = vrot.slane %v5841_v21, %v5366_v14  ;;  %v2456_v29 = vsel %vm2308_vm0, %v1820_v28, 0.0 }
  0xaa   :  { %v1273_v23 = vcombine.low %v7592_v13, %v632_v39  ;;  %v1274_v53 = vcombine.low %v7593_v44, %v640_v58  ;;  %v1264_v56 = vrot.slane %v6214_v47, %v5374_v20  ;;  %v1271_v58 = vrot.slane %v1257_v45, %v5374_v20 }
  0xab   :  { %v1290_v39 = vcombine.low %v7595_v10, %v7594_v27  ;;  %v7596_v19 = vrot.slane %v5841_v21, %v5372_v17  ;;  %v7597_v49 = vrot.slane %v5841_v21, %v5370_v16  ;;  %v2455_v8 = vadd.f32 %v2454_v26, %v2453_v32 }
  0xac   :  { %v1442_v24 = vmul.f32 %v6070_v18, %v35_v35  ;;  %v1837_v57 = vrot.slane %v1823_v38, %v5374_v20  ;;  %v1838_v12 = vcombine.high %v1830_v33, %v1830_v33  ;;  %v2458_v28 = vsel %vm2308_vm0, %v1822_v40, 0.0 }
  0xad   :  { %v1291_v48 = vcombine.low %v7597_v49, %v7596_v19  ;;  %v1281_v36 = vrot.slane %v1273_v23, %v5374_v20  ;;  %v1288_v9 = vrot.slane %v1274_v53, %v5374_v20  ;;  %v7598_v47 = vrot.slane %v5876_v41, %v5353_v5 }
  0xae   :  { %v7599_v43 = vrot.slane %v5876_v41, %v5351_v4  ;;  %v2457_v46 = vadd.f32 %v2456_v29, %v2455_v8  ;;  %v1298_v45 = vrot.slane %v1290_v39, %v5374_v20  ;;  %v7600_v18 = vrot.slane %v5876_v41, %v5357_v7 }
  0xaf   :  { %v7601_v54 = vrot.slane %v5876_v41, %v5355_v6  ;;  %v7602_v38 = vrot.slane %v5876_v41, %v5368_v15  ;;  %v7603_v26 = vrot.slane %v5876_v41, %v5366_v14  ;;  %v2460_v13 = vsel %vm2308_vm0, %v1830_v33, 0.0 }
  0xb0   :  { %v1307_v21 = vcombine.low %v7599_v43, %v7598_v47  ;;  %v1325_v23 = vcombine.low %v684_v30, %v688_v31  ;;  %v1341_v44 = vcombine.low %v692_v11, %v696_v34  ;;  %v1342_v33 = vcombine.low %v700_v0, %v704_v1  ;;  %v36_v31 = vld [vmem:[%s7549_s0 + $0xa8] sm:$0xff] }
  0xb1   :  { %v1308_v40 = vcombine.low %v7601_v54, %v7600_v18  ;;  %v1324_v35 = vcombine.low %v7603_v26, %v7602_v38  ;;  %v2459_v53 = vadd.f32 %v2458_v28, %v2457_v46  ;;  %v1839_v32 = vcombine.high %v1837_v57, %v1837_v57 }
  0xb2   :  { %v1840_v27 = vcombine.high %v1442_v24, %v1442_v24  ;;  %v1847_v41 = vrot.slane %v1442_v24, %v5374_v20  ;;  %v2462_v30 = vsel %vm2308_vm0, %v1838_v12, 0.0  ;;  %v1305_v11 = vrot.slane %v1291_v48, %v5374_v20 }
  0xb3   :  { %v7604_v34 = vrot.slane %v5911_v2, %v5368_v15  ;;  %v7605_v10 = vrot.slane %v5911_v2, %v5366_v14  ;;  %v1359_v1 = vcombine.low %v716_v59, %v720_v50  ;;  %v2461_v39 = vadd.f32 %v2460_v13, %v2459_v53  ;;  %v38_v13 = vld [vmem:[%s7549_s0 + $0xb8] sm:$0xff] }
  0xb4   :  { %v1315_v29 = vrot.slane %v1307_v21, %v5374_v20  ;;  %v1322_v19 = vrot.slane %v1308_v40, %v5374_v20  ;;  %v1332_v49 = vrot.slane %v1324_v35, %v5374_v20  ;;  %v2464_v48 = vsel %vm2308_vm0, %v1837_v57, 0.0  ;;  %v37_v35 = vld [vmem:[%s7549_s0 + $0xb0] sm:$0xff] }
  0xb5   :  { %v1358_v0 = vcombine.low %v7605_v10, %v7604_v34  ;;  %v1339_v8 = vrot.slane %v1325_v23, %v5374_v20  ;;  %v1349_v24 = vrot.slane %v1341_v44, %v5374_v20  ;;  %v1356_v12 = vrot.slane %v1342_v33, %v5374_v20  ;;  %v45_v34 = vld [vmem:[%s7549_s0 + $0xf0] sm:$0xff]  ;;  %v46_v10 = vld [vmem:[%s7549_s0 + $0xf8] sm:$0xff] }
  0xb6   :  { %v2463_v28 = vadd.f32 %v2462_v30, %v2461_v39  ;;  %v1443_v47 = vmul.f32 %v6089_v25, %v36_v31  ;;  %v1854_v2 = vrot.slane %v1840_v27, %v5374_v20  ;;  %v1855_v59 = vcombine.high %v1847_v41, %v1847_v41 }
  0xb7   :  { %v2466_v50 = vsel %vm2308_vm0, %v1839_v32, 0.0  ;;  %v1366_v43 = vrot.slane %v1358_v0, %v5374_v20  ;;  %v1373_v21 = vrot.slane %v1359_v1, %v5374_v20  ;;  %v7606_v57 = vrot.slane %v5954_v61, %v5353_v5  ;;  %v43_v32 = vld [vmem:[%s7549_s0 + $0xe0] sm:$0xff] }
  0xb8   :  { %v7607_v46 = vrot.slane %v5954_v61, %v5351_v4  ;;  %v2465_v54 = vadd.f32 %v2464_v48, %v2463_v28  ;;  %v1255_v40 = vcombine.low %v1247_v52, %v1254_v37  ;;  %v1272_v25 = vcombine.low %v1264_v56, %v1271_v58  ;;  %v39_v61 = vld [vmem:[%s7549_s0 + $0xc0] sm:$0xff]  ;;  %v40_v37 = vld [vmem:[%s7549_s0 + $0xc8] sm:$0xff]  ;;  %v41_v56 = vld [vmem:[%s7549_s0 + $0xd0] sm:$0xff] }
  0xb9   :  { %v1289_v38 = vcombine.low %v1281_v36, %v1288_v9  ;;  %v2468_v26 = vsel %vm2308_vm0, %v1847_v41, 0.0  ;;  %v1306_v23 = vcombine.low %v1298_v45, %v1305_v11  ;;  %v1323_v44 = vcombine.low %v1315_v29, %v1322_v19  ;;  %v42_v58 = vld [vmem:[%s7549_s0 + $0xd8] sm:$0xff]  ;;  %v44_v11 = vld [vmem:[%s7549_s0 + $0xe8] sm:$0xff]  ;;  %v47_v19 = vld [vmem:[%s7549_s0 + $0x100] sm:$0xff] }
  0xba   :  { %v6340_v18 = vcombine.low %v7607_v46, %v7606_v57  ;;  %v1340_v33 = vcombine.low %v1332_v49, %v1339_v8  ;;  %v2467_v52 = vadd.f32 %v2466_v50, %v2465_v54  ;;  %v1856_v36 = vcombine.high %v1854_v2, %v1854_v2  ;;  %v52_v50 = vld [vmem:[%s7549_s0 + $0x128] sm:$0xff] }
  0xbb   :  { %v1857_v9 = vcombine.high %v1443_v47, %v1443_v47  ;;  %v1864_v53 = vrot.slane %v1443_v47, %v5374_v20  ;;  %v2470_v45 = vsel %vm2308_vm0, %v1855_v59, 0.0  ;;  %v1357_v27 = vcombine.low %v1349_v24, %v1356_v12 }
  0xbc   :  { %v1374_v41 = vcombine.low %v1366_v43, %v1373_v21  ;;  %v1382_v30 = vrot.slane %v6340_v18, %v5374_v20  ;;  %v2469_v31 = vadd.f32 %v2468_v26, %v2467_v52  ;;  %v1444_v0 = vmul.f32 %v6093_v22, %v37_v35  ;;  %v48_v22 = vld [vmem:[%s7549_s0 + $0x108] sm:$0xff]  ;;  %v53_v43 = vld [vmem:[%s7549_s0 + $0x130] sm:$0xf] }
  0xbd   :  { %v1445_v1 = vmul.f32 %v6136_v62, %v38_v13  ;;  %v1446_v39 = vmul.f32 %v6162_v51, %v39_v61  ;;  %v2472_v29 = vsel %vm2308_vm0, %v1854_v2, 0.0  ;;  %v1447_v49 = vmul.f32 %v6177_v63, %v40_v37  ;;  %v49_v62 = vld [vmem:[%s7549_s0 + $0x110] sm:$0xff] }
  0xbe   :  { %v6386_v48 = vmul.f32 %v6183_v60, %v41_v56  ;;  %v6389_v8 = vmul.f32 %v6185_v55, %v42_v58  ;;  %v2471_v24 = vadd.f32 %v2470_v45, %v2469_v31  ;;  %v6398_v51 = vmul.f32 %v6206_v42, %v43_v32  ;;  %v50_v55 = vld [vmem:[%s7549_s0 + $0x118] sm:$0xff]  ;;  %v51_v42 = vld [vmem:[%s7549_s0 + $0x120] sm:$0xff] }
  0xbf   :  { %v1871_v63 = vrot.slane %v1857_v9, %v5374_v20  ;;  %v1872_v12 = vcombine.high %v1864_v53, %v1864_v53  ;;  %v2474_v60 = vsel %vm2308_vm0, %v1856_v36, 0.0  ;;  %v6406_v28 = vmul.f32 %v6241_v3, %v44_v11 }
  0xc0   :  { %v6408_v47 = vmul.f32 %v1255_v40, %v45_v34  ;;  %v6410_v2 = vmul.f32 %v1272_v25, %v46_v10  ;;  %v2473_v59 = vadd.f32 %v2472_v29, %v2471_v24  ;;  %v6421_v21 = vmul.f32 %v1289_v38, %v47_v19 }
  0xc1   :  { %v1874_v3 = vcombine.high %v1444_v0, %v1444_v0  ;;  %v1881_v57 = vrot.slane %v1444_v0, %v5374_v20  ;;  %v2476_v46 = vsel %vm2308_vm0, %v1864_v53, 0.0  ;;  %v6425_v18 = vmul.f32 %v1306_v23, %v48_v22  ;;  %v6441_v23 = vld [vmem:[%s7550_s1 + $0x1] ss:$2 sm:$0xff] }
  0xc2   :  { %v6427_v54 = vmul.f32 %v1323_v44, %v49_v62  ;;  %v1891_v40 = vcombine.high %v1445_v1, %v1445_v1  ;;  %v2475_v25 = vadd.f32 %v2474_v60, %v2473_v59  ;;  %v6429_v26 = vmul.f32 %v1340_v33, %v50_v55 }
  0xc3   :  { %v1873_v35 = vcombine.high %v1871_v63, %v1871_v63  ;;  %v1908_v13 = vcombine.high %v1446_v39, %v1446_v39  ;;  %v2478_v61 = vsel %vm2308_vm0, %v1872_v12, 0.0  ;;  %v6432_v52 = vmul.f32 %v1357_v27, %v51_v42 }
  0xc4   :  { %v6434_v38 = vmul.f32 %v1374_v41, %v52_v50  ;;  %v6436_v37 = vmul.f32 %v1382_v30, %v53_v43  ;;  %v2477_v56 = vadd.f32 %v2476_v46, %v2475_v25  ;;  %v1888_v44 = vrot.slane %v1874_v3, %v5374_v20 }
  0xc5   :  { %v1889_v33 = vcombine.high %v1881_v57, %v1881_v57  ;;  %v1898_v58 = vrot.slane %v1445_v1, %v5374_v20  ;;  %v2480_v36 = vsel %vm2308_vm0, %v1871_v63, 0.0  ;;  %v6447_v9 = vrot.slane %v1891_v40, %v5374_v20 }
  0xc6   :  { %v6450_v53 = vrot.slane %v1446_v39, %v5374_v20  ;;  %v1925_v45 = vcombine.high %v1447_v49, %v1447_v49  ;;  %v2479_v32 = vadd.f32 %v2478_v61, %v2477_v56  ;;  %v6453_v27 = vrot.slane %v1908_v13, %v5374_v20 }
  0xc7   :  { %v1942_v41 = vcombine.high %v6386_v48, %v6386_v48  ;;  %v2482_v30 = vsel %vm2308_vm0, %v1873_v35, 0.0  ;;  %v2682_v31 = vrot.slane %v6441_v23, %v5351_v4  ;;  %v2686_v34 = vrot.slane %v6441_v23, %v5353_v5 }
  0xc8   :  { %v2481_v11 = vadd.f32 %v2480_v36, %v2479_v32  ;;  %v2690_v10 = vrot.slane %v6441_v23, %v5355_v6  ;;  %v2694_v0 = vrot.slane %v6441_v23, %v5357_v7  ;;  %v1890_v1 = vcombine.high %v1888_v44, %v1888_v44 }
  0xc9   :  { %v1906_v39 = vcombine.high %v1898_v58, %v1898_v58  ;;  %v1959_v29 = vcombine.high %v6389_v8, %v6389_v8  ;;  %v2484_v19 = vsel %vm2308_vm0, %v1881_v57, 0.0  ;;  %v1907_v24 = vcombine.high %v6447_v9, %v6447_v9 }
  0xca   :  { %v6472_v22 = vrot.slane %v1447_v49, %v5374_v20  ;;  %v6475_v62 = vrot.slane %v1925_v45, %v5374_v20  ;;  %v2483_v63 = vadd.f32 %v2482_v30, %v2481_v11  ;;  %v1923_v12 = vcombine.high %v6450_v53, %v6450_v53 }
  0xcb   :  { %v1924_v60 = vcombine.high %v6453_v27, %v6453_v27  ;;  %v6483_v55 = vrot.slane %v6386_v48, %v5374_v20  ;;  %v2486_v59 = vsel %vm2308_vm0, %v1889_v33, 0.0  ;;  %v6487_v42 = vrot.slane %v1942_v41, %v5374_v20 }
  0xcc   :  { %v2485_v49 = vadd.f32 %v2484_v19, %v2483_v63  ;;  %v3295_v50 = vcombine.low %v2682_v31, %v2686_v34  ;;  %v3296_v43 = vcombine.low %v2690_v10, %v2694_v0  ;;  %v6491_v3 = vrot.slane %v6389_v8, %v5374_v20 }
  0xcd   :  { %v6494_v57 = vrot.slane %v1959_v29, %v5374_v20  ;;  %v1976_v46 = vcombine.high %v6398_v51, %v6398_v51  ;;  %v2488_v48 = vsel %vm2308_vm0, %v1888_v44, 0.0  ;;  %v1940_v40 = vcombine.high %v6472_v22, %v6472_v22 }
  0xce   :  { %v1941_v25 = vcombine.high %v6475_v62, %v6475_v62  ;;  %v6505_v35 = vrot.slane %v6398_v51, %v5374_v20  ;;  %v2487_v8 = vadd.f32 %v2486_v59, %v2485_v49  ;;  %v1957_v13 = vcombine.high %v6483_v55, %v6483_v55 }
  0xcf   :  { %v1993_v61 = vcombine.high %v6406_v28, %v6406_v28  ;;  %v2010_v56 = vcombine.high %v6408_v47, %v6408_v47  ;;  %v2490_v44 = vsel %vm2308_vm0, %v1890_v1, 0.0  ;;  %v1958_v33 = vcombine.high %v6487_v42, %v6487_v42 }
  0xd0   :  { %v2489_v36 = vadd.f32 %v2488_v48, %v2487_v8  ;;  %v3303_v45 = vrot.slane %v3295_v50, %v5374_v20  ;;  %v3310_v51 = vrot.slane %v3296_v43, %v5374_v20  ;;  %v1974_v32 = vcombine.high %v6491_v3, %v6491_v3 }
  0xd1   :  { %v1975_v41 = vcombine.high %v6494_v57, %v6494_v57  ;;  %v6523_v30 = vrot.slane %v1976_v46, %v5374_v20  ;;  %v2492_v31 = vsel %vm2308_vm0, %v1898_v58, 0.0  ;;  %v6530_v34 = vrot.slane %v6406_v28, %v5374_v20 }
  0xd2   :  { %v2027_v10 = vcombine.high %v6410_v2, %v6410_v2  ;;  %v2491_v0 = vadd.f32 %v2490_v44, %v2489_v36  ;;  %v6535_v1 = vrot.slane %v1993_v61, %v5374_v20  ;;  %v6539_v29 = vrot.slane %v6408_v47, %v5374_v20 }
  0xd3   :  { %v6542_v58 = vrot.slane %v2010_v56, %v5374_v20  ;;  %v2494_v19 = vsel %vm2308_vm0, %v1906_v39, 0.0  ;;  %v6547_v28 = vrot.slane %v6410_v2, %v5374_v20  ;;  %v2698_v59 = vrot.slane %v6441_v23, %v5366_v14 }
  0xd4   :  { %v2493_v63 = vadd.f32 %v2492_v31, %v2491_v0  ;;  %v3311_v49 = vcombine.low %v3303_v45, %v3310_v51  ;;  %v2496_v50 = vsel %vm2308_vm0, %v6447_v9, 0.0  ;;  %v2702_v47 = vrot.slane %v6441_v23, %v5368_v15  ;;  %v6582_v51 = vld [vmem:[%s7550_s1 + $0x11] ss:$2 sm:$0xff]  ;;  %v5266_v31 = vld [vmem:[%s7549_s0] sm:$0xff] }
  0xd5   :  { %v2706_v43 = vrot.slane %v6441_v23, %v5370_v16  ;;  %v2710_v39 = vrot.slane %v6441_v23, %v5372_v17  ;;  %v6562_v46 = vrot.slane %v2027_v10, %v5374_v20  ;;  %v2044_v48 = vcombine.high %v6421_v21, %v6421_v21 }
  0xd6   :  { %v2495_v8 = vadd.f32 %v2494_v19, %v2493_v63  ;;  %v2498_v23 = vsel %vm2308_vm0, %v1907_v24, 0.0  ;;  %v6577_v36 = vrot.slane %v6421_v21, %v5374_v20  ;;  %v3988_v10 = vmul.f32 %v5266_v31, %v3311_v49 }
  0xd7   :  { %v2500_v0 = vsel %vm2308_vm0, %v6450_v53, 0.0  ;;  %v3312_v19 = vcombine.low %v2698_v59, %v2702_v47  ;;  %v3313_v21 = vcombine.low %v2706_v43, %v2710_v39  ;;  %v6600_v49 = vrot.slane %v6425_v18, %v5374_v20 }
  0xd8   :  { %v2497_v45 = vadd.f32 %v2496_v50, %v2495_v8  ;;  %v6594_v50 = vrot.slane %v2044_v48, %v5374_v20  ;;  %v2061_v8 = vcombine.high %v6425_v18, %v6425_v18  ;;  %v2078_v31 = vcombine.high %v6427_v54, %v6427_v54 }
  0xd9   :  { %v2502_v59 = vsel %vm2308_vm0, %v1923_v12, 0.0  ;;  %v2714_v47 = vrot.slane %v6582_v51, %v5351_v4  ;;  %v2718_v39 = vrot.slane %v6582_v51, %v5353_v5  ;;  %v2722_v48 = vrot.slane %v6582_v51, %v5355_v6 }
  0xda   :  { %v2499_v44 = vadd.f32 %v2498_v23, %v2497_v45  ;;  %v4073_v18 = vrot.slane %v3988_v10, %v5374_v20  ;;  %v2504_v23 = vsel %vm2308_vm0, %v6453_v27, 0.0  ;;  %v2726_v53 = vrot.slane %v6582_v51, %v5357_v7 }
  0xdb   :  { %v3320_v12 = vrot.slane %v3312_v19, %v5374_v20  ;;  %v3327_v45 = vrot.slane %v3313_v21, %v5374_v20  ;;  %v6626_v63 = vrot.slane %v2061_v8, %v5374_v20  ;;  %v6632_v61 = vrot.slane %v6427_v54, %v5374_v20 }
  0xdc   :  { %v2501_v43 = vadd.f32 %v2500_v0, %v2499_v44  ;;  %v2095_v19 = vcombine.high %v6429_v26, %v6429_v26  ;;  %v2506_v21 = vsel %vm2308_vm0, %v1924_v60, 0.0  ;;  %v6641_v0 = vrot.slane %v2078_v31, %v5374_v20 }
  0xdd   :  { %v2508_v56 = vsel %vm2308_vm0, %v6472_v22, 0.0  ;;  %v3328_v44 = vcombine.low %v3320_v12, %v3327_v45  ;;  %v3329_v54 = vcombine.low %v2714_v47, %v2718_v39  ;;  %v3330_v9 = vcombine.low %v2722_v48, %v2726_v53  ;;  %v5267_v45 = vld [vmem:[%s7549_s0 + $0x8] sm:$0xff] }
  0xde   :  { %v2503_v24 = vadd.f32 %v2502_v59, %v2501_v43  ;;  %v4066_v59 = vcombine.high %v3988_v10, %v3988_v10  ;;  %v4081_v43 = vcombine.high %v4073_v18, %v4073_v18  ;;  %v6647_v2 = vrot.slane %v6429_v26, %v5374_v20 }
  0xdf   :  { %v2112_v27 = vcombine.high %v6432_v52, %v6432_v52  ;;  %v2730_v31 = vrot.slane %v6582_v51, %v5366_v14  ;;  %v2510_v10 = vsel %vm2308_vm0, %v1940_v40, 0.0  ;;  %v2738_v47 = vrot.slane %v6582_v51, %v5370_v16 }
  0xe0   :  { %v2505_v8 = vadd.f32 %v2504_v23, %v2503_v24  ;;  %v2734_v24 = vrot.slane %v6582_v51, %v5368_v15  ;;  %v2742_v26 = vrot.slane %v6582_v51, %v5372_v17  ;;  %v4080_v48 = vrot.slane %v4066_v59, %v5374_v20  ;;  %v6687_v59 = vld [vmem:[%s7550_s1 + $0x21] ss:$2 sm:$0xff] }
  0xe1   :  { %v4874_v23 = vsel %vm2308_vm0, %v4073_v18, 0.0  ;;  %v4875_v53 = vsel %vm2308_vm0, %v4081_v43, 0.0  ;;  %v2512_v22 = vsel %vm2308_vm0, %v6475_v62, 0.0  ;;  %v3337_v40 = vrot.slane %v3329_v54, %v5374_v20 }
  0xe2   :  { %v2507_v60 = vadd.f32 %v2506_v21, %v2505_v8  ;;  %v3344_v12 = vrot.slane %v3330_v9, %v5374_v20  ;;  %v3989_v21 = vmul.f32 %v5267_v45, %v3328_v44  ;;  %v6678_v18 = vrot.slane %v2095_v19, %v5374_v20 }
  0xe3   :  { %v2514_v9 = vsel %vm2308_vm0, %v1941_v25, 0.0  ;;  %v3346_v44 = vcombine.low %v2730_v31, %v2734_v24  ;;  %v3347_v43 = vcombine.low %v2738_v47, %v2742_v26  ;;  %v4876_v54 = vadd.f32 %v4875_v53, %v4874_v23 }
  0xe4   :  { %v2509_v39 = vadd.f32 %v2508_v56, %v2507_v60  ;;  %v4082_v45 = vcombine.high %v4080_v48, %v4080_v48  ;;  %v4083_v51 = vcombine.high %v3989_v21, %v3989_v21  ;;  %v4877_v19 = vsel %vm2308_vm0, %v4080_v48, 0.0 }
  0xe5   :  { %v2516_v62 = vsel %vm2308_vm0, %v6483_v55, 0.0  ;;  %v3345_v25 = vcombine.low %v3337_v40, %v3344_v12  ;;  %v2746_v31 = vrot.slane %v6687_v59, %v5351_v4  ;;  %v2750_v24 = vrot.slane %v6687_v59, %v5353_v5 }
  0xe6   :  { %v2511_v8 = vadd.f32 %v2510_v10, %v2509_v39  ;;  %v6692_v10 = vrot.slane %v6432_v52, %v5374_v20  ;;  %v4090_v39 = vrot.slane %v3989_v21, %v5374_v20  ;;  %v2754_v47 = vrot.slane %v6687_v59, %v5355_v6 }
  0xe7   :  { %v2518_v52 = vsel %vm2308_vm0, %v1957_v13, 0.0  ;;  %v2758_v26 = vrot.slane %v6687_v59, %v5357_v7  ;;  %v3354_v48 = vrot.slane %v3346_v44, %v5374_v20  ;;  %v4878_v23 = vadd.f32 %v4877_v19, %v4876_v54  ;;  %v5268_v13 = vld [vmem:[%s7549_s0 + $0x10] sm:$0xff] }
  0xe8   :  { %v2513_v60 = vadd.f32 %v2512_v22, %v2511_v8  ;;  %v3361_v22 = vrot.slane %v3347_v43, %v5374_v20  ;;  %v4097_v40 = vrot.slane %v4083_v51, %v5374_v20  ;;  %v4879_v12 = vsel %vm2308_vm0, %v4082_v45, 0.0 }
  0xe9   :  { %v2520_v55 = vsel %vm2308_vm0, %v6487_v42, 0.0  ;;  %v3990_v8 = vmul.f32 %v5268_v13, %v3345_v25  ;;  %v6723_v44 = vrot.slane %v2112_v27, %v5374_v20  ;;  %v2762_v43 = vrot.slane %v6687_v59, %v5366_v14 }
  0xea   :  { %v2515_v56 = vadd.f32 %v2514_v9, %v2513_v60  ;;  %v4098_v9 = vcombine.high %v4090_v39, %v4090_v39  ;;  %v2522_v54 = vsel %vm2308_vm0, %v1958_v33, 0.0  ;;  %v3363_v60 = vcombine.low %v2746_v31, %v2750_v24 }
  0xeb   :  { %v3364_v45 = vcombine.low %v2754_v47, %v2758_v26  ;;  %v4880_v19 = vadd.f32 %v4879_v12, %v4878_v23  ;;  %v2524_v25 = vsel %vm2308_vm0, %v6491_v3, 0.0  ;;  %v3362_v13 = vcombine.low %v3354_v48, %v3361_v22  ;;  %v6747_v47 = vld [vmem:[%s7550_s1 + $0x31] ss:$2 sm:$0xff] }
  0xec   :  { %v2517_v53 = vadd.f32 %v2516_v62, %v2515_v56  ;;  %v4099_v56 = vcombine.high %v4097_v40, %v4097_v40  ;;  %v4100_v27 = vcombine.high %v3990_v8, %v3990_v8  ;;  %v4883_v21 = vsel %vm2308_vm0, %v4098_v9, 0.0 }
  0xed   :  { %v2766_v42 = vrot.slane %v6687_v59, %v5368_v15  ;;  %v2770_v33 = vrot.slane %v6687_v59, %v5370_v16  ;;  %v2526_v24 = vsel %vm2308_vm0, %v1974_v32, 0.0  ;;  %v3371_v26 = vrot.slane %v3363_v60, %v5374_v20  ;;  %v5269_v32 = vld [vmem:[%s7549_s0 + $0x18] sm:$0xff] }
  0xee   :  { %v2519_v51 = vadd.f32 %v2518_v52, %v2517_v53  ;;  %v4107_v52 = vrot.slane %v3990_v8, %v5374_v20  ;;  %v4881_v53 = vsel %vm2308_vm0, %v4090_v39, 0.0  ;;  %v2774_v39 = vrot.slane %v6687_v59, %v5372_v17 }
  0xef   :  { %v4882_v31 = vadd.f32 %v4881_v53, %v4880_v19  ;;  %v4885_v48 = vsel %vm2308_vm0, %v4097_v40, 0.0  ;;  %v2528_v22 = vsel %vm2308_vm0, %v6494_v57, 0.0  ;;  %v3378_v3 = vrot.slane %v3364_v45, %v5374_v20 }
  0xf0   :  { %v2521_v62 = vadd.f32 %v2520_v55, %v2519_v51  ;;  %v3991_v55 = vmul.f32 %v5269_v32, %v3362_v13  ;;  %v4114_v8 = vrot.slane %v4100_v27, %v5374_v20  ;;  %v4115_v9 = vcombine.high %v4107_v52, %v4107_v52 }
  0xf1   :  { %v4884_v12 = vadd.f32 %v4883_v21, %v4882_v31  ;;  %v4887_v59 = vsel %vm2308_vm0, %v4099_v56, 0.0  ;;  %v2129_v40 = vcombine.high %v6434_v38, %v6434_v38  ;;  %v2778_v51 = vrot.slane %v6747_v47, %v5351_v4 }
  0xf2   :  { %v2523_v11 = vadd.f32 %v2522_v54, %v2521_v62  ;;  %v2530_v21 = vsel %vm2308_vm0, %v1975_v41, 0.0  ;;  %v3380_v60 = vcombine.low %v2762_v43, %v2766_v42  ;;  %v3381_v45 = vcombine.low %v2770_v33, %v2774_v39 }
  0xf3   :  { %v4886_v54 = vadd.f32 %v4885_v48, %v4884_v12  ;;  %v4889_v19 = vsel %vm2308_vm0, %v4107_v52, 0.0  ;;  %v2532_v56 = vsel %vm2308_vm0, %v6505_v35, 0.0  ;;  %v4116_v27 = vcombine.high %v4114_v8, %v4114_v8 }
  0xf4   :  { %v2525_v23 = vadd.f32 %v2524_v25, %v2523_v11  ;;  %v3379_v25 = vcombine.low %v3371_v26, %v3378_v3  ;;  %v4117_v53 = vcombine.high %v3991_v55, %v3991_v55  ;;  %v4124_v31 = vrot.slane %v3991_v55, %v5374_v20  ;;  %v5270_v3 = vld [vmem:[%s7549_s0 + $0x20] sm:$0xff] }
  0xf5   :  { %v4888_v13 = vadd.f32 %v4887_v59, %v4886_v54  ;;  %v2782_v57 = vrot.slane %v6747_v47, %v5353_v5  ;;  %v2786_v41 = vrot.slane %v6747_v47, %v5355_v6  ;;  %v7608_v52 = vcombine.high %v6505_v35, %v6505_v35 }
  0xf6   :  { %v2527_v11 = vadd.f32 %v2526_v24, %v2525_v23  ;;  %v4891_v24 = vsel %vm2308_vm0, %v4115_v9, 0.0  ;;  %v2790_v33 = vrot.slane %v6747_v47, %v5357_v7  ;;  %v3388_v39 = vrot.slane %v3380_v60, %v5374_v20 }
  0xf7   :  { %v4890_v43 = vadd.f32 %v4889_v19, %v4888_v13  ;;  %v2534_v42 = vsel %vm2308_vm0, %v7608_v52, 0.0  ;;  %v4893_v26 = vsel %vm2308_vm0, %v4114_v8, 0.0  ;;  %v3992_v12 = vmul.f32 %v5270_v3, %v3379_v25 }
  0xf8   :  { %v2529_v62 = vadd.f32 %v2528_v22, %v2527_v11  ;;  %v3395_v22 = vrot.slane %v3381_v45, %v5374_v20  ;;  %v2536_v35 = vsel %vm2308_vm0, %v6523_v30, 0.0  ;;  %v4131_v55 = vrot.slane %v4117_v53, %v5374_v20 }
  0xf9   :  { %v4892_v32 = vadd.f32 %v4891_v24, %v4890_v43  ;;  %v4132_v9 = vcombine.high %v4124_v31, %v4124_v31  ;;  %v4895_v59 = vsel %vm2308_vm0, %v4116_v27, 0.0  ;;  %v2111_v8 = vcombine.high %v6678_v18, %v6678_v18 }
  0xfa   :  { %v2531_v48 = vadd.f32 %v2530_v21, %v2529_v62  ;;  %v2794_v54 = vrot.slane %v6747_v47, %v5366_v14  ;;  %v7609_v60 = vcombine.high %v6523_v30, %v6523_v30  ;;  %v3397_v19 = vcombine.low %v2778_v51, %v2782_v57 }
  0xfb   :  { %v4894_v21 = vadd.f32 %v4893_v26, %v4892_v32  ;;  %v3398_v62 = vcombine.low %v2786_v41, %v2790_v33  ;;  %v2540_v13 = vsel %vm2308_vm0, %v6530_v34, 0.0  ;;  %v3396_v27 = vcombine.low %v3388_v39, %v3395_v22  ;;  %v6818_v33 = vld [vmem:[%s7550_s1 + $0x41] ss:$2 sm:$0xff] }
  0xfc   :  { %v2533_v23 = vadd.f32 %v2532_v56, %v2531_v48  ;;  %v2538_v45 = vsel %vm2308_vm0, %v7609_v60, 0.0  ;;  %v4897_v56 = vsel %vm2308_vm0, %v4124_v31, 0.0  ;;  %v4133_v24 = vcombine.high %v4131_v55, %v4131_v55 }
  0xfd   :  { %v4896_v53 = vadd.f32 %v4895_v59, %v4894_v21  ;;  %v4134_v48 = vcombine.high %v3992_v12, %v3992_v12  ;;  %v4141_v43 = vrot.slane %v3992_v12, %v5374_v20  ;;  %v4899_v52 = vsel %vm2308_vm0, %v4132_v9, 0.0 }
  0xfe   :  { %v2535_v11 = vadd.f32 %v2534_v42, %v2533_v23  ;;  %v2798_v30 = vrot.slane %v6747_v47, %v5368_v15  ;;  %v2802_v51 = vrot.slane %v6747_v47, %v5370_v16  ;;  %v7610_v57 = vcombine.high %v6530_v34, %v6530_v34  ;;  %v5271_v34 = vld [vmem:[%s7549_s0 + $0x28] sm:$0xff] }
  0xff   :  { %v4898_v31 = vadd.f32 %v4897_v56, %v4896_v53  ;;  %v2806_v39 = vrot.slane %v6747_v47, %v5372_v17  ;;  %v3405_v26 = vrot.slane %v3397_v19, %v5374_v20  ;;  %v4901_v23 = vsel %vm2308_vm0, %v4131_v55, 0.0 }
 0x100   :  { %v2537_v25 = vadd.f32 %v2536_v35, %v2535_v11  ;;  %v2542_v41 = vsel %vm2308_vm0, %v7610_v57, 0.0  ;;  %v3412_v3 = vrot.slane %v3398_v62, %v5374_v20  ;;  %v3993_v12 = vmul.f32 %v5271_v34, %v3396_v27 }
 0x101   :  { %v4900_v32 = vadd.f32 %v4899_v52, %v4898_v31  ;;  %v2544_v35 = vsel %vm2308_vm0, %v6535_v1, 0.0  ;;  %v4148_v9 = vrot.slane %v4134_v48, %v5374_v20  ;;  %v4149_v59 = vcombine.high %v4141_v43, %v4141_v43 }
 0x102   :  { %v2539_v42 = vadd.f32 %v2538_v45, %v2537_v25  ;;  %v4903_v47 = vsel %vm2308_vm0, %v4133_v24, 0.0  ;;  %v2127_v55 = vcombine.high %v6692_v10, %v6692_v10  ;;  %v2810_v21 = vrot.slane %v6818_v33, %v5351_v4 }
 0x103   :  { %v4902_v60 = vadd.f32 %v4901_v23, %v4900_v32  ;;  %v7611_v45 = vcombine.high %v6535_v1, %v6535_v1  ;;  %v3414_v62 = vcombine.low %v2794_v54, %v2798_v30  ;;  %v3415_v56 = vcombine.low %v2802_v51, %v2806_v39 }
 0x104   :  { %v2541_v22 = vadd.f32 %v2540_v13, %v2539_v42  ;;  %v4905_v25 = vsel %vm2308_vm0, %v4141_v43, 0.0  ;;  %v2548_v27 = vsel %vm2308_vm0, %v6539_v29, 0.0  ;;  %v3413_v53 = vcombine.low %v3405_v26, %v3412_v3  ;;  %v5272_v3 = vld [vmem:[%s7549_s0 + $0x30] sm:$0xff] }
 0x105   :  { %v2546_v19 = vsel %vm2308_vm0, %v7611_v45, 0.0  ;;  %v4904_v24 = vadd.f32 %v4903_v47, %v4902_v60  ;;  %v4150_v48 = vcombine.high %v4148_v9, %v4148_v9  ;;  %v4151_v52 = vcombine.high %v3993_v12, %v3993_v12 }
 0x106   :  { %v2543_v11 = vadd.f32 %v2542_v41, %v2541_v22  ;;  %v4158_v42 = vrot.slane %v3993_v12, %v5374_v20  ;;  %v4907_v31 = vsel %vm2308_vm0, %v4149_v59, 0.0  ;;  %v2814_v1 = vrot.slane %v6818_v33, %v5353_v5 }
 0x107   :  { %v2818_v54 = vrot.slane %v6818_v33, %v5355_v6  ;;  %v4906_v43 = vadd.f32 %v4905_v25, %v4904_v24  ;;  %v7612_v30 = vcombine.high %v6539_v29, %v6539_v29  ;;  %v2822_v41 = vrot.slane %v6818_v33, %v5357_v7 }
 0x108   :  { %v2545_v13 = vadd.f32 %v2544_v35, %v2543_v11  ;;  %v3422_v39 = vrot.slane %v3414_v62, %v5374_v20  ;;  %v4909_v26 = vsel %vm2308_vm0, %v4148_v9, 0.0  ;;  %v3429_v22 = vrot.slane %v3415_v56, %v5374_v20 }
 0x109   :  { %v2550_v51 = vsel %vm2308_vm0, %v7612_v30, 0.0  ;;  %v3994_v34 = vmul.f32 %v5272_v3, %v3413_v53  ;;  %v4908_v12 = vadd.f32 %v4907_v31, %v4906_v43  ;;  %v2552_v29 = vsel %vm2308_vm0, %v6542_v58, 0.0  ;;  %v6891_v30 = vld [vmem:[%s7550_s1 + $0x51] ss:$2 sm:$0xff] }
 0x10a   :  { %v2547_v57 = vadd.f32 %v2546_v19, %v2545_v13  ;;  %v4165_v32 = vrot.slane %v4151_v52, %v5374_v20  ;;  %v4166_v35 = vcombine.high %v4158_v42, %v4158_v42  ;;  %v4911_v59 = vsel %vm2308_vm0, %v4150_v48, 0.0 }
 0x10b   :  { %v6867_v9 = vrot.slane %v6434_v38, %v5374_v20  ;;  %v2826_v11 = vrot.slane %v6818_v33, %v5366_v14  ;;  %v4910_v60 = vadd.f32 %v4909_v26, %v4908_v12  ;;  %v7613_v45 = vcombine.high %v6542_v58, %v6542_v58 }
 0x10c   :  { %v2549_v23 = vadd.f32 %v2548_v27, %v2547_v57  ;;  %v3431_v62 = vcombine.low %v2810_v21, %v2814_v1  ;;  %v3432_v56 = vcombine.low %v2818_v54, %v2822_v41  ;;  %v4913_v25 = vsel %vm2308_vm0, %v4158_v42, 0.0 }
 0x10d   :  { %v2554_v19 = vsel %vm2308_vm0, %v7613_v45, 0.0  ;;  %v2556_v27 = vsel %vm2308_vm0, %v6547_v28, 0.0  ;;  %v3430_v53 = vcombine.low %v3422_v39, %v3429_v22  ;;  %v4912_v24 = vadd.f32 %v4911_v59, %v4910_v60 }
 0x10e   :  { %v2551_v47 = vadd.f32 %v2550_v51, %v2549_v23  ;;  %v4167_v48 = vcombine.high %v4165_v32, %v4165_v32  ;;  %v4168_v52 = vcombine.high %v3994_v34, %v3994_v34  ;;  %v4175_v31 = vrot.slane %v3994_v34, %v5374_v20 }
 0x10f   :  { %v4915_v57 = vsel %vm2308_vm0, %v4166_v35, 0.0  ;;  %v2830_v58 = vrot.slane %v6818_v33, %v5368_v15  ;;  %v2834_v21 = vrot.slane %v6818_v33, %v5370_v16  ;;  %v4914_v42 = vadd.f32 %v4913_v25, %v4912_v24 }
 0x110   :  { %v2553_v13 = vadd.f32 %v2552_v29, %v2551_v47  ;;  %v7614_v1 = vcombine.high %v6547_v28, %v6547_v28  ;;  %v2838_v51 = vrot.slane %v6818_v33, %v5372_v17  ;;  %v3439_v41 = vrot.slane %v3431_v62, %v5374_v20  ;;  %v5273_v28 = vld [vmem:[%s7549_s0 + $0x38] sm:$0xff] }
 0x111   :  { %v4917_v39 = vsel %vm2308_vm0, %v4165_v32, 0.0  ;;  %v3446_v23 = vrot.slane %v3432_v56, %v5374_v20  ;;  %v3995_v22 = vmul.f32 %v5273_v28, %v3430_v53  ;;  %v4916_v3 = vadd.f32 %v4915_v57, %v4914_v42 }
 0x112   :  { %v2555_v43 = vadd.f32 %v2554_v19, %v2553_v13  ;;  %v2558_v54 = vsel %vm2308_vm0, %v7614_v1, 0.0  ;;  %v2560_v34 = vsel %vm2308_vm0, %v6562_v46, 0.0  ;;  %v4182_v12 = vrot.slane %v4168_v52, %v5374_v20 }
 0x113   :  { %v4183_v29 = vcombine.high %v4175_v31, %v4175_v31  ;;  %v4919_v33 = vsel %vm2308_vm0, %v4167_v48, 0.0  ;;  %v6907_v32 = vrot.slane %v6436_v37, %v5374_v20  ;;  %v2842_v59 = vrot.slane %v6891_v30, %v5351_v4 }
 0x114   :  { %v2557_v26 = vadd.f32 %v2556_v27, %v2555_v43  ;;  %v4918_v47 = vadd.f32 %v4917_v39, %v4916_v3  ;;  %v7615_v60 = vcombine.high %v6562_v46, %v6562_v46  ;;  %v3448_v19 = vcombine.low %v2826_v11, %v2830_v58 }
 0x115   :  { %v3449_v62 = vcombine.low %v2834_v21, %v2838_v51  ;;  %v4921_v56 = vsel %vm2308_vm0, %v4175_v31, 0.0  ;;  %v3447_v13 = vcombine.low %v3439_v41, %v3446_v23  ;;  %v4185_v27 = vcombine.high %v3995_v22, %v3995_v22  ;;  %v5274_v41 = vld [vmem:[%s7549_s0 + $0x40] sm:$0xff] }
 0x116   :  { %v2559_v35 = vadd.f32 %v2558_v54, %v2557_v26  ;;  %v2562_v45 = vsel %vm2308_vm0, %v7615_v60, 0.0  ;;  %v4920_v53 = vadd.f32 %v4919_v33, %v4918_v47  ;;  %v2564_v37 = vsel %vm2308_vm0, %v6577_v36, 0.0 }
 0x117   :  { %v4184_v24 = vcombine.high %v4182_v12, %v4182_v12  ;;  %v4192_v48 = vrot.slane %v3995_v22, %v5374_v20  ;;  %v4923_v52 = vsel %vm2308_vm0, %v4183_v29, 0.0  ;;  %v2846_v46 = vrot.slane %v6891_v30, %v5353_v5 }
 0x118   :  { %v2561_v25 = vadd.f32 %v2560_v34, %v2559_v35  ;;  %v2850_v11 = vrot.slane %v6891_v30, %v5355_v6  ;;  %v4922_v31 = vadd.f32 %v4921_v56, %v4920_v53  ;;  %v7616_v43 = vcombine.high %v6577_v36, %v6577_v36 }
 0x119   :  { %v2854_v21 = vrot.slane %v6891_v30, %v5357_v7  ;;  %v3456_v42 = vrot.slane %v3448_v19, %v5374_v20  ;;  %v4925_v1 = vsel %vm2308_vm0, %v4182_v12, 0.0  ;;  %v3463_v51 = vrot.slane %v3449_v62, %v5374_v20 }
 0x11a   :  { %v2563_v57 = vadd.f32 %v2562_v45, %v2561_v25  ;;  %v2566_v58 = vsel %vm2308_vm0, %v7616_v43, 0.0  ;;  %v3996_v39 = vmul.f32 %v5274_v41, %v3447_v13  ;;  %v4924_v26 = vadd.f32 %v4923_v52, %v4922_v31 }
 0x11b   :  { %v2568_v36 = vsel %vm2308_vm0, %v6594_v50, 0.0  ;;  %v4199_v23 = vrot.slane %v4185_v27, %v5374_v20  ;;  %v4200_v28 = vcombine.high %v4192_v48, %v4192_v48  ;;  %v4927_v22 = vsel %vm2308_vm0, %v4184_v24, 0.0 }
 0x11c   :  { %v2565_v54 = vadd.f32 %v2564_v37, %v2563_v57  ;;  %v2128_v3 = vcombine.high %v6723_v44, %v6723_v44  ;;  %v2858_v12 = vrot.slane %v6891_v30, %v5366_v14  ;;  %v4926_v29 = vadd.f32 %v4925_v1, %v4924_v26 }
 0x11d   :  { %v7617_v33 = vcombine.high %v6594_v50, %v6594_v50  ;;  %v3465_v47 = vcombine.low %v2842_v59, %v2846_v46  ;;  %v3466_v60 = vcombine.low %v2850_v11, %v2854_v21  ;;  %v4929_v45 = vsel %vm2308_vm0, %v4192_v48, 0.0  ;;  %v6964_v46 = vld [vmem:[%s7550_s1 + $0x61] ss:$2 sm:$0xff] }
 0x11e   :  { %v2567_v34 = vadd.f32 %v2566_v58, %v2565_v54  ;;  %v3464_v62 = vcombine.low %v3456_v42, %v3463_v51  ;;  %v4202_v56 = vcombine.high %v3996_v39, %v3996_v39  ;;  %v4928_v25 = vadd.f32 %v4927_v22, %v4926_v29 }
 0x11f   :  { %v2570_v35 = vsel %vm2308_vm0, %v7617_v33, 0.0  ;;  %v2572_v13 = vsel %vm2308_vm0, %v6600_v49, 0.0  ;;  %v4201_v27 = vcombine.high %v4199_v23, %v4199_v23  ;;  %v4209_v53 = vrot.slane %v3996_v39, %v5374_v20 }
 0x120   :  { %v2569_v19 = vadd.f32 %v2568_v36, %v2567_v34  ;;  %v4931_v37 = vsel %vm2308_vm0, %v4200_v28, 0.0  ;;  %v2862_v50 = vrot.slane %v6891_v30, %v5368_v15  ;;  %v2866_v59 = vrot.slane %v6891_v30, %v5370_v16 }
 0x121   :  { %v4930_v48 = vadd.f32 %v4929_v45, %v4928_v25  ;;  %v7618_v52 = vcombine.high %v6600_v49, %v6600_v49  ;;  %v2870_v11 = vrot.slane %v6891_v30, %v5372_v17  ;;  %v3473_v31 = vrot.slane %v3465_v47, %v5374_v20  ;;  %v5275_v49 = vld [vmem:[%s7549_s0 + $0x48] sm:$0xff] }
 0x122   :  { %v2571_v24 = vadd.f32 %v2570_v35, %v2569_v19  ;;  %v4933_v43 = vsel %vm2308_vm0, %v4199_v23, 0.0  ;;  %v3480_v21 = vrot.slane %v3466_v60, %v5374_v20  ;;  %v3997_v42 = vmul.f32 %v5275_v49, %v3464_v62 }
 0x123   :  { %v2574_v57 = vsel %vm2308_vm0, %v7618_v52, 0.0  ;;  %v4932_v1 = vadd.f32 %v4931_v37, %v4930_v48  ;;  %v2576_v54 = vsel %vm2308_vm0, %v6626_v63, 0.0  ;;  %v4216_v51 = vrot.slane %v4202_v56, %v5374_v20  ;;  %v5276_v48 = vld [vmem:[%s7549_s0 + $0x50] sm:$0xff] }
 0x124   :  { %v2573_v58 = vadd.f32 %v2572_v13, %v2571_v24  ;;  %v4217_v41 = vcombine.high %v4209_v53, %v4209_v53  ;;  %v4935_v30 = vsel %vm2308_vm0, %v4201_v27, 0.0  ;;  %v6982_v39 = vrot.slane %v2129_v40, %v5374_v20 }
 0x125   :  { %v2874_v36 = vrot.slane %v6964_v46, %v5351_v4  ;;  %v4934_v23 = vadd.f32 %v4933_v43, %v4932_v1  ;;  %v7619_v28 = vcombine.high %v6626_v63, %v6626_v63  ;;  %v3482_v34 = vcombine.low %v2858_v12, %v2862_v50 }
 0x126   :  { %v2575_v26 = vadd.f32 %v2574_v57, %v2573_v58  ;;  %v3483_v29 = vcombine.low %v2866_v59, %v2870_v11  ;;  %v4937_v33 = vsel %vm2308_vm0, %v4209_v53, 0.0  ;;  %v3481_v47 = vcombine.low %v3473_v31, %v3480_v21 }
 0x127   :  { %v2578_v22 = vsel %vm2308_vm0, %v7619_v28, 0.0  ;;  %v4219_v60 = vcombine.high %v3997_v42, %v3997_v42  ;;  %v4936_v38 = vadd.f32 %v4935_v30, %v4934_v23  ;;  %v2580_v40 = vsel %vm2308_vm0, %v6632_v61, 0.0 }
 0x128   :  { %v2577_v35 = vadd.f32 %v2576_v54, %v2575_v26  ;;  %v4218_v45 = vcombine.high %v4216_v51, %v4216_v51  ;;  %v4226_v19 = vrot.slane %v3997_v42, %v5374_v20  ;;  %v4939_v62 = vsel %vm2308_vm0, %v4217_v41, 0.0 }
 0x129   :  { %v2878_v63 = vrot.slane %v6964_v46, %v5353_v5  ;;  %v2882_v12 = vrot.slane %v6964_v46, %v5355_v6  ;;  %v4938_v25 = vadd.f32 %v4937_v33, %v4936_v38  ;;  %v7620_v13 = vcombine.high %v6632_v61, %v6632_v61 }
 0x12a   :  { %v2579_v56 = vadd.f32 %v2578_v22, %v2577_v35  ;;  %v2886_v53 = vrot.slane %v6964_v46, %v5357_v7  ;;  %v3490_v37 = vrot.slane %v3482_v34, %v5374_v20  ;;  %v4941_v24 = vsel %vm2308_vm0, %v4216_v51, 0.0 }
 0x12b   :  { %v2582_v27 = vsel %vm2308_vm0, %v7620_v13, 0.0  ;;  %v3497_v59 = vrot.slane %v3483_v29, %v5374_v20  ;;  %v3998_v52 = vmul.f32 %v5276_v48, %v3481_v47  ;;  %v4940_v57 = vadd.f32 %v4939_v62, %v4938_v25 }
 0x12c   :  { %v2581_v50 = vadd.f32 %v2580_v40, %v2579_v56  ;;  %v2584_v61 = vsel %vm2308_vm0, %v6641_v0, 0.0  ;;  %v4233_v11 = vrot.slane %v4219_v60, %v5374_v20  ;;  %v4234_v31 = vcombine.high %v4226_v19, %v4226_v19 }
 0x12d   :  { %v4943_v43 = vsel %vm2308_vm0, %v4218_v45, 0.0  ;;  %v2144_v58 = vcombine.high %v6867_v9, %v6867_v9  ;;  %v2890_v49 = vrot.slane %v6964_v46, %v5366_v14  ;;  %v4942_v42 = vadd.f32 %v4941_v24, %v4940_v57  ;;  %v7039_v45 = vld [vmem:[%s7550_s1 + $0x71] ss:$2 sm:$0xff] }
 0x12e   :  { %v2583_v21 = vadd.f32 %v2582_v27, %v2581_v50  ;;  %v7621_v1 = vcombine.high %v6641_v0, %v6641_v0  ;;  %v3499_v51 = vcombine.low %v2874_v36, %v2878_v63  ;;  %v3500_v41 = vcombine.low %v2882_v12, %v2886_v53 }
 0x12f   :  { %v4945_v30 = vsel %vm2308_vm0, %v4226_v19, 0.0  ;;  %v3498_v23 = vcombine.low %v3490_v37, %v3497_v59  ;;  %v4236_v28 = vcombine.high %v3998_v52, %v3998_v52  ;;  %v4944_v22 = vadd.f32 %v4943_v43, %v4942_v42 }
 0x130   :  { %v2586_v54 = vsel %vm2308_vm0, %v7621_v1, 0.0  ;;  %v2585_v26 = vadd.f32 %v2584_v61, %v2583_v21  ;;  %v2588_v34 = vsel %vm2308_vm0, %v6647_v2, 0.0  ;;  %v4235_v29 = vcombine.high %v4233_v11, %v4233_v11 }
 0x131   :  { %v4243_v33 = vrot.slane %v3998_v52, %v5374_v20  ;;  %v4947_v35 = vsel %vm2308_vm0, %v4234_v31, 0.0  ;;  %v2894_v0 = vrot.slane %v6964_v46, %v5368_v15  ;;  %v2898_v36 = vrot.slane %v6964_v46, %v5370_v16 }
 0x132   :  { %v2587_v47 = vadd.f32 %v2586_v54, %v2585_v26  ;;  %v4946_v60 = vadd.f32 %v4945_v30, %v4944_v22  ;;  %v7622_v38 = vcombine.high %v6647_v2, %v6647_v2  ;;  %v2902_v19 = vrot.slane %v6964_v46, %v5372_v17  ;;  %v5277_v2 = vld [vmem:[%s7549_s0 + $0x58] sm:$0xff] }
 0x133   :  { %v3507_v62 = vrot.slane %v3499_v51, %v5374_v20  ;;  %v4949_v56 = vsel %vm2308_vm0, %v4233_v11, 0.0  ;;  %v3514_v12 = vrot.slane %v3500_v41, %v5374_v20  ;;  %v3999_v25 = vmul.f32 %v5277_v2, %v3498_v23 }
 0x134   :  { %v2590_v40 = vsel %vm2308_vm0, %v7622_v38, 0.0  ;;  %v2589_v63 = vadd.f32 %v2588_v34, %v2587_v47  ;;  %v4948_v13 = vadd.f32 %v4947_v35, %v4946_v60  ;;  %v2592_v27 = vsel %vm2308_vm0, %v6678_v18, 0.0 }
 0x135   :  { %v4250_v53 = vrot.slane %v4236_v28, %v5374_v20  ;;  %v4251_v37 = vcombine.high %v4243_v33, %v4243_v33  ;;  %v4951_v46 = vsel %vm2308_vm0, %v4235_v29, 0.0  ;;  %v2145_v24 = vcombine.high %v6982_v39, %v6982_v39 }
 0x136   :  { %v2591_v50 = vadd.f32 %v2590_v40, %v2589_v63  ;;  %v2906_v59 = vrot.slane %v7039_v45, %v5351_v4  ;;  %v4950_v48 = vadd.f32 %v4949_v56, %v4948_v13  ;;  %v2594_v52 = vsel %vm2308_vm0, %v2111_v8, 0.0 }
 0x137   :  { %v3516_v57 = vcombine.low %v2890_v49, %v2894_v0  ;;  %v3517_v61 = vcombine.low %v2898_v36, %v2902_v19  ;;  %v4953_v11 = vsel %vm2308_vm0, %v4243_v33, 0.0  ;;  %v3515_v43 = vcombine.low %v3507_v62, %v3514_v12  ;;  %v5278_v33 = vld [vmem:[%s7549_s0 + $0x60] sm:$0xff] }
 0x138   :  { %v2593_v31 = vadd.f32 %v2592_v27, %v2591_v50  ;;  %v4253_v21 = vcombine.high %v3999_v25, %v3999_v25  ;;  %v4952_v42 = vadd.f32 %v4951_v46, %v4950_v48  ;;  %v2596_v1 = vsel %vm2308_vm0, %v6692_v10, 0.0 }
 0x139   :  { %v4252_v54 = vcombine.high %v4250_v53, %v4250_v53  ;;  %v4260_v51 = vrot.slane %v3999_v25, %v5374_v20  ;;  %v4955_v41 = vsel %vm2308_vm0, %v4251_v37, 0.0  ;;  %v2910_v18 = vrot.slane %v7039_v45, %v5353_v5 }
 0x13a   :  { %v2595_v30 = vadd.f32 %v2594_v52, %v2593_v31  ;;  %v2914_v8 = vrot.slane %v7039_v45, %v5355_v6  ;;  %v4954_v49 = vadd.f32 %v4953_v11, %v4952_v42  ;;  %v2598_v26 = vsel %vm2308_vm0, %v2127_v55, 0.0 }
 0x13b   :  { %v2918_v23 = vrot.slane %v7039_v45, %v5357_v7  ;;  %v3524_v28 = vrot.slane %v3516_v57, %v5374_v20  ;;  %v4957_v22 = vsel %vm2308_vm0, %v4250_v53, 0.0  ;;  %v3531_v29 = vrot.slane %v3517_v61, %v5374_v20 }
 0x13c   :  { %v2597_v34 = vadd.f32 %v2596_v1, %v2595_v30  ;;  %v4000_v35 = vmul.f32 %v5278_v33, %v3515_v43  ;;  %v4956_v47 = vadd.f32 %v4955_v41, %v4954_v49  ;;  %v2600_v10 = vsel %vm2308_vm0, %v6723_v44, 0.0  ;;  %v5279_v43 = vld [vmem:[%s7549_s0 + $0x68] sm:$0xff] }
 0x13d   :  { %v4267_v55 = vrot.slane %v4253_v21, %v5374_v20  ;;  %v4268_v0 = vcombine.high %v4260_v51, %v4260_v51  ;;  %v4959_v36 = vsel %vm2308_vm0, %v4252_v54, 0.0  ;;  %v2922_v38 = vrot.slane %v7039_v45, %v5366_v14 }
 0x13e   :  { %v2599_v60 = vadd.f32 %v2598_v26, %v2597_v34  ;;  %v2926_v40 = vrot.slane %v7039_v45, %v5368_v15  ;;  %v4958_v19 = vadd.f32 %v4957_v22, %v4956_v47  ;;  %v2602_v62 = vsel %vm2308_vm0, %v2128_v3, 0.0 }
 0x13f   :  { %v3533_v56 = vcombine.low %v2906_v59, %v2910_v18  ;;  %v3534_v63 = vcombine.low %v2914_v8, %v2918_v23  ;;  %v4961_v12 = vsel %vm2308_vm0, %v4260_v51, 0.0  ;;  %v3532_v25 = vcombine.low %v3524_v28, %v3531_v29  ;;  %v5247_v8 = vld [vmem:[%s7550_s1 + $0x81] ss:$2 sm:$0xff] }
 0x140   :  { %v2601_v2 = vadd.f32 %v2600_v10, %v2599_v60  ;;  %v4270_v13 = vcombine.high %v4000_v35, %v4000_v35  ;;  %v4960_v27 = vadd.f32 %v4959_v36, %v4958_v19  ;;  %v2604_v53 = vsel %vm2308_vm0, %v6867_v9, 0.0 }
 0x141   :  { %v4269_v37 = vcombine.high %v4267_v55, %v4267_v55  ;;  %v4277_v46 = vrot.slane %v4000_v35, %v5374_v20  ;;  %v4963_v50 = vsel %vm2308_vm0, %v4268_v0, 0.0  ;;  %v2930_v44 = vrot.slane %v7039_v45, %v5370_v16 }
 0x142   :  { %v2603_v48 = vadd.f32 %v2602_v62, %v2601_v2  ;;  %v2934_v3 = vrot.slane %v7039_v45, %v5372_v17  ;;  %v4962_v59 = vadd.f32 %v4961_v12, %v4960_v27  ;;  %v2606_v52 = vsel %vm2308_vm0, %v2144_v58, 0.0 }
 0x143   :  { %v3541_v57 = vrot.slane %v3533_v56, %v5374_v20  ;;  %v3548_v61 = vrot.slane %v3534_v63, %v5374_v20  ;;  %v4965_v11 = vsel %vm2308_vm0, %v4267_v55, 0.0  ;;  %v4001_v21 = vmul.f32 %v5279_v43, %v3532_v25  ;;  %v5280_v56 = vld [vmem:[%s7549_s0 + $0x70] sm:$0xff] }
 0x144   :  { %v2605_v31 = vadd.f32 %v2604_v53, %v2603_v48  ;;  %v4964_v42 = vadd.f32 %v4963_v50, %v4962_v59  ;;  %v2608_v45 = vsel %vm2308_vm0, %v6982_v39, 0.0  ;;  %v4284_v9 = vrot.slane %v4270_v13, %v5374_v20 }
 0x145   :  { %v4285_v1 = vcombine.high %v4277_v46, %v4277_v46  ;;  %v4967_v58 = vsel %vm2308_vm0, %v4269_v37, 0.0  ;;  %v2153_v54 = vcombine.high %v6907_v32, %v6907_v32  ;;  %v3550_v41 = vcombine.low %v2922_v38, %v2926_v40 }
 0x146   :  { %v2607_v51 = vadd.f32 %v2606_v52, %v2605_v31  ;;  %v4966_v30 = vadd.f32 %v4965_v11, %v4964_v42  ;;  %v2610_v18 = vsel %vm2308_vm0, %v2145_v24, 0.0  ;;  %v3549_v49 = vcombine.low %v3541_v57, %v3548_v61 }
 0x147   :  { %v3551_v26 = vcombine.low %v2930_v44, %v2934_v3  ;;  %v4969_v23 = vsel %vm2308_vm0, %v4277_v46, 0.0  ;;  %v4287_v22 = vcombine.high %v4001_v21, %v4001_v21  ;;  %v2612_v29 = vsel %vm2308_vm0, %v6907_v32, 0.0 }
 0x148   :  { %v2609_v28 = vadd.f32 %v2608_v45, %v2607_v51  ;;  %v4968_v34 = vadd.f32 %v4967_v58, %v4966_v30  ;;  %v4286_v33 = vcombine.high %v4284_v9, %v4284_v9  ;;  %v4294_v39 = vrot.slane %v4001_v21, %v5374_v20 }
 0x149   :  { %v4971_v24 = vsel %vm2308_vm0, %v4285_v1, 0.0  ;;  %v2938_v47 = vrot.slane %v5247_v8, %v5351_v4  ;;  %v2942_v10 = vrot.slane %v5247_v8, %v5353_v5  ;;  %v2615_v0 = vsel %vm2614_vm1, %v2153_v54, 0.0  ;;  %v5281_v1 = vld [vmem:[%s7549_s0 + $0x78] sm:$0xff] }
 0x14a   :  { %v2611_v35 = vadd.f32 %v2610_v18, %v2609_v28  ;;  %v4970_v55 = vadd.f32 %v4969_v23, %v4968_v34  ;;  %v2946_v36 = vrot.slane %v5247_v8, %v5355_v6  ;;  %v2950_v60 = vrot.slane %v5247_v8, %v5357_v7 }
 0x14b   :  { %v4973_v38 = vsel %vm2308_vm0, %v4284_v9, 0.0  ;;  %v3558_v40 = vrot.slane %v3550_v41, %v5374_v20  ;;  %v3565_v19 = vrot.slane %v3551_v26, %v5374_v20  ;;  %v4002_v63 = vmul.f32 %v5280_v56, %v3549_v49 }
 0x14c   :  { %v2613_v32 = vadd.f32 %v2612_v29, %v2611_v35  ;;  %v4972_v62 = vadd.f32 %v4971_v24, %v4970_v55  ;;  %v4301_v12 = vrot.slane %v4287_v22, %v5374_v20  ;;  %v4302_v2 = vcombine.high %v4294_v39, %v4294_v39 }
 0x14d   :  { %v4975_v25 = vsel %vm2308_vm0, %v4286_v33, 0.0  ;;  %v4977_v53 = vsel %vm2308_vm0, %v4294_v39, 0.0  ;;  %v3566_v37 = vcombine.low %v3558_v40, %v3565_v19  ;;  %v3567_v46 = vcombine.low %v2938_v47, %v2942_v10 }
 0x14e   :  { %v2616_v13 = vadd.f32 %v2615_v0, %v2613_v32  ;;  %v4974_v27 = vadd.f32 %v4973_v38, %v4972_v62  ;;  %v3568_v50 = vcombine.low %v2946_v36, %v2950_v60  ;;  %v4303_v44 = vcombine.high %v4301_v12, %v4301_v12  ;;  %v5282_v38 = vld [vmem:[%s7549_s0 + $0x80] sm:$0xff] }
 0x14f   :  { %v4304_v3 = vcombine.high %v4002_v63, %v4002_v63  ;;  %v4311_v59 = vrot.slane %v4002_v63, %v5374_v20  ;;  %v4979_v52 = vsel %vm2308_vm0, %v4302_v2, 0.0  ;;  %v2954_v61 = vrot.slane %v5247_v8, %v5366_v14 }
 0x150   :  { %2617 = vadd.xlane.f32.xlu0 %v2616_v13  ;;  %v4976_v48 = vadd.f32 %v4975_v25, %v4974_v27  ;;  %v2958_v11 = vrot.slane %v5247_v8, %v5368_v15  ;;  %v2962_v31 = vrot.slane %v5247_v8, %v5370_v16  ;;  %v4981_v43 = vsel %vm2308_vm0, %v4301_v12, 0.0 }
 0x151   :  { %v2966_v21 = vrot.slane %v5247_v8, %v5372_v17  ;;  %v3575_v42 = vrot.slane %v3567_v46, %v5374_v20  ;;  %v3582_v45 = vrot.slane %v3568_v50, %v5374_v20  ;;  %v4003_v58 = vmul.f32 %v5281_v1, %v3566_v37  ;;  %v5248_v8 = vld [vmem:[%s7550_s1 + $0x91] ss:$2 sm:$0xff] }
 0x152   :  { %v4978_v57 = vadd.f32 %v4977_v53, %v4976_v48  ;;  %v4318_v54 = vrot.slane %v4304_v3, %v5374_v20  ;;  %v4319_v51 = vcombine.high %v4311_v59, %v4311_v59  ;;  %v4983_v41 = vsel %vm2308_vm0, %v4303_v44, 0.0 }
 0x153   :  { %v4985_v18 = vsel %vm2308_vm0, %v4311_v59, 0.0  ;;  %v3583_v49 = vcombine.low %v3575_v42, %v3582_v45  ;;  %v3584_v26 = vcombine.low %v2954_v61, %v2958_v11  ;;  %v3585_v23 = vcombine.low %v2962_v31, %v2966_v21  ;;  %v5283_v31 = vld [vmem:[%s7549_s0 + $0x88] sm:$0xff] }
 0x154   :  { %v4980_v9 = vadd.f32 %v4979_v52, %v4978_v57  ;;  %v4320_v22 = vcombine.high %v4318_v54, %v4318_v54  ;;  %v4321_v34 = vcombine.high %v4003_v58, %v4003_v58  ;;  %v4328_v29 = vrot.slane %v4003_v58, %v5374_v20  ;;  %v5249_v58 = vld [vmem:[%s7550_s1 + $0xa1] ss:$2 sm:$0xff] }
 0x155   :  { %v4987_v33 = vsel %vm2308_vm0, %v4319_v51, 0.0  ;;  %v2970_v24 = vrot.slane %v5248_v8, %v5351_v4  ;;  %v2974_v35 = vrot.slane %v5248_v8, %v5353_v5  ;;  %v2978_v47 = vrot.slane %v5248_v8, %v5355_v6 }
 0x156   :  { %v4982_v30 = vadd.f32 %v4981_v43, %v4980_v9  ;;  %v4989_v10 = vsel %vm2308_vm0, %v4318_v54, 0.0  ;;  %v2982_v55 = vrot.slane %v5248_v8, %v5357_v7  ;;  %v3592_v0 = vrot.slane %v3584_v26, %v5374_v20 }
 0x157   :  { %v3599_v36 = vrot.slane %v3585_v23, %v5374_v20  ;;  %v4004_v32 = vmul.f32 %v5282_v38, %v3583_v49  ;;  %v4335_v40 = vrot.slane %v4321_v34, %v5374_v20  ;;  %v4336_v19 = vcombine.high %v4328_v29, %v4328_v29 }
 0x158   :  { %v4984_v28 = vadd.f32 %v4983_v41, %v4982_v30  ;;  %v4991_v62 = vsel %vm2308_vm0, %v4320_v22, 0.0  ;;  %v4993_v63 = vsel %vm2308_vm0, %v4328_v29, 0.0  ;;  %v3601_v2 = vcombine.low %v2970_v24, %v2974_v35 }
 0x159   :  { %v3600_v12 = vcombine.low %v3592_v0, %v3599_v36  ;;  %v3602_v25 = vcombine.low %v2978_v47, %v2982_v55  ;;  %v4337_v27 = vcombine.high %v4335_v40, %v4335_v40  ;;  %v4338_v53 = vcombine.high %v4004_v32, %v4004_v32  ;;  %v5284_v47 = vld [vmem:[%s7549_s0 + $0x90] sm:$0xff] }
 0x15a   :  { %v4986_v39 = vadd.f32 %v4985_v18, %v4984_v28  ;;  %v4345_v37 = vrot.slane %v4004_v32, %v5374_v20  ;;  %v4995_v46 = vsel %vm2308_vm0, %v4336_v19, 0.0  ;;  %v2986_v48 = vrot.slane %v5248_v8, %v5366_v14 }
 0x15b   :  { %v2990_v44 = vrot.slane %v5248_v8, %v5368_v15  ;;  %v2994_v3 = vrot.slane %v5248_v8, %v5370_v16  ;;  %v4997_v59 = vsel %vm2308_vm0, %v4335_v40, 0.0  ;;  %v2998_v52 = vrot.slane %v5248_v8, %v5372_v17 }
 0x15c   :  { %v4988_v60 = vadd.f32 %v4987_v33, %v4986_v39  ;;  %v3609_v57 = vrot.slane %v3601_v2, %v5374_v20  ;;  %v3616_v61 = vrot.slane %v3602_v25, %v5374_v20  ;;  %v4005_v43 = vmul.f32 %v5283_v31, %v3600_v12 }
 0x15d   :  { %v4352_v21 = vrot.slane %v4338_v53, %v5374_v20  ;;  %v4353_v42 = vcombine.high %v4345_v37, %v4345_v37  ;;  %v4999_v45 = vsel %vm2308_vm0, %v4337_v27, 0.0  ;;  %v5001_v1 = vsel %vm2308_vm0, %v4345_v37, 0.0 }
 0x15e   :  { %v4990_v56 = vadd.f32 %v4989_v10, %v4988_v60  ;;  %v3617_v54 = vcombine.low %v3609_v57, %v3616_v61  ;;  %v3618_v51 = vcombine.low %v2986_v48, %v2990_v44  ;;  %v3619_v41 = vcombine.low %v2994_v3, %v2998_v52  ;;  %v5285_v3 = vld [vmem:[%s7549_s0 + $0x98] sm:$0xff] }
 0x15f   :  { %v4354_v18 = vcombine.high %v4352_v21, %v4352_v21  ;;  %v4355_v8 = vcombine.high %v4005_v43, %v4005_v43  ;;  %v4362_v49 = vrot.slane %v4005_v43, %v5374_v20  ;;  %v5003_v26 = vsel %vm2308_vm0, %v4353_v42, 0.0  ;;  %v5250_v43 = vld [vmem:[%s7550_s1 + $0xb1] ss:$2 sm:$0xff] }
 0x160   :  { %v4992_v13 = vadd.f32 %v4991_v62, %v4990_v56  ;;  %v3002_v28 = vrot.slane %v5249_v58, %v5351_v4  ;;  %v3006_v22 = vrot.slane %v5249_v58, %v5353_v5  ;;  %v3010_v34 = vrot.slane %v5249_v58, %v5355_v6 }
 0x161   :  { %v5005_v29 = vsel %vm2308_vm0, %v4352_v21, 0.0  ;;  %v3014_v33 = vrot.slane %v5249_v58, %v5357_v7  ;;  %v3626_v39 = vrot.slane %v3618_v51, %v5374_v20  ;;  %v3633_v24 = vrot.slane %v3619_v41, %v5374_v20 }
 0x162   :  { %v4994_v50 = vadd.f32 %v4993_v63, %v4992_v13  ;;  %v4006_v10 = vmul.f32 %v5284_v47, %v3617_v54  ;;  %v4369_v55 = vrot.slane %v4355_v8, %v5374_v20  ;;  %v4370_v0 = vcombine.high %v4362_v49, %v4362_v49 }
 0x163   :  { %v5007_v36 = vsel %vm2308_vm0, %v4354_v18, 0.0  ;;  %v5009_v38 = vsel %vm2308_vm0, %v4362_v49, 0.0  ;;  %v3634_v32 = vcombine.low %v3626_v39, %v3633_v24  ;;  %v3635_v40 = vcombine.low %v3002_v28, %v3006_v22 }
 0x164   :  { %v4996_v11 = vadd.f32 %v4995_v46, %v4994_v50  ;;  %v3636_v19 = vcombine.low %v3010_v34, %v3014_v33  ;;  %v4371_v56 = vcombine.high %v4369_v55, %v4369_v55  ;;  %v4372_v63 = vcombine.high %v4006_v10, %v4006_v10  ;;  %v5286_v34 = vld [vmem:[%s7549_s0 + $0xa0] sm:$0xff] }
 0x165   :  { %v4379_v12 = vrot.slane %v4006_v10, %v5374_v20  ;;  %v5011_v2 = vsel %vm2308_vm0, %v4370_v0, 0.0  ;;  %v3018_v13 = vrot.slane %v5249_v58, %v5366_v14  ;;  %v3022_v27 = vrot.slane %v5249_v58, %v5368_v15 }
 0x166   :  { %v4998_v9 = vadd.f32 %v4997_v59, %v4996_v11  ;;  %v3026_v53 = vrot.slane %v5249_v58, %v5370_v16  ;;  %v5013_v37 = vsel %vm2308_vm0, %v4369_v55, 0.0  ;;  %v3030_v46 = vrot.slane %v5249_v58, %v5372_v17 }
 0x167   :  { %v3643_v50 = vrot.slane %v3635_v40, %v5374_v20  ;;  %v3650_v48 = vrot.slane %v3636_v19, %v5374_v20  ;;  %v4007_v59 = vmul.f32 %v5285_v3, %v3634_v32  ;;  %v4386_v52 = vrot.slane %v4372_v63, %v5374_v20 }
 0x168   :  { %v5000_v30 = vadd.f32 %v4999_v45, %v4998_v9  ;;  %v4387_v57 = vcombine.high %v4379_v12, %v4379_v12  ;;  %v5015_v61 = vsel %vm2308_vm0, %v4371_v56, 0.0  ;;  %v5017_v31 = vsel %vm2308_vm0, %v4379_v12, 0.0 }
 0x169   :  { %v3651_v21 = vcombine.low %v3643_v50, %v3650_v48  ;;  %v3652_v42 = vcombine.low %v3018_v13, %v3022_v27  ;;  %v3653_v45 = vcombine.low %v3026_v53, %v3030_v46  ;;  %v4389_v58 = vcombine.high %v4007_v59, %v4007_v59  ;;  %v5287_v53 = vld [vmem:[%s7549_s0 + $0xa8] sm:$0xff] }
 0x16a   :  { %v5002_v23 = vadd.f32 %v5001_v1, %v5000_v30  ;;  %v4388_v1 = vcombine.high %v4386_v52, %v4386_v52  ;;  %v4396_v54 = vrot.slane %v4007_v59, %v5374_v20  ;;  %v5019_v51 = vsel %vm2308_vm0, %v4387_v57, 0.0  ;;  %v5251_v59 = vld [vmem:[%s7550_s1 + $0xc1] ss:$2 sm:$0xff] }
 0x16b   :  { %v3034_v30 = vrot.slane %v5250_v43, %v5351_v4  ;;  %v3038_v18 = vrot.slane %v5250_v43, %v5353_v5  ;;  %v3042_v8 = vrot.slane %v5250_v43, %v5355_v6  ;;  %v5021_v49 = vsel %vm2308_vm0, %v4386_v52, 0.0 }
 0x16c   :  { %v5004_v35 = vadd.f32 %v5003_v26, %v5002_v23  ;;  %v3046_v26 = vrot.slane %v5250_v43, %v5357_v7  ;;  %v3660_v23 = vrot.slane %v3652_v42, %v5374_v20  ;;  %v3667_v28 = vrot.slane %v3653_v45, %v5374_v20 }
 0x16d   :  { %v4403_v33 = vrot.slane %v4389_v58, %v5374_v20  ;;  %v4404_v39 = vcombine.high %v4396_v54, %v4396_v54  ;;  %v5023_v24 = vsel %vm2308_vm0, %v4388_v1, 0.0  ;;  %v5025_v47 = vsel %vm2308_vm0, %v4396_v54, 0.0 }
 0x16e   :  { %v5006_v60 = vadd.f32 %v5005_v29, %v5004_v35  ;;  %v4008_v29 = vmul.f32 %v5286_v34, %v3651_v21  ;;  %v3668_v10 = vcombine.low %v3660_v23, %v3667_v28  ;;  %v3669_v55 = vcombine.low %v3034_v30, %v3038_v18 }
 0x16f   :  { %v3670_v0 = vcombine.low %v3042_v8, %v3046_v26  ;;  %v5027_v40 = vsel %vm2308_vm0, %v4404_v39, 0.0  ;;  %v3054_v56 = vrot.slane %v5250_v43, %v5368_v15  ;;  %v3058_v63 = vrot.slane %v5250_v43, %v5370_v16  ;;  %v5288_v8 = vld [vmem:[%s7549_s0 + $0xb0] sm:$0xff] }
 0x170   :  { %v5008_v62 = vadd.f32 %v5007_v36, %v5006_v60  ;;  %v4405_v60 = vcombine.high %v4403_v33, %v4403_v33  ;;  %v4413_v32 = vrot.slane %v4008_v29, %v5374_v20  ;;  %v5029_v12 = vsel %vm2308_vm0, %v4403_v33, 0.0 }
 0x171   :  { %v3684_v13 = vrot.slane %v3670_v0, %v5374_v20  ;;  %v3070_v1 = vrot.slane %v5251_v59, %v5353_v5  ;;  %v3074_v58 = vrot.slane %v5251_v59, %v5355_v6 }
 0x172   :  { %v5010_v25 = vadd.f32 %v5009_v38, %v5008_v62  ;;  %v4406_v38 = vcombine.high %v4008_v29, %v4008_v29  ;;  %v3050_v62 = vrot.slane %v5250_v43, %v5366_v14  ;;  %v4421_v50 = vcombine.high %v4413_v32, %v4413_v32 }
 0x173   :  { %v5031_v48 = vsel %vm2308_vm0, %v4405_v60, 0.0  ;;  %v5033_v3 = vsel %vm2308_vm0, %v4413_v32, 0.0  ;;  %v3086_v60 = vrot.slane %v5251_v59, %v5368_v15 }
 0x174   :  { %v5012_v44 = vadd.f32 %v5011_v2, %v5010_v25  ;;  %v3062_v2 = vrot.slane %v5250_v43, %v5372_v17  ;;  %v3677_v25 = vrot.slane %v3669_v55, %v5374_v20  ;;  %v4420_v46 = vrot.slane %v4406_v38, %v5374_v20 }
 0x175   :  { %v3686_v57 = vcombine.low %v3050_v62, %v3054_v56  ;;  %v5035_v42 = vsel %vm2308_vm0, %v4421_v50, 0.0  ;;  %v3090_v38 = vrot.slane %v5251_v59, %v5370_v16 }
 0x176   :  { %v5014_v11 = vadd.f32 %v5013_v37, %v5012_v44  ;;  %v4009_v37 = vmul.f32 %v5287_v53, %v3668_v10  ;;  %v3685_v52 = vcombine.low %v3677_v25, %v3684_v13  ;;  %v5037_v54 = vsel %vm2308_vm0, %v4420_v46, 0.0 }
 0x178   :  { %v5016_v9 = vadd.f32 %v5015_v61, %v5014_v11  ;;  %v3687_v61 = vcombine.low %v3058_v63, %v3062_v2  ;;  %v4423_v43 = vcombine.high %v4009_v37, %v4009_v37  ;;  %v4430_v21 = vrot.slane %v4009_v37, %v5374_v20  ;;  %v5289_v63 = vld [vmem:[%s7549_s0 + $0xb8] sm:$0xff] }
 0x179   :  { %v5252_v37 = vld [vmem:[%s7550_s1 + $0xd1] ss:$2 sm:$0xff] }
 0x17a   :  { %v5018_v41 = vadd.f32 %v5017_v31, %v5016_v9  ;;  %v4422_v31 = vcombine.high %v4420_v46, %v4420_v46  ;;  %v3066_v9 = vrot.slane %v5251_v59, %v5351_v4  ;;  %v3701_v30 = vrot.slane %v3687_v61, %v5374_v20 }
 0x17b   :  { %v4437_v26 = vrot.slane %v4423_v43, %v5374_v20  ;;  %v4438_v23 = vcombine.high %v4430_v21, %v4430_v21  ;;  %v5041_v34 = vsel %vm2308_vm0, %v4430_v21, 0.0  ;;  %v3106_v43 = vrot.slane %v5252_v37, %v5355_v6 }
 0x17c   :  { %v5020_v22 = vadd.f32 %v5019_v51, %v5018_v41  ;;  %v3078_v51 = vrot.slane %v5251_v59, %v5357_v7  ;;  %v3694_v41 = vrot.slane %v3686_v57, %v5374_v20  ;;  %v5039_v28 = vsel %vm2308_vm0, %v4422_v31, 0.0 }
 0x17d   :  { %v3703_v33 = vcombine.low %v3066_v9, %v3070_v1  ;;  %v5043_v55 = vsel %vm2308_vm0, %v4438_v23, 0.0  ;;  %v5045_v32 = vsel %vm2308_vm0, %v4437_v26, 0.0  ;;  %v3102_v31 = vrot.slane %v5252_v37, %v5353_v5 }
 0x17e   :  { %v5022_v35 = vadd.f32 %v5021_v49, %v5020_v22  ;;  %v4010_v49 = vmul.f32 %v5288_v8, %v3685_v52  ;;  %v3702_v29 = vcombine.low %v3694_v41, %v3701_v30  ;;  %v3704_v39 = vcombine.low %v3074_v58, %v3078_v51  ;;  %v5290_v58 = vld [vmem:[%s7549_s0 + $0xc0] sm:$0xff] }
 0x180   :  { %v5024_v36 = vadd.f32 %v5023_v24, %v5022_v35  ;;  %v4439_v35 = vcombine.high %v4437_v26, %v4437_v26  ;;  %v4447_v10 = vrot.slane %v4010_v49, %v5374_v20  ;;  %v3718_v62 = vrot.slane %v3704_v39, %v5374_v20 }
 0x182   :  { %v5026_v19 = vadd.f32 %v5025_v47, %v5024_v36  ;;  %v4440_v47 = vcombine.high %v4010_v49, %v4010_v49  ;;  %v3082_v36 = vrot.slane %v5251_v59, %v5366_v14  ;;  %v4455_v25 = vcombine.high %v4447_v10, %v4447_v10 }
 0x183   :  { %v5047_v13 = vsel %vm2308_vm0, %v4439_v35, 0.0  ;;  %v5049_v53 = vsel %vm2308_vm0, %v4447_v10, 0.0  ;;  %v3118_v35 = vrot.slane %v5252_v37, %v5368_v15 }
 0x184   :  { %v5028_v27 = vadd.f32 %v5027_v40, %v5026_v19  ;;  %v3094_v40 = vrot.slane %v5251_v59, %v5372_v17  ;;  %v3711_v19 = vrot.slane %v3703_v33, %v5374_v20  ;;  %v4454_v2 = vrot.slane %v4440_v47, %v5374_v20 }
 0x185   :  { %v3720_v50 = vcombine.low %v3082_v36, %v3086_v60  ;;  %v5051_v57 = vsel %vm2308_vm0, %v4455_v25, 0.0  ;;  %v3122_v47 = vrot.slane %v5252_v37, %v5370_v16 }
 0x186   :  { %v5030_v44 = vadd.f32 %v5029_v12, %v5028_v27  ;;  %v4011_v12 = vmul.f32 %v5289_v63, %v3702_v29  ;;  %v3719_v46 = vcombine.low %v3711_v19, %v3718_v62  ;;  %v5053_v21 = vsel %vm2308_vm0, %v4454_v2, 0.0 }
 0x188   :  { %v5032_v11 = vadd.f32 %v5031_v48, %v5030_v44  ;;  %v3721_v48 = vcombine.low %v3090_v38, %v3094_v40  ;;  %v4457_v59 = vcombine.high %v4011_v12, %v4011_v12  ;;  %v4464_v52 = vrot.slane %v4011_v12, %v5374_v20  ;;  %v5291_v38 = vld [vmem:[%s7549_s0 + $0xc8] sm:$0xff] }
 0x189   :  { %v5253_v12 = vld [vmem:[%s7550_s1 + $0xe1] ss:$2 sm:$0xff] }
 0x18a   :  { %v5034_v45 = vadd.f32 %v5033_v3, %v5032_v11  ;;  %v4456_v3 = vcombine.high %v4454_v2, %v4454_v2  ;;  %v3098_v11 = vrot.slane %v5252_v37, %v5351_v4  ;;  %v3735_v9 = vrot.slane %v3721_v48, %v5374_v20 }
 0x18b   :  { %v4471_v51 = vrot.slane %v4457_v59, %v5374_v20  ;;  %v4472_v41 = vcombine.high %v4464_v52, %v4464_v52  ;;  %v5057_v8 = vsel %vm2308_vm0, %v4464_v52, 0.0  ;;  %v3138_v59 = vrot.slane %v5253_v12, %v5355_v6 }
 0x18c   :  { %v5036_v18 = vadd.f32 %v5035_v42, %v5034_v45  ;;  %v3110_v42 = vrot.slane %v5252_v37, %v5357_v7  ;;  %v3728_v45 = vrot.slane %v3720_v50, %v5374_v20  ;;  %v5055_v30 = vsel %vm2308_vm0, %v4456_v3, 0.0 }
 0x18d   :  { %v3737_v26 = vcombine.low %v3098_v11, %v3102_v31  ;;  %v5059_v33 = vsel %vm2308_vm0, %v4472_v41, 0.0  ;;  %v5061_v10 = vsel %vm2308_vm0, %v4471_v51, 0.0  ;;  %v3134_v3 = vrot.slane %v5253_v12, %v5353_v5 }
 0x18e   :  { %v5038_v22 = vadd.f32 %v5037_v54, %v5036_v18  ;;  %v4012_v54 = vmul.f32 %v5290_v58, %v3719_v46  ;;  %v3736_v49 = vcombine.low %v3728_v45, %v3735_v9  ;;  %v3738_v23 = vcombine.low %v3106_v43, %v3110_v42  ;;  %v5292_v43 = vld [vmem:[%s7549_s0 + $0xd0] sm:$0xff] }
 0x190   :  { %v5040_v24 = vadd.f32 %v5039_v28, %v5038_v22  ;;  %v4473_v22 = vcombine.high %v4471_v51, %v4471_v51  ;;  %v4481_v29 = vrot.slane %v4012_v54, %v5374_v20  ;;  %v3752_v36 = vrot.slane %v3738_v23, %v5374_v20 }
 0x192   :  { %v5042_v0 = vadd.f32 %v5041_v34, %v5040_v24  ;;  %v4474_v34 = vcombine.high %v4012_v54, %v4012_v54  ;;  %v3114_v24 = vrot.slane %v5252_v37, %v5366_v14  ;;  %v4489_v19 = vcombine.high %v4481_v29, %v4481_v29 }
 0x193   :  { %v5063_v62 = vsel %vm2308_vm0, %v4473_v22, 0.0  ;;  %v5065_v63 = vsel %vm2308_vm0, %v4481_v29, 0.0  ;;  %v3150_v22 = vrot.slane %v5253_v12, %v5368_v15 }
 0x194   :  { %v5044_v56 = vadd.f32 %v5043_v55, %v5042_v0  ;;  %v3126_v55 = vrot.slane %v5252_v37, %v5372_v17  ;;  %v3745_v0 = vrot.slane %v3737_v26, %v5374_v20  ;;  %v4488_v40 = vrot.slane %v4474_v34, %v5374_v20 }
 0x195   :  { %v3754_v25 = vcombine.low %v3114_v24, %v3118_v35  ;;  %v5067_v50 = vsel %vm2308_vm0, %v4489_v19, 0.0  ;;  %v3154_v34 = vrot.slane %v5253_v12, %v5370_v16 }
 0x196   :  { %v5046_v27 = vadd.f32 %v5045_v32, %v5044_v56  ;;  %v4013_v32 = vmul.f32 %v5291_v38, %v3736_v49  ;;  %v3753_v2 = vcombine.low %v3745_v0, %v3752_v36  ;;  %v5069_v52 = vsel %vm2308_vm0, %v4488_v40, 0.0 }
 0x198   :  { %v5048_v44 = vadd.f32 %v5047_v13, %v5046_v27  ;;  %v3755_v13 = vcombine.low %v3122_v47, %v3126_v55  ;;  %v4491_v37 = vcombine.high %v4013_v32, %v4013_v32  ;;  %v4498_v46 = vrot.slane %v4013_v32, %v5374_v20  ;;  %v5293_v47 = vld [vmem:[%s7549_s0 + $0xd8] sm:$0xff] }
 0x199   :  { %v5254_v32 = vld [vmem:[%s7550_s1 + $0xf1] ss:$2 sm:$0xff] }
 0x19a   :  { %v5050_v61 = vadd.f32 %v5049_v53, %v5048_v44  ;;  %v4490_v53 = vcombine.high %v4488_v40, %v4488_v40  ;;  %v3130_v44 = vrot.slane %v5253_v12, %v5351_v4  ;;  %v3769_v11 = vrot.slane %v3755_v13, %v5374_v20 }
 0x19b   :  { %v4505_v42 = vrot.slane %v4491_v37, %v5374_v20  ;;  %v4506_v45 = vcombine.high %v4498_v46, %v4498_v46  ;;  %v5073_v58 = vsel %vm2308_vm0, %v4498_v46, 0.0  ;;  %v3170_v37 = vrot.slane %v5254_v32, %v5355_v6 }
 0x19c   :  { %v5052_v1 = vadd.f32 %v5051_v57, %v5050_v61  ;;  %v3142_v57 = vrot.slane %v5253_v12, %v5357_v7  ;;  %v3762_v61 = vrot.slane %v3754_v25, %v5374_v20  ;;  %v5071_v9 = vsel %vm2308_vm0, %v4490_v53, 0.0 }
 0x19d   :  { %v3771_v51 = vcombine.low %v3130_v44, %v3134_v3  ;;  %v5075_v26 = vsel %vm2308_vm0, %v4506_v45, 0.0  ;;  %v5077_v29 = vsel %vm2308_vm0, %v4505_v42, 0.0  ;;  %v3166_v53 = vrot.slane %v5254_v32, %v5353_v5 }
 0x19e   :  { %v5054_v18 = vadd.f32 %v5053_v21, %v5052_v1  ;;  %v4014_v21 = vmul.f32 %v5292_v43, %v3753_v2  ;;  %v3770_v54 = vcombine.low %v3762_v61, %v3769_v11  ;;  %v3772_v41 = vcombine.low %v3138_v59, %v3142_v57  ;;  %v5294_v59 = vld [vmem:[%s7549_s0 + $0xe0] sm:$0xff] }
 0x1a0   :  { %v5056_v28 = vadd.f32 %v5055_v30, %v5054_v18  ;;  %v4507_v18 = vcombine.high %v4505_v42, %v4505_v42  ;;  %v4515_v49 = vrot.slane %v4014_v21, %v5374_v20  ;;  %v3786_v24 = vrot.slane %v3772_v41, %v5374_v20 }
 0x1a2   :  { %v5058_v39 = vadd.f32 %v5057_v8, %v5056_v28  ;;  %v4508_v8 = vcombine.high %v4014_v21, %v4014_v21  ;;  %v3146_v28 = vrot.slane %v5253_v12, %v5366_v14  ;;  %v4523_v0 = vcombine.high %v4515_v49, %v4515_v49 }
 0x1a3   :  { %v5079_v36 = vsel %vm2308_vm0, %v4507_v18, 0.0  ;;  %v5081_v38 = vsel %vm2308_vm0, %v4515_v49, 0.0  ;;  %v3182_v18 = vrot.slane %v5254_v32, %v5368_v15 }
 0x1a4   :  { %v5060_v60 = vadd.f32 %v5059_v33, %v5058_v39  ;;  %v3158_v33 = vrot.slane %v5253_v12, %v5372_v17  ;;  %v3779_v39 = vrot.slane %v3771_v51, %v5374_v20  ;;  %v4522_v55 = vrot.slane %v4508_v8, %v5374_v20 }
 0x1a5   :  { %v3788_v19 = vcombine.low %v3146_v28, %v3150_v22  ;;  %v5083_v25 = vsel %vm2308_vm0, %v4523_v0, 0.0  ;;  %v3186_v8 = vrot.slane %v5254_v32, %v5370_v16 }
 0x1a6   :  { %v5062_v56 = vadd.f32 %v5061_v10, %v5060_v60  ;;  %v4015_v10 = vmul.f32 %v5293_v47, %v3770_v54  ;;  %v3787_v40 = vcombine.low %v3779_v39, %v3786_v24  ;;  %v5085_v46 = vsel %vm2308_vm0, %v4522_v55, 0.0 }
 0x1a8   :  { %v5064_v27 = vadd.f32 %v5063_v62, %v5062_v56  ;;  %v3789_v62 = vcombine.low %v3154_v34, %v3158_v33  ;;  %v4525_v12 = vcombine.high %v4015_v10, %v4015_v10  ;;  %v4532_v2 = vrot.slane %v4015_v10, %v5374_v20  ;;  %v5295_v34 = vld [vmem:[%s7549_s0 + $0xe8] sm:$0xff] }
 0x1a9   :  { %v5255_v10 = vld [vmem:[%s7550_s1 + $0x101] ss:$2 sm:$0xff] }
 0x1aa   :  { %v5066_v48 = vadd.f32 %v5065_v63, %v5064_v27  ;;  %v4524_v63 = vcombine.high %v4522_v55, %v4522_v55  ;;  %v3162_v27 = vrot.slane %v5254_v32, %v5351_v4  ;;  %v3803_v44 = vrot.slane %v3789_v62, %v5374_v20 }
 0x1ab   :  { %v4539_v57 = vrot.slane %v4525_v12, %v5374_v20  ;;  %v4540_v61 = vcombine.high %v4532_v2, %v4532_v2  ;;  %v5089_v43 = vsel %vm2308_vm0, %v4532_v2, 0.0  ;;  %v3202_v12 = vrot.slane %v5255_v10, %v5355_v6 }
 0x1ac   :  { %v5068_v31 = vadd.f32 %v5067_v50, %v5066_v48  ;;  %v3174_v50 = vrot.slane %v5254_v32, %v5357_v7  ;;  %v3796_v48 = vrot.slane %v3788_v19, %v5374_v20  ;;  %v5087_v11 = vsel %vm2308_vm0, %v4524_v63, 0.0 }
 0x1ad   :  { %v3805_v42 = vcombine.low %v3162_v27, %v3166_v53  ;;  %v5091_v51 = vsel %vm2308_vm0, %v4540_v61, 0.0  ;;  %v5093_v49 = vsel %vm2308_vm0, %v4539_v57, 0.0  ;;  %v3198_v63 = vrot.slane %v5255_v10, %v5353_v5 }
 0x1ae   :  { %v5070_v1 = vadd.f32 %v5069_v52, %v5068_v31  ;;  %v4016_v52 = vmul.f32 %v5294_v59, %v3787_v40  ;;  %v3804_v21 = vcombine.low %v3796_v48, %v3803_v44  ;;  %v3806_v45 = vcombine.low %v3170_v37, %v3174_v50  ;;  %v5296_v37 = vld [vmem:[%s7549_s0 + $0xf0] sm:$0xff] }
 0x1b0   :  { %v5072_v30 = vadd.f32 %v5071_v9, %v5070_v1  ;;  %v4541_v1 = vcombine.high %v4539_v57, %v4539_v57  ;;  %v4549_v54 = vrot.slane %v4016_v52, %v5374_v20  ;;  %v3820_v28 = vrot.slane %v3806_v45, %v5374_v20 }
 0x1b2   :  { %v5074_v23 = vadd.f32 %v5073_v58, %v5072_v30  ;;  %v4542_v58 = vcombine.high %v4016_v52, %v4016_v52  ;;  %v3178_v30 = vrot.slane %v5254_v32, %v5366_v14  ;;  %v4557_v39 = vcombine.high %v4549_v54, %v4549_v54 }
 0x1b3   :  { %v5095_v24 = vsel %vm2308_vm0, %v4541_v1, 0.0  ;;  %v5097_v47 = vsel %vm2308_vm0, %v4549_v54, 0.0  ;;  %v3214_v1 = vrot.slane %v5255_v10, %v5368_v15 }
 0x1b4   :  { %v5076_v35 = vadd.f32 %v5075_v26, %v5074_v23  ;;  %v3190_v26 = vrot.slane %v5254_v32, %v5372_v17  ;;  %v3813_v23 = vrot.slane %v3805_v42, %v5374_v20  ;;  %v4556_v33 = vrot.slane %v4542_v58, %v5374_v20 }
 0x1b5   :  { %v3822_v0 = vcombine.low %v3178_v30, %v3182_v18  ;;  %v5099_v19 = vsel %vm2308_vm0, %v4557_v39, 0.0  ;;  %v3218_v58 = vrot.slane %v5255_v10, %v5370_v16 }
 0x1b6   :  { %v5078_v60 = vadd.f32 %v5077_v29, %v5076_v35  ;;  %v4017_v29 = vmul.f32 %v5295_v34, %v3804_v21  ;;  %v3821_v55 = vcombine.low %v3813_v23, %v3820_v28  ;;  %v5101_v2 = vsel %vm2308_vm0, %v4556_v33, 0.0 }
 0x1b8   :  { %v5080_v56 = vadd.f32 %v5079_v36, %v5078_v60  ;;  %v3823_v36 = vcombine.low %v3186_v8, %v3190_v26  ;;  %v4559_v32 = vcombine.high %v4017_v29, %v4017_v29  ;;  %v4566_v40 = vrot.slane %v4017_v29, %v5374_v20  ;;  %v5297_v8 = vld [vmem:[%s7549_s0 + $0xf8] sm:$0xff] }
 0x1b9   :  { %v5256_v29 = vld [vmem:[%s7550_s1 + $0x111] ss:$2 sm:$0xff] }
 0x1ba   :  { %v5082_v13 = vadd.f32 %v5081_v38, %v5080_v56  ;;  %v4558_v38 = vcombine.high %v4556_v33, %v4556_v33  ;;  %v3194_v56 = vrot.slane %v5255_v10, %v5351_v4  ;;  %v3837_v27 = vrot.slane %v3823_v36, %v5374_v20 }
 0x1bb   :  { %v4573_v50 = vrot.slane %v4559_v32, %v5374_v20  ;;  %v4574_v48 = vcombine.high %v4566_v40, %v4566_v40  ;;  %v5105_v59 = vsel %vm2308_vm0, %v4566_v40, 0.0  ;;  %v3234_v32 = vrot.slane %v5256_v29, %v5355_v6 }
 0x1bc   :  { %v5084_v3 = vadd.f32 %v5083_v25, %v5082_v13  ;;  %v3206_v25 = vrot.slane %v5255_v10, %v5357_v7  ;;  %v3830_v13 = vrot.slane %v3822_v0, %v5374_v20  ;;  %v5103_v44 = vsel %vm2308_vm0, %v4558_v38, 0.0 }
 0x1bd   :  { %v3839_v57 = vcombine.low %v3194_v56, %v3198_v63  ;;  %v5107_v42 = vsel %vm2308_vm0, %v4574_v48, 0.0  ;;  %v5109_v54 = vsel %vm2308_vm0, %v4573_v50, 0.0  ;;  %v3230_v38 = vrot.slane %v5256_v29, %v5353_v5 }
 0x1be   :  { %v5086_v31 = vadd.f32 %v5085_v46, %v5084_v3  ;;  %v4018_v46 = vmul.f32 %v5296_v37, %v3821_v55  ;;  %v3838_v52 = vcombine.low %v3830_v13, %v3837_v27  ;;  %v3840_v61 = vcombine.low %v3202_v12, %v3206_v25  ;;  %v5298_v12 = vld [vmem:[%s7549_s0 + $0x100] sm:$0xff] }
 0x1c0   :  { %v5088_v9 = vadd.f32 %v5087_v11, %v5086_v31  ;;  %v4575_v31 = vcombine.high %v4573_v50, %v4573_v50  ;;  %v4583_v21 = vrot.slane %v4018_v46, %v5374_v20  ;;  %v3854_v30 = vrot.slane %v3840_v61, %v5374_v20 }
 0x1c2   :  { %v5090_v41 = vadd.f32 %v5089_v43, %v5088_v9  ;;  %v4576_v43 = vcombine.high %v4018_v46, %v4018_v46  ;;  %v3210_v9 = vrot.slane %v5255_v10, %v5366_v14  ;;  %v4591_v23 = vcombine.high %v4583_v21, %v4583_v21 }
 0x1c3   :  { %v5111_v28 = vsel %vm2308_vm0, %v4575_v31, 0.0  ;;  %v5113_v34 = vsel %vm2308_vm0, %v4583_v21, 0.0  ;;  %v3246_v31 = vrot.slane %v5256_v29, %v5368_v15 }
 0x1c4   :  { %v5092_v22 = vadd.f32 %v5091_v51, %v5090_v41  ;;  %v3222_v51 = vrot.slane %v5255_v10, %v5372_v17  ;;  %v3847_v41 = vrot.slane %v3839_v57, %v5374_v20  ;;  %v4590_v26 = vrot.slane %v4576_v43, %v5374_v20 }
 0x1c5   :  { %v3856_v39 = vcombine.low %v3210_v9, %v3214_v1  ;;  %v5115_v0 = vsel %vm2308_vm0, %v4591_v23, 0.0  ;;  %v3250_v43 = vrot.slane %v5256_v29, %v5370_v16 }
 0x1c6   :  { %v5094_v35 = vadd.f32 %v5093_v49, %v5092_v22  ;;  %v4019_v49 = vmul.f32 %v5297_v8, %v3838_v52  ;;  %v3855_v33 = vcombine.low %v3847_v41, %v3854_v30  ;;  %v5117_v40 = vsel %vm2308_vm0, %v4590_v26, 0.0 }
 0x1c8   :  { %v5096_v60 = vadd.f32 %v5095_v24, %v5094_v35  ;;  %v3857_v24 = vcombine.low %v3218_v58, %v3222_v51  ;;  %v4593_v10 = vcombine.high %v4019_v49, %v4019_v49  ;;  %v4600_v55 = vrot.slane %v4019_v49, %v5374_v20  ;;  %v5299_v58 = vld [vmem:[%s7549_s0 + $0x108] sm:$0xff] }
 0x1c9   :  { %v5257_v49 = vld [vmem:[%s7550_s1 + $0x121] ss:$2 sm:$0xff] }
 0x1ca   :  { %v5098_v62 = vadd.f32 %v5097_v47, %v5096_v60  ;;  %v4592_v47 = vcombine.high %v4590_v26, %v4590_v26  ;;  %v3226_v60 = vrot.slane %v5256_v29, %v5351_v4  ;;  %v3871_v56 = vrot.slane %v3857_v24, %v5374_v20 }
 0x1cb   :  { %v4607_v25 = vrot.slane %v4593_v10, %v5374_v20  ;;  %v4608_v13 = vcombine.high %v4600_v55, %v4600_v55  ;;  %v5121_v37 = vsel %vm2308_vm0, %v4600_v55, 0.0  ;;  %v3266_v10 = vrot.slane %v5257_v49, %v5355_v6 }
 0x1cc   :  { %v5100_v53 = vadd.f32 %v5099_v19, %v5098_v62  ;;  %v3238_v19 = vrot.slane %v5256_v29, %v5357_v7  ;;  %v3864_v62 = vrot.slane %v3856_v39, %v5374_v20  ;;  %v5119_v27 = vsel %vm2308_vm0, %v4592_v47, 0.0 }
 0x1cd   :  { %v3873_v50 = vcombine.low %v3226_v60, %v3230_v38  ;;  %v5123_v57 = vsel %vm2308_vm0, %v4608_v13, 0.0  ;;  %v5125_v21 = vsel %vm2308_vm0, %v4607_v25, 0.0  ;;  %v3262_v47 = vrot.slane %v5257_v49, %v5353_v5 }
 0x1ce   :  { %v5102_v3 = vadd.f32 %v5101_v2, %v5100_v53  ;;  %v4020_v2 = vmul.f32 %v5298_v12, %v3855_v33  ;;  %v3872_v46 = vcombine.low %v3864_v62, %v3871_v56  ;;  %v3874_v48 = vcombine.low %v3234_v32, %v3238_v19  ;;  %v5300_v32 = vld [vmem:[%s7549_s0 + $0x110] sm:$0xff] }
 0x1d0   :  { %v5104_v11 = vadd.f32 %v5103_v44, %v5102_v3  ;;  %v4609_v3 = vcombine.high %v4607_v25, %v4607_v25  ;;  %v4617_v52 = vrot.slane %v4020_v2, %v5374_v20  ;;  %v3888_v9 = vrot.slane %v3874_v48, %v5374_v20 }
 0x1d1   :  { %v3278_v48 = vrot.slane %v5257_v49, %v5368_v15 }
 0x1d2   :  { %v5106_v45 = vadd.f32 %v5105_v59, %v5104_v11  ;;  %v4610_v59 = vcombine.high %v4020_v2, %v4020_v2  ;;  %v3242_v11 = vrot.slane %v5256_v29, %v5366_v14  ;;  %v4625_v41 = vcombine.high %v4617_v52, %v4617_v52 }
 0x1d3   :  { %v5127_v30 = vsel %vm2308_vm0, %v4609_v3, 0.0  ;;  %v5129_v8 = vsel %vm2308_vm0, %v4617_v52, 0.0 }
 0x1d4   :  { %v5108_v18 = vadd.f32 %v5107_v42, %v5106_v45  ;;  %v3254_v42 = vrot.slane %v5256_v29, %v5372_v17  ;;  %v3881_v45 = vrot.slane %v3873_v50, %v5374_v20  ;;  %v4624_v51 = vrot.slane %v4610_v59, %v5374_v20 }
 0x1d5   :  { %v3890_v23 = vcombine.low %v3242_v11, %v3246_v31  ;;  %v5131_v39 = vsel %vm2308_vm0, %v4625_v41, 0.0  ;;  %v3274_v50 = vrot.slane %v5257_v49, %v5366_v14  ;;  %v3286_v59 = vrot.slane %v5257_v49, %v5372_v17  ;;  %v5301_v11 = vld [vmem:[%s7549_s0 + $0x118] sm:$0xff] }
 0x1d6   :  { %v5110_v22 = vadd.f32 %v5109_v54, %v5108_v18  ;;  %v4021_v54 = vmul.f32 %v5299_v58, %v3872_v46  ;;  %v3889_v26 = vcombine.low %v3881_v45, %v3888_v9  ;;  %v5133_v55 = vsel %vm2308_vm0, %v4624_v51, 0.0 }
 0x1d7   :  { %v3924_v17 = vcombine.low %v3274_v50, %v3278_v48  ;;  %v5304_v48 = vld [vmem:[%s7549_s0 + $0x130] sm:$0xf] }
 0x1d8   :  { %v5112_v35 = vadd.f32 %v5111_v28, %v5110_v22  ;;  %v3891_v28 = vcombine.low %v3250_v43, %v3254_v42  ;;  %v4627_v29 = vcombine.high %v4021_v54, %v4021_v54  ;;  %v4634_v33 = vrot.slane %v4021_v54, %v5374_v20 }
 0x1da   :  { %v5114_v36 = vadd.f32 %v5113_v34, %v5112_v35  ;;  %v4626_v34 = vcombine.high %v4624_v51, %v4624_v51  ;;  %v3258_v35 = vrot.slane %v5257_v49, %v5351_v4  ;;  %v3905_v60 = vrot.slane %v3891_v28, %v5374_v20 }
 0x1db   :  { %v4641_v19 = vrot.slane %v4627_v29, %v5374_v20  ;;  %v4642_v62 = vcombine.high %v4634_v33, %v4634_v33 }
 0x1dc   :  { %v5116_v63 = vadd.f32 %v5115_v0, %v5114_v36  ;;  %v3270_v0 = vrot.slane %v5257_v49, %v5357_v7  ;;  %v3898_v36 = vrot.slane %v3890_v23, %v5374_v20  ;;  %v5135_v56 = vsel %vm2308_vm0, %v4626_v34, 0.0  ;;  %v5302_v23 = vld [vmem:[%s7549_s0 + $0x120] sm:$0xff] }
 0x1dd   :  { %v3907_v7 = vcombine.low %v3258_v35, %v3262_v47  ;;  %v4643_v13 = vcombine.high %v4641_v19, %v4641_v19  ;;  %v5141_v3 = vsel %vm2308_vm0, %v4641_v19, 0.0 }
 0x1de   :  { %v5118_v53 = vadd.f32 %v5117_v40, %v5116_v63  ;;  %v4022_v40 = vmul.f32 %v5300_v32, %v3889_v26  ;;  %v5137_v63 = vsel %vm2308_vm0, %v4634_v33, 0.0  ;;  %v3906_v12 = vcombine.low %v3898_v36, %v3905_v60  ;;  %v5258_v26 = vld [vmem:[%s7550_s1 + $0x131] ss:$2 sm:$0x3] }
 0x1df   :  { %v3908_v2 = vcombine.low %v3266_v10, %v3270_v0  ;;  %v3915_v52 = vrot.slane %v3907_v7, %v5374_v20  ;;  %v5143_v15 = vsel %vm2308_vm0, %v4643_v13, 0.0  ;;  %v3294_v35 = vrot.slane %v5258_v26, %v5353_v5 }
 0x1e0   :  { %v5120_v44 = vadd.f32 %v5119_v27, %v5118_v53  ;;  %v4644_v27 = vcombine.high %v4022_v40, %v4022_v40  ;;  %v4651_v53 = vrot.slane %v4022_v40, %v5374_v20  ;;  %v4023_v31 = vmul.f32 %v5301_v11, %v3906_v12 }
 0x1e2   :  { %v5122_v61 = vadd.f32 %v5121_v37, %v5120_v44  ;;  %v5139_v37 = vsel %vm2308_vm0, %v4642_v62, 0.0  ;;  %v3282_v44 = vrot.slane %v5257_v49, %v5370_v16  ;;  %v4658_v14 = vrot.slane %v4644_v27, %v5374_v20  ;;  %v5303_v62 = vld [vmem:[%s7549_s0 + $0x128] sm:$0xff] }
 0x1e3   :  { %v4659_v43 = vcombine.high %v4651_v53, %v4651_v53  ;;  %v4661_v58 = vcombine.high %v4023_v31, %v4023_v31  ;;  %v4668_v54 = vrot.slane %v4023_v31, %v5374_v20 }
 0x1e4   :  { %v5124_v1 = vadd.f32 %v5123_v57, %v5122_v61  ;;  %v3922_v57 = vrot.slane %v3908_v2, %v5374_v20  ;;  %v3925_v45 = vcombine.low %v3282_v44, %v3286_v59 }
 0x1e5   :  { %v5147_v51 = vsel %vm2308_vm0, %v4659_v43, 0.0  ;;  %v4676_v34 = vcombine.high %v4668_v54, %v4668_v54 }
 0x1e6   :  { %v5126_v18 = vadd.f32 %v5125_v21, %v5124_v1  ;;  %v5145_v21 = vsel %vm2308_vm0, %v4651_v53, 0.0  ;;  %v3923_v42 = vcombine.low %v3915_v52, %v3922_v57  ;;  %v4660_v1 = vcombine.high %v4658_v14, %v4658_v14 }
 0x1e7   :  { %v5155_v60 = vsel %vm2308_vm0, %v4676_v34, 0.0 }
 0x1e8   :  { %v5128_v22 = vadd.f32 %v5127_v30, %v5126_v18  ;;  %v5149_v30 = vsel %vm2308_vm0, %v4658_v14, 0.0  ;;  %v3932_v18 = vrot.slane %v3924_v17, %v5374_v20  ;;  %v4024_v28 = vmul.f32 %v5302_v23, %v3923_v42 }
 0x1e9   :  { %v5151_v29 = vsel %vm2308_vm0, %v4660_v1, 0.0 }
 0x1ea   :  { %v5130_v24 = vadd.f32 %v5129_v8, %v5128_v22  ;;  %v3939_v8 = vrot.slane %v3925_v45, %v5374_v20  ;;  %v4675_v22 = vrot.slane %v4661_v58, %v5374_v20  ;;  %v4678_v0 = vcombine.high %v4024_v28, %v4024_v28 }
 0x1eb   :  { %v4685_v36 = vrot.slane %v4024_v28, %v5374_v20 }
 0x1ec   :  { %v5132_v38 = vadd.f32 %v5131_v39, %v5130_v24  ;;  %v5153_v39 = vsel %vm2308_vm0, %v4668_v54, 0.0  ;;  %v3290_v24 = vrot.slane %v5258_v26, %v5351_v4  ;;  %v3940_v47 = vcombine.low %v3932_v18, %v3939_v8 }
 0x1ed   :  { %v5157_v32 = vsel %vm2308_vm0, %v4675_v22, 0.0  ;;  %v4692_v5 = vrot.slane %v4678_v0, %v5374_v20  ;;  %v5161_v12 = vsel %vm2308_vm0, %v4685_v36, 0.0 }
 0x1ee   :  { %v5134_v6 = vadd.f32 %v5133_v55, %v5132_v38  ;;  %v4677_v55 = vcombine.high %v4675_v22, %v4675_v22  ;;  %v3941_v40 = vcombine.low %v3290_v24, %v3294_v35  ;;  %v4025_v4 = vmul.f32 %v5303_v62, %v3940_v47 }
 0x1f0   :  { %v5136_v25 = vadd.f32 %v5135_v56, %v5134_v6  ;;  %v4693_v56 = vcombine.high %v4685_v36, %v4685_v36  ;;  %v5159_v6 = vsel %vm2308_vm0, %v4677_v55, 0.0  ;;  %v3948_v7 = vrot.slane %v3941_v40, %v5374_v20 }
 0x1f1   :  { %v4695_v13 = vcombine.high %v4025_v4, %v4025_v4  ;;  %v4702_v27 = vrot.slane %v4025_v4, %v5374_v20 }
 0x1f2   :  { %v5138_v46 = vadd.f32 %v5137_v63, %v5136_v25  ;;  %v4694_v25 = vcombine.high %v4692_v5, %v4692_v5  ;;  %v5163_v53 = vsel %vm2308_vm0, %v4693_v56, 0.0  ;;  %v4026_v44 = vmul.f32 %v5304_v48, %v3948_v7 }
 0x1f3   :  { %v4710_v59 = vcombine.high %v4702_v27, %v4702_v27 }
 0x1f4   :  { %v5140_v61 = vadd.f32 %v5139_v37, %v5138_v46  ;;  %v5165_v46 = vsel %vm2308_vm0, %v4692_v5, 0.0  ;;  %v5167_v52 = vsel %vm2308_vm0, %v4694_v25, 0.0  ;;  %v4718_v14 = vrot.slane %v4026_v44, %v5374_v20 }
 0x1f5   :  { %v5171_v43 = vsel %vm2308_vm0, %v4710_v59, 0.0 }
 0x1f6   :  { %v5142_v16 = vadd.f32 %v5141_v3, %v5140_v61  ;;  %v4709_v3 = vrot.slane %v4695_v13, %v5374_v20  ;;  %v5169_v61 = vsel %vm2308_vm0, %v4702_v27, 0.0  ;;  %v4719_v42 = vcombine.high %v4718_v14, %v4718_v14  ;;  %v5259_v20 = vld [vmem:[%s7551_s2] ss:$0 sm:$0xff]  ;;  %s5305_s2 = scalar_lea.vmem %s5213_s6, 32 }
 0x1f7   :  { %p5306_p0 = scmp.ne.s32.totalorder %s5213_s6, %s5305_s2  ;;  %p5311_p2 = scmp.lt.s32.totalorder %s5305_s2, %s5305_s2 }
 0x1f8   :  { %v5144_v9 = vadd.f32 %v5143_v15, %v5142_v16  ;;  %v4711_v31 = vcombine.high %v4709_v3, %v4709_v3  ;;  %v5173_v16 = vsel %vm2308_vm0, %v4709_v3, 0.0  ;;  %v5179_v58 = vsel %vm2614_vm1, %v4719_v42, 0.0 }
 0x1f9   :  { %p5312_p3 = por %p5311_p2, %p5310_p1 }
 0x1fa   :  { %v5146_v41 = vadd.f32 %v5145_v21, %v5144_v9  ;;  %v5175_v17 = vsel %vm2308_vm0, %v4711_v31, 0.0  ;;  %v5177_v9 = vsel %vm2308_vm0, %v4718_v14, 0.0 }
 0x1fb   :  { %p5313_p4 = pnand %p5312_p3, %p5306_p0 }
 0x1fc   :  { %v5148_v49 = vadd.f32 %v5147_v51, %v5146_v41  ;;  %v2618_v41 = vpop.xlane.xlu0 %2617 }
 0x1fe   :  { %v5150_v33 = vadd.f32 %v5149_v30, %v5148_v49 }
 0x200   :  { %v5152_v10 = vadd.f32 %v5151_v29, %v5150_v33 }
 0x202   :  { %v5154_v38 = vadd.f32 %v5153_v39, %v5152_v10 }
 0x204   :  { %v5156_v19 = vadd.f32 %v5155_v60, %v5154_v38 }
 0x206   :  { %v5158_v63 = vadd.f32 %v5157_v32, %v5156_v19 }
 0x208   :  { %v5160_v2 = vadd.f32 %v5159_v6, %v5158_v63 }
 0x20a   :  { %v5162_v37 = vadd.f32 %v5161_v12, %v5160_v2 }
 0x20c   :  { %v5164_v50 = vadd.f32 %v5163_v53, %v5162_v37 }
 0x20e   :  { %v5166_v57 = vadd.f32 %v5165_v46, %v5164_v50 }
 0x210   :  { %v5168_v11 = vadd.f32 %v5167_v52, %v5166_v57 }
 0x212   :  { %v5170_v15 = vadd.f32 %v5169_v61, %v5168_v11 }
 0x214   :  { %v5172_v21 = vadd.f32 %v5171_v43, %v5170_v15 }
 0x216   :  { %v5174_v45 = vadd.f32 %v5173_v16, %v5172_v21 }
 0x218   :  { %v5176_v1 = vadd.f32 %v5175_v17, %v5174_v45 }
 0x21a   :  { %v5178_v54 = vadd.f32 %v5177_v9, %v5176_v1 }
 0x21c   :  { %v5180_v51 = vadd.f32 %v5179_v58, %v5178_v54 }
 0x21e   :  { %5181 = vadd.xlane.f32.xlu0 %v5180_v51 }
 0x2ab   :  { %v5182_v30 = vpop.xlane.xlu0 %5181 }
 0x2ac   :  { %v5184_v18 = vsel %vm5183_vm2, %v2618_v41, %v5182_v30 }
 0x2ad   :  { %v5192_v8 = vadd.f32 %v5259_v20, %v5184_v18 }
 0x2af   :  { %v5194_v49 = vsel %vm5193_vm3, %v5192_v8, -inf }
 0x2b0   :  { %5195 = vmax.xlane.f32.xlu1 %v5194_v49 }
 0x33d   :  { %v5196_v26 = vpop.xlane.xlu1 %5195 }
 0x33e   :  { %v5197_v23 = vsub.f32 %v5192_v8, %v5196_v26 }
 0x340   :  { %v5198_v28 = vmul.f32 1.442695, %v5197_v23 }
 0x342   :  { %5262 = vpow2.f32 %v5198_v28 }
 0x34c   :  { %v5263_v22 = vpop.eup %5262 }
 0x34d   :  { %v5200_v34 = vsel %vm5193_vm3, %v5263_v22, 0.0 }
 0x34e   :  { %5201 = vadd.xlane.f32.xlu1 %v5200_v34 }
 0x3db   :  { %v5202_v29 = vpop.xlane.xlu1 %5201 }
 0x3dc   :  { %5264 = vrcp.f32 %v5202_v29 }
 0x3e6   :  { %v5265_v33 = vpop.eup %5264 }
 0x3e7   :  { %v5204_v39 = vmul.f32 %v5265_v33, %v5263_v22 }
 0x3e9   :  { %5205 = vst.msk [vmem:[#allocation2] sm:$0x3] %vm5193_vm3, %v5204_v39 }
 0x3ea   :  { %5316 = shalt.err (!%p5313_p4)
}
 0x3eb   :  { %s5317_s9 = scalar_lea.hbm %s7552_s3, 32 }
 0x3ec   :  { %p5318_p5 = scmp.ne.s32.totalorder %s7552_s3, %s5317_s9  ;;  %p5321_p6 = scmp.lt.u32.totalorder %s5317_s9, %s7552_s3 }
 0x3ee   :  { %p5323_p7 = pnand %p5321_p6, %p5318_p5 }
 0x3f0   :  { %5326 = shalt.err (!%p5323_p7)
}
 0x3f1   :  { %5215 = dma.vmem_to_hbm [thread:$0]  %s5213_s6, 32, %s7552_s3, [#allocation3]  }
 0x3f2   :  { %5327 = dma.done.wait [#allocation3], 32  }
 0x3f3   :  { %5328 = vsyncadd [#allocation3], 4294967264 }
 0x3f4   :  { %5219 = vsyncpa [#allocation3], 1 }

</bundles_post_ra>
